<compile_context>
chip_gen: v6e
topology: v6e:2x2x1
jax: 0.10.0
libtpu: 0.0.40
codegen_flags: <defaults>
</compile_context>

<pallas_src>
import jax
import jax.numpy as jnp
from jax.experimental import pallas as pl
from jax.experimental.pallas import tpu as pltpu

BN_EPS = 1e-5


def _round_up(x, m):
    return ((x + m - 1) // m) * m


def _make_kernel(H, W, Cin, Cout, Nb, U, PAD1, ACC_ROWS):
    Q = W // 2
    Wp = W + 2                    # padded full-res row stride (also the
                                  # vertical tap stride on the dilated grid)
    OFF0 = W + 4                  # first valid conv0 centre inside the block
    U2 = U // 2                   # per-image stride of the dilated half-res grid
    MD = Nb * U2                  # dilated half-res rows per grid step
    M0 = Nb * U - 2 * OFF0        # conv0 output rows per grid step

    taps = [(dy, dx) for dy in (-1, 0, 1) for dx in (-1, 0, 1)]

    def conv3x3(src_ref, base, w_ref, ci, m_rows, acc_ref):
        # 9 accumulating MXU matmuls; every tap is a contiguous sublane slice.
        for t, (dy, dx) in enumerate(taps):
            lhs = src_ref[pl.ds(base + dy * Wp + dx, m_rows), :]
            prod = jnp.dot(lhs, w_ref[pl.ds(t * ci, ci), :],
                           preferred_element_type=jnp.float32)
            if t == 0:
                acc_ref[pl.ds(0, m_rows), :] = prod
            else:
                acc_ref[pl.ds(0, m_rows), :] += prod

    def kernel(x_ref, w0_ref, w1_ref, w2_ref, bn_ref, mask_ref, out_ref,
               acc_big, acc_sm, x0_buf, x1_buf):
        s0 = bn_ref[0:1, :]
        b0 = bn_ref[1:2, :]
        b1 = bn_ref[2:3, :]
        b2 = bn_ref[3:4, :]
        keep = mask_ref[...] > 0.0            # (MD,1) dilated-grid halo mask

        # Zero only the slop rows that must read back as zeros; interiors are
        # fully overwritten every grid step (correct per-core under "parallel").
        acc_big[pl.ds(M0, ACC_ROWS - M0), :] = jnp.zeros(
            (ACC_ROWS - M0, Cout), jnp.float32)
        zpad = jnp.zeros((PAD1, Cout), jnp.float32)
        x0_buf[pl.ds(0, PAD1), :] = zpad
        x0_buf[pl.ds(PAD1 + MD, PAD1), :] = zpad
        x1_buf[pl.ds(0, PAD1), :] = zpad
        x1_buf[pl.ds(PAD1 + MD, PAD1), :] = zpad

        # ---- cnn_layer: conv3x3 (batch folded into the matmul M dim) -------
        conv3x3(x_ref, OFF0, w0_ref, Cin, M0, acc_big)

        # ---- MaxPool2d(2): four stride-2 reads + three maxima.  The result
        # lands directly on the dilated half-res grid used by conv1/conv2.
        p00 = acc_big[pl.ds(0, MD, stride=2), :]
        p01 = acc_big[pl.ds(1, MD, stride=2), :]
        p10 = acc_big[pl.ds(Wp, MD, stride=2), :]
        p11 = acc_big[pl.ds(Wp + 1, MD, stride=2), :]
        pooled = jnp.maximum(jnp.maximum(p00, p01), jnp.maximum(p10, p11))

        # BN0 + ReLU (s0 cannot be folded into w0: the pool sits between).
        x0 = jnp.maximum(pooled * s0 + b0, 0.0)
        x0 = jnp.where(keep, x0, 0.0)          # zero dilated-grid halos
        x0_buf[pl.ds(PAD1, MD), :] = x0

        # ---- BasicBlock conv1 -> bn1 (scale folded into w1) -> ReLU --------
        conv3x3(x0_buf, PAD1, w1_ref, Cout, MD, acc_sm)
        x1 = jnp.maximum(acc_sm[...] + b1, 0.0)
        x1 = jnp.where(keep, x1, 0.0)
        x1_buf[pl.ds(PAD1, MD), :] = x1

        # ---- BasicBlock conv2 -> bn2 (scale folded) -> +x0 -> ReLU ---------
        conv3x3(x1_buf, PAD1, w2_ref, Cout, MD, acc_sm)
        x0v = x0_buf[pl.ds(PAD1, MD), :]       # reload x0 (bounds live range)
        r = jnp.maximum(acc_sm[...] + b2 + x0v, 0.0)   # BasicBlock output
        out_ref[...] = (x0v + r).astype(out_ref.dtype)

    return kernel


def _fold_bn(gamma, beta, mean, var):
    scale = gamma / jnp.sqrt(var + BN_EPS)
    bias = beta - mean * scale
    return scale, bias


def custom_res_block_pallas(x_nchw, params, images_per_step=8):
    N, Cin, H, W = x_nchw.shape
    Cout = params["w0"].shape[0]
    assert H % 2 == 0 and W % 2 == 0
    P, Q = H // 2, W // 2
    Wp = W + 2

    # Per-image padded map: 1 zero row above, 2+ below, 2 zero columns on the
    # left, 0 on the right (the next row's left halo doubles as the right
    # halo), flattened with row stride Wp.  U is rounded to a multiple of 16
    # so all blocks / the dilated half-res grid stay 8-sublane aligned.
    U_raw = (H + 3) * Wp
    U = _round_up(U_raw, 16)
    U2 = U // 2

    # >= 2 grid steps so ("parallel",) actually shards across v7x's two TCs.
    Nb = max(1, min(images_per_step, -(-N // 2)))
    Npad = _round_up(N, Nb)
    G = Npad // Nb
    MD = Nb * U2
    PAD1 = _round_up(Wp + 2, 8)                 # halo slop rows for conv1/conv2
    ACC_ROWS = _round_up(Nb * U + Wp, 8)        # conv0 acc + pool-read slop

    # ---- NCHW -> width-padded, batch-stacked, flattened maps (XLA glue) ----
    xt = jnp.transpose(x_nchw, (0, 2, 3, 1)).astype(jnp.float32)   # (N,H,W,Ci)
    xp = jnp.pad(xt, ((0, 0), (1, 2), (2, 0), (0, 0)))             # (N,H+3,Wp,Ci)
    xp = xp.reshape(N, U_raw, Cin)
    xp = jnp.pad(xp, ((0, 0), (0, U - U_raw), (0, 0)))             # (N,U,Ci)
    xp = jnp.pad(xp, ((0, Npad - N), (0, 0), (0, 0)))
    x_flat = xp.reshape(Npad * U, Cin)

    # Conv weights as (9*Ci, Co) tap matrices; BN1/BN2 scales folded into the
    # weight columns (no pooling between those convs and their BN, so valid).
    def taps_mat(w, col_scale=None):
        co, ci = w.shape[0], w.shape[1]
        m = jnp.transpose(w, (2, 3, 1, 0)).reshape(9 * ci, co).astype(jnp.float32)
        if col_scale is not None:
            m = m * col_scale.reshape(1, co)
        return m

    s0, b0 = _fold_bn(params["g0"], params["be0"], params["m0"], params["v0"])
    s1, b1 = _fold_bn(params["g1"], params["be1"], params["m1"], params["v1"])
    s2, b2 = _fold_bn(params["g2"], params["be2"], params["m2"], params["v2"])
    w0m = taps_mat(params["w0"])        # s0 NOT folded (max-pool before BN0)
    w1m = taps_mat(params["w1"], s1)
    w2m = taps_mat(params["w2"], s2)
    bn = jnp.stack([s0, b0, b1, b2]).astype(jnp.float32)           # (4, Cout)

    # Halo mask for the dilated half-res grid, hoisted to the wrapper (no
    # per-step iota/mod/select rebuilds inside the kernel).
    kk = jnp.arange(MD, dtype=jnp.int32)
    rem = kk % U2
    col = rem % (Q + 1)
    slot = rem // (Q + 1)
    mask = ((col < Q) & (slot < H)).astype(jnp.float32).reshape(MD, 1)

    kernel = _make_kernel(H, W, Cin, Cout, Nb, U, PAD1, ACC_ROWS)

    def full(shape):
        return pl.BlockSpec(shape, lambda b: (0,) * len(shape))

    out_flat = pl.pallas_call(
        kernel,
        out_shape=jax.ShapeDtypeStruct((Npad * U2, Cout), jnp.float32),
        grid=(G,),
        in_specs=[
            pl.BlockSpec((Nb * U, Cin), lambda b: (b, 0)),
            full((9 * Cin, Cout)),
            full((9 * Cout, Cout)),
            full((9 * Cout, Cout)),
            full((4, Cout)),
            full((MD, 1)),
        ],
        out_specs=pl.BlockSpec((MD, Cout), lambda b: (b, 0)),
        scratch_shapes=[
            pltpu.VMEM((ACC_ROWS, Cout), jnp.float32),            # conv0 acc
            pltpu.VMEM((MD, Cout), jnp.float32),                  # conv1/2 acc
            pltpu.VMEM((PAD1 + MD + PAD1, Cout), jnp.float32),    # x0 (dilated)
            pltpu.VMEM((PAD1 + MD + PAD1, Cout), jnp.float32),    # conv1 output
        ],
        compiler_params=pltpu.CompilerParams(
            # Batch axis shards across TensorCores on v7x.
            dimension_semantics=("parallel",),
            # Budget: <= ~5 MiB scratch + ~3 MiB double-buffered blocks at
            # Nb=8 (Cout lane-padded to 128); fits every generation's VMEM.
            vmem_limit_bytes=32 * 1024 * 1024,
        ),
    )(x_flat, w0m, w1m, w2m, bn, mask)

    # Extract the valid half-res entries (every other row-slot, first Q cols).
    out3 = out_flat.reshape(Npad, U2, Cout)[:, :H * (Q + 1), :]
    out4 = out3.reshape(Npad, H, Q + 1, Cout)[:, 0:H:2, 0:Q, :]   # (Npad,P,Q,Co)
    return jnp.transpose(out4[:N], (0, 3, 1, 2))                  # back to NCHW


def custom_res_block_reference(x_nchw, params):
    """Pure-JAX reference (NCHW, matches PyTorch eval-mode semantics)."""
    def conv(x, w):
        return jax.lax.conv_general_dilated(
            x, w, window_strides=(1, 1), padding=((1, 1), (1, 1)),
            dimension_numbers=("NCHW", "OIHW", "NCHW"))

    def bn(x, g, be, m, v):
        s = g / jnp.sqrt(v + BN_EPS)
        return x * s[None, :, None, None] + (be - m * s)[None, :, None, None]

    c = conv(x_nchw, params["w0"])
    c = jax.lax.reduce_window(c, -jnp.inf, jax.lax.max,
                              (1, 1, 2, 2), (1, 1, 2, 2), "VALID")
    x0 = jnp.maximum(bn(c, params["g0"], params["be0"],
                        params["m0"], params["v0"]), 0.0)
    t = jnp.maximum(bn(conv(x0, params["w1"]), params["g1"], params["be1"],
                       params["m1"], params["v1"]), 0.0)
    t = bn(conv(t, params["w2"]), params["g2"], params["be2"],
           params["m2"], params["v2"])
    r = jnp.maximum(t + x0, 0.0)
    return x0 + r


if __name__ == "__main__":
    N, Cin, Cout, H, W = 2, 4, 16, 16, 16
    ks = jax.random.split(jax.random.PRNGKey(0), 16)
    x = jax.random.normal(ks[0], (N, Cin, H, W), jnp.float32)

    def conv_w(k, co, ci):
        return jax.random.normal(k, (co, ci, 3, 3), jnp.float32) / jnp.sqrt(9.0 * ci)

    params = {
        "w0": conv_w(ks[1], Cout, Cin),
        "w1": conv_w(ks[2], Cout, Cout),
        "w2": conv_w(ks[3], Cout, Cout),
    }
    for i, (g, be, m, v) in enumerate([(4, 5, 6, 7), (8, 9, 10, 11), (12, 13, 14, 15)]):
        params[f"g{i}"] = jax.random.uniform(ks[g], (Cout,), jnp.float32, 0.5, 1.5)
        params[f"be{i}"] = 0.1 * jax.random.normal(ks[be], (Cout,), jnp.float32)
        params[f"m{i}"] = 0.1 * jax.random.normal(ks[m], (Cout,), jnp.float32)
        params[f"v{i}"] = jax.random.uniform(ks[v], (Cout,), jnp.float32, 0.5, 1.5)

    out = jax.block_until_ready(custom_res_block_pallas(x, params))
    ref = jax.block_until_ready(custom_res_block_reference(x, params))

    assert out.shape == (N, Cout, H // 2, W // 2), out.shape
    max_err = float(jnp.max(jnp.abs(out - ref)))
    assert jnp.allclose(out, ref, atol=5e-4, rtol=5e-4), f"max abs err {max_err}"
    print("KERNEL_OK")
</pallas_src>

<mosaic_0001>
module attributes {stable_mosaic.version = 11 : i64} {
  func.func @kernel(%arg0: i32, %arg1: memref<352x4xf32, #tpu.memory_space<vmem>>, %arg2: memref<36x16xf32, #tpu.memory_space<vmem>>, %arg3: memref<144x16xf32, #tpu.memory_space<vmem>>, %arg4: memref<144x16xf32, #tpu.memory_space<vmem>>, %arg5: memref<4x16xf32, #tpu.memory_space<vmem>>, %arg6: memref<176x1xf32, #tpu.memory_space<vmem>>, %arg7: memref<176x16xf32, #tpu.memory_space<vmem>>, %arg8: memref<376x16xf32, #tpu.memory_space<vmem>>, %arg9: memref<176x16xf32, #tpu.memory_space<vmem>>, %arg10: memref<224x16xf32, #tpu.memory_space<vmem>>, %arg11: memref<224x16xf32, #tpu.memory_space<vmem>>) attributes {dimension_semantics = [#tpu.dimension_semantics<parallel>], iteration_bounds = array<i64: 2>, scalar_prefetch = 0 : i64, scratch_operands = 4 : i64, tpu.core_type = #tpu.core_type<tc>, window_params = [{transform_indices = @transform_0, window_bounds = array<i64: 352, 4>}, {pipeline_mode = #tpu.pipeline_mode<synchronous>, transform_indices = @transform_1, window_bounds = array<i64: 36, 16>}, {pipeline_mode = #tpu.pipeline_mode<synchronous>, transform_indices = @transform_2, window_bounds = array<i64: 144, 16>}, {pipeline_mode = #tpu.pipeline_mode<synchronous>, transform_indices = @transform_3, window_bounds = array<i64: 144, 16>}, {pipeline_mode = #tpu.pipeline_mode<synchronous>, transform_indices = @transform_4, window_bounds = array<i64: 4, 16>}, {pipeline_mode = #tpu.pipeline_mode<synchronous>, transform_indices = @transform_5, window_bounds = array<i64: 176, 1>}, {transform_indices = @transform_6, window_bounds = array<i64: 176, 16>}]} {
    %c0 = arith.constant 0 : index
    %c0_0 = arith.constant 0 : index
    %0 = vector.load %arg5[%c0, %c0_0] : memref<4x16xf32, #tpu.memory_space<vmem>>, vector<1x16xf32>
    %c1 = arith.constant 1 : index
    %c0_1 = arith.constant 0 : index
    %1 = vector.load %arg5[%c1, %c0_1] : memref<4x16xf32, #tpu.memory_space<vmem>>, vector<1x16xf32>
    %c2 = arith.constant 2 : index
    %c0_2 = arith.constant 0 : index
    %2 = vector.load %arg5[%c2, %c0_2] : memref<4x16xf32, #tpu.memory_space<vmem>>, vector<1x16xf32>
    %c3 = arith.constant 3 : index
    %c0_3 = arith.constant 0 : index
    %3 = vector.load %arg5[%c3, %c0_3] : memref<4x16xf32, #tpu.memory_space<vmem>>, vector<1x16xf32>
    %c0_4 = arith.constant 0 : index
    %c0_5 = arith.constant 0 : index
    %4 = vector.load %arg6[%c0_4, %c0_5] : memref<176x1xf32, #tpu.memory_space<vmem>>, vector<176x1xf32>
    %cst = arith.constant 0.000000e+00 : f32
    %5 = vector.broadcast %cst : f32 to vector<176x1xf32>
    %6 = arith.cmpf ogt, %4, %5 : vector<176x1xf32>
    %cst_6 = arith.constant 0.000000e+00 : f32
    %7 = vector.broadcast %cst_6 : f32 to vector<64x16xf32>
    %c312 = arith.constant 312 : index
    %c0_7 = arith.constant 0 : index
    %8 = vector.load %arg8[%c312, %c0_7] : memref<376x16xf32, #tpu.memory_space<vmem>>, vector<64x16xf32>
    tpu.vector_store %arg8[%c312, %c0_7], %7 {strides = array<i32>} : memref<376x16xf32, #tpu.memory_space<vmem>>, vector<64x16xf32>,
    %cst_8 = arith.constant 0.000000e+00 : f32
    %9 = vector.broadcast %cst_8 : f32 to vector<24x16xf32>
    %c0_9 = arith.constant 0 : index
    %c0_10 = arith.constant 0 : index
    %10 = vector.load %arg10[%c0_9, %c0_10] : memref<224x16xf32, #tpu.memory_space<vmem>>, vector<24x16xf32>
    tpu.vector_store %arg10[%c0_9, %c0_10], %9 {strides = array<i32>} : memref<224x16xf32, #tpu.memory_space<vmem>>, vector<24x16xf32>,
    %c200 = arith.constant 200 : index
    %c0_11 = arith.constant 0 : index
    %11 = vector.load %arg10[%c200, %c0_11] : memref<224x16xf32, #tpu.memory_space<vmem>>, vector<24x16xf32>
    tpu.vector_store %arg10[%c200, %c0_11], %9 {strides = array<i32>} : memref<224x16xf32, #tpu.memory_space<vmem>>, vector<24x16xf32>,
    %c0_12 = arith.constant 0 : index
    %c0_13 = arith.constant 0 : index
    %12 = vector.load %arg11[%c0_12, %c0_13] : memref<224x16xf32, #tpu.memory_space<vmem>>, vector<24x16xf32>
    tpu.vector_store %arg11[%c0_12, %c0_13], %9 {strides = array<i32>} : memref<224x16xf32, #tpu.memory_space<vmem>>, vector<24x16xf32>,
    %c200_14 = arith.constant 200 : index
    %c0_15 = arith.constant 0 : index
    %13 = vector.load %arg11[%c200_14, %c0_15] : memref<224x16xf32, #tpu.memory_space<vmem>>, vector<24x16xf32>
    tpu.vector_store %arg11[%c200_14, %c0_15], %9 {strides = array<i32>} : memref<224x16xf32, #tpu.memory_space<vmem>>, vector<24x16xf32>,
    %c1_16 = arith.constant 1 : index
    %c0_17 = arith.constant 0 : index
    %14 = vector.load %arg1[%c1_16, %c0_17] : memref<352x4xf32, #tpu.memory_space<vmem>>, vector<312x4xf32>
    %c0_18 = arith.constant 0 : index
    %c0_19 = arith.constant 0 : index
    %15 = vector.load %arg2[%c0_18, %c0_19] : memref<36x16xf32, #tpu.memory_space<vmem>>, vector<4x16xf32>
    %cst_20 = arith.constant dense<0.000000e+00> : vector<312x16xf32>
    %16 = tpu.matmul %14, %15, %cst_20 {dimension_numbers = #tpu.dot_dimension_numbers<[1], [0], [0], [1], [0, 0, 1, 1], [], []>} : vector<312x4xf32>, vector<4x16xf32>, vector<312x16xf32> -> vector<312x16xf32>
    %c0_21 = arith.constant 0 : index
    %c0_22 = arith.constant 0 : index
    %17 = vector.load %arg8[%c0_21, %c0_22] : memref<376x16xf32, #tpu.memory_space<vmem>>, vector<312x16xf32>
    tpu.vector_store %arg8[%c0_21, %c0_22], %16 {strides = array<i32>} : memref<376x16xf32, #tpu.memory_space<vmem>>, vector<312x16xf32>,
    %c2_23 = arith.constant 2 : index
    %c0_24 = arith.constant 0 : index
    %18 = vector.load %arg1[%c2_23, %c0_24] : memref<352x4xf32, #tpu.memory_space<vmem>>, vector<312x4xf32>
    %c4 = arith.constant 4 : index
    %c0_25 = arith.constant 0 : index
    %19 = vector.load %arg2[%c4, %c0_25] : memref<36x16xf32, #tpu.memory_space<vmem>>, vector<4x16xf32>
    %cst_26 = arith.constant dense<0.000000e+00> : vector<312x16xf32>
    %20 = tpu.matmul %18, %19, %cst_26 {dimension_numbers = #tpu.dot_dimension_numbers<[1], [0], [0], [1], [0, 0, 1, 1], [], []>} : vector<312x4xf32>, vector<4x16xf32>, vector<312x16xf32> -> vector<312x16xf32>
    %c0_27 = arith.constant 0 : index
    %c0_28 = arith.constant 0 : index
    %21 = vector.load %arg8[%c0_27, %c0_28] : memref<376x16xf32, #tpu.memory_space<vmem>>, vector<312x16xf32>
    %22 = arith.addf %21, %20 : vector<312x16xf32>
    %c0_29 = arith.constant 0 : index
    %c0_30 = arith.constant 0 : index
    %23 = vector.load %arg8[%c0_29, %c0_30] : memref<376x16xf32, #tpu.memory_space<vmem>>, vector<312x16xf32>
    tpu.vector_store %arg8[%c0_29, %c0_30], %22 {strides = array<i32>} : memref<376x16xf32, #tpu.memory_space<vmem>>, vector<312x16xf32>,
    %c3_31 = arith.constant 3 : index
    %c0_32 = arith.constant 0 : index
    %24 = vector.load %arg1[%c3_31, %c0_32] : memref<352x4xf32, #tpu.memory_space<vmem>>, vector<312x4xf32>
    %c8 = arith.constant 8 : index
    %c0_33 = arith.constant 0 : index
    %25 = vector.load %arg2[%c8, %c0_33] : memref<36x16xf32, #tpu.memory_space<vmem>>, vector<4x16xf32>
    %cst_34 = arith.constant dense<0.000000e+00> : vector<312x16xf32>
    %26 = tpu.matmul %24, %25, %cst_34 {dimension_numbers = #tpu.dot_dimension_numbers<[1], [0], [0], [1], [0, 0, 1, 1], [], []>} : vector<312x4xf32>, vector<4x16xf32>, vector<312x16xf32> -> vector<312x16xf32>
    %c0_35 = arith.constant 0 : index
    %c0_36 = arith.constant 0 : index
    %27 = vector.load %arg8[%c0_35, %c0_36] : memref<376x16xf32, #tpu.memory_space<vmem>>, vector<312x16xf32>
    %28 = arith.addf %27, %26 : vector<312x16xf32>
    %c0_37 = arith.constant 0 : index
    %c0_38 = arith.constant 0 : index
    %29 = vector.load %arg8[%c0_37, %c0_38] : memref<376x16xf32, #tpu.memory_space<vmem>>, vector<312x16xf32>
    tpu.vector_store %arg8[%c0_37, %c0_38], %28 {strides = array<i32>} : memref<376x16xf32, #tpu.memory_space<vmem>>, vector<312x16xf32>,
    %c19 = arith.constant 19 : index
    %c0_39 = arith.constant 0 : index
    %30 = vector.load %arg1[%c19, %c0_39] : memref<352x4xf32, #tpu.memory_space<vmem>>, vector<312x4xf32>
    %c12 = arith.constant 12 : index
    %c0_40 = arith.constant 0 : index
    %31 = vector.load %arg2[%c12, %c0_40] : memref<36x16xf32, #tpu.memory_space<vmem>>, vector<4x16xf32>
    %cst_41 = arith.constant dense<0.000000e+00> : vector<312x16xf32>
    %32 = tpu.matmul %30, %31, %cst_41 {dimension_numbers = #tpu.dot_dimension_numbers<[1], [0], [0], [1], [0, 0, 1, 1], [], []>} : vector<312x4xf32>, vector<4x16xf32>, vector<312x16xf32> -> vector<312x16xf32>
    %c0_42 = arith.constant 0 : index
    %c0_43 = arith.constant 0 : index
    %33 = vector.load %arg8[%c0_42, %c0_43] : memref<376x16xf32, #tpu.memory_space<vmem>>, vector<312x16xf32>
    %34 = arith.addf %33, %32 : vector<312x16xf32>
    %c0_44 = arith.constant 0 : index
    %c0_45 = arith.constant 0 : index
    %35 = vector.load %arg8[%c0_44, %c0_45] : memref<376x16xf32, #tpu.memory_space<vmem>>, vector<312x16xf32>
    tpu.vector_store %arg8[%c0_44, %c0_45], %34 {strides = array<i32>} : memref<376x16xf32, #tpu.memory_space<vmem>>, vector<312x16xf32>,
    %c20 = arith.constant 20 : index
    %c0_46 = arith.constant 0 : index
    %36 = vector.load %arg1[%c20, %c0_46] : memref<352x4xf32, #tpu.memory_space<vmem>>, vector<312x4xf32>
    %c16 = arith.constant 16 : index
    %c0_47 = arith.constant 0 : index
    %37 = vector.load %arg2[%c16, %c0_47] : memref<36x16xf32, #tpu.memory_space<vmem>>, vector<4x16xf32>
    %cst_48 = arith.constant dense<0.000000e+00> : vector<312x16xf32>
    %38 = tpu.matmul %36, %37, %cst_48 {dimension_numbers = #tpu.dot_dimension_numbers<[1], [0], [0], [1], [0, 0, 1, 1], [], []>} : vector<312x4xf32>, vector<4x16xf32>, vector<312x16xf32> -> vector<312x16xf32>
    %c0_49 = arith.constant 0 : index
    %c0_50 = arith.constant 0 : index
    %39 = vector.load %arg8[%c0_49, %c0_50] : memref<376x16xf32, #tpu.memory_space<vmem>>, vector<312x16xf32>
    %40 = arith.addf %39, %38 : vector<312x16xf32>
    %c0_51 = arith.constant 0 : index
    %c0_52 = arith.constant 0 : index
    %41 = vector.load %arg8[%c0_51, %c0_52] : memref<376x16xf32, #tpu.memory_space<vmem>>, vector<312x16xf32>
    tpu.vector_store %arg8[%c0_51, %c0_52], %40 {strides = array<i32>} : memref<376x16xf32, #tpu.memory_space<vmem>>, vector<312x16xf32>,
    %c21 = arith.constant 21 : index
    %c0_53 = arith.constant 0 : index
    %42 = vector.load %arg1[%c21, %c0_53] : memref<352x4xf32, #tpu.memory_space<vmem>>, vector<312x4xf32>
    %c20_54 = arith.constant 20 : index
    %c0_55 = arith.constant 0 : index
    %43 = vector.load %arg2[%c20_54, %c0_55] : memref<36x16xf32, #tpu.memory_space<vmem>>, vector<4x16xf32>
    %cst_56 = arith.constant dense<0.000000e+00> : vector<312x16xf32>
    %44 = tpu.matmul %42, %43, %cst_56 {dimension_numbers = #tpu.dot_dimension_numbers<[1], [0], [0], [1], [0, 0, 1, 1], [], []>} : vector<312x4xf32>, vector<4x16xf32>, vector<312x16xf32> -> vector<312x16xf32>
    %c0_57 = arith.constant 0 : index
    %c0_58 = arith.constant 0 : index
    %45 = vector.load %arg8[%c0_57, %c0_58] : memref<376x16xf32, #tpu.memory_space<vmem>>, vector<312x16xf32>
    %46 = arith.addf %45, %44 : vector<312x16xf32>
    %c0_59 = arith.constant 0 : index
    %c0_60 = arith.constant 0 : index
    %47 = vector.load %arg8[%c0_59, %c0_60] : memref<376x16xf32, #tpu.memory_space<vmem>>, vector<312x16xf32>
    tpu.vector_store %arg8[%c0_59, %c0_60], %46 {strides = array<i32>} : memref<376x16xf32, #tpu.memory_space<vmem>>, vector<312x16xf32>,
    %c37 = arith.constant 37 : index
    %c0_61 = arith.constant 0 : index
    %48 = vector.load %arg1[%c37, %c0_61] : memref<352x4xf32, #tpu.memory_space<vmem>>, vector<312x4xf32>
    %c24 = arith.constant 24 : index
    %c0_62 = arith.constant 0 : index
    %49 = vector.load %arg2[%c24, %c0_62] : memref<36x16xf32, #tpu.memory_space<vmem>>, vector<4x16xf32>
    %cst_63 = arith.constant dense<0.000000e+00> : vector<312x16xf32>
    %50 = tpu.matmul %48, %49, %cst_63 {dimension_numbers = #tpu.dot_dimension_numbers<[1], [0], [0], [1], [0, 0, 1, 1], [], []>} : vector<312x4xf32>, vector<4x16xf32>, vector<312x16xf32> -> vector<312x16xf32>
    %c0_64 = arith.constant 0 : index
    %c0_65 = arith.constant 0 : index
    %51 = vector.load %arg8[%c0_64, %c0_65] : memref<376x16xf32, #tpu.memory_space<vmem>>, vector<312x16xf32>
    %52 = arith.addf %51, %50 : vector<312x16xf32>
    %c0_66 = arith.constant 0 : index
    %c0_67 = arith.constant 0 : index
    %53 = vector.load %arg8[%c0_66, %c0_67] : memref<376x16xf32, #tpu.memory_space<vmem>>, vector<312x16xf32>
    tpu.vector_store %arg8[%c0_66, %c0_67], %52 {strides = array<i32>} : memref<376x16xf32, #tpu.memory_space<vmem>>, vector<312x16xf32>,
    %c38 = arith.constant 38 : index
    %c0_68 = arith.constant 0 : index
    %54 = vector.load %arg1[%c38, %c0_68] : memref<352x4xf32, #tpu.memory_space<vmem>>, vector<312x4xf32>
    %c28 = arith.constant 28 : index
    %c0_69 = arith.constant 0 : index
    %55 = vector.load %arg2[%c28, %c0_69] : memref<36x16xf32, #tpu.memory_space<vmem>>, vector<4x16xf32>
    %cst_70 = arith.constant dense<0.000000e+00> : vector<312x16xf32>
    %56 = tpu.matmul %54, %55, %cst_70 {dimension_numbers = #tpu.dot_dimension_numbers<[1], [0], [0], [1], [0, 0, 1, 1], [], []>} : vector<312x4xf32>, vector<4x16xf32>, vector<312x16xf32> -> vector<312x16xf32>
    %c0_71 = arith.constant 0 : index
    %c0_72 = arith.constant 0 : index
    %57 = vector.load %arg8[%c0_71, %c0_72] : memref<376x16xf32, #tpu.memory_space<vmem>>, vector<312x16xf32>
    %58 = arith.addf %57, %56 : vector<312x16xf32>
    %c0_73 = arith.constant 0 : index
    %c0_74 = arith.constant 0 : index
    %59 = vector.load %arg8[%c0_73, %c0_74] : memref<376x16xf32, #tpu.memory_space<vmem>>, vector<312x16xf32>
    tpu.vector_store %arg8[%c0_73, %c0_74], %58 {strides = array<i32>} : memref<376x16xf32, #tpu.memory_space<vmem>>, vector<312x16xf32>,
    %c39 = arith.constant 39 : index
    %c0_75 = arith.constant 0 : index
    %60 = vector.load %arg1[%c39, %c0_75] : memref<352x4xf32, #tpu.memory_space<vmem>>, vector<312x4xf32>
    %c32 = arith.constant 32 : index
    %c0_76 = arith.constant 0 : index
    %61 = vector.load %arg2[%c32, %c0_76] : memref<36x16xf32, #tpu.memory_space<vmem>>, vector<4x16xf32>
    %cst_77 = arith.constant dense<0.000000e+00> : vector<312x16xf32>
    %62 = tpu.matmul %60, %61, %cst_77 {dimension_numbers = #tpu.dot_dimension_numbers<[1], [0], [0], [1], [0, 0, 1, 1], [], []>} : vector<312x4xf32>, vector<4x16xf32>, vector<312x16xf32> -> vector<312x16xf32>
    %c0_78 = arith.constant 0 : index
    %c0_79 = arith.constant 0 : index
    %63 = vector.load %arg8[%c0_78, %c0_79] : memref<376x16xf32, #tpu.memory_space<vmem>>, vector<312x16xf32>
    %64 = arith.addf %63, %62 : vector<312x16xf32>
    %c0_80 = arith.constant 0 : index
    %c0_81 = arith.constant 0 : index
    %65 = vector.load %arg8[%c0_80, %c0_81] : memref<376x16xf32, #tpu.memory_space<vmem>>, vector<312x16xf32>
    tpu.vector_store %arg8[%c0_80, %c0_81], %64 {strides = array<i32>} : memref<376x16xf32, #tpu.memory_space<vmem>>, vector<312x16xf32>,
    %c0_82 = arith.constant 0 : index
    %c0_83 = arith.constant 0 : index
    %66 = tpu.strided_load %arg8[%c0_82, %c0_83] {strides = array<i32: 2, 1>} : memref<376x16xf32, #tpu.memory_space<vmem>>, vector<176x16xf32>
    %c1_84 = arith.constant 1 : index
    %c0_85 = arith.constant 0 : index
    %67 = tpu.strided_load %arg8[%c1_84, %c0_85] {strides = array<i32: 2, 1>} : memref<376x16xf32, #tpu.memory_space<vmem>>, vector<176x16xf32>
    %c18 = arith.constant 18 : index
    %c0_86 = arith.constant 0 : index
    %68 = tpu.strided_load %arg8[%c18, %c0_86] {strides = array<i32: 2, 1>} : memref<376x16xf32, #tpu.memory_space<vmem>>, vector<176x16xf32>
    %c19_87 = arith.constant 19 : index
    %c0_88 = arith.constant 0 : index
    %69 = tpu.strided_load %arg8[%c19_87, %c0_88] {strides = array<i32: 2, 1>} : memref<376x16xf32, #tpu.memory_space<vmem>>, vector<176x16xf32>
    %70 = arith.maximumf %66, %67 : vector<176x16xf32>
    %71 = arith.maximumf %68, %69 : vector<176x16xf32>
    %72 = arith.maximumf %70, %71 : vector<176x16xf32>
    %73 = vector.broadcast %0 : vector<1x16xf32> to vector<176x16xf32>
    %74 = arith.mulf %72, %73 : vector<176x16xf32>
    %75 = vector.broadcast %1 : vector<1x16xf32> to vector<176x16xf32>
    %76 = arith.addf %74, %75 : vector<176x16xf32>
    %cst_89 = arith.constant 0.000000e+00 : f32
    %77 = vector.broadcast %cst_89 : f32 to vector<176x16xf32>
    %78 = arith.maximumf %76, %77 : vector<176x16xf32>
    %cst_90 = arith.constant 0.000000e+00 : f32
    %79 = vector.shape_cast %6 : vector<176x1xi1> to vector<176x1xi1>
    %80 = vector.broadcast %79 : vector<176x1xi1> to vector<176x16xi1>
    %81 = vector.broadcast %cst_90 : f32 to vector<176x16xf32>
    %82 = arith.select %80, %78, %81 : vector<176x16xi1>, vector<176x16xf32>
    %c24_91 = arith.constant 24 : index
    %c0_92 = arith.constant 0 : index
    %83 = vector.load %arg10[%c24_91, %c0_92] : memref<224x16xf32, #tpu.memory_space<vmem>>, vector<176x16xf32>
    tpu.vector_store %arg10[%c24_91, %c0_92], %82 {strides = array<i32>} : memref<224x16xf32, #tpu.memory_space<vmem>>, vector<176x16xf32>,
    %c5 = arith.constant 5 : index
    %c0_93 = arith.constant 0 : index
    %84 = vector.load %arg10[%c5, %c0_93] : memref<224x16xf32, #tpu.memory_space<vmem>>, vector<176x16xf32>
    %c0_94 = arith.constant 0 : index
    %c0_95 = arith.constant 0 : index
    %85 = vector.load %arg3[%c0_94, %c0_95] : memref<144x16xf32, #tpu.memory_space<vmem>>, vector<16x16xf32>
    %cst_96 = arith.constant dense<0.000000e+00> : vector<176x16xf32>
    %86 = tpu.matmul %84, %85, %cst_96 {dimension_numbers = #tpu.dot_dimension_numbers<[1], [0], [0], [1], [0, 0, 1, 1], [], []>} : vector<176x16xf32>, vector<16x16xf32>, vector<176x16xf32> -> vector<176x16xf32>
    %c0_97 = arith.constant 0 : index
    %c0_98 = arith.constant 0 : index
    %87 = vector.load %arg9[%c0_97, %c0_98] : memref<176x16xf32, #tpu.memory_space<vmem>>, vector<176x16xf32>
    tpu.vector_store %arg9[%c0_97, %c0_98], %86 {strides = array<i32>} : memref<176x16xf32, #tpu.memory_space<vmem>>, vector<176x16xf32>,
    %c6 = arith.constant 6 : index
    %c0_99 = arith.constant 0 : index
    %88 = vector.load %arg10[%c6, %c0_99] : memref<224x16xf32, #tpu.memory_space<vmem>>, vector<176x16xf32>
    %c16_100 = arith.constant 16 : index
    %c0_101 = arith.constant 0 : index
    %89 = vector.load %arg3[%c16_100, %c0_101] : memref<144x16xf32, #tpu.memory_space<vmem>>, vector<16x16xf32>
    %cst_102 = arith.constant dense<0.000000e+00> : vector<176x16xf32>
    %90 = tpu.matmul %88, %89, %cst_102 {dimension_numbers = #tpu.dot_dimension_numbers<[1], [0], [0], [1], [0, 0, 1, 1], [], []>} : vector<176x16xf32>, vector<16x16xf32>, vector<176x16xf32> -> vector<176x16xf32>
    %c0_103 = arith.constant 0 : index
    %c0_104 = arith.constant 0 : index
    %91 = vector.load %arg9[%c0_103, %c0_104] : memref<176x16xf32, #tpu.memory_space<vmem>>, vector<176x16xf32>
    %92 = arith.addf %91, %90 : vector<176x16xf32>
    %c0_105 = arith.constant 0 : index
    %c0_106 = arith.constant 0 : index
    %93 = vector.load %arg9[%c0_105, %c0_106] : memref<176x16xf32, #tpu.memory_space<vmem>>, vector<176x16xf32>
    tpu.vector_store %arg9[%c0_105, %c0_106], %92 {strides = array<i32>} : memref<176x16xf32, #tpu.memory_space<vmem>>, vector<176x16xf32>,
    %c7 = arith.constant 7 : index
    %c0_107 = arith.constant 0 : index
    %94 = vector.load %arg10[%c7, %c0_107] : memref<224x16xf32, #tpu.memory_space<vmem>>, vector<176x16xf32>
    %c32_108 = arith.constant 32 : index
    %c0_109 = arith.constant 0 : index
    %95 = vector.load %arg3[%c32_108, %c0_109] : memref<144x16xf32, #tpu.memory_space<vmem>>, vector<16x16xf32>
    %cst_110 = arith.constant dense<0.000000e+00> : vector<176x16xf32>
    %96 = tpu.matmul %94, %95, %cst_110 {dimension_numbers = #tpu.dot_dimension_numbers<[1], [0], [0], [1], [0, 0, 1, 1], [], []>} : vector<176x16xf32>, vector<16x16xf32>, vector<176x16xf32> -> vector<176x16xf32>
    %c0_111 = arith.constant 0 : index
    %c0_112 = arith.constant 0 : index
    %97 = vector.load %arg9[%c0_111, %c0_112] : memref<176x16xf32, #tpu.memory_space<vmem>>, vector<176x16xf32>
    %98 = arith.addf %97, %96 : vector<176x16xf32>
    %c0_113 = arith.constant 0 : index
    %c0_114 = arith.constant 0 : index
    %99 = vector.load %arg9[%c0_113, %c0_114] : memref<176x16xf32, #tpu.memory_space<vmem>>, vector<176x16xf32>
    tpu.vector_store %arg9[%c0_113, %c0_114], %98 {strides = array<i32>} : memref<176x16xf32, #tpu.memory_space<vmem>>, vector<176x16xf32>,
    %c23 = arith.constant 23 : index
    %c0_115 = arith.constant 0 : index
    %100 = vector.load %arg10[%c23, %c0_115] : memref<224x16xf32, #tpu.memory_space<vmem>>, vector<176x16xf32>
    %c48 = arith.constant 48 : index
    %c0_116 = arith.constant 0 : index
    %101 = vector.load %arg3[%c48, %c0_116] : memref<144x16xf32, #tpu.memory_space<vmem>>, vector<16x16xf32>
    %cst_117 = arith.constant dense<0.000000e+00> : vector<176x16xf32>
    %102 = tpu.matmul %100, %101, %cst_117 {dimension_numbers = #tpu.dot_dimension_numbers<[1], [0], [0], [1], [0, 0, 1, 1], [], []>} : vector<176x16xf32>, vector<16x16xf32>, vector<176x16xf32> -> vector<176x16xf32>
    %c0_118 = arith.constant 0 : index
    %c0_119 = arith.constant 0 : index
    %103 = vector.load %arg9[%c0_118, %c0_119] : memref<176x16xf32, #tpu.memory_space<vmem>>, vector<176x16xf32>
    %104 = arith.addf %103, %102 : vector<176x16xf32>
    %c0_120 = arith.constant 0 : index
    %c0_121 = arith.constant 0 : index
    %105 = vector.load %arg9[%c0_120, %c0_121] : memref<176x16xf32, #tpu.memory_space<vmem>>, vector<176x16xf32>
    tpu.vector_store %arg9[%c0_120, %c0_121], %104 {strides = array<i32>} : memref<176x16xf32, #tpu.memory_space<vmem>>, vector<176x16xf32>,
    %c24_122 = arith.constant 24 : index
    %c0_123 = arith.constant 0 : index
    %106 = vector.load %arg10[%c24_122, %c0_123] : memref<224x16xf32, #tpu.memory_space<vmem>>, vector<176x16xf32>
    %c64 = arith.constant 64 : index
    %c0_124 = arith.constant 0 : index
    %107 = vector.load %arg3[%c64, %c0_124] : memref<144x16xf32, #tpu.memory_space<vmem>>, vector<16x16xf32>
    %cst_125 = arith.constant dense<0.000000e+00> : vector<176x16xf32>
    %108 = tpu.matmul %106, %107, %cst_125 {dimension_numbers = #tpu.dot_dimension_numbers<[1], [0], [0], [1], [0, 0, 1, 1], [], []>} : vector<176x16xf32>, vector<16x16xf32>, vector<176x16xf32> -> vector<176x16xf32>
    %c0_126 = arith.constant 0 : index
    %c0_127 = arith.constant 0 : index
    %109 = vector.load %arg9[%c0_126, %c0_127] : memref<176x16xf32, #tpu.memory_space<vmem>>, vector<176x16xf32>
    %110 = arith.addf %109, %108 : vector<176x16xf32>
    %c0_128 = arith.constant 0 : index
    %c0_129 = arith.constant 0 : index
    %111 = vector.load %arg9[%c0_128, %c0_129] : memref<176x16xf32, #tpu.memory_space<vmem>>, vector<176x16xf32>
    tpu.vector_store %arg9[%c0_128, %c0_129], %110 {strides = array<i32>} : memref<176x16xf32, #tpu.memory_space<vmem>>, vector<176x16xf32>,
    %c25 = arith.constant 25 : index
    %c0_130 = arith.constant 0 : index
    %112 = vector.load %arg10[%c25, %c0_130] : memref<224x16xf32, #tpu.memory_space<vmem>>, vector<176x16xf32>
    %c80 = arith.constant 80 : index
    %c0_131 = arith.constant 0 : index
    %113 = vector.load %arg3[%c80, %c0_131] : memref<144x16xf32, #tpu.memory_space<vmem>>, vector<16x16xf32>
    %cst_132 = arith.constant dense<0.000000e+00> : vector<176x16xf32>
    %114 = tpu.matmul %112, %113, %cst_132 {dimension_numbers = #tpu.dot_dimension_numbers<[1], [0], [0], [1], [0, 0, 1, 1], [], []>} : vector<176x16xf32>, vector<16x16xf32>, vector<176x16xf32> -> vector<176x16xf32>
    %c0_133 = arith.constant 0 : index
    %c0_134 = arith.constant 0 : index
    %115 = vector.load %arg9[%c0_133, %c0_134] : memref<176x16xf32, #tpu.memory_space<vmem>>, vector<176x16xf32>
    %116 = arith.addf %115, %114 : vector<176x16xf32>
    %c0_135 = arith.constant 0 : index
    %c0_136 = arith.constant 0 : index
    %117 = vector.load %arg9[%c0_135, %c0_136] : memref<176x16xf32, #tpu.memory_space<vmem>>, vector<176x16xf32>
    tpu.vector_store %arg9[%c0_135, %c0_136], %116 {strides = array<i32>} : memref<176x16xf32, #tpu.memory_space<vmem>>, vector<176x16xf32>,
    %c41 = arith.constant 41 : index
    %c0_137 = arith.constant 0 : index
    %118 = vector.load %arg10[%c41, %c0_137] : memref<224x16xf32, #tpu.memory_space<vmem>>, vector<176x16xf32>
    %c96 = arith.constant 96 : index
    %c0_138 = arith.constant 0 : index
    %119 = vector.load %arg3[%c96, %c0_138] : memref<144x16xf32, #tpu.memory_space<vmem>>, vector<16x16xf32>
    %cst_139 = arith.constant dense<0.000000e+00> : vector<176x16xf32>
    %120 = tpu.matmul %118, %119, %cst_139 {dimension_numbers = #tpu.dot_dimension_numbers<[1], [0], [0], [1], [0, 0, 1, 1], [], []>} : vector<176x16xf32>, vector<16x16xf32>, vector<176x16xf32> -> vector<176x16xf32>
    %c0_140 = arith.constant 0 : index
    %c0_141 = arith.constant 0 : index
    %121 = vector.load %arg9[%c0_140, %c0_141] : memref<176x16xf32, #tpu.memory_space<vmem>>, vector<176x16xf32>
    %122 = arith.addf %121, %120 : vector<176x16xf32>
    %c0_142 = arith.constant 0 : index
    %c0_143 = arith.constant 0 : index
    %123 = vector.load %arg9[%c0_142, %c0_143] : memref<176x16xf32, #tpu.memory_space<vmem>>, vector<176x16xf32>
    tpu.vector_store %arg9[%c0_142, %c0_143], %122 {strides = array<i32>} : memref<176x16xf32, #tpu.memory_space<vmem>>, vector<176x16xf32>,
    %c42 = arith.constant 42 : index
    %c0_144 = arith.constant 0 : index
    %124 = vector.load %arg10[%c42, %c0_144] : memref<224x16xf32, #tpu.memory_space<vmem>>, vector<176x16xf32>
    %c112 = arith.constant 112 : index
    %c0_145 = arith.constant 0 : index
    %125 = vector.load %arg3[%c112, %c0_145] : memref<144x16xf32, #tpu.memory_space<vmem>>, vector<16x16xf32>
    %cst_146 = arith.constant dense<0.000000e+00> : vector<176x16xf32>
    %126 = tpu.matmul %124, %125, %cst_146 {dimension_numbers = #tpu.dot_dimension_numbers<[1], [0], [0], [1], [0, 0, 1, 1], [], []>} : vector<176x16xf32>, vector<16x16xf32>, vector<176x16xf32> -> vector<176x16xf32>
    %c0_147 = arith.constant 0 : index
    %c0_148 = arith.constant 0 : index
    %127 = vector.load %arg9[%c0_147, %c0_148] : memref<176x16xf32, #tpu.memory_space<vmem>>, vector<176x16xf32>
    %128 = arith.addf %127, %126 : vector<176x16xf32>
    %c0_149 = arith.constant 0 : index
    %c0_150 = arith.constant 0 : index
    %129 = vector.load %arg9[%c0_149, %c0_150] : memref<176x16xf32, #tpu.memory_space<vmem>>, vector<176x16xf32>
    tpu.vector_store %arg9[%c0_149, %c0_150], %128 {strides = array<i32>} : memref<176x16xf32, #tpu.memory_space<vmem>>, vector<176x16xf32>,
    %c43 = arith.constant 43 : index
    %c0_151 = arith.constant 0 : index
    %130 = vector.load %arg10[%c43, %c0_151] : memref<224x16xf32, #tpu.memory_space<vmem>>, vector<176x16xf32>
    %c128 = arith.constant 128 : index
    %c0_152 = arith.constant 0 : index
    %131 = vector.load %arg3[%c128, %c0_152] : memref<144x16xf32, #tpu.memory_space<vmem>>, vector<16x16xf32>
    %cst_153 = arith.constant dense<0.000000e+00> : vector<176x16xf32>
    %132 = tpu.matmul %130, %131, %cst_153 {dimension_numbers = #tpu.dot_dimension_numbers<[1], [0], [0], [1], [0, 0, 1, 1], [], []>} : vector<176x16xf32>, vector<16x16xf32>, vector<176x16xf32> -> vector<176x16xf32>
    %c0_154 = arith.constant 0 : index
    %c0_155 = arith.constant 0 : index
    %133 = vector.load %arg9[%c0_154, %c0_155] : memref<176x16xf32, #tpu.memory_space<vmem>>, vector<176x16xf32>
    %134 = arith.addf %133, %132 : vector<176x16xf32>
    %c0_156 = arith.constant 0 : index
    %c0_157 = arith.constant 0 : index
    %135 = vector.load %arg9[%c0_156, %c0_157] : memref<176x16xf32, #tpu.memory_space<vmem>>, vector<176x16xf32>
    tpu.vector_store %arg9[%c0_156, %c0_157], %134 {strides = array<i32>} : memref<176x16xf32, #tpu.memory_space<vmem>>, vector<176x16xf32>,
    %c0_158 = arith.constant 0 : index
    %c0_159 = arith.constant 0 : index
    %136 = vector.load %arg9[%c0_158, %c0_159] : memref<176x16xf32, #tpu.memory_space<vmem>>, vector<176x16xf32>
    %137 = vector.broadcast %2 : vector<1x16xf32> to vector<176x16xf32>
    %138 = arith.addf %136, %137 : vector<176x16xf32>
    %cst_160 = arith.constant 0.000000e+00 : f32
    %139 = vector.broadcast %cst_160 : f32 to vector<176x16xf32>
    %140 = arith.maximumf %138, %139 : vector<176x16xf32>
    %cst_161 = arith.constant 0.000000e+00 : f32
    %141 = vector.shape_cast %6 : vector<176x1xi1> to vector<176x1xi1>
    %142 = vector.broadcast %141 : vector<176x1xi1> to vector<176x16xi1>
    %143 = vector.broadcast %cst_161 : f32 to vector<176x16xf32>
    %144 = arith.select %142, %140, %143 : vector<176x16xi1>, vector<176x16xf32>
    %c24_162 = arith.constant 24 : index
    %c0_163 = arith.constant 0 : index
    %145 = vector.load %arg11[%c24_162, %c0_163] : memref<224x16xf32, #tpu.memory_space<vmem>>, vector<176x16xf32>
    tpu.vector_store %arg11[%c24_162, %c0_163], %144 {strides = array<i32>} : memref<224x16xf32, #tpu.memory_space<vmem>>, vector<176x16xf32>,
    %c5_164 = arith.constant 5 : index
    %c0_165 = arith.constant 0 : index
    %146 = vector.load %arg11[%c5_164, %c0_165] : memref<224x16xf32, #tpu.memory_space<vmem>>, vector<176x16xf32>
    %c0_166 = arith.constant 0 : index
    %c0_167 = arith.constant 0 : index
    %147 = vector.load %arg4[%c0_166, %c0_167] : memref<144x16xf32, #tpu.memory_space<vmem>>, vector<16x16xf32>
    %cst_168 = arith.constant dense<0.000000e+00> : vector<176x16xf32>
    %148 = tpu.matmul %146, %147, %cst_168 {dimension_numbers = #tpu.dot_dimension_numbers<[1], [0], [0], [1], [0, 0, 1, 1], [], []>} : vector<176x16xf32>, vector<16x16xf32>, vector<176x16xf32> -> vector<176x16xf32>
    %c0_169 = arith.constant 0 : index
    %c0_170 = arith.constant 0 : index
    %149 = vector.load %arg9[%c0_169, %c0_170] : memref<176x16xf32, #tpu.memory_space<vmem>>, vector<176x16xf32>
    tpu.vector_store %arg9[%c0_169, %c0_170], %148 {strides = array<i32>} : memref<176x16xf32, #tpu.memory_space<vmem>>, vector<176x16xf32>,
    %c6_171 = arith.constant 6 : index
    %c0_172 = arith.constant 0 : index
    %150 = vector.load %arg11[%c6_171, %c0_172] : memref<224x16xf32, #tpu.memory_space<vmem>>, vector<176x16xf32>
    %c16_173 = arith.constant 16 : index
    %c0_174 = arith.constant 0 : index
    %151 = vector.load %arg4[%c16_173, %c0_174] : memref<144x16xf32, #tpu.memory_space<vmem>>, vector<16x16xf32>
    %cst_175 = arith.constant dense<0.000000e+00> : vector<176x16xf32>
    %152 = tpu.matmul %150, %151, %cst_175 {dimension_numbers = #tpu.dot_dimension_numbers<[1], [0], [0], [1], [0, 0, 1, 1], [], []>} : vector<176x16xf32>, vector<16x16xf32>, vector<176x16xf32> -> vector<176x16xf32>
    %c0_176 = arith.constant 0 : index
    %c0_177 = arith.constant 0 : index
    %153 = vector.load %arg9[%c0_176, %c0_177] : memref<176x16xf32, #tpu.memory_space<vmem>>, vector<176x16xf32>
    %154 = arith.addf %153, %152 : vector<176x16xf32>
    %c0_178 = arith.constant 0 : index
    %c0_179 = arith.constant 0 : index
    %155 = vector.load %arg9[%c0_178, %c0_179] : memref<176x16xf32, #tpu.memory_space<vmem>>, vector<176x16xf32>
    tpu.vector_store %arg9[%c0_178, %c0_179], %154 {strides = array<i32>} : memref<176x16xf32, #tpu.memory_space<vmem>>, vector<176x16xf32>,
    %c7_180 = arith.constant 7 : index
    %c0_181 = arith.constant 0 : index
    %156 = vector.load %arg11[%c7_180, %c0_181] : memref<224x16xf32, #tpu.memory_space<vmem>>, vector<176x16xf32>
    %c32_182 = arith.constant 32 : index
    %c0_183 = arith.constant 0 : index
    %157 = vector.load %arg4[%c32_182, %c0_183] : memref<144x16xf32, #tpu.memory_space<vmem>>, vector<16x16xf32>
    %cst_184 = arith.constant dense<0.000000e+00> : vector<176x16xf32>
    %158 = tpu.matmul %156, %157, %cst_184 {dimension_numbers = #tpu.dot_dimension_numbers<[1], [0], [0], [1], [0, 0, 1, 1], [], []>} : vector<176x16xf32>, vector<16x16xf32>, vector<176x16xf32> -> vector<176x16xf32>
    %c0_185 = arith.constant 0 : index
    %c0_186 = arith.constant 0 : index
    %159 = vector.load %arg9[%c0_185, %c0_186] : memref<176x16xf32, #tpu.memory_space<vmem>>, vector<176x16xf32>
    %160 = arith.addf %159, %158 : vector<176x16xf32>
    %c0_187 = arith.constant 0 : index
    %c0_188 = arith.constant 0 : index
    %161 = vector.load %arg9[%c0_187, %c0_188] : memref<176x16xf32, #tpu.memory_space<vmem>>, vector<176x16xf32>
    tpu.vector_store %arg9[%c0_187, %c0_188], %160 {strides = array<i32>} : memref<176x16xf32, #tpu.memory_space<vmem>>, vector<176x16xf32>,
    %c23_189 = arith.constant 23 : index
    %c0_190 = arith.constant 0 : index
    %162 = vector.load %arg11[%c23_189, %c0_190] : memref<224x16xf32, #tpu.memory_space<vmem>>, vector<176x16xf32>
    %c48_191 = arith.constant 48 : index
    %c0_192 = arith.constant 0 : index
    %163 = vector.load %arg4[%c48_191, %c0_192] : memref<144x16xf32, #tpu.memory_space<vmem>>, vector<16x16xf32>
    %cst_193 = arith.constant dense<0.000000e+00> : vector<176x16xf32>
    %164 = tpu.matmul %162, %163, %cst_193 {dimension_numbers = #tpu.dot_dimension_numbers<[1], [0], [0], [1], [0, 0, 1, 1], [], []>} : vector<176x16xf32>, vector<16x16xf32>, vector<176x16xf32> -> vector<176x16xf32>
    %c0_194 = arith.constant 0 : index
    %c0_195 = arith.constant 0 : index
    %165 = vector.load %arg9[%c0_194, %c0_195] : memref<176x16xf32, #tpu.memory_space<vmem>>, vector<176x16xf32>
    %166 = arith.addf %165, %164 : vector<176x16xf32>
    %c0_196 = arith.constant 0 : index
    %c0_197 = arith.constant 0 : index
    %167 = vector.load %arg9[%c0_196, %c0_197] : memref<176x16xf32, #tpu.memory_space<vmem>>, vector<176x16xf32>
    tpu.vector_store %arg9[%c0_196, %c0_197], %166 {strides = array<i32>} : memref<176x16xf32, #tpu.memory_space<vmem>>, vector<176x16xf32>,
    %c24_198 = arith.constant 24 : index
    %c0_199 = arith.constant 0 : index
    %168 = vector.load %arg11[%c24_198, %c0_199] : memref<224x16xf32, #tpu.memory_space<vmem>>, vector<176x16xf32>
    %c64_200 = arith.constant 64 : index
    %c0_201 = arith.constant 0 : index
    %169 = vector.load %arg4[%c64_200, %c0_201] : memref<144x16xf32, #tpu.memory_space<vmem>>, vector<16x16xf32>
    %cst_202 = arith.constant dense<0.000000e+00> : vector<176x16xf32>
    %170 = tpu.matmul %168, %169, %cst_202 {dimension_numbers = #tpu.dot_dimension_numbers<[1], [0], [0], [1], [0, 0, 1, 1], [], []>} : vector<176x16xf32>, vector<16x16xf32>, vector<176x16xf32> -> vector<176x16xf32>
    %c0_203 = arith.constant 0 : index
    %c0_204 = arith.constant 0 : index
    %171 = vector.load %arg9[%c0_203, %c0_204] : memref<176x16xf32, #tpu.memory_space<vmem>>, vector<176x16xf32>
    %172 = arith.addf %171, %170 : vector<176x16xf32>
    %c0_205 = arith.constant 0 : index
    %c0_206 = arith.constant 0 : index
    %173 = vector.load %arg9[%c0_205, %c0_206] : memref<176x16xf32, #tpu.memory_space<vmem>>, vector<176x16xf32>
    tpu.vector_store %arg9[%c0_205, %c0_206], %172 {strides = array<i32>} : memref<176x16xf32, #tpu.memory_space<vmem>>, vector<176x16xf32>,
    %c25_207 = arith.constant 25 : index
    %c0_208 = arith.constant 0 : index
    %174 = vector.load %arg11[%c25_207, %c0_208] : memref<224x16xf32, #tpu.memory_space<vmem>>, vector<176x16xf32>
    %c80_209 = arith.constant 80 : index
    %c0_210 = arith.constant 0 : index
    %175 = vector.load %arg4[%c80_209, %c0_210] : memref<144x16xf32, #tpu.memory_space<vmem>>, vector<16x16xf32>
    %cst_211 = arith.constant dense<0.000000e+00> : vector<176x16xf32>
    %176 = tpu.matmul %174, %175, %cst_211 {dimension_numbers = #tpu.dot_dimension_numbers<[1], [0], [0], [1], [0, 0, 1, 1], [], []>} : vector<176x16xf32>, vector<16x16xf32>, vector<176x16xf32> -> vector<176x16xf32>
    %c0_212 = arith.constant 0 : index
    %c0_213 = arith.constant 0 : index
    %177 = vector.load %arg9[%c0_212, %c0_213] : memref<176x16xf32, #tpu.memory_space<vmem>>, vector<176x16xf32>
    %178 = arith.addf %177, %176 : vector<176x16xf32>
    %c0_214 = arith.constant 0 : index
    %c0_215 = arith.constant 0 : index
    %179 = vector.load %arg9[%c0_214, %c0_215] : memref<176x16xf32, #tpu.memory_space<vmem>>, vector<176x16xf32>
    tpu.vector_store %arg9[%c0_214, %c0_215], %178 {strides = array<i32>} : memref<176x16xf32, #tpu.memory_space<vmem>>, vector<176x16xf32>,
    %c41_216 = arith.constant 41 : index
    %c0_217 = arith.constant 0 : index
    %180 = vector.load %arg11[%c41_216, %c0_217] : memref<224x16xf32, #tpu.memory_space<vmem>>, vector<176x16xf32>
    %c96_218 = arith.constant 96 : index
    %c0_219 = arith.constant 0 : index
    %181 = vector.load %arg4[%c96_218, %c0_219] : memref<144x16xf32, #tpu.memory_space<vmem>>, vector<16x16xf32>
    %cst_220 = arith.constant dense<0.000000e+00> : vector<176x16xf32>
    %182 = tpu.matmul %180, %181, %cst_220 {dimension_numbers = #tpu.dot_dimension_numbers<[1], [0], [0], [1], [0, 0, 1, 1], [], []>} : vector<176x16xf32>, vector<16x16xf32>, vector<176x16xf32> -> vector<176x16xf32>
    %c0_221 = arith.constant 0 : index
    %c0_222 = arith.constant 0 : index
    %183 = vector.load %arg9[%c0_221, %c0_222] : memref<176x16xf32, #tpu.memory_space<vmem>>, vector<176x16xf32>
    %184 = arith.addf %183, %182 : vector<176x16xf32>
    %c0_223 = arith.constant 0 : index
    %c0_224 = arith.constant 0 : index
    %185 = vector.load %arg9[%c0_223, %c0_224] : memref<176x16xf32, #tpu.memory_space<vmem>>, vector<176x16xf32>
    tpu.vector_store %arg9[%c0_223, %c0_224], %184 {strides = array<i32>} : memref<176x16xf32, #tpu.memory_space<vmem>>, vector<176x16xf32>,
    %c42_225 = arith.constant 42 : index
    %c0_226 = arith.constant 0 : index
    %186 = vector.load %arg11[%c42_225, %c0_226] : memref<224x16xf32, #tpu.memory_space<vmem>>, vector<176x16xf32>
    %c112_227 = arith.constant 112 : index
    %c0_228 = arith.constant 0 : index
    %187 = vector.load %arg4[%c112_227, %c0_228] : memref<144x16xf32, #tpu.memory_space<vmem>>, vector<16x16xf32>
    %cst_229 = arith.constant dense<0.000000e+00> : vector<176x16xf32>
    %188 = tpu.matmul %186, %187, %cst_229 {dimension_numbers = #tpu.dot_dimension_numbers<[1], [0], [0], [1], [0, 0, 1, 1], [], []>} : vector<176x16xf32>, vector<16x16xf32>, vector<176x16xf32> -> vector<176x16xf32>
    %c0_230 = arith.constant 0 : index
    %c0_231 = arith.constant 0 : index
    %189 = vector.load %arg9[%c0_230, %c0_231] : memref<176x16xf32, #tpu.memory_space<vmem>>, vector<176x16xf32>
    %190 = arith.addf %189, %188 : vector<176x16xf32>
    %c0_232 = arith.constant 0 : index
    %c0_233 = arith.constant 0 : index
    %191 = vector.load %arg9[%c0_232, %c0_233] : memref<176x16xf32, #tpu.memory_space<vmem>>, vector<176x16xf32>
    tpu.vector_store %arg9[%c0_232, %c0_233], %190 {strides = array<i32>} : memref<176x16xf32, #tpu.memory_space<vmem>>, vector<176x16xf32>,
    %c43_234 = arith.constant 43 : index
    %c0_235 = arith.constant 0 : index
    %192 = vector.load %arg11[%c43_234, %c0_235] : memref<224x16xf32, #tpu.memory_space<vmem>>, vector<176x16xf32>
    %c128_236 = arith.constant 128 : index
    %c0_237 = arith.constant 0 : index
    %193 = vector.load %arg4[%c128_236, %c0_237] : memref<144x16xf32, #tpu.memory_space<vmem>>, vector<16x16xf32>
    %cst_238 = arith.constant dense<0.000000e+00> : vector<176x16xf32>
    %194 = tpu.matmul %192, %193, %cst_238 {dimension_numbers = #tpu.dot_dimension_numbers<[1], [0], [0], [1], [0, 0, 1, 1], [], []>} : vector<176x16xf32>, vector<16x16xf32>, vector<176x16xf32> -> vector<176x16xf32>
    %c0_239 = arith.constant 0 : index
    %c0_240 = arith.constant 0 : index
    %195 = vector.load %arg9[%c0_239, %c0_240] : memref<176x16xf32, #tpu.memory_space<vmem>>, vector<176x16xf32>
    %196 = arith.addf %195, %194 : vector<176x16xf32>
    %c0_241 = arith.constant 0 : index
    %c0_242 = arith.constant 0 : index
    %197 = vector.load %arg9[%c0_241, %c0_242] : memref<176x16xf32, #tpu.memory_space<vmem>>, vector<176x16xf32>
    tpu.vector_store %arg9[%c0_241, %c0_242], %196 {strides = array<i32>} : memref<176x16xf32, #tpu.memory_space<vmem>>, vector<176x16xf32>,
    %c24_243 = arith.constant 24 : index
    %c0_244 = arith.constant 0 : index
    %198 = vector.load %arg10[%c24_243, %c0_244] : memref<224x16xf32, #tpu.memory_space<vmem>>, vector<176x16xf32>
    %c0_245 = arith.constant 0 : index
    %c0_246 = arith.constant 0 : index
    %199 = vector.load %arg9[%c0_245, %c0_246] : memref<176x16xf32, #tpu.memory_space<vmem>>, vector<176x16xf32>
    %200 = vector.broadcast %3 : vector<1x16xf32> to vector<176x16xf32>
    %201 = arith.addf %199, %200 : vector<176x16xf32>
    %202 = arith.addf %201, %198 : vector<176x16xf32>
    %cst_247 = arith.constant 0.000000e+00 : f32
    %203 = vector.broadcast %cst_247 : f32 to vector<176x16xf32>
    %204 = arith.maximumf %202, %203 : vector<176x16xf32>
    %205 = arith.addf %198, %204 : vector<176x16xf32>
    %c0_248 = arith.constant 0 : index
    %c0_249 = arith.constant 0 : index
    %206 = vector.load %arg7[%c0_248, %c0_249] : memref<176x16xf32, #tpu.memory_space<vmem>>, vector<176x16xf32>
    tpu.vector_store %arg7[%c0_248, %c0_249], %205 {strides = array<i32>} : memref<176x16xf32, #tpu.memory_space<vmem>>, vector<176x16xf32>,
    return
  }
  func.func @transform_0(%arg0: i32) -> (i32, i32) {
    %c0_i32 = arith.constant 0 : i32
    %c0_i32_0 = arith.constant 0 : i32
    return %arg0, %c0_i32 : i32, i32
  }
  func.func @transform_1(%arg0: i32) -> (i32, i32) {
    %c0_i32 = arith.constant 0 : i32
    %c0_i32_0 = arith.constant 0 : i32
    %c0_i32_1 = arith.constant 0 : i32
    return %c0_i32, %c0_i32_0 : i32, i32
  }
  func.func @transform_2(%arg0: i32) -> (i32, i32) {
    %c0_i32 = arith.constant 0 : i32
    %c0_i32_0 = arith.constant 0 : i32
    %c0_i32_1 = arith.constant 0 : i32
    return %c0_i32, %c0_i32_0 : i32, i32
  }
  func.func @transform_3(%arg0: i32) -> (i32, i32) {
    %c0_i32 = arith.constant 0 : i32
    %c0_i32_0 = arith.constant 0 : i32
    %c0_i32_1 = arith.constant 0 : i32
    return %c0_i32, %c0_i32_0 : i32, i32
  }
  func.func @transform_4(%arg0: i32) -> (i32, i32) {
    %c0_i32 = arith.constant 0 : i32
    %c0_i32_0 = arith.constant 0 : i32
    %c0_i32_1 = arith.constant 0 : i32
    return %c0_i32, %c0_i32_0 : i32, i32
  }
  func.func @transform_5(%arg0: i32) -> (i32, i32) {
    %c0_i32 = arith.constant 0 : i32
    %c0_i32_0 = arith.constant 0 : i32
    %c0_i32_1 = arith.constant 0 : i32
    return %c0_i32, %c0_i32_0 : i32, i32
  }
  func.func @transform_6(%arg0: i32) -> (i32, i32) {
    %c0_i32 = arith.constant 0 : i32
    %c0_i32_0 = arith.constant 0 : i32
    return %arg0, %c0_i32 : i32, i32
  }
}

</mosaic_0001>

<bundles_post_ra>
// kernel: tpu_custom_call.1
= control target key start
LH: loop header
LB: loop body
LE: loop exit
PB: predicated region body
PF: predicated region fallthrough
CT: control target
= control target key end

     0   :  { %s15125_s21 = smov 0   ;;  %s19192_s0 = inlined_call_operand.vmem [shape: f32[704,4], index: 0, kind: input, shape index: {}]   ;;  %s19193_s1 = inlined_call_operand.vmem [shape: f32[36,16], index: 1, kind: input, shape index: {}]   ;;  %s19194_s2 = inlined_call_operand.vmem [shape: f32[144,16], index: 2, kind: input, shape index: {}]   ;;  %s19195_s3 = inlined_call_operand.vmem [shape: f32[144,16], index: 3, kind: input, shape index: {}]   ;;  %s19196_s4 = inlined_call_operand.vmem [shape: f32[4,16], index: 4, kind: input, shape index: {}]   ;;  %s19197_s5 = inlined_call_operand.vmem [shape: f32[176,1], index: 5, kind: input, shape index: {}]   ;;  %s19198_s6 = inlined_call_operand.vmem [shape: f32[352,16], index: 6, kind: output, shape index: {}]  }
   0x1 LB: > { %s11748_s22 = sadd.s32 4294967295, %s15085_s21   ;;  %p11752_p0 = scmp.ge.s32.totalorder %s15085_s21, 1  ;;  %s15085_s21 = sphi %s15125_s21, %s16_s21  }
   0x2   : > { %p213_p1 = scmp.lt.s32.totalorder %s15085_s21, 3 }
   0x4   : > { %p214_p2 = pnand %p11752_p0, %p213_p1 }
   0x6   : > { %217 = sbr.rel (%p214_p2) target bundleno = 1869 (0x74d), region = 44 }
   0xb   : > { %v363_v0 = vld [vmem:[%s19193_s1] sm:$0xf]  ;;  %vm482_vm0 = vcmask 1043456   ;;  %s243_s25 = smul.u32 44, %s11748_s22  ;;  %v15087_v1 = vmov 0.0   ;;  %vm15088_vm1 = vmmov 0  }
   0xc   : > { %13309 = vmatprep.subr.mxu0 %v15087_v1  ;;  %13311 = vmatprep.mubr.msk.f32.mxu0 %vm15088_vm1, %v15087_v1  ;;  %v824_v2 = vld [vmem:[%s19193_s1 + $0x4] sm:$0xf]  ;;  %vm364_vm2 = vcmask 31744   ;;  %v1898_v21 = vld [vmem:[%s19193_s1 + $0xc] sm:$0xf]  ;;  %vm303_vm3 = vcmask 130048  }
   0xd   : > { %13310 = vmatpush3.msk.msra.mxu0 %vm482_vm0, %v363_v0  ;;  %p244_p3 = scmp.lt.s32.totalorder %s243_s25, 87  ;;  %15046 = vmatprep.subr.mxu1 %v15087_v1  ;;  %304 = vst.msk [vmem:[#allocation2 + $0x138] sm:$0xff] %vm303_vm3, %v15087_v1  ;;  %305 = vst.msk [vmem:[#allocation2 + $0x140] sm:$0xff] %vm303_vm3, %v15087_v1  ;;  %s19077_s20 = smul.u32 22, %s11748_s22 }
   0xe   : > { %13428 = vmatprep.subr.mxu0 %v15087_v1  ;;  %15047 = vmatpush3.msk.msra.mxu1 %vm482_vm0, %v824_v2  ;;  %306 = vst.msk [vmem:[#allocation2 + $0x148] sm:$0xff] %vm303_vm3, %v15087_v1  ;;  %307 = vst.msk [vmem:[#allocation2 + $0x150] sm:$0xff] %vm303_vm3, %v15087_v1 }
   0xf   : > { %s19229_s25 = smov (!%p244_p3, %s243_s25), 87  ;;  %13436 = vmatprep.mubr.msk.f32.mxu1 %vm15088_vm1, %v15087_v1  ;;  %13666 = vmatprep.subr.mxu1 %v15087_v1  ;;  %308 = vst.msk [vmem:[#allocation2 + $0x158] sm:$0xff] %vm303_vm3, %v15087_v1  ;;  %309 = vst.msk [vmem:[#allocation2 + $0x160] sm:$0xff] %vm303_vm3, %v15087_v1  ;;  %p250_p4 = scmp.lt.s32.totalorder %s19077_s20, 43 }
  0x10   : > { %s11753_s28 = sshll.u32 %s19229_s25, 3  ;;  %310 = vst.msk [vmem:[#allocation2 + $0x168] sm:$0xff] %vm303_vm3, %v15087_v1  ;;  %311 = vst.msk [vmem:[#allocation2 + $0x170] sm:$0xff] %vm303_vm3, %v15087_v1 }
  0x11   : > { %s15154_s7 = scalar_lea.vmem %s19192_s0, %s11753_s28  ;;  %312 = vst.msk [vmem:[#allocation4] sm:$0xff] %vm303_vm3, %v15087_v1  ;;  %313 = vst.msk [vmem:[#allocation4 + $0x8] sm:$0xff] %vm303_vm3, %v15087_v1  ;;  %s19231_s20 = smov (!%p250_p4, %s19077_s20), 43 }
  0x12   : > { %v324_v3 = vld [vmem:[%s15154_s7 + $0x1] sm:$0xff]  ;;  %v787_v4 = vld [vmem:[%s15154_s7 + $0x12] sm:$0xff]  ;;  %v325_v5 = vld [vmem:[%s15154_s7 + $0x9] sm:$0xff]  ;;  %314 = vst.msk [vmem:[#allocation4 + $0x10] sm:$0xff] %vm303_vm3, %v15087_v1  ;;  %s11754_s24 = sshll.u32 %s19231_s20, 3 }
  0x13   : > { %13312 = vmatmul.mubr.msk.f32.vlgmr.msra.gmra.mxu0 %vm364_vm2, %v324_v3  ;;  %13437 = vmatmul.mubr.msk.f32.vlgmr.msra.gmra.mxu1 %vm364_vm2, %v787_v4  ;;  %v788_v6 = vld [vmem:[%s15154_s7 + $0x1a] sm:$0xff]  ;;  %v326_v7 = vld [vmem:[%s15154_s7 + $0x11] sm:$0xff]  ;;  %v789_v8 = vld [vmem:[%s15154_s7 + $0x22] sm:$0xff]  ;;  %315 = vst.msk [vmem:[#allocation4 + $0xc8] sm:$0xff] %vm303_vm3, %v15087_v1  ;;  %s19109_s27 = scalar_lea.vmem %s19198_s6, %s11754_s24 }
  0x14   : > { %13429 = vmatpush3.msk.msra.mxu0 %vm482_vm0, %v824_v2  ;;  %13314 = vmatprep.mubr.msk.f32.mxu0 %vm15088_vm1, %v15087_v1  ;;  %v327_v9 = vld [vmem:[%s15154_s7 + $0x19] sm:$0xff]  ;;  %v790_v10 = vld [vmem:[%s15154_s7 + $0x2a] sm:$0xff]  ;;  %v328_v11 = vld [vmem:[%s15154_s7 + $0x21] sm:$0xff]  ;;  %316 = vst.msk [vmem:[#allocation4 + $0xd0] sm:$0xff] %vm303_vm3, %v15087_v1 }
  0x15   : > { %13547 = vmatprep.subr.mxu0 %v15087_v1  ;;  %13439 = vmatprep.mubr.msk.f32.mxu1 %vm15088_vm1, %v15087_v1  ;;  %v791_v12 = vld [vmem:[%s15154_s7 + $0x32] sm:$0xff]  ;;  %v329_v13 = vld [vmem:[%s15154_s7 + $0x29] sm:$0xff]  ;;  %v792_v14 = vld [vmem:[%s15154_s7 + $0x3a] sm:$0xff]  ;;  %317 = vst.msk [vmem:[#allocation4 + $0xd8] sm:$0xff] %vm303_vm3, %v15087_v1 }
  0x16   : > { %v330_v15 = vld [vmem:[%s15154_s7 + $0x31] sm:$0xff]  ;;  %v793_v16 = vld [vmem:[%s15154_s7 + $0x42] sm:$0xff]  ;;  %v331_v17 = vld [vmem:[%s15154_s7 + $0x39] sm:$0xff]  ;;  %13667 = vmatpush3.msk.msra.mxu1 %vm482_vm0, %v1898_v21  ;;  %318 = vst.msk [vmem:[#allocation5] sm:$0xff] %vm303_vm3, %v15087_v1 }
  0x17   : > { %13315 = vmatmul.mubr.msk.f32.gmra.mxu0 %vm364_vm2, %v325_v5  ;;  %13440 = vmatmul.mubr.msk.f32.gmra.mxu1 %vm364_vm2, %v788_v6  ;;  %v794_v18 = vld [vmem:[%s15154_s7 + $0x4a] sm:$0xff]  ;;  %v332_v19 = vld [vmem:[%s15154_s7 + $0x41] sm:$0xff]  ;;  %v795_v20 = vld [vmem:[%s15154_s7 + $0x52] sm:$0xff]  ;;  %319 = vst.msk [vmem:[#allocation5 + $0x8] sm:$0xff] %vm303_vm3, %v15087_v1 }
  0x18   : > { %13317 = vmatprep.mubr.msk.f32.mxu0 %vm15088_vm1, %v15087_v1  ;;  %13442 = vmatprep.mubr.msk.f32.mxu1 %vm15088_vm1, %v15087_v1  ;;  %v333_v22 = vld [vmem:[%s15154_s7 + $0x49] sm:$0xff]  ;;  %v796_v23 = vld [vmem:[%s15154_s7 + $0x5a] sm:$0xff]  ;;  %v334_v24 = vld [vmem:[%s15154_s7 + $0x51] sm:$0xff]  ;;  %320 = vst.msk [vmem:[#allocation5 + $0x10] sm:$0xff] %vm303_vm3, %v15087_v1 }
  0x19   : > { %13904 = vmatprep.subr.mxu1 %v15087_v1  ;;  %v797_v25 = vld [vmem:[%s15154_s7 + $0x62] sm:$0xff]  ;;  %v335_v26 = vld [vmem:[%s15154_s7 + $0x59] sm:$0xff]  ;;  %v798_v27 = vld [vmem:[%s15154_s7 + $0x6a] sm:$0xff]  ;;  %321 = vst.msk [vmem:[#allocation5 + $0xc8] sm:$0xff] %vm303_vm3, %v15087_v1 }
  0x1a   : > { %v336_v28 = vld [vmem:[%s15154_s7 + $0x61] sm:$0xff]  ;;  %v799_v29 = vld [vmem:[%s15154_s7 + $0x72] sm:$0xff]  ;;  %v337_v30 = vld [vmem:[%s15154_s7 + $0x69] sm:$0xff]  ;;  %322 = vst.msk [vmem:[#allocation5 + $0xd0] sm:$0xff] %vm303_vm3, %v15087_v1 }
  0x1b   : > { %13318 = vmatmul.mubr.msk.f32.gmra.mxu0 %vm364_vm2, %v326_v7  ;;  %13443 = vmatmul.mubr.msk.f32.gmra.mxu1 %vm364_vm2, %v789_v8  ;;  %v800_v31 = vld [vmem:[%s15154_s7 + $0x7a] sm:$0xff]  ;;  %v338_v32 = vld [vmem:[%s15154_s7 + $0x71] sm:$0xff]  ;;  %v801_v33 = vld [vmem:[%s15154_s7 + $0x82] sm:$0xff]  ;;  %323 = vst.msk [vmem:[#allocation5 + $0xd8] sm:$0xff] %vm303_vm3, %v15087_v1 }
  0x1c   : > { %13320 = vmatprep.mubr.msk.f32.mxu0 %vm15088_vm1, %v15087_v1  ;;  %13445 = vmatprep.mubr.msk.f32.mxu1 %vm15088_vm1, %v15087_v1  ;;  %v339_v34 = vld [vmem:[%s15154_s7 + $0x79] sm:$0xff]  ;;  %v802_v35 = vld [vmem:[%s15154_s7 + $0x8a] sm:$0xff]  ;;  %v340_v36 = vld [vmem:[%s15154_s7 + $0x81] sm:$0xff] }
  0x1d   : > { %v803_v37 = vld [vmem:[%s15154_s7 + $0x92] sm:$0xff]  ;;  %v341_v38 = vld [vmem:[%s15154_s7 + $0x89] sm:$0xff]  ;;  %v804_v39 = vld [vmem:[%s15154_s7 + $0x9a] sm:$0xff] }
  0x1e   : > { %v342_v40 = vld [vmem:[%s15154_s7 + $0x91] sm:$0xff]  ;;  %v805_v41 = vld [vmem:[%s15154_s7 + $0xa2] sm:$0xff]  ;;  %v343_v42 = vld [vmem:[%s15154_s7 + $0x99] sm:$0xff] }
  0x1f   : > { %13321 = vmatmul.mubr.msk.f32.gmra.mxu0 %vm364_vm2, %v327_v9  ;;  %13446 = vmatmul.mubr.msk.f32.gmra.mxu1 %vm364_vm2, %v790_v10  ;;  %v806_v43 = vld [vmem:[%s15154_s7 + $0xaa] sm:$0xff]  ;;  %v344_v44 = vld [vmem:[%s15154_s7 + $0xa1] sm:$0xff]  ;;  %v807_v45 = vld [vmem:[%s15154_s7 + $0xb2] sm:$0xff] }
  0x20   : > { %13323 = vmatprep.mubr.msk.f32.mxu0 %vm15088_vm1, %v15087_v1  ;;  %13448 = vmatprep.mubr.msk.f32.mxu1 %vm15088_vm1, %v15087_v1  ;;  %v345_v46 = vld [vmem:[%s15154_s7 + $0xa9] sm:$0xff]  ;;  %v808_v47 = vld [vmem:[%s15154_s7 + $0xba] sm:$0xff]  ;;  %v346_v48 = vld [vmem:[%s15154_s7 + $0xb1] sm:$0xff] }
  0x21   : > { %v809_v49 = vld [vmem:[%s15154_s7 + $0xc2] sm:$0xff]  ;;  %v347_v50 = vld [vmem:[%s15154_s7 + $0xb9] sm:$0xff]  ;;  %v810_v51 = vld [vmem:[%s15154_s7 + $0xca] sm:$0xff] }
  0x22   : > { %v348_v52 = vld [vmem:[%s15154_s7 + $0xc1] sm:$0xff]  ;;  %v811_v53 = vld [vmem:[%s15154_s7 + $0xd2] sm:$0xff]  ;;  %v349_v54 = vld [vmem:[%s15154_s7 + $0xc9] sm:$0xff] }
  0x23   : > { %13324 = vmatmul.mubr.msk.f32.gmra.mxu0 %vm364_vm2, %v328_v11  ;;  %13449 = vmatmul.mubr.msk.f32.gmra.mxu1 %vm364_vm2, %v791_v12  ;;  %v812_v55 = vld [vmem:[%s15154_s7 + $0xda] sm:$0xff]  ;;  %v350_v56 = vld [vmem:[%s15154_s7 + $0xd1] sm:$0xff]  ;;  %v813_v57 = vld [vmem:[%s15154_s7 + $0xe2] sm:$0xff] }
  0x24   : > { %13326 = vmatprep.mubr.msk.f32.mxu0 %vm15088_vm1, %v15087_v1  ;;  %13451 = vmatprep.mubr.msk.f32.mxu1 %vm15088_vm1, %v15087_v1  ;;  %v351_v58 = vld [vmem:[%s15154_s7 + $0xd9] sm:$0xff]  ;;  %v814_v59 = vld [vmem:[%s15154_s7 + $0xea] sm:$0xff]  ;;  %v352_v60 = vld [vmem:[%s15154_s7 + $0xe1] sm:$0xff] }
  0x25   : > { %v815_v61 = vld [vmem:[%s15154_s7 + $0xf2] sm:$0xff]  ;;  %v353_v62 = vld [vmem:[%s15154_s7 + $0xe9] sm:$0xff]  ;;  %v816_v63 = vld [vmem:[%s15154_s7 + $0xfa] sm:$0xff] }
  0x26   : > { %v354_v0 = vld [vmem:[%s15154_s7 + $0xf1] sm:$0xff]  ;;  %v817_v2 = vld [vmem:[%s15154_s7 + $0x102] sm:$0xff]  ;;  %v355_v3 = vld [vmem:[%s15154_s7 + $0xf9] sm:$0xff] }
  0x27   : > { %13327 = vmatmul.mubr.msk.f32.gmra.mxu0 %vm364_vm2, %v329_v13  ;;  %13452 = vmatmul.mubr.msk.f32.gmra.mxu1 %vm364_vm2, %v792_v14  ;;  %v818_v4 = vld [vmem:[%s15154_s7 + $0x10a] sm:$0xff]  ;;  %v356_v5 = vld [vmem:[%s15154_s7 + $0x101] sm:$0xff]  ;;  %v819_v6 = vld [vmem:[%s15154_s7 + $0x112] sm:$0xff] }
  0x28   : > { %13329 = vmatprep.mubr.msk.f32.mxu0 %vm15088_vm1, %v15087_v1  ;;  %13454 = vmatprep.mubr.msk.f32.mxu1 %vm15088_vm1, %v15087_v1  ;;  %v357_v7 = vld [vmem:[%s15154_s7 + $0x109] sm:$0xff]  ;;  %v820_v8 = vld [vmem:[%s15154_s7 + $0x11a] sm:$0xff]  ;;  %v358_v9 = vld [vmem:[%s15154_s7 + $0x111] sm:$0xff] }
  0x29   : > { %v821_v10 = vld [vmem:[%s15154_s7 + $0x122] sm:$0xff]  ;;  %v359_v11 = vld [vmem:[%s15154_s7 + $0x119] sm:$0xff]  ;;  %v822_v12 = vld [vmem:[%s15154_s7 + $0x12a] sm:$0xff] }
  0x2a   : > { %v360_v13 = vld [vmem:[%s15154_s7 + $0x121] sm:$0xff]  ;;  %v823_v14 = vld [vmem:[%s15154_s7 + $0x132] sm:$0xff]  ;;  %v786_v21 = vld [vmem:[%s15154_s7 + $0xa] sm:$0xff] }
  0x2b   : > { %13330 = vmatmul.mubr.msk.f32.gmra.mxu0 %vm364_vm2, %v330_v15  ;;  %13455 = vmatmul.mubr.msk.f32.gmra.mxu1 %vm364_vm2, %v793_v16  ;;  %v361_v15 = vld [vmem:[%s15154_s7 + $0x129] sm:$0xff]  ;;  %v362_v16 = vld [vmem:[%s15154_s7 + $0x131] sm:$0xff] }
  0x2c   : > { %13332 = vmatprep.mubr.msk.f32.mxu0 %vm15088_vm1, %v15087_v1  ;;  %13457 = vmatprep.mubr.msk.f32.mxu1 %vm15088_vm1, %v15087_v1 }
  0x2f   : > { %13333 = vmatmul.mubr.msk.f32.gmra.mxu0 %vm364_vm2, %v331_v17  ;;  %13458 = vmatmul.mubr.msk.f32.gmra.mxu1 %vm364_vm2, %v794_v18  ;;  %v1324_v17 = vld [vmem:[%s15154_s7 + $0x13] sm:$0xff]  ;;  %v785_v18 = vld [vmem:[%s15154_s7 + $0x2] sm:$0xff] }
  0x30   : > { %13335 = vmatprep.mubr.msk.f32.mxu0 %vm15088_vm1, %v15087_v1  ;;  %13460 = vmatprep.mubr.msk.f32.mxu1 %vm15088_vm1, %v15087_v1 }
  0x33   : > { %13336 = vmatmul.mubr.msk.f32.gmra.mxu0 %vm364_vm2, %v332_v19  ;;  %13461 = vmatmul.mubr.msk.f32.gmra.mxu1 %vm364_vm2, %v795_v20  ;;  %v1325_v19 = vld [vmem:[%s15154_s7 + $0x1b] sm:$0xff]  ;;  %v1361_v20 = vld [vmem:[%s19193_s1 + $0x8] sm:$0xf] }
  0x34   : > { %13338 = vmatprep.mubr.msk.f32.mxu0 %vm15088_vm1, %v15087_v1  ;;  %13463 = vmatprep.mubr.msk.f32.mxu1 %vm15088_vm1, %v15087_v1 }
  0x37   : > { %13339 = vmatmul.mubr.msk.f32.gmra.mxu0 %vm364_vm2, %v333_v22  ;;  %13464 = vmatmul.mubr.msk.f32.gmra.mxu1 %vm364_vm2, %v796_v23  ;;  %v1326_v22 = vld [vmem:[%s15154_s7 + $0x23] sm:$0xff] }
  0x38   : > { %13341 = vmatprep.mubr.msk.f32.mxu0 %vm15088_vm1, %v15087_v1  ;;  %13466 = vmatprep.mubr.msk.f32.mxu1 %vm15088_vm1, %v15087_v1  ;;  %v1322_v23 = vld [vmem:[%s15154_s7 + $0x3] sm:$0xff] }
  0x3b   : > { %13342 = vmatmul.mubr.msk.f32.gmra.mxu0 %vm364_vm2, %v334_v24  ;;  %13467 = vmatmul.mubr.msk.f32.gmra.mxu1 %vm364_vm2, %v797_v25  ;;  %v1327_v24 = vld [vmem:[%s15154_s7 + $0x2b] sm:$0xff] }
  0x3c   : > { %13344 = vmatprep.mubr.msk.f32.mxu0 %vm15088_vm1, %v15087_v1  ;;  %13469 = vmatprep.mubr.msk.f32.mxu1 %vm15088_vm1, %v15087_v1  ;;  %v2435_v25 = vld [vmem:[%s19193_s1 + $0x10] sm:$0xf] }
  0x3f   : > { %13345 = vmatmul.mubr.msk.f32.gmra.mxu0 %vm364_vm2, %v335_v26  ;;  %13470 = vmatmul.mubr.msk.f32.gmra.mxu1 %vm364_vm2, %v798_v27  ;;  %v1323_v26 = vld [vmem:[%s15154_s7 + $0xb] sm:$0xff]  ;;  %v1328_v27 = vld [vmem:[%s15154_s7 + $0x33] sm:$0xff] }
  0x40   : > { %13347 = vmatprep.mubr.msk.f32.mxu0 %vm15088_vm1, %v15087_v1  ;;  %13472 = vmatprep.mubr.msk.f32.mxu1 %vm15088_vm1, %v15087_v1 }
  0x43   : > { %13348 = vmatmul.mubr.msk.f32.gmra.mxu0 %vm364_vm2, %v336_v28  ;;  %13473 = vmatmul.mubr.msk.f32.gmra.mxu1 %vm364_vm2, %v799_v29  ;;  %v1329_v28 = vld [vmem:[%s15154_s7 + $0x3b] sm:$0xff]  ;;  %v1330_v29 = vld [vmem:[%s15154_s7 + $0x43] sm:$0xff] }
  0x44   : > { %13350 = vmatprep.mubr.msk.f32.mxu0 %vm15088_vm1, %v15087_v1  ;;  %13475 = vmatprep.mubr.msk.f32.mxu1 %vm15088_vm1, %v15087_v1 }
  0x47   : > { %13351 = vmatmul.mubr.msk.f32.gmra.mxu0 %vm364_vm2, %v337_v30  ;;  %13476 = vmatmul.mubr.msk.f32.gmra.mxu1 %vm364_vm2, %v800_v31  ;;  %v1331_v30 = vld [vmem:[%s15154_s7 + $0x4b] sm:$0xff]  ;;  %v1332_v31 = vld [vmem:[%s15154_s7 + $0x53] sm:$0xff] }
  0x48   : > { %13353 = vmatprep.mubr.msk.f32.mxu0 %vm15088_vm1, %v15087_v1  ;;  %13478 = vmatprep.mubr.msk.f32.mxu1 %vm15088_vm1, %v15087_v1 }
  0x4b   : > { %13354 = vmatmul.mubr.msk.f32.gmra.mxu0 %vm364_vm2, %v338_v32  ;;  %13479 = vmatmul.mubr.msk.f32.gmra.mxu1 %vm364_vm2, %v801_v33  ;;  %v2972_v32 = vld [vmem:[%s19193_s1 + $0x14] sm:$0xf]  ;;  %v1333_v33 = vld [vmem:[%s15154_s7 + $0x5b] sm:$0xff] }
  0x4c   : > { %13356 = vmatprep.mubr.msk.f32.mxu0 %vm15088_vm1, %v15087_v1  ;;  %13481 = vmatprep.mubr.msk.f32.mxu1 %vm15088_vm1, %v15087_v1 }
  0x4f   : > { %13357 = vmatmul.mubr.msk.f32.gmra.mxu0 %vm364_vm2, %v339_v34  ;;  %13482 = vmatmul.mubr.msk.f32.gmra.mxu1 %vm364_vm2, %v802_v35  ;;  %v1334_v34 = vld [vmem:[%s15154_s7 + $0x63] sm:$0xff] }
  0x50   : > { %13359 = vmatprep.mubr.msk.f32.mxu0 %vm15088_vm1, %v15087_v1  ;;  %13484 = vmatprep.mubr.msk.f32.mxu1 %vm15088_vm1, %v15087_v1 }
  0x53   : > { %13360 = vmatmul.mubr.msk.f32.gmra.mxu0 %vm364_vm2, %v340_v36  ;;  %13485 = vmatmul.mubr.msk.f32.gmra.mxu1 %vm364_vm2, %v803_v37  ;;  %v15602_v36 = vld [vmem:[%s15154_s7 + $0x6b] sm:$0xff] }
  0x54   : > { %13362 = vmatprep.mubr.msk.f32.mxu0 %vm15088_vm1, %v15087_v1  ;;  %13487 = vmatprep.mubr.msk.f32.mxu1 %vm15088_vm1, %v15087_v1 }
  0x57   : > { %13363 = vmatmul.mubr.msk.f32.gmra.mxu0 %vm364_vm2, %v341_v38  ;;  %13488 = vmatmul.mubr.msk.f32.gmra.mxu1 %vm364_vm2, %v804_v39 }
  0x58   : > { %13365 = vmatprep.mubr.msk.f32.mxu0 %vm15088_vm1, %v15087_v1  ;;  %13490 = vmatprep.mubr.msk.f32.mxu1 %vm15088_vm1, %v15087_v1 }
  0x5b   : > { %13366 = vmatmul.mubr.msk.f32.gmra.mxu0 %vm364_vm2, %v342_v40  ;;  %13491 = vmatmul.mubr.msk.f32.gmra.mxu1 %vm364_vm2, %v805_v41  ;;  %v15613_v41 = vld [vmem:[%s15154_s7 + $0x73] sm:$0xff] }
  0x5c   : > { %13368 = vmatprep.mubr.msk.f32.mxu0 %vm15088_vm1, %v15087_v1  ;;  %13493 = vmatprep.mubr.msk.f32.mxu1 %vm15088_vm1, %v15087_v1 }
  0x5f   : > { %13369 = vmatmul.mubr.msk.f32.gmra.mxu0 %vm364_vm2, %v343_v42  ;;  %13494 = vmatmul.mubr.msk.f32.gmra.mxu1 %vm364_vm2, %v806_v43 }
  0x60   : > { %13371 = vmatprep.mubr.msk.f32.mxu0 %vm15088_vm1, %v15087_v1  ;;  %13496 = vmatprep.mubr.msk.f32.mxu1 %vm15088_vm1, %v15087_v1 }
  0x63   : > { %13372 = vmatmul.mubr.msk.f32.gmra.mxu0 %vm364_vm2, %v344_v44  ;;  %13497 = vmatmul.mubr.msk.f32.gmra.mxu1 %vm364_vm2, %v807_v45 }
  0x64   : > { %13374 = vmatprep.mubr.msk.f32.mxu0 %vm15088_vm1, %v15087_v1  ;;  %13499 = vmatprep.mubr.msk.f32.mxu1 %vm15088_vm1, %v15087_v1 }
  0x67   : > { %13375 = vmatmul.mubr.msk.f32.gmra.mxu0 %vm364_vm2, %v345_v46  ;;  %13500 = vmatmul.mubr.msk.f32.gmra.mxu1 %vm364_vm2, %v808_v47  ;;  %v15624_v46 = vld [vmem:[%s15154_s7 + $0x7b] sm:$0xff] }
  0x68   : > { %13377 = vmatprep.mubr.msk.f32.mxu0 %vm15088_vm1, %v15087_v1  ;;  %13502 = vmatprep.mubr.msk.f32.mxu1 %vm15088_vm1, %v15087_v1 }
  0x6b   : > { %13378 = vmatmul.mubr.msk.f32.gmra.mxu0 %vm364_vm2, %v346_v48  ;;  %13503 = vmatmul.mubr.msk.f32.gmra.mxu1 %vm364_vm2, %v809_v49 }
  0x6c   : > { %13380 = vmatprep.mubr.msk.f32.mxu0 %vm15088_vm1, %v15087_v1  ;;  %13505 = vmatprep.mubr.msk.f32.mxu1 %vm15088_vm1, %v15087_v1 }
  0x6f   : > { %13381 = vmatmul.mubr.msk.f32.gmra.mxu0 %vm364_vm2, %v347_v50  ;;  %13506 = vmatmul.mubr.msk.f32.gmra.mxu1 %vm364_vm2, %v810_v51  ;;  %v15635_v51 = vld [vmem:[%s15154_s7 + $0x83] sm:$0xff] }
  0x70   : > { %13383 = vmatprep.mubr.msk.f32.mxu0 %vm15088_vm1, %v15087_v1  ;;  %13508 = vmatprep.mubr.msk.f32.mxu1 %vm15088_vm1, %v15087_v1 }
  0x73   : > { %13384 = vmatmul.mubr.msk.f32.gmra.mxu0 %vm364_vm2, %v348_v52  ;;  %13509 = vmatmul.mubr.msk.f32.gmra.mxu1 %vm364_vm2, %v811_v53 }
  0x74   : > { %13386 = vmatprep.mubr.msk.f32.mxu0 %vm15088_vm1, %v15087_v1  ;;  %13511 = vmatprep.mubr.msk.f32.mxu1 %vm15088_vm1, %v15087_v1 }
  0x77   : > { %13387 = vmatmul.mubr.msk.f32.gmra.mxu0 %vm364_vm2, %v349_v54  ;;  %13512 = vmatmul.mubr.msk.f32.gmra.mxu1 %vm364_vm2, %v812_v55 }
  0x78   : > { %13389 = vmatprep.mubr.msk.f32.mxu0 %vm15088_vm1, %v15087_v1  ;;  %13514 = vmatprep.mubr.msk.f32.mxu1 %vm15088_vm1, %v15087_v1 }
  0x7b   : > { %13390 = vmatmul.mubr.msk.f32.gmra.mxu0 %vm364_vm2, %v350_v56  ;;  %13515 = vmatmul.mubr.msk.f32.gmra.mxu1 %vm364_vm2, %v813_v57 }
  0x7c   : > { %13392 = vmatprep.mubr.msk.f32.mxu0 %vm15088_vm1, %v15087_v1  ;;  %13517 = vmatprep.mubr.msk.f32.mxu1 %vm15088_vm1, %v15087_v1 }
  0x7f   : > { %13393 = vmatmul.mubr.msk.f32.gmra.mxu0 %vm364_vm2, %v351_v58  ;;  %13518 = vmatmul.mubr.msk.f32.gmra.mxu1 %vm364_vm2, %v814_v59  ;;  %v15646_v58 = vld [vmem:[%s15154_s7 + $0x8b] sm:$0xff] }
  0x80   : > { %13395 = vmatprep.mubr.msk.f32.mxu0 %vm15088_vm1, %v15087_v1  ;;  %13520 = vmatprep.mubr.msk.f32.mxu1 %vm15088_vm1, %v15087_v1 }
  0x83   : > { %13396 = vmatmul.mubr.msk.f32.gmra.mxu0 %vm364_vm2, %v352_v60  ;;  %13521 = vmatmul.mubr.msk.f32.gmra.mxu1 %vm364_vm2, %v815_v61 }
  0x84   : > { %13398 = vmatprep.mubr.msk.f32.mxu0 %vm15088_vm1, %v15087_v1  ;;  %13523 = vmatprep.mubr.msk.f32.mxu1 %vm15088_vm1, %v15087_v1 }
  0x87   : > { %13399 = vmatmul.mubr.msk.f32.gmra.mxu0 %vm364_vm2, %v353_v62  ;;  %13524 = vmatmul.mubr.msk.f32.gmra.mxu1 %vm364_vm2, %v816_v63 }
  0x88   : > { %13401 = vmatprep.mubr.msk.f32.mxu0 %vm15088_vm1, %v15087_v1  ;;  %13526 = vmatprep.mubr.msk.f32.mxu1 %vm15088_vm1, %v15087_v1 }
  0x8b   : > { %13402 = vmatmul.mubr.msk.f32.gmra.mxu0 %vm364_vm2, %v354_v0  ;;  %13527 = vmatmul.mubr.msk.f32.gmra.mxu1 %vm364_vm2, %v817_v2  ;;  %v15658_v2 = vld [vmem:[%s15154_s7 + $0x93] sm:$0xff] }
  0x8c   : > { %13404 = vmatprep.mubr.msk.f32.mxu0 %vm15088_vm1, %v15087_v1  ;;  %13529 = vmatprep.mubr.msk.f32.mxu1 %vm15088_vm1, %v15087_v1 }
  0x8f   : > { %13405 = vmatmul.mubr.msk.f32.gmra.mxu0 %vm364_vm2, %v355_v3  ;;  %13530 = vmatmul.mubr.msk.f32.gmra.mxu1 %vm364_vm2, %v818_v4 }
  0x90   : > { %13407 = vmatprep.mubr.msk.f32.mxu0 %vm15088_vm1, %v15087_v1  ;;  %13532 = vmatprep.mubr.msk.f32.mxu1 %vm15088_vm1, %v15087_v1 }
  0x93   : > { %13408 = vmatmul.mubr.msk.f32.gmra.mxu0 %vm364_vm2, %v356_v5  ;;  %13533 = vmatmul.mubr.msk.f32.gmra.mxu1 %vm364_vm2, %v819_v6 }
  0x94   : > { %13410 = vmatprep.mubr.msk.f32.mxu0 %vm15088_vm1, %v15087_v1  ;;  %13535 = vmatprep.mubr.msk.f32.mxu1 %vm15088_vm1, %v15087_v1 }
  0x97   : > { %13411 = vmatmul.mubr.msk.f32.gmra.mxu0 %vm364_vm2, %v357_v7  ;;  %13536 = vmatmul.mubr.msk.f32.gmra.mxu1 %vm364_vm2, %v820_v8 }
  0x98   : > { %13413 = vmatprep.mubr.msk.f32.mxu0 %vm15088_vm1, %v15087_v1  ;;  %13538 = vmatprep.mubr.msk.f32.mxu1 %vm15088_vm1, %v15087_v1 }
  0x9b   : > { %13414 = vmatmul.mubr.msk.f32.gmra.mxu0 %vm364_vm2, %v358_v9  ;;  %13539 = vmatmul.mubr.msk.f32.gmra.mxu1 %vm364_vm2, %v821_v10  ;;  %v15671_v9 = vld [vmem:[%s15154_s7 + $0x9b] sm:$0xff] }
  0x9c   : > { %13416 = vmatprep.mubr.msk.f32.mxu0 %vm15088_vm1, %v15087_v1  ;;  %13541 = vmatprep.mubr.msk.f32.mxu1 %vm15088_vm1, %v15087_v1 }
  0x9f   : > { %13417 = vmatmul.mubr.msk.f32.gmra.mxu0 %vm364_vm2, %v359_v11  ;;  %13542 = vmatmul.mubr.msk.f32.gmra.mxu1 %vm364_vm2, %v822_v12 }
  0xa0   : > { %13419 = vmatprep.mubr.msk.f32.mxu0 %vm15088_vm1, %v15087_v1  ;;  %13544 = vmatprep.mubr.msk.f32.mxu1 %vm15088_vm1, %v15087_v1 }
  0xa3   : > { %13420 = vmatmul.mubr.msk.f32.gmra.mxu0 %vm364_vm2, %v360_v13  ;;  %13545 = vmatmul.mubr.msk.f32.gmra.mxu1 %vm364_vm2, %v823_v14 }
  0xa4   : > { %13422 = vmatprep.mubr.msk.f32.mxu0 %vm15088_vm1, %v15087_v1  ;;  %13668 = vmatprep.mubr.msk.f32.mxu1 %vm15088_vm1, %v15087_v1 }
  0xa7   : > { %13423 = vmatmul.mubr.msk.f32.gmra.mxu0 %vm364_vm2, %v361_v15  ;;  %13669 = vmatmul.mubr.msk.f32.vlgmr.msra.gmra.mxu1 %vm364_vm2, %v1324_v17 }
  0xa8   : > { %13425 = vmatprep.mubr.msk.f32.mxu0 %vm15088_vm1, %v15087_v1  ;;  %13671 = vmatprep.mubr.msk.f32.mxu1 %vm15088_vm1, %v15087_v1 }
  0xa9   : > { %13905 = vmatpush3.msk.msra.mxu1 %vm482_vm0, %v2972_v32 }
  0xaa   : > { %14142 = vmatprep.subr.mxu1 %v15087_v1 }
  0xab   : > { %13426 = vmatmul.mubr.msk.f32.gmra.mxu0 %vm364_vm2, %v362_v16  ;;  %13672 = vmatmul.mubr.msk.f32.gmra.mxu1 %vm364_vm2, %v1325_v19  ;;  %v15684_v16 = vld [vmem:[%s15154_s7 + $0xa3] sm:$0xff] }
  0xac   : > { %13430 = vmatprep.mubr.msk.f32.mxu0 %vm15088_vm1, %v15087_v1  ;;  %13674 = vmatprep.mubr.msk.f32.mxu1 %vm15088_vm1, %v15087_v1 }
  0xaf   : > { %13431 = vmatmul.mubr.msk.f32.vlgmr.msra.gmra.mxu0 %vm364_vm2, %v785_v18  ;;  %13675 = vmatmul.mubr.msk.f32.gmra.mxu1 %vm364_vm2, %v1326_v22 }
  0xb0   : > { %13548 = vmatpush3.msk.msra.mxu0 %vm482_vm0, %v1361_v20  ;;  %13433 = vmatprep.mubr.msk.f32.mxu0 %vm15088_vm1, %v15087_v1 }
  0xb1   : > { %13785 = vmatprep.subr.mxu0 %v15087_v1  ;;  %13677 = vmatprep.mubr.msk.f32.mxu1 %vm15088_vm1, %v15087_v1 }
  0xb3   : > { %13434 = vmatmul.mubr.msk.f32.gmra.mxu0 %vm364_vm2, %v786_v21  ;;  %13678 = vmatmul.mubr.msk.f32.gmra.mxu1 %vm364_vm2, %v1327_v24 }
  0xb4   : > { %13549 = vmatprep.mubr.msk.f32.mxu0 %vm15088_vm1, %v15087_v1  ;;  %13680 = vmatprep.mubr.msk.f32.mxu1 %vm15088_vm1, %v15087_v1 }
  0xb7   : > { %13550 = vmatmul.mubr.msk.f32.vlgmr.msra.gmra.mxu0 %vm364_vm2, %v1322_v23  ;;  %13681 = vmatmul.mubr.msk.f32.gmra.mxu1 %vm364_vm2, %v1328_v27  ;;  %v15697_v23 = vld [vmem:[%s15154_s7 + $0xab] sm:$0xff] }
  0xb8   : > { %13786 = vmatpush3.msk.msra.mxu0 %vm482_vm0, %v2435_v25  ;;  %13552 = vmatprep.mubr.msk.f32.mxu0 %vm15088_vm1, %v15087_v1 }
  0xb9   : > { %14023 = vmatprep.subr.mxu0 %v15087_v1  ;;  %13683 = vmatprep.mubr.msk.f32.mxu1 %vm15088_vm1, %v15087_v1 }
  0xbb   : > { %13553 = vmatmul.mubr.msk.f32.gmra.mxu0 %vm364_vm2, %v1323_v26  ;;  %13684 = vmatmul.mubr.msk.f32.gmra.mxu1 %vm364_vm2, %v1329_v28 }
  0xbc   : > { %13555 = vmatprep.mubr.msk.f32.mxu0 %vm15088_vm1, %v15087_v1  ;;  %13686 = vmatprep.mubr.msk.f32.mxu1 %vm15088_vm1, %v15087_v1 }
  0xbf   : > { %13556 = vmatmul.mubr.msk.f32.gmra.mxu0 %vm364_vm2, %v1324_v17  ;;  %13687 = vmatmul.mubr.msk.f32.gmra.mxu1 %vm364_vm2, %v1330_v29 }
  0xc0   : > { %13558 = vmatprep.mubr.msk.f32.mxu0 %vm15088_vm1, %v15087_v1  ;;  %13689 = vmatprep.mubr.msk.f32.mxu1 %vm15088_vm1, %v15087_v1 }
  0xc3   : > { %13559 = vmatmul.mubr.msk.f32.gmra.mxu0 %vm364_vm2, %v1325_v19  ;;  %13690 = vmatmul.mubr.msk.f32.gmra.mxu1 %vm364_vm2, %v1331_v30 }
  0xc4   : > { %13561 = vmatprep.mubr.msk.f32.mxu0 %vm15088_vm1, %v15087_v1  ;;  %13692 = vmatprep.mubr.msk.f32.mxu1 %vm15088_vm1, %v15087_v1 }
  0xc7   : > { %13562 = vmatmul.mubr.msk.f32.gmra.mxu0 %vm364_vm2, %v1326_v22  ;;  %13693 = vmatmul.mubr.msk.f32.gmra.mxu1 %vm364_vm2, %v1332_v31 }
  0xc8   : > { %13564 = vmatprep.mubr.msk.f32.mxu0 %vm15088_vm1, %v15087_v1  ;;  %13695 = vmatprep.mubr.msk.f32.mxu1 %vm15088_vm1, %v15087_v1 }
  0xcb   : > { %13565 = vmatmul.mubr.msk.f32.gmra.mxu0 %vm364_vm2, %v1327_v24  ;;  %13696 = vmatmul.mubr.msk.f32.gmra.mxu1 %vm364_vm2, %v1333_v33 }
  0xcc   : > { %13567 = vmatprep.mubr.msk.f32.mxu0 %vm15088_vm1, %v15087_v1  ;;  %13698 = vmatprep.mubr.msk.f32.mxu1 %vm15088_vm1, %v15087_v1 }
  0xcf   : > { %13568 = vmatmul.mubr.msk.f32.gmra.mxu0 %vm364_vm2, %v1328_v27  ;;  %13699 = vmatmul.mubr.msk.f32.gmra.mxu1 %vm364_vm2, %v1334_v34 }
  0xd0   : > { %13570 = vmatprep.mubr.msk.f32.mxu0 %vm15088_vm1, %v15087_v1  ;;  %13701 = vmatprep.mubr.msk.f32.mxu1 %vm15088_vm1, %v15087_v1 }
  0xd3   : > { %v552_v35 = vpop.f32.mrf.mxu0  ;;  %13571 = vmatmul.mubr.msk.f32.gmra.mxu0 %vm364_vm2, %v1329_v28  ;;  %v1021_v38 = vpop.f32.mrf.mxu1  ;;  %13702 = vmatmul.mubr.msk.f32.gmra.mxu1 %vm364_vm2, %v15602_v36 }
  0xd4   : > { %746 = vst.msk [vmem:[#allocation2] sm:$0xff] %vm303_vm3, %v552_v35  ;;  %13573 = vmatprep.mubr.msk.f32.mxu0 %vm15088_vm1, %v15087_v1  ;;  %13704 = vmatprep.mubr.msk.f32.mxu1 %vm15088_vm1, %v15087_v1 }
  0xd5   : > { %v13313_v37 = vpop.f32.mrf.mxu0  ;;  %v13438_v40 = vpop.f32.mrf.mxu1 }
  0xd6   : > { %v15723_v37 = vld [vmem:[%s15154_s7 + $0xbb] sm:$0xff] }
  0xd7   : > { %v557_v39 = vpop.f32.mrf.mxu0  ;;  %13574 = vmatmul.mubr.msk.f32.gmra.mxu0 %vm364_vm2, %v1330_v29  ;;  %v1026_v43 = vpop.f32.mrf.mxu1  ;;  %13705 = vmatmul.mubr.msk.f32.gmra.mxu1 %vm364_vm2, %v15613_v41 }
  0xd8   : > { %747 = vst.msk [vmem:[#allocation2 + $0x8] sm:$0xff] %vm303_vm3, %v557_v39  ;;  %13576 = vmatprep.mubr.msk.f32.mxu0 %vm15088_vm1, %v15087_v1  ;;  %13707 = vmatprep.mubr.msk.f32.mxu1 %vm15088_vm1, %v15087_v1 }
  0xd9   : > { %v13316_v42 = vpop.f32.mrf.mxu0  ;;  %v13441_v45 = vpop.f32.mrf.mxu1 }
  0xdb   : > { %v562_v44 = vpop.f32.mrf.mxu0  ;;  %13577 = vmatmul.mubr.msk.f32.gmra.mxu0 %vm364_vm2, %v1331_v30  ;;  %v1031_v48 = vpop.f32.mrf.mxu1  ;;  %13708 = vmatmul.mubr.msk.f32.gmra.mxu1 %vm364_vm2, %v15624_v46  ;;  %v15710_v30 = vld [vmem:[%s15154_s7 + $0xb3] sm:$0xff] }
  0xdc   : > { %748 = vst.msk [vmem:[#allocation2 + $0x10] sm:$0xff] %vm303_vm3, %v562_v44  ;;  %13579 = vmatprep.mubr.msk.f32.mxu0 %vm15088_vm1, %v15087_v1  ;;  %13710 = vmatprep.mubr.msk.f32.mxu1 %vm15088_vm1, %v15087_v1  ;;  %v15736_v44 = vld [vmem:[%s15154_s7 + $0xc3] sm:$0xff] }
  0xdd   : > { %v13319_v47 = vpop.f32.mrf.mxu0  ;;  %v13444_v50 = vpop.f32.mrf.mxu1 }
  0xdf   : > { %v567_v49 = vpop.f32.mrf.mxu0  ;;  %13580 = vmatmul.mubr.msk.f32.gmra.mxu0 %vm364_vm2, %v1332_v31  ;;  %v1036_v53 = vpop.f32.mrf.mxu1  ;;  %13711 = vmatmul.mubr.msk.f32.gmra.mxu1 %vm364_vm2, %v15635_v51 }
  0xe0   : > { %749 = vst.msk [vmem:[#allocation2 + $0x18] sm:$0xff] %vm303_vm3, %v567_v49  ;;  %13582 = vmatprep.mubr.msk.f32.mxu0 %vm15088_vm1, %v15087_v1  ;;  %13713 = vmatprep.mubr.msk.f32.mxu1 %vm15088_vm1, %v15087_v1 }
  0xe1   : > { %v13322_v52 = vpop.f32.mrf.mxu0  ;;  %v13447_v56 = vpop.f32.mrf.mxu1 }
  0xe3   : > { %v572_v54 = vpop.f32.mrf.mxu0  ;;  %v1207_v55 = vld [vmem:[#allocation2 + $0x10] sm:$0xff]  ;;  %13583 = vmatmul.mubr.msk.f32.gmra.mxu0 %vm364_vm2, %v1333_v33  ;;  %v1041_v60 = vpop.f32.mrf.mxu1  ;;  %13714 = vmatmul.mubr.msk.f32.gmra.mxu1 %vm364_vm2, %v15646_v58 }
  0xe4   : > { %750 = vst.msk [vmem:[#allocation2 + $0x20] sm:$0xff] %vm303_vm3, %v572_v54  ;;  %v1246_v57 = vadd.f32 %v1207_v55, %v1021_v38  ;;  %13585 = vmatprep.mubr.msk.f32.mxu0 %vm15088_vm1, %v15087_v1  ;;  %13716 = vmatprep.mubr.msk.f32.mxu1 %vm15088_vm1, %v15087_v1 }
  0xe5   : > { %v13325_v59 = vpop.f32.mrf.mxu0  ;;  %v13450_v63 = vpop.f32.mrf.mxu1 }
  0xe6   : > { %1285 = vst.msk [vmem:[#allocation2 + $0x10] sm:$0xff] %vm303_vm3, %v1246_v57 }
  0xe7   : > { %v577_v61 = vpop.f32.mrf.mxu0  ;;  %v1208_v62 = vld [vmem:[#allocation2 + $0x18] sm:$0xff]  ;;  %13586 = vmatmul.mubr.msk.f32.gmra.mxu0 %vm364_vm2, %v1334_v34  ;;  %v1046_v4 = vpop.f32.mrf.mxu1  ;;  %13717 = vmatmul.mubr.msk.f32.gmra.mxu1 %vm364_vm2, %v15658_v2 }
  0xe8   : > { %751 = vst.msk [vmem:[#allocation2 + $0x28] sm:$0xff] %vm303_vm3, %v577_v61  ;;  %v1247_v0 = vadd.f32 %v1208_v62, %v1026_v43  ;;  %13588 = vmatprep.mubr.msk.f32.mxu0 %vm15088_vm1, %v15087_v1  ;;  %13719 = vmatprep.mubr.msk.f32.mxu1 %vm15088_vm1, %v15087_v1 }
  0xe9   : > { %v13328_v3 = vpop.f32.mrf.mxu0  ;;  %v13453_v7 = vpop.f32.mrf.mxu1 }
  0xea   : > { %1286 = vst.msk [vmem:[#allocation2 + $0x18] sm:$0xff] %vm303_vm3, %v1247_v0 }
  0xeb   : > { %v582_v5 = vpop.f32.mrf.mxu0  ;;  %v1209_v6 = vld [vmem:[#allocation2 + $0x20] sm:$0xff]  ;;  %13589 = vmatmul.mubr.msk.f32.gmra.mxu0 %vm364_vm2, %v15602_v36  ;;  %v1051_v11 = vpop.f32.mrf.mxu1  ;;  %13720 = vmatmul.mubr.msk.f32.gmra.mxu1 %vm364_vm2, %v15671_v9 }
  0xec   : > { %752 = vst.msk [vmem:[#allocation2 + $0x30] sm:$0xff] %vm303_vm3, %v582_v5  ;;  %v1248_v8 = vadd.f32 %v1209_v6, %v1031_v48  ;;  %13591 = vmatprep.mubr.msk.f32.mxu0 %vm15088_vm1, %v15087_v1  ;;  %13722 = vmatprep.mubr.msk.f32.mxu1 %vm15088_vm1, %v15087_v1 }
  0xed   : > { %v13331_v10 = vpop.f32.mrf.mxu0  ;;  %v13456_v14 = vpop.f32.mrf.mxu1 }
  0xee   : > { %1287 = vst.msk [vmem:[#allocation2 + $0x20] sm:$0xff] %vm303_vm3, %v1248_v8 }
  0xef   : > { %v587_v12 = vpop.f32.mrf.mxu0  ;;  %v1210_v13 = vld [vmem:[#allocation2 + $0x28] sm:$0xff]  ;;  %13592 = vmatmul.mubr.msk.f32.gmra.mxu0 %vm364_vm2, %v15613_v41  ;;  %v1056_v18 = vpop.f32.mrf.mxu1  ;;  %13723 = vmatmul.mubr.msk.f32.gmra.mxu1 %vm364_vm2, %v15684_v16 }
  0xf0   : > { %753 = vst.msk [vmem:[#allocation2 + $0x38] sm:$0xff] %vm303_vm3, %v587_v12  ;;  %v1249_v15 = vadd.f32 %v1210_v13, %v1036_v53  ;;  %13594 = vmatprep.mubr.msk.f32.mxu0 %vm15088_vm1, %v15087_v1  ;;  %13725 = vmatprep.mubr.msk.f32.mxu1 %vm15088_vm1, %v15087_v1 }
  0xf1   : > { %v13334_v17 = vpop.f32.mrf.mxu0  ;;  %v13459_v21 = vpop.f32.mrf.mxu1 }
  0xf2   : > { %1288 = vst.msk [vmem:[#allocation2 + $0x28] sm:$0xff] %vm303_vm3, %v1249_v15 }
  0xf3   : > { %v592_v19 = vpop.f32.mrf.mxu0  ;;  %v1211_v20 = vld [vmem:[#allocation2 + $0x30] sm:$0xff]  ;;  %13595 = vmatmul.mubr.msk.f32.gmra.mxu0 %vm364_vm2, %v15624_v46  ;;  %v1061_v25 = vpop.f32.mrf.mxu1  ;;  %13726 = vmatmul.mubr.msk.f32.gmra.mxu1 %vm364_vm2, %v15697_v23 }
  0xf4   : > { %754 = vst.msk [vmem:[#allocation2 + $0x40] sm:$0xff] %vm303_vm3, %v592_v19  ;;  %v1250_v22 = vadd.f32 %v1211_v20, %v1041_v60  ;;  %13597 = vmatprep.mubr.msk.f32.mxu0 %vm15088_vm1, %v15087_v1  ;;  %13728 = vmatprep.mubr.msk.f32.mxu1 %vm15088_vm1, %v15087_v1 }
  0xf5   : > { %v13337_v24 = vpop.f32.mrf.mxu0  ;;  %v13462_v28 = vpop.f32.mrf.mxu1 }
  0xf6   : > { %1289 = vst.msk [vmem:[#allocation2 + $0x30] sm:$0xff] %vm303_vm3, %v1250_v22 }
  0xf7   : > { %v597_v26 = vpop.f32.mrf.mxu0  ;;  %v1212_v27 = vld [vmem:[#allocation2 + $0x38] sm:$0xff]  ;;  %13598 = vmatmul.mubr.msk.f32.gmra.mxu0 %vm364_vm2, %v15635_v51  ;;  %v1066_v32 = vpop.f32.mrf.mxu1  ;;  %13729 = vmatmul.mubr.msk.f32.gmra.mxu1 %vm364_vm2, %v15710_v30  ;;  %v15749_v51 = vld [vmem:[%s15154_s7 + $0xcb] sm:$0xff] }
  0xf8   : > { %755 = vst.msk [vmem:[#allocation2 + $0x48] sm:$0xff] %vm303_vm3, %v597_v26  ;;  %v1251_v29 = vadd.f32 %v1212_v27, %v1046_v4  ;;  %13600 = vmatprep.mubr.msk.f32.mxu0 %vm15088_vm1, %v15087_v1  ;;  %13731 = vmatprep.mubr.msk.f32.mxu1 %vm15088_vm1, %v15087_v1 }
  0xf9   : > { %v13340_v31 = vpop.f32.mrf.mxu0  ;;  %v13465_v35 = vpop.f32.mrf.mxu1 }
  0xfa   : > { %1290 = vst.msk [vmem:[#allocation2 + $0x38] sm:$0xff] %vm303_vm3, %v1251_v29 }
  0xfb   : > { %v602_v33 = vpop.f32.mrf.mxu0  ;;  %v1213_v34 = vld [vmem:[#allocation2 + $0x40] sm:$0xff]  ;;  %13601 = vmatmul.mubr.msk.f32.gmra.mxu0 %vm364_vm2, %v15646_v58  ;;  %v1071_v39 = vpop.f32.mrf.mxu1  ;;  %13732 = vmatmul.mubr.msk.f32.gmra.mxu1 %vm364_vm2, %v15723_v37  ;;  %v15762_v58 = vld [vmem:[%s15154_s7 + $0xd3] sm:$0xff] }
  0xfc   : > { %756 = vst.msk [vmem:[#allocation2 + $0x50] sm:$0xff] %vm303_vm3, %v602_v33  ;;  %v1252_v36 = vadd.f32 %v1213_v34, %v1051_v11  ;;  %13603 = vmatprep.mubr.msk.f32.mxu0 %vm15088_vm1, %v15087_v1  ;;  %13734 = vmatprep.mubr.msk.f32.mxu1 %vm15088_vm1, %v15087_v1 }
  0xfd   : > { %v13343_v38 = vpop.f32.mrf.mxu0  ;;  %v13468_v42 = vpop.f32.mrf.mxu1 }
  0xfe   : > { %1291 = vst.msk [vmem:[#allocation2 + $0x40] sm:$0xff] %vm303_vm3, %v1252_v36 }
  0xff   : > { %v607_v40 = vpop.f32.mrf.mxu0  ;;  %v1214_v41 = vld [vmem:[#allocation2 + $0x48] sm:$0xff]  ;;  %13604 = vmatmul.mubr.msk.f32.gmra.mxu0 %vm364_vm2, %v15658_v2  ;;  %v1076_v46 = vpop.f32.mrf.mxu1  ;;  %13735 = vmatmul.mubr.msk.f32.gmra.mxu1 %vm364_vm2, %v15736_v44  ;;  %v15775_v2 = vld [vmem:[%s15154_s7 + $0xdb] sm:$0xff] }
 0x100   : > { %757 = vst.msk [vmem:[#allocation2 + $0x58] sm:$0xff] %vm303_vm3, %v607_v40  ;;  %v1253_v43 = vadd.f32 %v1214_v41, %v1056_v18  ;;  %13606 = vmatprep.mubr.msk.f32.mxu0 %vm15088_vm1, %v15087_v1  ;;  %13737 = vmatprep.mubr.msk.f32.mxu1 %vm15088_vm1, %v15087_v1 }
 0x101   : > { %v13346_v45 = vpop.f32.mrf.mxu0  ;;  %v13471_v49 = vpop.f32.mrf.mxu1 }
 0x102   : > { %1292 = vst.msk [vmem:[#allocation2 + $0x48] sm:$0xff] %vm303_vm3, %v1253_v43 }
 0x103   : > { %v612_v47 = vpop.f32.mrf.mxu0  ;;  %v1215_v48 = vld [vmem:[#allocation2 + $0x50] sm:$0xff]  ;;  %13607 = vmatmul.mubr.msk.f32.gmra.mxu0 %vm364_vm2, %v15671_v9  ;;  %v1081_v53 = vpop.f32.mrf.mxu1  ;;  %13738 = vmatmul.mubr.msk.f32.gmra.mxu1 %vm364_vm2, %v15749_v51  ;;  %v15788_v9 = vld [vmem:[%s15154_s7 + $0xe3] sm:$0xff] }
 0x104   : > { %758 = vst.msk [vmem:[#allocation2 + $0x60] sm:$0xff] %vm303_vm3, %v612_v47  ;;  %v1254_v50 = vadd.f32 %v1215_v48, %v1061_v25  ;;  %13609 = vmatprep.mubr.msk.f32.mxu0 %vm15088_vm1, %v15087_v1  ;;  %13740 = vmatprep.mubr.msk.f32.mxu1 %vm15088_vm1, %v15087_v1 }
 0x105   : > { %v13349_v52 = vpop.f32.mrf.mxu0  ;;  %v13474_v56 = vpop.f32.mrf.mxu1 }
 0x106   : > { %1293 = vst.msk [vmem:[#allocation2 + $0x50] sm:$0xff] %vm303_vm3, %v1254_v50 }
 0x107   : > { %v617_v54 = vpop.f32.mrf.mxu0  ;;  %v1216_v55 = vld [vmem:[#allocation2 + $0x58] sm:$0xff]  ;;  %13610 = vmatmul.mubr.msk.f32.gmra.mxu0 %vm364_vm2, %v15684_v16  ;;  %v1086_v60 = vpop.f32.mrf.mxu1  ;;  %13741 = vmatmul.mubr.msk.f32.gmra.mxu1 %vm364_vm2, %v15762_v58  ;;  %v15801_v16 = vld [vmem:[%s15154_s7 + $0xeb] sm:$0xff] }
 0x108   : > { %759 = vst.msk [vmem:[#allocation2 + $0x68] sm:$0xff] %vm303_vm3, %v617_v54  ;;  %v1255_v57 = vadd.f32 %v1216_v55, %v1066_v32  ;;  %13612 = vmatprep.mubr.msk.f32.mxu0 %vm15088_vm1, %v15087_v1  ;;  %13743 = vmatprep.mubr.msk.f32.mxu1 %vm15088_vm1, %v15087_v1 }
 0x109   : > { %v13352_v59 = vpop.f32.mrf.mxu0  ;;  %v13477_v63 = vpop.f32.mrf.mxu1 }
 0x10a   : > { %1294 = vst.msk [vmem:[#allocation2 + $0x58] sm:$0xff] %vm303_vm3, %v1255_v57 }
 0x10b   : > { %v622_v61 = vpop.f32.mrf.mxu0  ;;  %v1217_v62 = vld [vmem:[#allocation2 + $0x60] sm:$0xff]  ;;  %13613 = vmatmul.mubr.msk.f32.gmra.mxu0 %vm364_vm2, %v15697_v23  ;;  %v1091_v4 = vpop.f32.mrf.mxu1  ;;  %13744 = vmatmul.mubr.msk.f32.gmra.mxu1 %vm364_vm2, %v15775_v2  ;;  %v15814_v23 = vld [vmem:[%s15154_s7 + $0xf3] sm:$0xff] }
 0x10c   : > { %760 = vst.msk [vmem:[#allocation2 + $0x70] sm:$0xff] %vm303_vm3, %v622_v61  ;;  %v1256_v0 = vadd.f32 %v1217_v62, %v1071_v39  ;;  %13615 = vmatprep.mubr.msk.f32.mxu0 %vm15088_vm1, %v15087_v1  ;;  %13746 = vmatprep.mubr.msk.f32.mxu1 %vm15088_vm1, %v15087_v1 }
 0x10d   : > { %v13355_v3 = vpop.f32.mrf.mxu0  ;;  %v13480_v7 = vpop.f32.mrf.mxu1 }
 0x10e   : > { %1295 = vst.msk [vmem:[#allocation2 + $0x60] sm:$0xff] %vm303_vm3, %v1256_v0 }
 0x10f   : > { %v627_v5 = vpop.f32.mrf.mxu0  ;;  %v1218_v6 = vld [vmem:[#allocation2 + $0x68] sm:$0xff]  ;;  %13616 = vmatmul.mubr.msk.f32.gmra.mxu0 %vm364_vm2, %v15710_v30  ;;  %v1096_v11 = vpop.f32.mrf.mxu1  ;;  %13747 = vmatmul.mubr.msk.f32.gmra.mxu1 %vm364_vm2, %v15788_v9  ;;  %v15827_v30 = vld [vmem:[%s15154_s7 + $0xfb] sm:$0xff] }
 0x110   : > { %761 = vst.msk [vmem:[#allocation2 + $0x78] sm:$0xff] %vm303_vm3, %v627_v5  ;;  %v1257_v8 = vadd.f32 %v1218_v6, %v1076_v46  ;;  %13618 = vmatprep.mubr.msk.f32.mxu0 %vm15088_vm1, %v15087_v1  ;;  %13749 = vmatprep.mubr.msk.f32.mxu1 %vm15088_vm1, %v15087_v1 }
 0x111   : > { %v13358_v10 = vpop.f32.mrf.mxu0  ;;  %v13483_v14 = vpop.f32.mrf.mxu1 }
 0x112   : > { %1296 = vst.msk [vmem:[#allocation2 + $0x68] sm:$0xff] %vm303_vm3, %v1257_v8 }
 0x113   : > { %v632_v12 = vpop.f32.mrf.mxu0  ;;  %v1219_v13 = vld [vmem:[#allocation2 + $0x70] sm:$0xff]  ;;  %13619 = vmatmul.mubr.msk.f32.gmra.mxu0 %vm364_vm2, %v15723_v37  ;;  %v1101_v18 = vpop.f32.mrf.mxu1  ;;  %13750 = vmatmul.mubr.msk.f32.gmra.mxu1 %vm364_vm2, %v15801_v16  ;;  %v15840_v37 = vld [vmem:[%s15154_s7 + $0x103] sm:$0xff] }
 0x114   : > { %762 = vst.msk [vmem:[#allocation2 + $0x80] sm:$0xff] %vm303_vm3, %v632_v12  ;;  %v1258_v15 = vadd.f32 %v1219_v13, %v1081_v53  ;;  %13621 = vmatprep.mubr.msk.f32.mxu0 %vm15088_vm1, %v15087_v1  ;;  %13752 = vmatprep.mubr.msk.f32.mxu1 %vm15088_vm1, %v15087_v1 }
 0x115   : > { %v13361_v17 = vpop.f32.mrf.mxu0  ;;  %v13486_v21 = vpop.f32.mrf.mxu1 }
 0x116   : > { %1297 = vst.msk [vmem:[#allocation2 + $0x70] sm:$0xff] %vm303_vm3, %v1258_v15 }
 0x117   : > { %v637_v19 = vpop.f32.mrf.mxu0  ;;  %v1220_v20 = vld [vmem:[#allocation2 + $0x78] sm:$0xff]  ;;  %13622 = vmatmul.mubr.msk.f32.gmra.mxu0 %vm364_vm2, %v15736_v44  ;;  %v1106_v25 = vpop.f32.mrf.mxu1  ;;  %13753 = vmatmul.mubr.msk.f32.gmra.mxu1 %vm364_vm2, %v15814_v23  ;;  %v15853_v44 = vld [vmem:[%s15154_s7 + $0x10b] sm:$0xff] }
 0x118   : > { %763 = vst.msk [vmem:[#allocation2 + $0x88] sm:$0xff] %vm303_vm3, %v637_v19  ;;  %v1259_v22 = vadd.f32 %v1220_v20, %v1086_v60  ;;  %13624 = vmatprep.mubr.msk.f32.mxu0 %vm15088_vm1, %v15087_v1  ;;  %13755 = vmatprep.mubr.msk.f32.mxu1 %vm15088_vm1, %v15087_v1  ;;  %v1896_v19 = vld [vmem:[%s15154_s7 + $0x13b] sm:$0xff] }
 0x119   : > { %v13364_v24 = vpop.f32.mrf.mxu0  ;;  %v13489_v28 = vpop.f32.mrf.mxu1 }
 0x11a   : > { %1298 = vst.msk [vmem:[#allocation2 + $0x78] sm:$0xff] %vm303_vm3, %v1259_v22 }
 0x11b   : > { %v642_v26 = vpop.f32.mrf.mxu0  ;;  %v1221_v27 = vld [vmem:[#allocation2 + $0x80] sm:$0xff]  ;;  %13625 = vmatmul.mubr.msk.f32.gmra.mxu0 %vm364_vm2, %v15749_v51  ;;  %v1111_v32 = vpop.f32.mrf.mxu1  ;;  %13756 = vmatmul.mubr.msk.f32.gmra.mxu1 %vm364_vm2, %v15827_v30  ;;  %v15866_v51 = vld [vmem:[%s15154_s7 + $0x113] sm:$0xff] }
 0x11c   : > { %764 = vst.msk [vmem:[#allocation2 + $0x90] sm:$0xff] %vm303_vm3, %v642_v26  ;;  %v1260_v29 = vadd.f32 %v1221_v27, %v1091_v4  ;;  %13627 = vmatprep.mubr.msk.f32.mxu0 %vm15088_vm1, %v15087_v1  ;;  %13758 = vmatprep.mubr.msk.f32.mxu1 %vm15088_vm1, %v15087_v1  ;;  %v1897_v26 = vld [vmem:[%s15154_s7 + $0x143] sm:$0xff] }
 0x11d   : > { %v13367_v31 = vpop.f32.mrf.mxu0  ;;  %v13492_v35 = vpop.f32.mrf.mxu1 }
 0x11e   : > { %1299 = vst.msk [vmem:[#allocation2 + $0x80] sm:$0xff] %vm303_vm3, %v1260_v29 }
 0x11f   : > { %v647_v33 = vpop.f32.mrf.mxu0  ;;  %v1222_v34 = vld [vmem:[#allocation2 + $0x88] sm:$0xff]  ;;  %13628 = vmatmul.mubr.msk.f32.gmra.mxu0 %vm364_vm2, %v15762_v58  ;;  %v1116_v39 = vpop.f32.mrf.mxu1  ;;  %13759 = vmatmul.mubr.msk.f32.gmra.mxu1 %vm364_vm2, %v15840_v37  ;;  %v15879_v58 = vld [vmem:[%s15154_s7 + $0x11b] sm:$0xff] }
 0x120   : > { %765 = vst.msk [vmem:[#allocation2 + $0x98] sm:$0xff] %vm303_vm3, %v647_v33  ;;  %v1261_v36 = vadd.f32 %v1222_v34, %v1096_v11  ;;  %13630 = vmatprep.mubr.msk.f32.mxu0 %vm15088_vm1, %v15087_v1  ;;  %13761 = vmatprep.mubr.msk.f32.mxu1 %vm15088_vm1, %v15087_v1  ;;  %v2933_v33 = vld [vmem:[%s15154_s7 + $0x15] sm:$0xff] }
 0x121   : > { %v13370_v38 = vpop.f32.mrf.mxu0  ;;  %v13495_v42 = vpop.f32.mrf.mxu1 }
 0x122   : > { %1300 = vst.msk [vmem:[#allocation2 + $0x88] sm:$0xff] %vm303_vm3, %v1261_v36 }
 0x123   : > { %v652_v40 = vpop.f32.mrf.mxu0  ;;  %v1223_v41 = vld [vmem:[#allocation2 + $0x90] sm:$0xff]  ;;  %13631 = vmatmul.mubr.msk.f32.gmra.mxu0 %vm364_vm2, %v15775_v2  ;;  %v1121_v46 = vpop.f32.mrf.mxu1  ;;  %13762 = vmatmul.mubr.msk.f32.gmra.mxu1 %vm364_vm2, %v15853_v44  ;;  %v15892_v2 = vld [vmem:[%s15154_s7 + $0x123] sm:$0xff] }
 0x124   : > { %766 = vst.msk [vmem:[#allocation2 + $0xa0] sm:$0xff] %vm303_vm3, %v652_v40  ;;  %v1262_v43 = vadd.f32 %v1223_v41, %v1101_v18  ;;  %13633 = vmatprep.mubr.msk.f32.mxu0 %vm15088_vm1, %v15087_v1  ;;  %13764 = vmatprep.mubr.msk.f32.mxu1 %vm15088_vm1, %v15087_v1  ;;  %v2934_v40 = vld [vmem:[%s15154_s7 + $0x1d] sm:$0xff] }
 0x125   : > { %v13373_v45 = vpop.f32.mrf.mxu0  ;;  %v13498_v49 = vpop.f32.mrf.mxu1 }
 0x126   : > { %1301 = vst.msk [vmem:[#allocation2 + $0x90] sm:$0xff] %vm303_vm3, %v1262_v43 }
 0x127   : > { %v657_v47 = vpop.f32.mrf.mxu0  ;;  %v1224_v48 = vld [vmem:[#allocation2 + $0x98] sm:$0xff]  ;;  %13634 = vmatmul.mubr.msk.f32.gmra.mxu0 %vm364_vm2, %v15788_v9  ;;  %v1126_v53 = vpop.f32.mrf.mxu1  ;;  %13765 = vmatmul.mubr.msk.f32.gmra.mxu1 %vm364_vm2, %v15866_v51  ;;  %v15905_v9 = vld [vmem:[%s15154_s7 + $0x12b] sm:$0xff] }
 0x128   : > { %767 = vst.msk [vmem:[#allocation2 + $0xa8] sm:$0xff] %vm303_vm3, %v657_v47  ;;  %v1263_v50 = vadd.f32 %v1224_v48, %v1106_v25  ;;  %13636 = vmatprep.mubr.msk.f32.mxu0 %vm15088_vm1, %v15087_v1  ;;  %13767 = vmatprep.mubr.msk.f32.mxu1 %vm15088_vm1, %v15087_v1  ;;  %v2935_v47 = vld [vmem:[%s15154_s7 + $0x25] sm:$0xff] }
 0x129   : > { %v13376_v52 = vpop.f32.mrf.mxu0  ;;  %v13501_v56 = vpop.f32.mrf.mxu1 }
 0x12a   : > { %1302 = vst.msk [vmem:[#allocation2 + $0x98] sm:$0xff] %vm303_vm3, %v1263_v50 }
 0x12b   : > { %v662_v54 = vpop.f32.mrf.mxu0  ;;  %v1225_v55 = vld [vmem:[#allocation2 + $0xa0] sm:$0xff]  ;;  %13637 = vmatmul.mubr.msk.f32.gmra.mxu0 %vm364_vm2, %v15801_v16  ;;  %v1131_v60 = vpop.f32.mrf.mxu1  ;;  %13768 = vmatmul.mubr.msk.f32.gmra.mxu1 %vm364_vm2, %v15879_v58  ;;  %v15918_v16 = vld [vmem:[%s15154_s7 + $0x133] sm:$0xff] }
 0x12c   : > { %768 = vst.msk [vmem:[#allocation2 + $0xb0] sm:$0xff] %vm303_vm3, %v662_v54  ;;  %v1264_v57 = vadd.f32 %v1225_v55, %v1111_v32  ;;  %13639 = vmatprep.mubr.msk.f32.mxu0 %vm15088_vm1, %v15087_v1  ;;  %13770 = vmatprep.mubr.msk.f32.mxu1 %vm15088_vm1, %v15087_v1  ;;  %v2936_v54 = vld [vmem:[%s15154_s7 + $0x2d] sm:$0xff] }
 0x12d   : > { %v13379_v59 = vpop.f32.mrf.mxu0  ;;  %v13504_v63 = vpop.f32.mrf.mxu1 }
 0x12e   : > { %1303 = vst.msk [vmem:[#allocation2 + $0xa0] sm:$0xff] %vm303_vm3, %v1264_v57  ;;  %v2396_v59 = vld [vmem:[%s15154_s7 + $0x14] sm:$0xff] }
 0x12f   : > { %v667_v61 = vpop.f32.mrf.mxu0  ;;  %v1226_v62 = vld [vmem:[#allocation2 + $0xa8] sm:$0xff]  ;;  %13640 = vmatmul.mubr.msk.f32.gmra.mxu0 %vm364_vm2, %v15814_v23  ;;  %v1136_v4 = vpop.f32.mrf.mxu1  ;;  %13771 = vmatmul.mubr.msk.f32.gmra.mxu1 %vm364_vm2, %v15892_v2  ;;  %v2937_v63 = vld [vmem:[%s15154_s7 + $0x35] sm:$0xff] }
 0x130   : > { %769 = vst.msk [vmem:[#allocation2 + $0xb8] sm:$0xff] %vm303_vm3, %v667_v61  ;;  %v1265_v0 = vadd.f32 %v1226_v62, %v1116_v39  ;;  %13642 = vmatprep.mubr.msk.f32.mxu0 %vm15088_vm1, %v15087_v1  ;;  %13773 = vmatprep.mubr.msk.f32.mxu1 %vm15088_vm1, %v15087_v1  ;;  %v3509_v61 = vld [vmem:[%s19193_s1 + $0x18] sm:$0xf] }
 0x131   : > { %v13382_v3 = vpop.f32.mrf.mxu0  ;;  %v13507_v7 = vpop.f32.mrf.mxu1 }
 0x132   : > { %1304 = vst.msk [vmem:[#allocation2 + $0xa8] sm:$0xff] %vm303_vm3, %v1265_v0 }
 0x133   : > { %v672_v5 = vpop.f32.mrf.mxu0  ;;  %v1227_v6 = vld [vmem:[#allocation2 + $0xb0] sm:$0xff]  ;;  %13643 = vmatmul.mubr.msk.f32.gmra.mxu0 %vm364_vm2, %v15827_v30  ;;  %v1141_v11 = vpop.f32.mrf.mxu1  ;;  %13774 = vmatmul.mubr.msk.f32.gmra.mxu1 %vm364_vm2, %v15905_v9 }
 0x134   : > { %770 = vst.msk [vmem:[#allocation2 + $0xc0] sm:$0xff] %vm303_vm3, %v672_v5  ;;  %v1266_v8 = vadd.f32 %v1227_v6, %v1121_v46  ;;  %13645 = vmatprep.mubr.msk.f32.mxu0 %vm15088_vm1, %v15087_v1  ;;  %13776 = vmatprep.mubr.msk.f32.mxu1 %vm15088_vm1, %v15087_v1  ;;  %v2397_v5 = vld [vmem:[%s15154_s7 + $0x1c] sm:$0xff] }
 0x135   : > { %v13385_v10 = vpop.f32.mrf.mxu0  ;;  %v13510_v14 = vpop.f32.mrf.mxu1 }
 0x136   : > { %1305 = vst.msk [vmem:[#allocation2 + $0xb0] sm:$0xff] %vm303_vm3, %v1266_v8  ;;  %v2938_v8 = vld [vmem:[%s15154_s7 + $0x3d] sm:$0xff] }
 0x137   : > { %v677_v12 = vpop.f32.mrf.mxu0  ;;  %v1228_v13 = vld [vmem:[#allocation2 + $0xb8] sm:$0xff]  ;;  %13646 = vmatmul.mubr.msk.f32.gmra.mxu0 %vm364_vm2, %v15840_v37  ;;  %v1146_v18 = vpop.f32.mrf.mxu1  ;;  %13777 = vmatmul.mubr.msk.f32.gmra.mxu1 %vm364_vm2, %v15918_v16 }
 0x138   : > { %771 = vst.msk [vmem:[#allocation2 + $0xc8] sm:$0xff] %vm303_vm3, %v677_v12  ;;  %v1267_v15 = vadd.f32 %v1228_v13, %v1126_v53  ;;  %13648 = vmatprep.mubr.msk.f32.mxu0 %vm15088_vm1, %v15087_v1  ;;  %13779 = vmatprep.mubr.msk.f32.mxu1 %vm15088_vm1, %v15087_v1  ;;  %v2398_v13 = vld [vmem:[%s15154_s7 + $0x24] sm:$0xff] }
 0x139   : > { %v13388_v17 = vpop.f32.mrf.mxu0  ;;  %v13513_v22 = vpop.f32.mrf.mxu1 }
 0x13a   : > { %1306 = vst.msk [vmem:[#allocation2 + $0xb8] sm:$0xff] %vm303_vm3, %v1267_v15 }
 0x13b   : > { %v682_v20 = vpop.f32.mrf.mxu0  ;;  %v1229_v21 = vld [vmem:[#allocation2 + $0xc0] sm:$0xff]  ;;  %13649 = vmatmul.mubr.msk.f32.gmra.mxu0 %vm364_vm2, %v15853_v44  ;;  %v1151_v25 = vpop.f32.mrf.mxu1  ;;  %13780 = vmatmul.mubr.msk.f32.gmra.mxu1 %vm364_vm2, %v1896_v19 }
 0x13c   : > { %772 = vst.msk [vmem:[#allocation2 + $0xd0] sm:$0xff] %vm303_vm3, %v682_v20  ;;  %v1268_v23 = vadd.f32 %v1229_v21, %v1131_v60  ;;  %13651 = vmatprep.mubr.msk.f32.mxu0 %vm15088_vm1, %v15087_v1  ;;  %13782 = vmatprep.mubr.msk.f32.mxu1 %vm15088_vm1, %v15087_v1  ;;  %v2399_v21 = vld [vmem:[%s15154_s7 + $0x2c] sm:$0xff] }
 0x13d   : > { %v13391_v24 = vpop.f32.mrf.mxu0  ;;  %v13516_v29 = vpop.f32.mrf.mxu1 }
 0x13e   : > { %1307 = vst.msk [vmem:[#allocation2 + $0xc0] sm:$0xff] %vm303_vm3, %v1268_v23  ;;  %v2940_v24 = vld [vmem:[%s15154_s7 + $0x4d] sm:$0xff] }
 0x13f   : > { %v687_v27 = vpop.f32.mrf.mxu0  ;;  %v1230_v28 = vld [vmem:[#allocation2 + $0xc8] sm:$0xff]  ;;  %13652 = vmatmul.mubr.msk.f32.gmra.mxu0 %vm364_vm2, %v15866_v51  ;;  %v1156_v32 = vpop.f32.mrf.mxu1  ;;  %13783 = vmatmul.mubr.msk.f32.gmra.mxu1 %vm364_vm2, %v1897_v26  ;;  %v2400_v29 = vld [vmem:[%s15154_s7 + $0x34] sm:$0xff] }
 0x140   : > { %773 = vst.msk [vmem:[#allocation2 + $0xd8] sm:$0xff] %vm303_vm3, %v687_v27  ;;  %v1269_v30 = vadd.f32 %v1230_v28, %v1136_v4  ;;  %13654 = vmatprep.mubr.msk.f32.mxu0 %vm15088_vm1, %v15087_v1  ;;  %13906 = vmatprep.mubr.msk.f32.mxu1 %vm15088_vm1, %v15087_v1 }
 0x141   : > { %v13394_v31 = vpop.f32.mrf.mxu0  ;;  %v13519_v36 = vpop.f32.mrf.mxu1 }
 0x142   : > { %1308 = vst.msk [vmem:[#allocation2 + $0xc8] sm:$0xff] %vm303_vm3, %v1269_v30 }
 0x143   : > { %v692_v34 = vpop.f32.mrf.mxu0  ;;  %v1231_v35 = vld [vmem:[#allocation2 + $0xd0] sm:$0xff]  ;;  %13655 = vmatmul.mubr.msk.f32.gmra.mxu0 %vm364_vm2, %v15879_v58  ;;  %v1161_v39 = vpop.f32.mrf.mxu1  ;;  %13907 = vmatmul.mubr.msk.f32.vlgmr.msra.gmra.mxu1 %vm364_vm2, %v2933_v33 }
 0x144   : > { %774 = vst.msk [vmem:[#allocation2 + $0xe0] sm:$0xff] %vm303_vm3, %v692_v34  ;;  %v1270_v37 = vadd.f32 %v1231_v35, %v1141_v11  ;;  %13657 = vmatprep.mubr.msk.f32.mxu0 %vm15088_vm1, %v15087_v1  ;;  %13909 = vmatprep.mubr.msk.f32.mxu1 %vm15088_vm1, %v15087_v1 }
 0x145   : > { %v13397_v38 = vpop.f32.mrf.mxu0  ;;  %v13522_v43 = vpop.f32.mrf.mxu1 }
 0x146   : > { %1309 = vst.msk [vmem:[#allocation2 + $0xd0] sm:$0xff] %vm303_vm3, %v1270_v37  ;;  %v2401_v37 = vld [vmem:[%s15154_s7 + $0x3c] sm:$0xff] }
 0x147   : > { %v697_v41 = vpop.f32.mrf.mxu0  ;;  %v1232_v42 = vld [vmem:[#allocation2 + $0xd8] sm:$0xff]  ;;  %13658 = vmatmul.mubr.msk.f32.gmra.mxu0 %vm364_vm2, %v15892_v2  ;;  %v1166_v46 = vpop.f32.mrf.mxu1  ;;  %13910 = vmatmul.mubr.msk.f32.gmra.mxu1 %vm364_vm2, %v2934_v40 }
 0x148   : > { %775 = vst.msk [vmem:[#allocation2 + $0xe8] sm:$0xff] %vm303_vm3, %v697_v41  ;;  %v1271_v44 = vadd.f32 %v1232_v42, %v1146_v18  ;;  %13660 = vmatprep.mubr.msk.f32.mxu0 %vm15088_vm1, %v15087_v1  ;;  %13912 = vmatprep.mubr.msk.f32.mxu1 %vm15088_vm1, %v15087_v1  ;;  %v2942_v40 = vld [vmem:[%s15154_s7 + $0x5d] sm:$0xff] }
 0x149   : > { %v13400_v45 = vpop.f32.mrf.mxu0  ;;  %v13525_v50 = vpop.f32.mrf.mxu1 }
 0x14a   : > { %1310 = vst.msk [vmem:[#allocation2 + $0xd8] sm:$0xff] %vm303_vm3, %v1271_v44  ;;  %v2402_v45 = vld [vmem:[%s15154_s7 + $0x44] sm:$0xff] }
 0x14b   : > { %v702_v48 = vpop.f32.mrf.mxu0  ;;  %v1233_v49 = vld [vmem:[#allocation2 + $0xe0] sm:$0xff]  ;;  %13661 = vmatmul.mubr.msk.f32.gmra.mxu0 %vm364_vm2, %v15905_v9  ;;  %v1171_v53 = vpop.f32.mrf.mxu1  ;;  %13913 = vmatmul.mubr.msk.f32.gmra.mxu1 %vm364_vm2, %v2935_v47 }
 0x14c   : > { %776 = vst.msk [vmem:[#allocation2 + $0xf0] sm:$0xff] %vm303_vm3, %v702_v48  ;;  %v1272_v51 = vadd.f32 %v1233_v49, %v1151_v25  ;;  %13663 = vmatprep.mubr.msk.f32.mxu0 %vm15088_vm1, %v15087_v1  ;;  %13915 = vmatprep.mubr.msk.f32.mxu1 %vm15088_vm1, %v15087_v1  ;;  %v2943_v49 = vld [vmem:[%s15154_s7 + $0x65] sm:$0xff] }
 0x14d   : > { %v13403_v52 = vpop.f32.mrf.mxu0  ;;  %v13528_v57 = vpop.f32.mrf.mxu1 }
 0x14e   : > { %1311 = vst.msk [vmem:[#allocation2 + $0xe0] sm:$0xff] %vm303_vm3, %v1272_v51  ;;  %v2944_v57 = vld [vmem:[%s15154_s7 + $0x6d] sm:$0xff] }
 0x14f   : > { %v707_v55 = vpop.f32.mrf.mxu0  ;;  %v1234_v56 = vld [vmem:[#allocation2 + $0xe8] sm:$0xff]  ;;  %13664 = vmatmul.mubr.msk.f32.gmra.mxu0 %vm364_vm2, %v15918_v16  ;;  %v1176_v62 = vpop.f32.mrf.mxu1  ;;  %13916 = vmatmul.mubr.msk.f32.gmra.mxu1 %vm364_vm2, %v2936_v54 }
 0x150   : > { %777 = vst.msk [vmem:[#allocation2 + $0xf8] sm:$0xff] %vm303_vm3, %v707_v55  ;;  %v1273_v58 = vadd.f32 %v1234_v56, %v1156_v32  ;;  %13787 = vmatprep.mubr.msk.f32.mxu0 %vm15088_vm1, %v15087_v1  ;;  %13918 = vmatprep.mubr.msk.f32.mxu1 %vm15088_vm1, %v15087_v1  ;;  %v2939_v16 = vld [vmem:[%s15154_s7 + $0x45] sm:$0xff]  ;;  %v2941_v32 = vld [vmem:[%s15154_s7 + $0x55] sm:$0xff] }
 0x151   : > { %v13406_v60 = vpop.f32.mrf.mxu0  ;;  %v13531_v3 = vpop.f32.mrf.mxu1  ;;  %v2403_v54 = vld [vmem:[%s15154_s7 + $0x4c] sm:$0xff] }
 0x152   : > { %1312 = vst.msk [vmem:[#allocation2 + $0xe8] sm:$0xff] %vm303_vm3, %v1273_v58 }
 0x153   : > { %v712_v0 = vpop.f32.mrf.mxu0  ;;  %v1235_v2 = vld [vmem:[#allocation2 + $0xf0] sm:$0xff]  ;;  %13788 = vmatmul.mubr.msk.f32.vlgmr.msra.gmra.mxu0 %vm364_vm2, %v2396_v59  ;;  %v1181_v7 = vpop.f32.mrf.mxu1  ;;  %13919 = vmatmul.mubr.msk.f32.gmra.mxu1 %vm364_vm2, %v2937_v63  ;;  %v1205_v59 = vld [vmem:[#allocation2] sm:$0xff] }
 0x154   : > { %778 = vst.msk [vmem:[#allocation2 + $0x100] sm:$0xff] %vm303_vm3, %v712_v0  ;;  %v1274_v4 = vadd.f32 %v1235_v2, %v1161_v39  ;;  %14024 = vmatpush3.msk.msra.mxu0 %vm482_vm0, %v3509_v61  ;;  %13790 = vmatprep.mubr.msk.f32.mxu0 %vm15088_vm1, %v15087_v1  ;;  %v2404_v0 = vld [vmem:[%s15154_s7 + $0x54] sm:$0xff] }
 0x155   : > { %v13409_v6 = vpop.f32.mrf.mxu0  ;;  %14261 = vmatprep.subr.mxu0 %v15087_v1  ;;  %13921 = vmatprep.mubr.msk.f32.mxu1 %vm15088_vm1, %v15087_v1  ;;  %v13534_v11 = vpop.f32.mrf.mxu1 }
 0x156   : > { %1313 = vst.msk [vmem:[#allocation2 + $0xf0] sm:$0xff] %vm303_vm3, %v1274_v4  ;;  %v2945_v4 = vld [vmem:[%s15154_s7 + $0x75] sm:$0xff]  ;;  %v1206_v6 = vld [vmem:[#allocation2 + $0x8] sm:$0xff] }
 0x157   : > { %v717_v9 = vpop.f32.mrf.mxu0  ;;  %v1236_v10 = vld [vmem:[#allocation2 + $0xf8] sm:$0xff]  ;;  %13791 = vmatmul.mubr.msk.f32.gmra.mxu0 %vm364_vm2, %v2397_v5  ;;  %v1186_v15 = vpop.f32.mrf.mxu1  ;;  %13922 = vmatmul.mubr.msk.f32.gmra.mxu1 %vm364_vm2, %v2938_v8 }
 0x158   : > { %779 = vst.msk [vmem:[#allocation2 + $0x108] sm:$0xff] %vm303_vm3, %v717_v9  ;;  %v1275_v12 = vadd.f32 %v1236_v10, %v1166_v46  ;;  %13793 = vmatprep.mubr.msk.f32.mxu0 %vm15088_vm1, %v15087_v1  ;;  %13924 = vmatprep.mubr.msk.f32.mxu1 %vm15088_vm1, %v15087_v1  ;;  %v4046_v46 = vld [vmem:[%s19193_s1 + $0x1c] sm:$0xf] }
 0x159   : > { %v13412_v14 = vpop.f32.mrf.mxu0  ;;  %v13537_v19 = vpop.f32.mrf.mxu1  ;;  %14143 = vmatpush3.msk.msra.mxu1 %vm482_vm0, %v4046_v46  ;;  %v2405_v11 = vld [vmem:[%s15154_s7 + $0x5c] sm:$0xff] }
 0x15a   : > { %1314 = vst.msk [vmem:[#allocation2 + $0xf8] sm:$0xff] %vm303_vm3, %v1275_v12  ;;  %v2946_v14 = vld [vmem:[%s15154_s7 + $0x7d] sm:$0xff] }
 0x15b   : > { %v722_v17 = vpop.f32.mrf.mxu0  ;;  %v1237_v18 = vld [vmem:[#allocation2 + $0x100] sm:$0xff]  ;;  %13794 = vmatmul.mubr.msk.f32.gmra.mxu0 %vm364_vm2, %v2398_v13  ;;  %v1191_v23 = vpop.f32.mrf.mxu1  ;;  %13925 = vmatmul.mubr.msk.f32.gmra.mxu1 %vm364_vm2, %v2939_v16 }
 0x15c   : > { %780 = vst.msk [vmem:[#allocation2 + $0x110] sm:$0xff] %vm303_vm3, %v722_v17  ;;  %v1276_v20 = vadd.f32 %v1237_v18, %v1171_v53  ;;  %13796 = vmatprep.mubr.msk.f32.mxu0 %vm15088_vm1, %v15087_v1  ;;  %13927 = vmatprep.mubr.msk.f32.mxu1 %vm15088_vm1, %v15087_v1  ;;  %v2406_v17 = vld [vmem:[%s15154_s7 + $0x64] sm:$0xff] }
 0x15d   : > { %v13415_v22 = vpop.f32.mrf.mxu0  ;;  %v13540_v27 = vpop.f32.mrf.mxu1 }
 0x15e   : > { %1315 = vst.msk [vmem:[#allocation2 + $0x100] sm:$0xff] %vm303_vm3, %v1276_v20  ;;  %v2947_v22 = vld [vmem:[%s15154_s7 + $0x85] sm:$0xff] }
 0x15f   : > { %v727_v25 = vpop.f32.mrf.mxu0  ;;  %v1238_v26 = vld [vmem:[#allocation2 + $0x108] sm:$0xff]  ;;  %13797 = vmatmul.mubr.msk.f32.gmra.mxu0 %vm364_vm2, %v2399_v21  ;;  %v1196_v31 = vpop.f32.mrf.mxu1  ;;  %13928 = vmatmul.mubr.msk.f32.gmra.mxu1 %vm364_vm2, %v2940_v24 }
 0x160   : > { %781 = vst.msk [vmem:[#allocation2 + $0x118] sm:$0xff] %vm303_vm3, %v727_v25  ;;  %v1277_v28 = vadd.f32 %v1238_v26, %v1176_v62  ;;  %13799 = vmatprep.mubr.msk.f32.mxu0 %vm15088_vm1, %v15087_v1  ;;  %13930 = vmatprep.mubr.msk.f32.mxu1 %vm15088_vm1, %v15087_v1  ;;  %v2407_v25 = vld [vmem:[%s15154_s7 + $0x6c] sm:$0xff] }
 0x161   : > { %v13418_v30 = vpop.f32.mrf.mxu0  ;;  %v13543_v35 = vpop.f32.mrf.mxu1 }
 0x162   : > { %1316 = vst.msk [vmem:[#allocation2 + $0x108] sm:$0xff] %vm303_vm3, %v1277_v28  ;;  %v2948_v30 = vld [vmem:[%s15154_s7 + $0x8d] sm:$0xff] }
 0x163   : > { %v732_v33 = vpop.f32.mrf.mxu0  ;;  %v1239_v34 = vld [vmem:[#allocation2 + $0x110] sm:$0xff]  ;;  %13800 = vmatmul.mubr.msk.f32.gmra.mxu0 %vm364_vm2, %v2400_v29  ;;  %v1201_v39 = vpop.f32.mrf.mxu1  ;;  %13931 = vmatmul.mubr.msk.f32.gmra.mxu1 %vm364_vm2, %v2941_v32 }
 0x164   : > { %782 = vst.msk [vmem:[#allocation2 + $0x120] sm:$0xff] %vm303_vm3, %v732_v33  ;;  %v1278_v36 = vadd.f32 %v1239_v34, %v1181_v7  ;;  %13802 = vmatprep.mubr.msk.f32.mxu0 %vm15088_vm1, %v15087_v1  ;;  %13933 = vmatprep.mubr.msk.f32.mxu1 %vm15088_vm1, %v15087_v1  ;;  %v1744_v32 = vld [vmem:[#allocation2 + $0x10] sm:$0xff] }
 0x165   : > { %v13421_v38 = vpop.f32.mrf.mxu0  ;;  %v13546_v43 = vpop.f32.mrf.mxu1  ;;  %v2408_v35 = vld [vmem:[%s15154_s7 + $0x74] sm:$0xff] }
 0x166   : > { %1317 = vst.msk [vmem:[#allocation2 + $0x110] sm:$0xff] %vm303_vm3, %v1278_v36  ;;  %v2949_v38 = vld [vmem:[%s15154_s7 + $0x95] sm:$0xff] }
 0x167   : > { %v737_v41 = vpop.f32.mrf.mxu0  ;;  %v1240_v42 = vld [vmem:[#allocation2 + $0x118] sm:$0xff]  ;;  %13803 = vmatmul.mubr.msk.f32.gmra.mxu0 %vm364_vm2, %v2401_v37  ;;  %v16050_v48 = vpop.f32.mrf.mxu1  ;;  %13934 = vmatmul.mubr.msk.f32.gmra.mxu1 %vm364_vm2, %v2942_v40 }
 0x168   : > { %783 = vst.msk [vmem:[#allocation2 + $0x128] sm:$0xff] %vm303_vm3, %v737_v41  ;;  %v1279_v44 = vadd.f32 %v1240_v42, %v1186_v15  ;;  %13805 = vmatprep.mubr.msk.f32.mxu0 %vm15088_vm1, %v15087_v1  ;;  %13936 = vmatprep.mubr.msk.f32.mxu1 %vm15088_vm1, %v15087_v1  ;;  %v1745_v41 = vld [vmem:[#allocation2 + $0x18] sm:$0xff] }
 0x169   : > { %v13424_v47 = vpop.f32.mrf.mxu0  ;;  %v13670_v52 = vpop.f32.mrf.mxu1 }
 0x16a   : > { %1318 = vst.msk [vmem:[#allocation2 + $0x118] sm:$0xff] %vm303_vm3, %v1279_v44 }
 0x16b   : > { %v742_v50 = vpop.f32.mrf.mxu0  ;;  %v1241_v51 = vld [vmem:[#allocation2 + $0x120] sm:$0xff]  ;;  %13806 = vmatmul.mubr.msk.f32.gmra.mxu0 %vm364_vm2, %v2402_v45  ;;  %v16063_v56 = vpop.f32.mrf.mxu1  ;;  %13937 = vmatmul.mubr.msk.f32.gmra.mxu1 %vm364_vm2, %v2943_v49 }
 0x16c   : > { %784 = vst.msk [vmem:[#allocation2 + $0x130] sm:$0xff] %vm303_vm3, %v742_v50  ;;  %v1280_v53 = vadd.f32 %v1241_v51, %v1191_v23  ;;  %13808 = vmatprep.mubr.msk.f32.mxu0 %vm15088_vm1, %v15087_v1  ;;  %13939 = vmatprep.mubr.msk.f32.mxu1 %vm15088_vm1, %v15087_v1  ;;  %v2409_v45 = vld [vmem:[%s15154_s7 + $0x7c] sm:$0xff] }
 0x16d   : > { %v13427_v55 = vpop.f32.mrf.mxu0  ;;  %v13673_v61 = vpop.f32.mrf.mxu1  ;;  %v2950_v49 = vld [vmem:[%s15154_s7 + $0x9d] sm:$0xff] }
 0x16e   : > { %1319 = vst.msk [vmem:[#allocation2 + $0x120] sm:$0xff] %vm303_vm3, %v1280_v53  ;;  %v1746_v51 = vld [vmem:[#allocation2 + $0x20] sm:$0xff] }
 0x16f   : > { %v1011_v58 = vpop.f32.mrf.mxu0  ;;  %v1242_v60 = vld [vmem:[#allocation2 + $0x128] sm:$0xff]  ;;  %13809 = vmatmul.mubr.msk.f32.gmra.mxu0 %vm364_vm2, %v2403_v54  ;;  %v16074_v3 = vpop.f32.mrf.mxu1  ;;  %13940 = vmatmul.mubr.msk.f32.gmra.mxu1 %vm364_vm2, %v2944_v57 }
 0x170   : > { %v1244_v62 = vadd.f32 %v1205_v59, %v1011_v58  ;;  %v1281_v63 = vadd.f32 %v1242_v60, %v1196_v31  ;;  %13811 = vmatprep.mubr.msk.f32.mxu0 %vm15088_vm1, %v15087_v1  ;;  %13942 = vmatprep.mubr.msk.f32.mxu1 %vm15088_vm1, %v15087_v1  ;;  %v2410_v55 = vld [vmem:[%s15154_s7 + $0x84] sm:$0xff] }
 0x171   : > { %v13432_v2 = vpop.f32.mrf.mxu0  ;;  %v13676_v8 = vpop.f32.mrf.mxu1 }
 0x172   : > { %1283 = vst.msk [vmem:[#allocation2] sm:$0xff] %vm303_vm3, %v1244_v62  ;;  %1320 = vst.msk [vmem:[#allocation2 + $0x128] sm:$0xff] %vm303_vm3, %v1281_v63  ;;  %v1747_v62 = vld [vmem:[#allocation2 + $0x28] sm:$0xff] }
 0x173   : > { %v1016_v5 = vpop.f32.mrf.mxu0  ;;  %v1243_v7 = vld [vmem:[#allocation2 + $0x130] sm:$0xff]  ;;  %13812 = vmatmul.mubr.msk.f32.gmra.mxu0 %vm364_vm2, %v2404_v0  ;;  %v16086_v13 = vpop.f32.mrf.mxu1  ;;  %13943 = vmatmul.mubr.msk.f32.gmra.mxu1 %vm364_vm2, %v2945_v4 }
 0x174   : > { %v1245_v9 = vadd.f32 %v1206_v6, %v1016_v5  ;;  %v1282_v10 = vadd.f32 %v1243_v7, %v1201_v39  ;;  %13814 = vmatprep.mubr.msk.f32.mxu0 %vm15088_vm1, %v15087_v1  ;;  %13945 = vmatprep.mubr.msk.f32.mxu1 %vm15088_vm1, %v15087_v1  ;;  %v2411_v2 = vld [vmem:[%s15154_s7 + $0x8c] sm:$0xff] }
 0x175   : > { %v13435_v12 = vpop.f32.mrf.mxu0  ;;  %v13679_v16 = vpop.f32.mrf.mxu1  ;;  %v2952_v7 = vld [vmem:[%s15154_s7 + $0xad] sm:$0xff] }
 0x176   : > { %1284 = vst.msk [vmem:[#allocation2 + $0x8] sm:$0xff] %vm303_vm3, %v1245_v9  ;;  %1321 = vst.msk [vmem:[#allocation2 + $0x130] sm:$0xff] %vm303_vm3, %v1282_v10  ;;  %v1748_v9 = vld [vmem:[#allocation2 + $0x30] sm:$0xff] }
 0x177   : > { %v1548_v15 = vpop.f32.mrf.mxu0  ;;  %13815 = vmatmul.mubr.msk.f32.gmra.mxu0 %vm364_vm2, %v2405_v11  ;;  %v16098_v20 = vpop.f32.mrf.mxu1  ;;  %13946 = vmatmul.mubr.msk.f32.gmra.mxu1 %vm364_vm2, %v2946_v14  ;;  %v2412_v12 = vld [vmem:[%s15154_s7 + $0x94] sm:$0xff] }
 0x178   : > { %13817 = vmatprep.mubr.msk.f32.mxu0 %vm15088_vm1, %v15087_v1  ;;  %13948 = vmatprep.mubr.msk.f32.mxu1 %vm15088_vm1, %v15087_v1 }
 0x179   : > { %v1742_v18 = vld [vmem:[#allocation2] sm:$0xff]  ;;  %v13551_v19 = vpop.f32.mrf.mxu0  ;;  %v13682_v24 = vpop.f32.mrf.mxu1 }
 0x17a   : > { %v1781_v21 = vadd.f32 %v1742_v18, %v1548_v15  ;;  %v1749_v19 = vld [vmem:[#allocation2 + $0x38] sm:$0xff] }
 0x17b   : > { %v1553_v23 = vpop.f32.mrf.mxu0  ;;  %13818 = vmatmul.mubr.msk.f32.gmra.mxu0 %vm364_vm2, %v2406_v17  ;;  %v16109_v28 = vpop.f32.mrf.mxu1  ;;  %13949 = vmatmul.mubr.msk.f32.gmra.mxu1 %vm364_vm2, %v2947_v22  ;;  %v2953_v17 = vld [vmem:[%s15154_s7 + $0xb5] sm:$0xff] }
 0x17c   : > { %1820 = vst.msk [vmem:[#allocation2] sm:$0xff] %vm303_vm3, %v1781_v21  ;;  %13820 = vmatprep.mubr.msk.f32.mxu0 %vm15088_vm1, %v15087_v1  ;;  %13951 = vmatprep.mubr.msk.f32.mxu1 %vm15088_vm1, %v15087_v1 }
 0x17d   : > { %v1743_v26 = vld [vmem:[#allocation2 + $0x8] sm:$0xff]  ;;  %v13554_v27 = vpop.f32.mrf.mxu0  ;;  %v13685_v33 = vpop.f32.mrf.mxu1 }
 0x17e   : > { %v1782_v29 = vadd.f32 %v1743_v26, %v1553_v23  ;;  %v2413_v23 = vld [vmem:[%s15154_s7 + $0x9c] sm:$0xff]  ;;  %v2414_v33 = vld [vmem:[%s15154_s7 + $0xa4] sm:$0xff] }
 0x17f   : > { %v1558_v31 = vpop.f32.mrf.mxu0  ;;  %13821 = vmatmul.mubr.msk.f32.gmra.mxu0 %vm364_vm2, %v2407_v25  ;;  %v16120_v37 = vpop.f32.mrf.mxu1  ;;  %13952 = vmatmul.mubr.msk.f32.gmra.mxu1 %vm364_vm2, %v2948_v30  ;;  %v2954_v27 = vld [vmem:[%s15154_s7 + $0xbd] sm:$0xff] }
 0x180   : > { %1821 = vst.msk [vmem:[#allocation2 + $0x8] sm:$0xff] %vm303_vm3, %v1782_v29  ;;  %v1783_v34 = vadd.f32 %v1744_v32, %v1558_v31  ;;  %13823 = vmatprep.mubr.msk.f32.mxu0 %vm15088_vm1, %v15087_v1  ;;  %13954 = vmatprep.mubr.msk.f32.mxu1 %vm15088_vm1, %v15087_v1  ;;  %v1750_v30 = vld [vmem:[#allocation2 + $0x40] sm:$0xff] }
 0x181   : > { %v13557_v36 = vpop.f32.mrf.mxu0  ;;  %v13688_v42 = vpop.f32.mrf.mxu1 }
 0x182   : > { %1822 = vst.msk [vmem:[#allocation2 + $0x10] sm:$0xff] %vm303_vm3, %v1783_v34 }
 0x183   : > { %v2279_v39 = vld [vmem:[#allocation2] sm:$0xff]  ;;  %v1563_v40 = vpop.f32.mrf.mxu0  ;;  %13824 = vmatmul.mubr.msk.f32.gmra.mxu0 %vm364_vm2, %v2408_v35  ;;  %v16132_v47 = vpop.f32.mrf.mxu1  ;;  %13955 = vmatmul.mubr.msk.f32.gmra.mxu1 %vm364_vm2, %v2949_v38 }
 0x184   : > { %v2318_v43 = vadd.f32 %v2279_v39, %v16050_v48  ;;  %v1784_v44 = vadd.f32 %v1745_v41, %v1563_v40  ;;  %13826 = vmatprep.mubr.msk.f32.mxu0 %vm15088_vm1, %v15087_v1  ;;  %13957 = vmatprep.mubr.msk.f32.mxu1 %vm15088_vm1, %v15087_v1  ;;  %v2955_v38 = vld [vmem:[%s15154_s7 + $0xc5] sm:$0xff] }
 0x185   : > { %v13560_v46 = vpop.f32.mrf.mxu0  ;;  %v13691_v52 = vpop.f32.mrf.mxu1  ;;  %v1751_v40 = vld [vmem:[#allocation2 + $0x48] sm:$0xff] }
 0x186   : > { %2357 = vst.msk [vmem:[#allocation2] sm:$0xff] %vm303_vm3, %v2318_v43  ;;  %1823 = vst.msk [vmem:[#allocation2 + $0x18] sm:$0xff] %vm303_vm3, %v1784_v44  ;;  %v2415_v43 = vld [vmem:[%s15154_s7 + $0xac] sm:$0xff] }
 0x187   : > { %v2280_v48 = vld [vmem:[#allocation2 + $0x8] sm:$0xff]  ;;  %v1568_v50 = vpop.f32.mrf.mxu0  ;;  %13827 = vmatmul.mubr.msk.f32.gmra.mxu0 %vm364_vm2, %v2409_v45  ;;  %v16145_v59 = vpop.f32.mrf.mxu1  ;;  %13958 = vmatmul.mubr.msk.f32.gmra.mxu1 %vm364_vm2, %v2950_v49 }
 0x188   : > { %v2319_v53 = vadd.f32 %v2280_v48, %v16063_v56  ;;  %v1785_v54 = vadd.f32 %v1746_v51, %v1568_v50  ;;  %13829 = vmatprep.mubr.msk.f32.mxu0 %vm15088_vm1, %v15087_v1  ;;  %13960 = vmatprep.mubr.msk.f32.mxu1 %vm15088_vm1, %v15087_v1  ;;  %v2951_v56 = vld [vmem:[%s15154_s7 + $0xa5] sm:$0xff]  ;;  %v2956_v49 = vld [vmem:[%s15154_s7 + $0xcd] sm:$0xff] }
 0x189   : > { %v13563_v57 = vpop.f32.mrf.mxu0  ;;  %v2281_v58 = vld [vmem:[#allocation2 + $0x10] sm:$0xff]  ;;  %v13694_v63 = vpop.f32.mrf.mxu1 }
 0x18a   : > { %2358 = vst.msk [vmem:[#allocation2 + $0x8] sm:$0xff] %vm303_vm3, %v2319_v53  ;;  %1824 = vst.msk [vmem:[#allocation2 + $0x20] sm:$0xff] %vm303_vm3, %v1785_v54  ;;  %v2320_v60 = vadd.f32 %v2281_v58, %v16074_v3  ;;  %v1752_v50 = vld [vmem:[#allocation2 + $0x50] sm:$0xff]  ;;  %v2417_v63 = vld [vmem:[%s15154_s7 + $0xbc] sm:$0xff] }
 0x18b   : > { %v1573_v61 = vpop.f32.mrf.mxu0  ;;  %13830 = vmatmul.mubr.msk.f32.gmra.mxu0 %vm364_vm2, %v2410_v55  ;;  %v16159_v5 = vpop.f32.mrf.mxu1  ;;  %13961 = vmatmul.mubr.msk.f32.gmra.mxu1 %vm364_vm2, %v2951_v56  ;;  %v2416_v53 = vld [vmem:[%s15154_s7 + $0xb4] sm:$0xff] }
 0x18c   : > { %2359 = vst.msk [vmem:[#allocation2 + $0x10] sm:$0xff] %vm303_vm3, %v2320_v60  ;;  %v1786_v0 = vadd.f32 %v1747_v62, %v1573_v61  ;;  %13832 = vmatprep.mubr.msk.f32.mxu0 %vm15088_vm1, %v15087_v1  ;;  %13963 = vmatprep.mubr.msk.f32.mxu1 %vm15088_vm1, %v15087_v1  ;;  %v2957_v58 = vld [vmem:[%s15154_s7 + $0xd5] sm:$0xff] }
 0x18d   : > { %v13566_v4 = vpop.f32.mrf.mxu0  ;;  %v2282_v3 = vld [vmem:[#allocation2 + $0x18] sm:$0xff]  ;;  %v13697_v10 = vpop.f32.mrf.mxu1 }
 0x18e   : > { %1825 = vst.msk [vmem:[#allocation2 + $0x28] sm:$0xff] %vm303_vm3, %v1786_v0  ;;  %v2321_v6 = vadd.f32 %v2282_v3, %v16086_v13  ;;  %v1753_v56 = vld [vmem:[#allocation2 + $0x58] sm:$0xff]  ;;  %v2418_v10 = vld [vmem:[%s15154_s7 + $0xc4] sm:$0xff] }
 0x18f   : > { %v1578_v8 = vpop.f32.mrf.mxu0  ;;  %13833 = vmatmul.mubr.msk.f32.gmra.mxu0 %vm364_vm2, %v2411_v2  ;;  %v16172_v15 = vpop.f32.mrf.mxu1  ;;  %13964 = vmatmul.mubr.msk.f32.gmra.mxu1 %vm364_vm2, %v2952_v7  ;;  %v2958_v3 = vld [vmem:[%s15154_s7 + $0xdd] sm:$0xff] }
 0x190   : > { %2360 = vst.msk [vmem:[#allocation2 + $0x18] sm:$0xff] %vm303_vm3, %v2321_v6  ;;  %v1787_v11 = vadd.f32 %v1748_v9, %v1578_v8  ;;  %13835 = vmatprep.mubr.msk.f32.mxu0 %vm15088_vm1, %v15087_v1  ;;  %13966 = vmatprep.mubr.msk.f32.mxu1 %vm15088_vm1, %v15087_v1  ;;  %v1754_v7 = vld [vmem:[#allocation2 + $0x60] sm:$0xff] }
 0x191   : > { %v13569_v14 = vpop.f32.mrf.mxu0  ;;  %v2283_v13 = vld [vmem:[#allocation2 + $0x20] sm:$0xff]  ;;  %v13700_v21 = vpop.f32.mrf.mxu1 }
 0x192   : > { %1826 = vst.msk [vmem:[#allocation2 + $0x30] sm:$0xff] %vm303_vm3, %v1787_v11  ;;  %v2322_v16 = vadd.f32 %v2283_v13, %v16098_v20  ;;  %v2959_v13 = vld [vmem:[%s15154_s7 + $0xe5] sm:$0xff] }
 0x193   : > { %v1583_v18 = vpop.f32.mrf.mxu0  ;;  %13836 = vmatmul.mubr.msk.f32.gmra.mxu0 %vm364_vm2, %v2412_v12  ;;  %v16185_v25 = vpop.f32.mrf.mxu1  ;;  %13967 = vmatmul.mubr.msk.f32.gmra.mxu1 %vm364_vm2, %v2953_v17  ;;  %v1755_v17 = vld [vmem:[#allocation2 + $0x68] sm:$0xff] }
 0x194   : > { %2361 = vst.msk [vmem:[#allocation2 + $0x20] sm:$0xff] %vm303_vm3, %v2322_v16  ;;  %v1788_v22 = vadd.f32 %v1749_v19, %v1583_v18  ;;  %13838 = vmatprep.mubr.msk.f32.mxu0 %vm15088_vm1, %v15087_v1  ;;  %13969 = vmatprep.mubr.msk.f32.mxu1 %vm15088_vm1, %v15087_v1  ;;  %v2419_v21 = vld [vmem:[%s15154_s7 + $0xcc] sm:$0xff] }
 0x195   : > { %v13572_v24 = vpop.f32.mrf.mxu0  ;;  %v2284_v20 = vld [vmem:[#allocation2 + $0x28] sm:$0xff]  ;;  %v13703_v31 = vpop.f32.mrf.mxu1 }
 0x196   : > { %1827 = vst.msk [vmem:[#allocation2 + $0x38] sm:$0xff] %vm303_vm3, %v1788_v22  ;;  %v2323_v26 = vadd.f32 %v2284_v20, %v16109_v28  ;;  %v2960_v20 = vld [vmem:[%s15154_s7 + $0xed] sm:$0xff] }
 0x197   : > { %v1588_v29 = vpop.f32.mrf.mxu0  ;;  %13839 = vmatmul.mubr.msk.f32.gmra.mxu0 %vm364_vm2, %v2413_v23  ;;  %v16198_v35 = vpop.f32.mrf.mxu1  ;;  %13970 = vmatmul.mubr.msk.f32.gmra.mxu1 %vm364_vm2, %v2954_v27  ;;  %v1756_v27 = vld [vmem:[#allocation2 + $0x70] sm:$0xff] }
 0x198   : > { %2362 = vst.msk [vmem:[#allocation2 + $0x28] sm:$0xff] %vm303_vm3, %v2323_v26  ;;  %v1789_v32 = vadd.f32 %v1750_v30, %v1588_v29  ;;  %13841 = vmatprep.mubr.msk.f32.mxu0 %vm15088_vm1, %v15087_v1  ;;  %13972 = vmatprep.mubr.msk.f32.mxu1 %vm15088_vm1, %v15087_v1  ;;  %v2420_v31 = vld [vmem:[%s15154_s7 + $0xd4] sm:$0xff] }
 0x199   : > { %v13575_v34 = vpop.f32.mrf.mxu0  ;;  %v2285_v28 = vld [vmem:[#allocation2 + $0x30] sm:$0xff]  ;;  %v13706_v41 = vpop.f32.mrf.mxu1 }
 0x19a   : > { %1828 = vst.msk [vmem:[#allocation2 + $0x40] sm:$0xff] %vm303_vm3, %v1789_v32  ;;  %v2324_v36 = vadd.f32 %v2285_v28, %v16120_v37  ;;  %v2961_v28 = vld [vmem:[%s15154_s7 + $0xf5] sm:$0xff] }
 0x19b   : > { %v1593_v39 = vpop.f32.mrf.mxu0  ;;  %13842 = vmatmul.mubr.msk.f32.gmra.mxu0 %vm364_vm2, %v2414_v33  ;;  %v16211_v45 = vpop.f32.mrf.mxu1  ;;  %13973 = vmatmul.mubr.msk.f32.gmra.mxu1 %vm364_vm2, %v2955_v38  ;;  %v1757_v38 = vld [vmem:[#allocation2 + $0x78] sm:$0xff] }
 0x19c   : > { %2363 = vst.msk [vmem:[#allocation2 + $0x30] sm:$0xff] %vm303_vm3, %v2324_v36  ;;  %v1790_v42 = vadd.f32 %v1751_v40, %v1593_v39  ;;  %13844 = vmatprep.mubr.msk.f32.mxu0 %vm15088_vm1, %v15087_v1  ;;  %13975 = vmatprep.mubr.msk.f32.mxu1 %vm15088_vm1, %v15087_v1  ;;  %v2421_v41 = vld [vmem:[%s15154_s7 + $0xdc] sm:$0xff] }
 0x19d   : > { %v13578_v44 = vpop.f32.mrf.mxu0  ;;  %v2286_v37 = vld [vmem:[#allocation2 + $0x38] sm:$0xff]  ;;  %v13709_v51 = vpop.f32.mrf.mxu1 }
 0x19e   : > { %1829 = vst.msk [vmem:[#allocation2 + $0x48] sm:$0xff] %vm303_vm3, %v1790_v42  ;;  %v2325_v46 = vadd.f32 %v2286_v37, %v16132_v47  ;;  %v2962_v37 = vld [vmem:[%s15154_s7 + $0xfd] sm:$0xff] }
 0x19f   : > { %v1598_v48 = vpop.f32.mrf.mxu0  ;;  %13845 = vmatmul.mubr.msk.f32.gmra.mxu0 %vm364_vm2, %v2415_v43  ;;  %v16224_v55 = vpop.f32.mrf.mxu1  ;;  %13976 = vmatmul.mubr.msk.f32.gmra.mxu1 %vm364_vm2, %v2956_v49  ;;  %v1758_v49 = vld [vmem:[#allocation2 + $0x80] sm:$0xff] }
 0x1a0   : > { %2364 = vst.msk [vmem:[#allocation2 + $0x38] sm:$0xff] %vm303_vm3, %v2325_v46  ;;  %v1791_v52 = vadd.f32 %v1752_v50, %v1598_v48  ;;  %13847 = vmatprep.mubr.msk.f32.mxu0 %vm15088_vm1, %v15087_v1  ;;  %13978 = vmatprep.mubr.msk.f32.mxu1 %vm15088_vm1, %v15087_v1  ;;  %v2422_v51 = vld [vmem:[%s15154_s7 + $0xe4] sm:$0xff] }
 0x1a1   : > { %v13581_v54 = vpop.f32.mrf.mxu0  ;;  %v2287_v47 = vld [vmem:[#allocation2 + $0x40] sm:$0xff]  ;;  %v13712_v61 = vpop.f32.mrf.mxu1 }
 0x1a2   : > { %1830 = vst.msk [vmem:[#allocation2 + $0x50] sm:$0xff] %vm303_vm3, %v1791_v52  ;;  %v2326_v57 = vadd.f32 %v2287_v47, %v16145_v59  ;;  %v2963_v47 = vld [vmem:[%s15154_s7 + $0x105] sm:$0xff] }
 0x1a3   : > { %v1603_v60 = vpop.f32.mrf.mxu0  ;;  %13848 = vmatmul.mubr.msk.f32.gmra.mxu0 %vm364_vm2, %v2416_v53  ;;  %v16237_v2 = vpop.f32.mrf.mxu1  ;;  %13979 = vmatmul.mubr.msk.f32.gmra.mxu1 %vm364_vm2, %v2957_v58  ;;  %v1759_v58 = vld [vmem:[#allocation2 + $0x88] sm:$0xff] }
 0x1a4   : > { %2365 = vst.msk [vmem:[#allocation2 + $0x40] sm:$0xff] %vm303_vm3, %v2326_v57  ;;  %v1792_v62 = vadd.f32 %v1753_v56, %v1603_v60  ;;  %13850 = vmatprep.mubr.msk.f32.mxu0 %vm15088_vm1, %v15087_v1  ;;  %13981 = vmatprep.mubr.msk.f32.mxu1 %vm15088_vm1, %v15087_v1  ;;  %v2423_v61 = vld [vmem:[%s15154_s7 + $0xec] sm:$0xff] }
 0x1a5   : > { %v13584_v0 = vpop.f32.mrf.mxu0  ;;  %v2288_v59 = vld [vmem:[#allocation2 + $0x48] sm:$0xff]  ;;  %v13715_v8 = vpop.f32.mrf.mxu1 }
 0x1a6   : > { %1831 = vst.msk [vmem:[#allocation2 + $0x58] sm:$0xff] %vm303_vm3, %v1792_v62  ;;  %v2327_v4 = vadd.f32 %v2288_v59, %v16159_v5  ;;  %v2964_v59 = vld [vmem:[%s15154_s7 + $0x10d] sm:$0xff] }
 0x1a7   : > { %v1608_v6 = vpop.f32.mrf.mxu0  ;;  %13851 = vmatmul.mubr.msk.f32.gmra.mxu0 %vm364_vm2, %v2417_v63  ;;  %v16250_v12 = vpop.f32.mrf.mxu1  ;;  %13982 = vmatmul.mubr.msk.f32.gmra.mxu1 %vm364_vm2, %v2958_v3  ;;  %v1760_v3 = vld [vmem:[#allocation2 + $0x90] sm:$0xff] }
 0x1a8   : > { %2366 = vst.msk [vmem:[#allocation2 + $0x48] sm:$0xff] %vm303_vm3, %v2327_v4  ;;  %v1793_v9 = vadd.f32 %v1754_v7, %v1608_v6  ;;  %13853 = vmatprep.mubr.msk.f32.mxu0 %vm15088_vm1, %v15087_v1  ;;  %13984 = vmatprep.mubr.msk.f32.mxu1 %vm15088_vm1, %v15087_v1  ;;  %v2424_v8 = vld [vmem:[%s15154_s7 + $0xf4] sm:$0xff] }
 0x1a9   : > { %v13587_v11 = vpop.f32.mrf.mxu0  ;;  %v2289_v5 = vld [vmem:[#allocation2 + $0x50] sm:$0xff]  ;;  %v13718_v18 = vpop.f32.mrf.mxu1 }
 0x1aa   : > { %1832 = vst.msk [vmem:[#allocation2 + $0x60] sm:$0xff] %vm303_vm3, %v1793_v9  ;;  %v2328_v14 = vadd.f32 %v2289_v5, %v16172_v15  ;;  %v2965_v5 = vld [vmem:[%s15154_s7 + $0x115] sm:$0xff] }
 0x1ab   : > { %v1613_v16 = vpop.f32.mrf.mxu0  ;;  %13854 = vmatmul.mubr.msk.f32.gmra.mxu0 %vm364_vm2, %v2418_v10  ;;  %v16263_v23 = vpop.f32.mrf.mxu1  ;;  %13985 = vmatmul.mubr.msk.f32.gmra.mxu1 %vm364_vm2, %v2959_v13  ;;  %v1761_v13 = vld [vmem:[#allocation2 + $0x98] sm:$0xff] }
 0x1ac   : > { %2367 = vst.msk [vmem:[#allocation2 + $0x50] sm:$0xff] %vm303_vm3, %v2328_v14  ;;  %v1794_v19 = vadd.f32 %v1755_v17, %v1613_v16  ;;  %13856 = vmatprep.mubr.msk.f32.mxu0 %vm15088_vm1, %v15087_v1  ;;  %13987 = vmatprep.mubr.msk.f32.mxu1 %vm15088_vm1, %v15087_v1  ;;  %v2425_v18 = vld [vmem:[%s15154_s7 + $0xfc] sm:$0xff] }
 0x1ad   : > { %v13590_v22 = vpop.f32.mrf.mxu0  ;;  %v2290_v15 = vld [vmem:[#allocation2 + $0x58] sm:$0xff]  ;;  %v13721_v29 = vpop.f32.mrf.mxu1 }
 0x1ae   : > { %1833 = vst.msk [vmem:[#allocation2 + $0x68] sm:$0xff] %vm303_vm3, %v1794_v19  ;;  %v2329_v24 = vadd.f32 %v2290_v15, %v16185_v25  ;;  %v2966_v15 = vld [vmem:[%s15154_s7 + $0x11d] sm:$0xff] }
 0x1af   : > { %v1618_v26 = vpop.f32.mrf.mxu0  ;;  %13857 = vmatmul.mubr.msk.f32.gmra.mxu0 %vm364_vm2, %v2419_v21  ;;  %v16276_v33 = vpop.f32.mrf.mxu1  ;;  %13988 = vmatmul.mubr.msk.f32.gmra.mxu1 %vm364_vm2, %v2960_v20  ;;  %v1762_v20 = vld [vmem:[#allocation2 + $0xa0] sm:$0xff] }
 0x1b0   : > { %2368 = vst.msk [vmem:[#allocation2 + $0x58] sm:$0xff] %vm303_vm3, %v2329_v24  ;;  %v1795_v30 = vadd.f32 %v1756_v27, %v1618_v26  ;;  %13859 = vmatprep.mubr.msk.f32.mxu0 %vm15088_vm1, %v15087_v1  ;;  %13990 = vmatprep.mubr.msk.f32.mxu1 %vm15088_vm1, %v15087_v1  ;;  %v2426_v29 = vld [vmem:[%s15154_s7 + $0x104] sm:$0xff] }
 0x1b1   : > { %v13593_v32 = vpop.f32.mrf.mxu0  ;;  %v2291_v25 = vld [vmem:[#allocation2 + $0x60] sm:$0xff]  ;;  %v13724_v39 = vpop.f32.mrf.mxu1 }
 0x1b2   : > { %1834 = vst.msk [vmem:[#allocation2 + $0x70] sm:$0xff] %vm303_vm3, %v1795_v30  ;;  %v2330_v34 = vadd.f32 %v2291_v25, %v16198_v35  ;;  %v2967_v25 = vld [vmem:[%s15154_s7 + $0x125] sm:$0xff] }
 0x1b3   : > { %v1623_v36 = vpop.f32.mrf.mxu0  ;;  %13860 = vmatmul.mubr.msk.f32.gmra.mxu0 %vm364_vm2, %v2420_v31  ;;  %v16289_v43 = vpop.f32.mrf.mxu1  ;;  %13991 = vmatmul.mubr.msk.f32.gmra.mxu1 %vm364_vm2, %v2961_v28  ;;  %v1763_v28 = vld [vmem:[#allocation2 + $0xa8] sm:$0xff] }
 0x1b4   : > { %2369 = vst.msk [vmem:[#allocation2 + $0x60] sm:$0xff] %vm303_vm3, %v2330_v34  ;;  %v1796_v40 = vadd.f32 %v1757_v38, %v1623_v36  ;;  %13862 = vmatprep.mubr.msk.f32.mxu0 %vm15088_vm1, %v15087_v1  ;;  %13993 = vmatprep.mubr.msk.f32.mxu1 %vm15088_vm1, %v15087_v1  ;;  %v2427_v39 = vld [vmem:[%s15154_s7 + $0x10c] sm:$0xff] }
 0x1b5   : > { %v13596_v42 = vpop.f32.mrf.mxu0  ;;  %v2292_v35 = vld [vmem:[#allocation2 + $0x68] sm:$0xff]  ;;  %v13727_v48 = vpop.f32.mrf.mxu1 }
 0x1b6   : > { %1835 = vst.msk [vmem:[#allocation2 + $0x78] sm:$0xff] %vm303_vm3, %v1796_v40  ;;  %v2331_v44 = vadd.f32 %v2292_v35, %v16211_v45  ;;  %v2968_v35 = vld [vmem:[%s15154_s7 + $0x12d] sm:$0xff] }
 0x1b7   : > { %v1628_v46 = vpop.f32.mrf.mxu0  ;;  %13863 = vmatmul.mubr.msk.f32.gmra.mxu0 %vm364_vm2, %v2421_v41  ;;  %v16302_v53 = vpop.f32.mrf.mxu1  ;;  %13994 = vmatmul.mubr.msk.f32.gmra.mxu1 %vm364_vm2, %v2962_v37  ;;  %v1764_v37 = vld [vmem:[#allocation2 + $0xb0] sm:$0xff] }
 0x1b8   : > { %2370 = vst.msk [vmem:[#allocation2 + $0x68] sm:$0xff] %vm303_vm3, %v2331_v44  ;;  %v1797_v50 = vadd.f32 %v1758_v49, %v1628_v46  ;;  %13865 = vmatprep.mubr.msk.f32.mxu0 %vm15088_vm1, %v15087_v1  ;;  %13996 = vmatprep.mubr.msk.f32.mxu1 %vm15088_vm1, %v15087_v1  ;;  %v2428_v48 = vld [vmem:[%s15154_s7 + $0x114] sm:$0xff] }
 0x1b9   : > { %v13599_v52 = vpop.f32.mrf.mxu0  ;;  %v2293_v45 = vld [vmem:[#allocation2 + $0x70] sm:$0xff]  ;;  %v13730_v60 = vpop.f32.mrf.mxu1 }
 0x1ba   : > { %1836 = vst.msk [vmem:[#allocation2 + $0x80] sm:$0xff] %vm303_vm3, %v1797_v50  ;;  %v2332_v54 = vadd.f32 %v2293_v45, %v16224_v55  ;;  %v2969_v45 = vld [vmem:[%s15154_s7 + $0x135] sm:$0xff] }
 0x1bb   : > { %v1633_v57 = vpop.f32.mrf.mxu0  ;;  %13866 = vmatmul.mubr.msk.f32.gmra.mxu0 %vm364_vm2, %v2422_v51  ;;  %v16315_v63 = vpop.f32.mrf.mxu1  ;;  %13997 = vmatmul.mubr.msk.f32.gmra.mxu1 %vm364_vm2, %v2963_v47  ;;  %v1765_v47 = vld [vmem:[#allocation2 + $0xb8] sm:$0xff] }
 0x1bc   : > { %2371 = vst.msk [vmem:[#allocation2 + $0x70] sm:$0xff] %vm303_vm3, %v2332_v54  ;;  %v1798_v56 = vadd.f32 %v1759_v58, %v1633_v57  ;;  %13868 = vmatprep.mubr.msk.f32.mxu0 %vm15088_vm1, %v15087_v1  ;;  %13999 = vmatprep.mubr.msk.f32.mxu1 %vm15088_vm1, %v15087_v1  ;;  %v2429_v60 = vld [vmem:[%s15154_s7 + $0x11c] sm:$0xff] }
 0x1bd   : > { %v13602_v62 = vpop.f32.mrf.mxu0  ;;  %v2294_v55 = vld [vmem:[#allocation2 + $0x78] sm:$0xff]  ;;  %v13733_v6 = vpop.f32.mrf.mxu1 }
 0x1be   : > { %1837 = vst.msk [vmem:[#allocation2 + $0x88] sm:$0xff] %vm303_vm3, %v1798_v56  ;;  %v2333_v0 = vadd.f32 %v2294_v55, %v16237_v2  ;;  %v2970_v55 = vld [vmem:[%s15154_s7 + $0x13d] sm:$0xff] }
 0x1bf   : > { %v1638_v4 = vpop.f32.mrf.mxu0  ;;  %13869 = vmatmul.mubr.msk.f32.gmra.mxu0 %vm364_vm2, %v2423_v61  ;;  %v16328_v10 = vpop.f32.mrf.mxu1  ;;  %14000 = vmatmul.mubr.msk.f32.gmra.mxu1 %vm364_vm2, %v2964_v59  ;;  %v1766_v59 = vld [vmem:[#allocation2 + $0xc0] sm:$0xff] }
 0x1c0   : > { %2372 = vst.msk [vmem:[#allocation2 + $0x78] sm:$0xff] %vm303_vm3, %v2333_v0  ;;  %v1799_v7 = vadd.f32 %v1760_v3, %v1638_v4  ;;  %13871 = vmatprep.mubr.msk.f32.mxu0 %vm15088_vm1, %v15087_v1  ;;  %14002 = vmatprep.mubr.msk.f32.mxu1 %vm15088_vm1, %v15087_v1  ;;  %v2430_v6 = vld [vmem:[%s15154_s7 + $0x124] sm:$0xff] }
 0x1c1   : > { %v13605_v9 = vpop.f32.mrf.mxu0  ;;  %v2295_v2 = vld [vmem:[#allocation2 + $0x80] sm:$0xff]  ;;  %v13736_v16 = vpop.f32.mrf.mxu1 }
 0x1c2   : > { %1838 = vst.msk [vmem:[#allocation2 + $0x90] sm:$0xff] %vm303_vm3, %v1799_v7  ;;  %v2334_v11 = vadd.f32 %v2295_v2, %v16250_v12  ;;  %v2971_v2 = vld [vmem:[%s15154_s7 + $0x145] sm:$0xff] }
 0x1c3   : > { %v1643_v14 = vpop.f32.mrf.mxu0  ;;  %13872 = vmatmul.mubr.msk.f32.gmra.mxu0 %vm364_vm2, %v2424_v8  ;;  %v16341_v21 = vpop.f32.mrf.mxu1  ;;  %14003 = vmatmul.mubr.msk.f32.gmra.mxu1 %vm364_vm2, %v2965_v5  ;;  %v1767_v5 = vld [vmem:[#allocation2 + $0xc8] sm:$0xff] }
 0x1c4   : > { %2373 = vst.msk [vmem:[#allocation2 + $0x80] sm:$0xff] %vm303_vm3, %v2334_v11  ;;  %v1800_v17 = vadd.f32 %v1761_v13, %v1643_v14  ;;  %13874 = vmatprep.mubr.msk.f32.mxu0 %vm15088_vm1, %v15087_v1  ;;  %14005 = vmatprep.mubr.msk.f32.mxu1 %vm15088_vm1, %v15087_v1  ;;  %v2431_v16 = vld [vmem:[%s15154_s7 + $0x12c] sm:$0xff] }
 0x1c5   : > { %v13608_v19 = vpop.f32.mrf.mxu0  ;;  %v2296_v12 = vld [vmem:[#allocation2 + $0x88] sm:$0xff]  ;;  %v13739_v26 = vpop.f32.mrf.mxu1 }
 0x1c6   : > { %1839 = vst.msk [vmem:[#allocation2 + $0x98] sm:$0xff] %vm303_vm3, %v1800_v17  ;;  %v2335_v22 = vadd.f32 %v2296_v12, %v16263_v23  ;;  %v4007_v12 = vld [vmem:[%s15154_s7 + $0x26] sm:$0xff]  ;;  %v2432_v26 = vld [vmem:[%s15154_s7 + $0x134] sm:$0xff] }
 0x1c7   : > { %v1648_v24 = vpop.f32.mrf.mxu0  ;;  %13875 = vmatmul.mubr.msk.f32.gmra.mxu0 %vm364_vm2, %v2425_v18  ;;  %v16354_v31 = vpop.f32.mrf.mxu1  ;;  %14006 = vmatmul.mubr.msk.f32.gmra.mxu1 %vm364_vm2, %v2966_v15  ;;  %v1768_v15 = vld [vmem:[#allocation2 + $0xd0] sm:$0xff] }
 0x1c8   : > { %2374 = vst.msk [vmem:[#allocation2 + $0x88] sm:$0xff] %vm303_vm3, %v2335_v22  ;;  %v1801_v27 = vadd.f32 %v1762_v20, %v1648_v24  ;;  %13877 = vmatprep.mubr.msk.f32.mxu0 %vm15088_vm1, %v15087_v1  ;;  %14008 = vmatprep.mubr.msk.f32.mxu1 %vm15088_vm1, %v15087_v1 }
 0x1c9   : > { %v13611_v30 = vpop.f32.mrf.mxu0  ;;  %v2297_v23 = vld [vmem:[#allocation2 + $0x90] sm:$0xff]  ;;  %v13742_v36 = vpop.f32.mrf.mxu1 }
 0x1ca   : > { %1840 = vst.msk [vmem:[#allocation2 + $0xa0] sm:$0xff] %vm303_vm3, %v1801_v27  ;;  %v2336_v32 = vadd.f32 %v2297_v23, %v16276_v33  ;;  %v4008_v23 = vld [vmem:[%s15154_s7 + $0x2e] sm:$0xff]  ;;  %v2433_v36 = vld [vmem:[%s15154_s7 + $0x13c] sm:$0xff] }
 0x1cb   : > { %v1653_v34 = vpop.f32.mrf.mxu0  ;;  %13878 = vmatmul.mubr.msk.f32.gmra.mxu0 %vm364_vm2, %v2426_v29  ;;  %v16367_v41 = vpop.f32.mrf.mxu1  ;;  %14009 = vmatmul.mubr.msk.f32.gmra.mxu1 %vm364_vm2, %v2967_v25  ;;  %v1769_v25 = vld [vmem:[#allocation2 + $0xd8] sm:$0xff] }
 0x1cc   : > { %2375 = vst.msk [vmem:[#allocation2 + $0x90] sm:$0xff] %vm303_vm3, %v2336_v32  ;;  %v1802_v38 = vadd.f32 %v1763_v28, %v1653_v34  ;;  %13880 = vmatprep.mubr.msk.f32.mxu0 %vm15088_vm1, %v15087_v1  ;;  %14011 = vmatprep.mubr.msk.f32.mxu1 %vm15088_vm1, %v15087_v1 }
 0x1cd   : > { %v13614_v40 = vpop.f32.mrf.mxu0  ;;  %v2298_v33 = vld [vmem:[#allocation2 + $0x98] sm:$0xff]  ;;  %v13745_v46 = vpop.f32.mrf.mxu1 }
 0x1ce   : > { %1841 = vst.msk [vmem:[#allocation2 + $0xa8] sm:$0xff] %vm303_vm3, %v1802_v38  ;;  %v2337_v42 = vadd.f32 %v2298_v33, %v16289_v43  ;;  %v4009_v33 = vld [vmem:[%s15154_s7 + $0x36] sm:$0xff]  ;;  %v2434_v46 = vld [vmem:[%s15154_s7 + $0x144] sm:$0xff] }
 0x1cf   : > { %v1658_v44 = vpop.f32.mrf.mxu0  ;;  %13881 = vmatmul.mubr.msk.f32.gmra.mxu0 %vm364_vm2, %v2427_v39  ;;  %v16380_v51 = vpop.f32.mrf.mxu1  ;;  %14012 = vmatmul.mubr.msk.f32.gmra.mxu1 %vm364_vm2, %v2968_v35  ;;  %v1770_v35 = vld [vmem:[#allocation2 + $0xe0] sm:$0xff] }
 0x1d0   : > { %2376 = vst.msk [vmem:[#allocation2 + $0x98] sm:$0xff] %vm303_vm3, %v2337_v42  ;;  %v1803_v49 = vadd.f32 %v1764_v37, %v1658_v44  ;;  %13883 = vmatprep.mubr.msk.f32.mxu0 %vm15088_vm1, %v15087_v1  ;;  %14014 = vmatprep.mubr.msk.f32.mxu1 %vm15088_vm1, %v15087_v1 }
 0x1d1   : > { %v13617_v50 = vpop.f32.mrf.mxu0  ;;  %v2299_v43 = vld [vmem:[#allocation2 + $0xa0] sm:$0xff]  ;;  %v13748_v57 = vpop.f32.mrf.mxu1 }
 0x1d2   : > { %1842 = vst.msk [vmem:[#allocation2 + $0xb0] sm:$0xff] %vm303_vm3, %v1803_v49  ;;  %v2338_v52 = vadd.f32 %v2299_v43, %v16302_v53  ;;  %v4010_v43 = vld [vmem:[%s15154_s7 + $0x3e] sm:$0xff] }
 0x1d3   : > { %v1663_v54 = vpop.f32.mrf.mxu0  ;;  %13884 = vmatmul.mubr.msk.f32.gmra.mxu0 %vm364_vm2, %v2428_v48  ;;  %v16393_v61 = vpop.f32.mrf.mxu1  ;;  %14015 = vmatmul.mubr.msk.f32.gmra.mxu1 %vm364_vm2, %v2969_v45  ;;  %v1771_v45 = vld [vmem:[#allocation2 + $0xe8] sm:$0xff] }
 0x1d4   : > { %2377 = vst.msk [vmem:[#allocation2 + $0xa0] sm:$0xff] %vm303_vm3, %v2338_v52  ;;  %v1804_v58 = vadd.f32 %v1765_v47, %v1663_v54  ;;  %13886 = vmatprep.mubr.msk.f32.mxu0 %vm15088_vm1, %v15087_v1  ;;  %14017 = vmatprep.mubr.msk.f32.mxu1 %vm15088_vm1, %v15087_v1  ;;  %v3470_v57 = vld [vmem:[%s15154_s7 + $0x25] sm:$0xff] }
 0x1d5   : > { %v13620_v56 = vpop.f32.mrf.mxu0  ;;  %v2300_v53 = vld [vmem:[#allocation2 + $0xa8] sm:$0xff]  ;;  %v13751_v4 = vpop.f32.mrf.mxu1 }
 0x1d6   : > { %1843 = vst.msk [vmem:[#allocation2 + $0xb8] sm:$0xff] %vm303_vm3, %v1804_v58  ;;  %v2339_v62 = vadd.f32 %v2300_v53, %v16315_v63 }
 0x1d7   : > { %v1668_v0 = vpop.f32.mrf.mxu0  ;;  %13887 = vmatmul.mubr.msk.f32.gmra.mxu0 %vm364_vm2, %v2429_v60  ;;  %v16406_v8 = vpop.f32.mrf.mxu1  ;;  %14018 = vmatmul.mubr.msk.f32.gmra.mxu1 %vm364_vm2, %v2970_v55 }
 0x1d8   : > { %2378 = vst.msk [vmem:[#allocation2 + $0xa8] sm:$0xff] %vm303_vm3, %v2339_v62  ;;  %v1805_v3 = vadd.f32 %v1766_v59, %v1668_v0  ;;  %13889 = vmatprep.mubr.msk.f32.mxu0 %vm15088_vm1, %v15087_v1  ;;  %14020 = vmatprep.mubr.msk.f32.mxu1 %vm15088_vm1, %v15087_v1  ;;  %v4011_v62 = vld [vmem:[%s15154_s7 + $0x46] sm:$0xff]  ;;  %v1772_v0 = vld [vmem:[#allocation2 + $0xf0] sm:$0xff] }
 0x1d9   : > { %v13623_v7 = vpop.f32.mrf.mxu0  ;;  %v2301_v63 = vld [vmem:[#allocation2 + $0xb0] sm:$0xff]  ;;  %v13754_v14 = vpop.f32.mrf.mxu1 }
 0x1da   : > { %1844 = vst.msk [vmem:[#allocation2 + $0xc0] sm:$0xff] %vm303_vm3, %v1805_v3  ;;  %v2340_v9 = vadd.f32 %v2301_v63, %v16328_v10  ;;  %v3471_v3 = vld [vmem:[%s15154_s7 + $0x2d] sm:$0xff] }
 0x1db   : > { %v1673_v11 = vpop.f32.mrf.mxu0  ;;  %13890 = vmatmul.mubr.msk.f32.gmra.mxu0 %vm364_vm2, %v2430_v6  ;;  %v16419_v18 = vpop.f32.mrf.mxu1  ;;  %14021 = vmatmul.mubr.msk.f32.gmra.mxu1 %vm364_vm2, %v2971_v2 }
 0x1dc   : > { %2379 = vst.msk [vmem:[#allocation2 + $0xb0] sm:$0xff] %vm303_vm3, %v2340_v9  ;;  %v1806_v13 = vadd.f32 %v1767_v5, %v1673_v11  ;;  %13892 = vmatprep.mubr.msk.f32.mxu0 %vm15088_vm1, %v15087_v1  ;;  %14144 = vmatprep.mubr.msk.f32.mxu1 %vm15088_vm1, %v15087_v1  ;;  %v4012_v9 = vld [vmem:[%s15154_s7 + $0x4e] sm:$0xff]  ;;  %v1773_v11 = vld [vmem:[#allocation2 + $0xf8] sm:$0xff] }
 0x1dd   : > { %v13626_v17 = vpop.f32.mrf.mxu0  ;;  %v2302_v10 = vld [vmem:[#allocation2 + $0xb8] sm:$0xff]  ;;  %v13757_v24 = vpop.f32.mrf.mxu1 }
 0x1de   : > { %1845 = vst.msk [vmem:[#allocation2 + $0xc8] sm:$0xff] %vm303_vm3, %v1806_v13  ;;  %v2341_v19 = vadd.f32 %v2302_v10, %v16341_v21  ;;  %v3472_v13 = vld [vmem:[%s15154_s7 + $0x35] sm:$0xff] }
 0x1df   : > { %v1678_v22 = vpop.f32.mrf.mxu0  ;;  %13893 = vmatmul.mubr.msk.f32.gmra.mxu0 %vm364_vm2, %v2431_v16  ;;  %v16432_v29 = vpop.f32.mrf.mxu1  ;;  %14145 = vmatmul.mubr.msk.f32.vlgmr.msra.gmra.mxu1 %vm364_vm2, %v4007_v12 }
 0x1e0   : > { %2380 = vst.msk [vmem:[#allocation2 + $0xb8] sm:$0xff] %vm303_vm3, %v2341_v19  ;;  %v1807_v20 = vadd.f32 %v1768_v15, %v1678_v22  ;;  %13895 = vmatprep.mubr.msk.f32.mxu0 %vm15088_vm1, %v15087_v1  ;;  %14147 = vmatprep.mubr.msk.f32.mxu1 %vm15088_vm1, %v15087_v1  ;;  %v4013_v19 = vld [vmem:[%s15154_s7 + $0x56] sm:$0xff]  ;;  %v1774_v22 = vld [vmem:[#allocation2 + $0x100] sm:$0xff] }
 0x1e1   : > { %v13629_v27 = vpop.f32.mrf.mxu0  ;;  %v2303_v21 = vld [vmem:[#allocation2 + $0xc0] sm:$0xff]  ;;  %v13760_v34 = vpop.f32.mrf.mxu1 }
 0x1e2   : > { %1846 = vst.msk [vmem:[#allocation2 + $0xd0] sm:$0xff] %vm303_vm3, %v1807_v20  ;;  %v2342_v30 = vadd.f32 %v2303_v21, %v16354_v31  ;;  %v3473_v20 = vld [vmem:[%s15154_s7 + $0x3d] sm:$0xff] }
 0x1e3   : > { %v1683_v32 = vpop.f32.mrf.mxu0  ;;  %13896 = vmatmul.mubr.msk.f32.gmra.mxu0 %vm364_vm2, %v2432_v26  ;;  %v16445_v39 = vpop.f32.mrf.mxu1  ;;  %14148 = vmatmul.mubr.msk.f32.gmra.mxu1 %vm364_vm2, %v4008_v23 }
 0x1e4   : > { %2381 = vst.msk [vmem:[#allocation2 + $0xc0] sm:$0xff] %vm303_vm3, %v2342_v30  ;;  %v1808_v28 = vadd.f32 %v1769_v25, %v1683_v32  ;;  %13898 = vmatprep.mubr.msk.f32.mxu0 %vm15088_vm1, %v15087_v1  ;;  %14150 = vmatprep.mubr.msk.f32.mxu1 %vm15088_vm1, %v15087_v1  ;;  %v4014_v30 = vld [vmem:[%s15154_s7 + $0x5e] sm:$0xff]  ;;  %v1775_v32 = vld [vmem:[#allocation2 + $0x108] sm:$0xff] }
 0x1e5   : > { %v13632_v38 = vpop.f32.mrf.mxu0  ;;  %v2304_v31 = vld [vmem:[#allocation2 + $0xc8] sm:$0xff]  ;;  %v13763_v44 = vpop.f32.mrf.mxu1 }
 0x1e6   : > { %1847 = vst.msk [vmem:[#allocation2 + $0xd8] sm:$0xff] %vm303_vm3, %v1808_v28  ;;  %v2343_v40 = vadd.f32 %v2304_v31, %v16367_v41  ;;  %v3474_v28 = vld [vmem:[%s15154_s7 + $0x45] sm:$0xff] }
 0x1e7   : > { %v1688_v42 = vpop.f32.mrf.mxu0  ;;  %13899 = vmatmul.mubr.msk.f32.gmra.mxu0 %vm364_vm2, %v2433_v36  ;;  %v16458_v48 = vpop.f32.mrf.mxu1  ;;  %14151 = vmatmul.mubr.msk.f32.gmra.mxu1 %vm364_vm2, %v4009_v33 }
 0x1e8   : > { %2382 = vst.msk [vmem:[#allocation2 + $0xc8] sm:$0xff] %vm303_vm3, %v2343_v40  ;;  %v1809_v37 = vadd.f32 %v1770_v35, %v1688_v42  ;;  %13901 = vmatprep.mubr.msk.f32.mxu0 %vm15088_vm1, %v15087_v1  ;;  %14153 = vmatprep.mubr.msk.f32.mxu1 %vm15088_vm1, %v15087_v1  ;;  %v4015_v40 = vld [vmem:[%s15154_s7 + $0x66] sm:$0xff]  ;;  %v1776_v42 = vld [vmem:[#allocation2 + $0x110] sm:$0xff] }
 0x1e9   : > { %v13635_v49 = vpop.f32.mrf.mxu0  ;;  %v2305_v41 = vld [vmem:[#allocation2 + $0xd0] sm:$0xff]  ;;  %v13766_v54 = vpop.f32.mrf.mxu1 }
 0x1ea   : > { %1848 = vst.msk [vmem:[#allocation2 + $0xe0] sm:$0xff] %vm303_vm3, %v1809_v37  ;;  %v2344_v50 = vadd.f32 %v2305_v41, %v16380_v51  ;;  %v4583_v51 = vld [vmem:[%s19193_s1 + $0x20] sm:$0xf]  ;;  %v3475_v37 = vld [vmem:[%s15154_s7 + $0x4d] sm:$0xff] }
 0x1eb   : > { %v1693_v52 = vpop.f32.mrf.mxu0  ;;  %13902 = vmatmul.mubr.msk.f32.gmra.mxu0 %vm364_vm2, %v2434_v46  ;;  %v16474_v56 = vpop.f32.mrf.mxu1  ;;  %14154 = vmatmul.mubr.msk.f32.gmra.mxu1 %vm364_vm2, %v4010_v43 }
 0x1ec   : > { %2383 = vst.msk [vmem:[#allocation2 + $0xd0] sm:$0xff] %vm303_vm3, %v2344_v50  ;;  %v1810_v47 = vadd.f32 %v1771_v45, %v1693_v52  ;;  %14025 = vmatprep.mubr.msk.f32.mxu0 %vm15088_vm1, %v15087_v1  ;;  %14156 = vmatprep.mubr.msk.f32.mxu1 %vm15088_vm1, %v15087_v1  ;;  %v4016_v50 = vld [vmem:[%s15154_s7 + $0x6e] sm:$0xff]  ;;  %v1777_v52 = vld [vmem:[#allocation2 + $0x118] sm:$0xff] }
 0x1ed   : > { %v13638_v58 = vpop.f32.mrf.mxu0  ;;  %v2306_v60 = vld [vmem:[#allocation2 + $0xd8] sm:$0xff]  ;;  %v13769_v59 = vpop.f32.mrf.mxu1 }
 0x1ee   : > { %1849 = vst.msk [vmem:[#allocation2 + $0xe8] sm:$0xff] %vm303_vm3, %v1810_v47  ;;  %v2345_v53 = vadd.f32 %v2306_v60, %v16393_v61  ;;  %v3476_v47 = vld [vmem:[%s15154_s7 + $0x55] sm:$0xff]  ;;  %v3477_v59 = vld [vmem:[%s15154_s7 + $0x5d] sm:$0xff] }
 0x1ef   : > { %v1698_v55 = vpop.f32.mrf.mxu0  ;;  %14026 = vmatmul.mubr.msk.f32.vlgmr.msra.gmra.mxu0 %vm364_vm2, %v3470_v57  ;;  %v16488_v7 = vpop.f32.mrf.mxu1  ;;  %14157 = vmatmul.mubr.msk.f32.gmra.mxu1 %vm364_vm2, %v4011_v62  ;;  %v1778_v62 = vld [vmem:[#allocation2 + $0x120] sm:$0xff] }
 0x1f0   : > { %2384 = vst.msk [vmem:[#allocation2 + $0xd8] sm:$0xff] %vm303_vm3, %v2345_v53  ;;  %v1811_v4 = vadd.f32 %v1772_v0, %v1698_v55  ;;  %14262 = vmatpush3.msk.msra.mxu0 %vm482_vm0, %v4583_v51  ;;  %14028 = vmatprep.mubr.msk.f32.mxu0 %vm15088_vm1, %v15087_v1  ;;  %v4017_v51 = vld [vmem:[%s15154_s7 + $0x76] sm:$0xff] }
 0x1f1   : > { %v13641_v61 = vpop.f32.mrf.mxu0  ;;  %v2307_v6 = vld [vmem:[#allocation2 + $0xe0] sm:$0xff]  ;;  %14159 = vmatprep.mubr.msk.f32.mxu1 %vm15088_vm1, %v15087_v1  ;;  %v13772_v5 = vpop.f32.mrf.mxu1 }
 0x1f2   : > { %1850 = vst.msk [vmem:[#allocation2 + $0xf0] sm:$0xff] %vm303_vm3, %v1811_v4  ;;  %v2346_v63 = vadd.f32 %v2307_v6, %v16406_v8  ;;  %v4018_v6 = vld [vmem:[%s15154_s7 + $0x7e] sm:$0xff] }
 0x1f3   : > { %v1703_v2 = vpop.f32.mrf.mxu0  ;;  %14029 = vmatmul.mubr.msk.f32.gmra.mxu0 %vm364_vm2, %v3471_v3  ;;  %v16501_v17 = vpop.f32.mrf.mxu1  ;;  %14160 = vmatmul.mubr.msk.f32.gmra.mxu1 %vm364_vm2, %v4012_v9  ;;  %v1779_v9 = vld [vmem:[#allocation2 + $0x128] sm:$0xff] }
 0x1f4   : > { %2385 = vst.msk [vmem:[#allocation2 + $0xe0] sm:$0xff] %vm303_vm3, %v2346_v63  ;;  %v1812_v14 = vadd.f32 %v1773_v11, %v1703_v2  ;;  %14031 = vmatprep.mubr.msk.f32.mxu0 %vm15088_vm1, %v15087_v1  ;;  %14162 = vmatprep.mubr.msk.f32.mxu1 %vm15088_vm1, %v15087_v1  ;;  %v3478_v5 = vld [vmem:[%s15154_s7 + $0x65] sm:$0xff] }
 0x1f5   : > { %v13644_v16 = vpop.f32.mrf.mxu0  ;;  %v2308_v8 = vld [vmem:[#allocation2 + $0xe8] sm:$0xff]  ;;  %v13775_v15 = vpop.f32.mrf.mxu1 }
 0x1f6   : > { %1851 = vst.msk [vmem:[#allocation2 + $0xf8] sm:$0xff] %vm303_vm3, %v1812_v14  ;;  %v2347_v10 = vadd.f32 %v2308_v8, %v16419_v18  ;;  %v4019_v8 = vld [vmem:[%s15154_s7 + $0x86] sm:$0xff] }
 0x1f7   : > { %v1708_v12 = vpop.f32.mrf.mxu0  ;;  %14032 = vmatmul.mubr.msk.f32.gmra.mxu0 %vm364_vm2, %v3472_v13  ;;  %v16514_v27 = vpop.f32.mrf.mxu1  ;;  %14163 = vmatmul.mubr.msk.f32.gmra.mxu1 %vm364_vm2, %v4013_v19  ;;  %v1780_v19 = vld [vmem:[#allocation2 + $0x130] sm:$0xff] }
 0x1f8   : > { %2386 = vst.msk [vmem:[#allocation2 + $0xe8] sm:$0xff] %vm303_vm3, %v2347_v10  ;;  %v1813_v24 = vadd.f32 %v1774_v22, %v1708_v12  ;;  %14034 = vmatprep.mubr.msk.f32.mxu0 %vm15088_vm1, %v15087_v1  ;;  %14165 = vmatprep.mubr.msk.f32.mxu1 %vm15088_vm1, %v15087_v1  ;;  %v3479_v15 = vld [vmem:[%s15154_s7 + $0x6d] sm:$0xff] }
 0x1f9   : > { %v13647_v26 = vpop.f32.mrf.mxu0  ;;  %v2309_v18 = vld [vmem:[#allocation2 + $0xf0] sm:$0xff]  ;;  %v13778_v25 = vpop.f32.mrf.mxu1 }
 0x1fa   : > { %1852 = vst.msk [vmem:[#allocation2 + $0x100] sm:$0xff] %vm303_vm3, %v1813_v24  ;;  %v2348_v21 = vadd.f32 %v2309_v18, %v16432_v29  ;;  %v4020_v18 = vld [vmem:[%s15154_s7 + $0x8e] sm:$0xff] }
 0x1fb   : > { %v1713_v23 = vpop.f32.mrf.mxu0  ;;  %14035 = vmatmul.mubr.msk.f32.gmra.mxu0 %vm364_vm2, %v3473_v20  ;;  %v16527_v38 = vpop.f32.mrf.mxu1  ;;  %14166 = vmatmul.mubr.msk.f32.gmra.mxu1 %vm364_vm2, %v4014_v30  ;;  %v2816_v30 = vld [vmem:[#allocation2] sm:$0xff]  ;;  %v3480_v25 = vld [vmem:[%s15154_s7 + $0x75] sm:$0xff] }
 0x1fc   : > { %2387 = vst.msk [vmem:[#allocation2 + $0xf0] sm:$0xff] %vm303_vm3, %v2348_v21  ;;  %v1814_v34 = vadd.f32 %v1775_v32, %v1713_v23  ;;  %14037 = vmatprep.mubr.msk.f32.mxu0 %vm15088_vm1, %v15087_v1  ;;  %14168 = vmatprep.mubr.msk.f32.mxu1 %vm15088_vm1, %v15087_v1 }
 0x1fd   : > { %v13650_v36 = vpop.f32.mrf.mxu0  ;;  %v2310_v29 = vld [vmem:[#allocation2 + $0xf8] sm:$0xff]  ;;  %v13781_v35 = vpop.f32.mrf.mxu1 }
 0x1fe   : > { %1853 = vst.msk [vmem:[#allocation2 + $0x108] sm:$0xff] %vm303_vm3, %v1814_v34  ;;  %v2349_v31 = vadd.f32 %v2310_v29, %v16445_v39  ;;  %v4021_v29 = vld [vmem:[%s15154_s7 + $0x96] sm:$0xff] }
 0x1ff   : > { %v1718_v33 = vpop.f32.mrf.mxu0  ;;  %14038 = vmatmul.mubr.msk.f32.gmra.mxu0 %vm364_vm2, %v3474_v28  ;;  %v16540_v49 = vpop.f32.mrf.mxu1  ;;  %14169 = vmatmul.mubr.msk.f32.gmra.mxu1 %vm364_vm2, %v4015_v40  ;;  %v2817_v40 = vld [vmem:[#allocation2 + $0x8] sm:$0xff]  ;;  %v3481_v35 = vld [vmem:[%s15154_s7 + $0x7d] sm:$0xff] }
 0x200   : > { %2388 = vst.msk [vmem:[#allocation2 + $0xf8] sm:$0xff] %vm303_vm3, %v2349_v31  ;;  %v1815_v44 = vadd.f32 %v1776_v42, %v1718_v33  ;;  %14040 = vmatprep.mubr.msk.f32.mxu0 %vm15088_vm1, %v15087_v1  ;;  %14171 = vmatprep.mubr.msk.f32.mxu1 %vm15088_vm1, %v15087_v1 }
 0x201   : > { %v13653_v46 = vpop.f32.mrf.mxu0  ;;  %v2311_v39 = vld [vmem:[#allocation2 + $0x100] sm:$0xff]  ;;  %v13784_v45 = vpop.f32.mrf.mxu1 }
 0x202   : > { %1854 = vst.msk [vmem:[#allocation2 + $0x110] sm:$0xff] %vm303_vm3, %v1815_v44  ;;  %v2350_v41 = vadd.f32 %v2311_v39, %v16458_v48  ;;  %v4022_v39 = vld [vmem:[%s15154_s7 + $0x9e] sm:$0xff] }
 0x203   : > { %v1723_v43 = vpop.f32.mrf.mxu0  ;;  %14041 = vmatmul.mubr.msk.f32.gmra.mxu0 %vm364_vm2, %v3475_v37  ;;  %v16553_v58 = vpop.f32.mrf.mxu1  ;;  %14172 = vmatmul.mubr.msk.f32.gmra.mxu1 %vm364_vm2, %v4016_v50  ;;  %v2818_v50 = vld [vmem:[#allocation2 + $0x10] sm:$0xff]  ;;  %v3482_v45 = vld [vmem:[%s15154_s7 + $0x85] sm:$0xff] }
 0x204   : > { %2389 = vst.msk [vmem:[#allocation2 + $0x100] sm:$0xff] %vm303_vm3, %v2350_v41  ;;  %v1816_v54 = vadd.f32 %v1777_v52, %v1723_v43  ;;  %14043 = vmatprep.mubr.msk.f32.mxu0 %vm15088_vm1, %v15087_v1  ;;  %14174 = vmatprep.mubr.msk.f32.mxu1 %vm15088_vm1, %v15087_v1 }
 0x205   : > { %v13656_v57 = vpop.f32.mrf.mxu0  ;;  %v2312_v48 = vld [vmem:[#allocation2 + $0x108] sm:$0xff]  ;;  %v13908_v55 = vpop.f32.mrf.mxu1 }
 0x206   : > { %1855 = vst.msk [vmem:[#allocation2 + $0x118] sm:$0xff] %vm303_vm3, %v1816_v54  ;;  %v2351_v60 = vadd.f32 %v2312_v48, %v16474_v56  ;;  %v4023_v48 = vld [vmem:[%s15154_s7 + $0xa6] sm:$0xff] }
 0x207   : > { %v1728_v53 = vpop.f32.mrf.mxu0  ;;  %14044 = vmatmul.mubr.msk.f32.gmra.mxu0 %vm364_vm2, %v3476_v47  ;;  %v16566_v3 = vpop.f32.mrf.mxu1  ;;  %14175 = vmatmul.mubr.msk.f32.gmra.mxu1 %vm364_vm2, %v4017_v51  ;;  %v2819_v51 = vld [vmem:[#allocation2 + $0x18] sm:$0xff]  ;;  %v3483_v55 = vld [vmem:[%s15154_s7 + $0x8d] sm:$0xff] }
 0x208   : > { %2390 = vst.msk [vmem:[#allocation2 + $0x108] sm:$0xff] %vm303_vm3, %v2351_v60  ;;  %v1817_v0 = vadd.f32 %v1778_v62, %v1728_v53  ;;  %14046 = vmatprep.mubr.msk.f32.mxu0 %vm15088_vm1, %v15087_v1  ;;  %14177 = vmatprep.mubr.msk.f32.mxu1 %vm15088_vm1, %v15087_v1 }
 0x209   : > { %v13659_v4 = vpop.f32.mrf.mxu0  ;;  %v2313_v56 = vld [vmem:[#allocation2 + $0x110] sm:$0xff]  ;;  %v13911_v2 = vpop.f32.mrf.mxu1 }
 0x20a   : > { %1856 = vst.msk [vmem:[#allocation2 + $0x120] sm:$0xff] %vm303_vm3, %v1817_v0  ;;  %v2352_v61 = vadd.f32 %v2313_v56, %v16488_v7  ;;  %v4024_v56 = vld [vmem:[%s15154_s7 + $0xae] sm:$0xff] }
 0x20b   : > { %v1733_v63 = vpop.f32.mrf.mxu0  ;;  %14047 = vmatmul.mubr.msk.f32.gmra.mxu0 %vm364_vm2, %v3477_v59  ;;  %v16579_v13 = vpop.f32.mrf.mxu1  ;;  %14178 = vmatmul.mubr.msk.f32.gmra.mxu1 %vm364_vm2, %v4018_v6  ;;  %v2820_v6 = vld [vmem:[#allocation2 + $0x20] sm:$0xff]  ;;  %v3484_v2 = vld [vmem:[%s15154_s7 + $0x95] sm:$0xff] }
 0x20c   : > { %2391 = vst.msk [vmem:[#allocation2 + $0x110] sm:$0xff] %vm303_vm3, %v2352_v61  ;;  %v1818_v11 = vadd.f32 %v1779_v9, %v1733_v63  ;;  %14049 = vmatprep.mubr.msk.f32.mxu0 %vm15088_vm1, %v15087_v1  ;;  %14180 = vmatprep.mubr.msk.f32.mxu1 %vm15088_vm1, %v15087_v1 }
 0x20d   : > { %v13662_v14 = vpop.f32.mrf.mxu0  ;;  %v2314_v7 = vld [vmem:[#allocation2 + $0x118] sm:$0xff]  ;;  %v13914_v12 = vpop.f32.mrf.mxu1 }
 0x20e   : > { %1857 = vst.msk [vmem:[#allocation2 + $0x128] sm:$0xff] %vm303_vm3, %v1818_v11  ;;  %v2353_v16 = vadd.f32 %v2314_v7, %v16501_v17  ;;  %v4025_v7 = vld [vmem:[%s15154_s7 + $0xb6] sm:$0xff] }
 0x20f   : > { %v1738_v10 = vpop.f32.mrf.mxu0  ;;  %14050 = vmatmul.mubr.msk.f32.gmra.mxu0 %vm364_vm2, %v3478_v5  ;;  %v16592_v20 = vpop.f32.mrf.mxu1  ;;  %14181 = vmatmul.mubr.msk.f32.gmra.mxu1 %vm364_vm2, %v4019_v8  ;;  %v2821_v8 = vld [vmem:[#allocation2 + $0x28] sm:$0xff]  ;;  %v3485_v12 = vld [vmem:[%s15154_s7 + $0x9d] sm:$0xff] }
 0x210   : > { %2392 = vst.msk [vmem:[#allocation2 + $0x118] sm:$0xff] %vm303_vm3, %v2353_v16  ;;  %v1819_v22 = vadd.f32 %v1780_v19, %v1738_v10  ;;  %14052 = vmatprep.mubr.msk.f32.mxu0 %vm15088_vm1, %v15087_v1  ;;  %14183 = vmatprep.mubr.msk.f32.mxu1 %vm15088_vm1, %v15087_v1 }
 0x211   : > { %v13665_v24 = vpop.f32.mrf.mxu0  ;;  %v2315_v17 = vld [vmem:[#allocation2 + $0x120] sm:$0xff]  ;;  %v13917_v23 = vpop.f32.mrf.mxu1 }
 0x212   : > { %1858 = vst.msk [vmem:[#allocation2 + $0x130] sm:$0xff] %vm303_vm3, %v1819_v22  ;;  %v2354_v26 = vadd.f32 %v2315_v17, %v16514_v27  ;;  %v4026_v17 = vld [vmem:[%s15154_s7 + $0xbe] sm:$0xff] }
 0x213   : > { %v2622_v21 = vpop.f32.mrf.mxu0  ;;  %14053 = vmatmul.mubr.msk.f32.gmra.mxu0 %vm364_vm2, %v3479_v15  ;;  %v16605_v28 = vpop.f32.mrf.mxu1  ;;  %14184 = vmatmul.mubr.msk.f32.gmra.mxu1 %vm364_vm2, %v4020_v18  ;;  %v2822_v18 = vld [vmem:[#allocation2 + $0x30] sm:$0xff]  ;;  %v3486_v23 = vld [vmem:[%s15154_s7 + $0xa5] sm:$0xff] }
 0x214   : > { %2393 = vst.msk [vmem:[#allocation2 + $0x120] sm:$0xff] %vm303_vm3, %v2354_v26  ;;  %v2855_v32 = vadd.f32 %v2816_v30, %v2622_v21  ;;  %14055 = vmatprep.mubr.msk.f32.mxu0 %vm15088_vm1, %v15087_v1  ;;  %14186 = vmatprep.mubr.msk.f32.mxu1 %vm15088_vm1, %v15087_v1 }
 0x215   : > { %v2316_v34 = vld [vmem:[#allocation2 + $0x128] sm:$0xff]  ;;  %v13789_v27 = vpop.f32.mrf.mxu0  ;;  %v13920_v33 = vpop.f32.mrf.mxu1 }
 0x216   : > { %2894 = vst.msk [vmem:[#allocation2] sm:$0xff] %vm303_vm3, %v2855_v32  ;;  %v2355_v36 = vadd.f32 %v2316_v34, %v16527_v38  ;;  %v4027_v27 = vld [vmem:[%s15154_s7 + $0xc6] sm:$0xff] }
 0x217   : > { %v2627_v31 = vpop.f32.mrf.mxu0  ;;  %14056 = vmatmul.mubr.msk.f32.gmra.mxu0 %vm364_vm2, %v3480_v25  ;;  %v16618_v37 = vpop.f32.mrf.mxu1  ;;  %14187 = vmatmul.mubr.msk.f32.gmra.mxu1 %vm364_vm2, %v4021_v29  ;;  %v2823_v29 = vld [vmem:[#allocation2 + $0x38] sm:$0xff]  ;;  %v3487_v33 = vld [vmem:[%s15154_s7 + $0xad] sm:$0xff] }
 0x218   : > { %2394 = vst.msk [vmem:[#allocation2 + $0x128] sm:$0xff] %vm303_vm3, %v2355_v36  ;;  %v2856_v42 = vadd.f32 %v2817_v40, %v2627_v31  ;;  %14058 = vmatprep.mubr.msk.f32.mxu0 %vm15088_vm1, %v15087_v1  ;;  %14189 = vmatprep.mubr.msk.f32.mxu1 %vm15088_vm1, %v15087_v1 }
 0x219   : > { %v2317_v44 = vld [vmem:[#allocation2 + $0x130] sm:$0xff]  ;;  %v13792_v38 = vpop.f32.mrf.mxu0  ;;  %v13923_v43 = vpop.f32.mrf.mxu1 }
 0x21a   : > { %2895 = vst.msk [vmem:[#allocation2 + $0x8] sm:$0xff] %vm303_vm3, %v2856_v42  ;;  %v2356_v46 = vadd.f32 %v2317_v44, %v16540_v49  ;;  %v4028_v38 = vld [vmem:[%s15154_s7 + $0xce] sm:$0xff] }
 0x21b   : > { %v2632_v41 = vpop.f32.mrf.mxu0  ;;  %14059 = vmatmul.mubr.msk.f32.gmra.mxu0 %vm364_vm2, %v3481_v35  ;;  %v16631_v47 = vpop.f32.mrf.mxu1  ;;  %14190 = vmatmul.mubr.msk.f32.gmra.mxu1 %vm364_vm2, %v4022_v39  ;;  %v2824_v39 = vld [vmem:[#allocation2 + $0x40] sm:$0xff]  ;;  %v3488_v43 = vld [vmem:[%s15154_s7 + $0xb5] sm:$0xff] }
 0x21c   : > { %2395 = vst.msk [vmem:[#allocation2 + $0x130] sm:$0xff] %vm303_vm3, %v2356_v46  ;;  %v2857_v52 = vadd.f32 %v2818_v50, %v2632_v41  ;;  %14061 = vmatprep.mubr.msk.f32.mxu0 %vm15088_vm1, %v15087_v1  ;;  %14192 = vmatprep.mubr.msk.f32.mxu1 %vm15088_vm1, %v15087_v1 }
 0x21d   : > { %v13795_v54 = vpop.f32.mrf.mxu0  ;;  %v3353_v49 = vld [vmem:[#allocation2] sm:$0xff]  ;;  %v13926_v53 = vpop.f32.mrf.mxu1 }
 0x21e   : > { %2896 = vst.msk [vmem:[#allocation2 + $0x10] sm:$0xff] %vm303_vm3, %v2857_v52  ;;  %v3392_v57 = vadd.f32 %v3353_v49, %v16553_v58  ;;  %v4029_v49 = vld [vmem:[%s15154_s7 + $0xd6] sm:$0xff] }
 0x21f   : > { %v2637_v60 = vpop.f32.mrf.mxu0  ;;  %14062 = vmatmul.mubr.msk.f32.gmra.mxu0 %vm364_vm2, %v3482_v45  ;;  %v16644_v59 = vpop.f32.mrf.mxu1  ;;  %14193 = vmatmul.mubr.msk.f32.gmra.mxu1 %vm364_vm2, %v4023_v48  ;;  %v2825_v48 = vld [vmem:[#allocation2 + $0x48] sm:$0xff]  ;;  %v3489_v53 = vld [vmem:[%s15154_s7 + $0xbd] sm:$0xff] }
 0x220   : > { %3431 = vst.msk [vmem:[#allocation2] sm:$0xff] %vm303_vm3, %v3392_v57  ;;  %v2858_v62 = vadd.f32 %v2819_v51, %v2637_v60  ;;  %14064 = vmatprep.mubr.msk.f32.mxu0 %vm15088_vm1, %v15087_v1  ;;  %14195 = vmatprep.mubr.msk.f32.mxu1 %vm15088_vm1, %v15087_v1 }
 0x221   : > { %v13798_v0 = vpop.f32.mrf.mxu0  ;;  %v3354_v58 = vld [vmem:[#allocation2 + $0x8] sm:$0xff]  ;;  %v13929_v63 = vpop.f32.mrf.mxu1 }
 0x222   : > { %2897 = vst.msk [vmem:[#allocation2 + $0x18] sm:$0xff] %vm303_vm3, %v2858_v62  ;;  %v3393_v4 = vadd.f32 %v3354_v58, %v16566_v3  ;;  %v4030_v58 = vld [vmem:[%s15154_s7 + $0xde] sm:$0xff] }
 0x223   : > { %v2642_v61 = vpop.f32.mrf.mxu0  ;;  %14065 = vmatmul.mubr.msk.f32.gmra.mxu0 %vm364_vm2, %v3483_v55  ;;  %v16657_v5 = vpop.f32.mrf.mxu1  ;;  %14196 = vmatmul.mubr.msk.f32.gmra.mxu1 %vm364_vm2, %v4024_v56  ;;  %v2826_v56 = vld [vmem:[#allocation2 + $0x50] sm:$0xff]  ;;  %v3490_v63 = vld [vmem:[%s15154_s7 + $0xc5] sm:$0xff] }
 0x224   : > { %3432 = vst.msk [vmem:[#allocation2 + $0x8] sm:$0xff] %vm303_vm3, %v3393_v4  ;;  %v2859_v9 = vadd.f32 %v2820_v6, %v2642_v61  ;;  %14067 = vmatprep.mubr.msk.f32.mxu0 %vm15088_vm1, %v15087_v1  ;;  %14198 = vmatprep.mubr.msk.f32.mxu1 %vm15088_vm1, %v15087_v1 }
 0x225   : > { %v13801_v11 = vpop.f32.mrf.mxu0  ;;  %v3355_v3 = vld [vmem:[#allocation2 + $0x10] sm:$0xff]  ;;  %v13932_v10 = vpop.f32.mrf.mxu1 }
 0x226   : > { %2898 = vst.msk [vmem:[#allocation2 + $0x20] sm:$0xff] %vm303_vm3, %v2859_v9  ;;  %v3394_v14 = vadd.f32 %v3355_v3, %v16579_v13  ;;  %v4031_v3 = vld [vmem:[%s15154_s7 + $0xe6] sm:$0xff] }
 0x227   : > { %v2647_v16 = vpop.f32.mrf.mxu0  ;;  %14068 = vmatmul.mubr.msk.f32.gmra.mxu0 %vm364_vm2, %v3484_v2  ;;  %v16670_v15 = vpop.f32.mrf.mxu1  ;;  %14199 = vmatmul.mubr.msk.f32.gmra.mxu1 %vm364_vm2, %v4025_v7  ;;  %v2827_v7 = vld [vmem:[#allocation2 + $0x58] sm:$0xff]  ;;  %v3491_v10 = vld [vmem:[%s15154_s7 + $0xcd] sm:$0xff] }
 0x228   : > { %3433 = vst.msk [vmem:[#allocation2 + $0x10] sm:$0xff] %vm303_vm3, %v3394_v14  ;;  %v2860_v19 = vadd.f32 %v2821_v8, %v2647_v16  ;;  %14070 = vmatprep.mubr.msk.f32.mxu0 %vm15088_vm1, %v15087_v1  ;;  %14201 = vmatprep.mubr.msk.f32.mxu1 %vm15088_vm1, %v15087_v1 }
 0x229   : > { %v13804_v22 = vpop.f32.mrf.mxu0  ;;  %v3356_v13 = vld [vmem:[#allocation2 + $0x18] sm:$0xff]  ;;  %v13935_v21 = vpop.f32.mrf.mxu1 }
 0x22a   : > { %2899 = vst.msk [vmem:[#allocation2 + $0x28] sm:$0xff] %vm303_vm3, %v2860_v19  ;;  %v3395_v24 = vadd.f32 %v3356_v13, %v16592_v20  ;;  %v4032_v13 = vld [vmem:[%s15154_s7 + $0xee] sm:$0xff] }
 0x22b   : > { %v2652_v26 = vpop.f32.mrf.mxu0  ;;  %14071 = vmatmul.mubr.msk.f32.gmra.mxu0 %vm364_vm2, %v3485_v12  ;;  %v16683_v25 = vpop.f32.mrf.mxu1  ;;  %14202 = vmatmul.mubr.msk.f32.gmra.mxu1 %vm364_vm2, %v4026_v17  ;;  %v2828_v17 = vld [vmem:[#allocation2 + $0x60] sm:$0xff]  ;;  %v3492_v21 = vld [vmem:[%s15154_s7 + $0xd5] sm:$0xff] }
 0x22c   : > { %3434 = vst.msk [vmem:[#allocation2 + $0x18] sm:$0xff] %vm303_vm3, %v3395_v24  ;;  %v2861_v30 = vadd.f32 %v2822_v18, %v2652_v26  ;;  %14073 = vmatprep.mubr.msk.f32.mxu0 %vm15088_vm1, %v15087_v1  ;;  %14204 = vmatprep.mubr.msk.f32.mxu1 %vm15088_vm1, %v15087_v1 }
 0x22d   : > { %v13807_v32 = vpop.f32.mrf.mxu0  ;;  %v3357_v20 = vld [vmem:[#allocation2 + $0x20] sm:$0xff]  ;;  %v13938_v31 = vpop.f32.mrf.mxu1 }
 0x22e   : > { %2900 = vst.msk [vmem:[#allocation2 + $0x30] sm:$0xff] %vm303_vm3, %v2861_v30  ;;  %v3396_v34 = vadd.f32 %v3357_v20, %v16605_v28  ;;  %v4033_v20 = vld [vmem:[%s15154_s7 + $0xf6] sm:$0xff] }
 0x22f   : > { %v2657_v36 = vpop.f32.mrf.mxu0  ;;  %14074 = vmatmul.mubr.msk.f32.gmra.mxu0 %vm364_vm2, %v3486_v23  ;;  %v16696_v35 = vpop.f32.mrf.mxu1  ;;  %14205 = vmatmul.mubr.msk.f32.gmra.mxu1 %vm364_vm2, %v4027_v27  ;;  %v2829_v27 = vld [vmem:[#allocation2 + $0x68] sm:$0xff]  ;;  %v3493_v31 = vld [vmem:[%s15154_s7 + $0xdd] sm:$0xff] }
 0x230   : > { %3435 = vst.msk [vmem:[#allocation2 + $0x20] sm:$0xff] %vm303_vm3, %v3396_v34  ;;  %v2862_v40 = vadd.f32 %v2823_v29, %v2657_v36  ;;  %14076 = vmatprep.mubr.msk.f32.mxu0 %vm15088_vm1, %v15087_v1  ;;  %14207 = vmatprep.mubr.msk.f32.mxu1 %vm15088_vm1, %v15087_v1 }
 0x231   : > { %v13810_v42 = vpop.f32.mrf.mxu0  ;;  %v3358_v28 = vld [vmem:[#allocation2 + $0x28] sm:$0xff]  ;;  %v13941_v41 = vpop.f32.mrf.mxu1 }
 0x232   : > { %2901 = vst.msk [vmem:[#allocation2 + $0x38] sm:$0xff] %vm303_vm3, %v2862_v40  ;;  %v3397_v44 = vadd.f32 %v3358_v28, %v16618_v37  ;;  %v4034_v28 = vld [vmem:[%s15154_s7 + $0xfe] sm:$0xff] }
 0x233   : > { %v2662_v46 = vpop.f32.mrf.mxu0  ;;  %14077 = vmatmul.mubr.msk.f32.gmra.mxu0 %vm364_vm2, %v3487_v33  ;;  %v16709_v45 = vpop.f32.mrf.mxu1  ;;  %14208 = vmatmul.mubr.msk.f32.gmra.mxu1 %vm364_vm2, %v4028_v38  ;;  %v2830_v38 = vld [vmem:[#allocation2 + $0x70] sm:$0xff]  ;;  %v3494_v41 = vld [vmem:[%s15154_s7 + $0xe5] sm:$0xff] }
 0x234   : > { %3436 = vst.msk [vmem:[#allocation2 + $0x28] sm:$0xff] %vm303_vm3, %v3397_v44  ;;  %v2863_v50 = vadd.f32 %v2824_v39, %v2662_v46  ;;  %14079 = vmatprep.mubr.msk.f32.mxu0 %vm15088_vm1, %v15087_v1  ;;  %14210 = vmatprep.mubr.msk.f32.mxu1 %vm15088_vm1, %v15087_v1 }
 0x235   : > { %v13813_v52 = vpop.f32.mrf.mxu0  ;;  %v3359_v37 = vld [vmem:[#allocation2 + $0x30] sm:$0xff]  ;;  %v13944_v60 = vpop.f32.mrf.mxu1 }
 0x236   : > { %2902 = vst.msk [vmem:[#allocation2 + $0x40] sm:$0xff] %vm303_vm3, %v2863_v50  ;;  %v3398_v54 = vadd.f32 %v3359_v37, %v16631_v47  ;;  %v4035_v37 = vld [vmem:[%s15154_s7 + $0x106] sm:$0xff] }
 0x237   : > { %v2667_v57 = vpop.f32.mrf.mxu0  ;;  %14080 = vmatmul.mubr.msk.f32.gmra.mxu0 %vm364_vm2, %v3488_v43  ;;  %v16722_v55 = vpop.f32.mrf.mxu1  ;;  %14211 = vmatmul.mubr.msk.f32.gmra.mxu1 %vm364_vm2, %v4029_v49  ;;  %v2831_v49 = vld [vmem:[#allocation2 + $0x78] sm:$0xff]  ;;  %v3495_v60 = vld [vmem:[%s15154_s7 + $0xed] sm:$0xff] }
 0x238   : > { %3437 = vst.msk [vmem:[#allocation2 + $0x30] sm:$0xff] %vm303_vm3, %v3398_v54  ;;  %v2864_v51 = vadd.f32 %v2825_v48, %v2667_v57  ;;  %14082 = vmatprep.mubr.msk.f32.mxu0 %vm15088_vm1, %v15087_v1  ;;  %14213 = vmatprep.mubr.msk.f32.mxu1 %vm15088_vm1, %v15087_v1 }
 0x239   : > { %v13816_v62 = vpop.f32.mrf.mxu0  ;;  %v3360_v47 = vld [vmem:[#allocation2 + $0x38] sm:$0xff]  ;;  %v13947_v61 = vpop.f32.mrf.mxu1 }
 0x23a   : > { %2903 = vst.msk [vmem:[#allocation2 + $0x48] sm:$0xff] %vm303_vm3, %v2864_v51  ;;  %v3399_v0 = vadd.f32 %v3360_v47, %v16644_v59  ;;  %v4036_v47 = vld [vmem:[%s15154_s7 + $0x10e] sm:$0xff] }
 0x23b   : > { %v2672_v4 = vpop.f32.mrf.mxu0  ;;  %14083 = vmatmul.mubr.msk.f32.gmra.mxu0 %vm364_vm2, %v3489_v53  ;;  %v16735_v2 = vpop.f32.mrf.mxu1  ;;  %14214 = vmatmul.mubr.msk.f32.gmra.mxu1 %vm364_vm2, %v4030_v58  ;;  %v2832_v58 = vld [vmem:[#allocation2 + $0x80] sm:$0xff]  ;;  %v3496_v61 = vld [vmem:[%s15154_s7 + $0xf5] sm:$0xff] }
 0x23c   : > { %3438 = vst.msk [vmem:[#allocation2 + $0x38] sm:$0xff] %vm303_vm3, %v3399_v0  ;;  %v2865_v6 = vadd.f32 %v2826_v56, %v2672_v4  ;;  %14085 = vmatprep.mubr.msk.f32.mxu0 %vm15088_vm1, %v15087_v1  ;;  %14216 = vmatprep.mubr.msk.f32.mxu1 %vm15088_vm1, %v15087_v1 }
 0x23d   : > { %v13819_v9 = vpop.f32.mrf.mxu0  ;;  %v3361_v59 = vld [vmem:[#allocation2 + $0x40] sm:$0xff]  ;;  %v13950_v16 = vpop.f32.mrf.mxu1 }
 0x23e   : > { %2904 = vst.msk [vmem:[#allocation2 + $0x50] sm:$0xff] %vm303_vm3, %v2865_v6  ;;  %v3400_v11 = vadd.f32 %v3361_v59, %v16657_v5  ;;  %v4037_v59 = vld [vmem:[%s15154_s7 + $0x116] sm:$0xff] }
 0x23f   : > { %v2677_v14 = vpop.f32.mrf.mxu0  ;;  %14086 = vmatmul.mubr.msk.f32.gmra.mxu0 %vm364_vm2, %v3490_v63  ;;  %v16748_v12 = vpop.f32.mrf.mxu1  ;;  %14217 = vmatmul.mubr.msk.f32.gmra.mxu1 %vm364_vm2, %v4031_v3  ;;  %v2833_v3 = vld [vmem:[#allocation2 + $0x88] sm:$0xff]  ;;  %v3497_v16 = vld [vmem:[%s15154_s7 + $0xfd] sm:$0xff] }
 0x240   : > { %3439 = vst.msk [vmem:[#allocation2 + $0x40] sm:$0xff] %vm303_vm3, %v3400_v11  ;;  %v2866_v8 = vadd.f32 %v2827_v7, %v2677_v14  ;;  %14088 = vmatprep.mubr.msk.f32.mxu0 %vm15088_vm1, %v15087_v1  ;;  %14219 = vmatprep.mubr.msk.f32.mxu1 %vm15088_vm1, %v15087_v1 }
 0x241   : > { %v13822_v19 = vpop.f32.mrf.mxu0  ;;  %v3362_v5 = vld [vmem:[#allocation2 + $0x48] sm:$0xff]  ;;  %v13953_v26 = vpop.f32.mrf.mxu1 }
 0x242   : > { %2905 = vst.msk [vmem:[#allocation2 + $0x58] sm:$0xff] %vm303_vm3, %v2866_v8  ;;  %v3401_v22 = vadd.f32 %v3362_v5, %v16670_v15  ;;  %v4038_v5 = vld [vmem:[%s15154_s7 + $0x11e] sm:$0xff] }
 0x243   : > { %v2682_v24 = vpop.f32.mrf.mxu0  ;;  %14089 = vmatmul.mubr.msk.f32.gmra.mxu0 %vm364_vm2, %v3491_v10  ;;  %v16761_v23 = vpop.f32.mrf.mxu1  ;;  %14220 = vmatmul.mubr.msk.f32.gmra.mxu1 %vm364_vm2, %v4032_v13  ;;  %v2834_v13 = vld [vmem:[#allocation2 + $0x90] sm:$0xff]  ;;  %v3498_v26 = vld [vmem:[%s15154_s7 + $0x105] sm:$0xff] }
 0x244   : > { %3440 = vst.msk [vmem:[#allocation2 + $0x48] sm:$0xff] %vm303_vm3, %v3401_v22  ;;  %v2867_v18 = vadd.f32 %v2828_v17, %v2682_v24  ;;  %14091 = vmatprep.mubr.msk.f32.mxu0 %vm15088_vm1, %v15087_v1  ;;  %14222 = vmatprep.mubr.msk.f32.mxu1 %vm15088_vm1, %v15087_v1 }
 0x245   : > { %v13825_v30 = vpop.f32.mrf.mxu0  ;;  %v3363_v15 = vld [vmem:[#allocation2 + $0x50] sm:$0xff]  ;;  %v13956_v36 = vpop.f32.mrf.mxu1 }
 0x246   : > { %2906 = vst.msk [vmem:[#allocation2 + $0x60] sm:$0xff] %vm303_vm3, %v2867_v18  ;;  %v3402_v32 = vadd.f32 %v3363_v15, %v16683_v25  ;;  %v4039_v15 = vld [vmem:[%s15154_s7 + $0x126] sm:$0xff] }
 0x247   : > { %v2687_v34 = vpop.f32.mrf.mxu0  ;;  %14092 = vmatmul.mubr.msk.f32.gmra.mxu0 %vm364_vm2, %v3492_v21  ;;  %v16774_v33 = vpop.f32.mrf.mxu1  ;;  %14223 = vmatmul.mubr.msk.f32.gmra.mxu1 %vm364_vm2, %v4033_v20  ;;  %v2835_v20 = vld [vmem:[#allocation2 + $0x98] sm:$0xff]  ;;  %v3499_v36 = vld [vmem:[%s15154_s7 + $0x10d] sm:$0xff] }
 0x248   : > { %3441 = vst.msk [vmem:[#allocation2 + $0x50] sm:$0xff] %vm303_vm3, %v3402_v32  ;;  %v2868_v29 = vadd.f32 %v2829_v27, %v2687_v34  ;;  %14094 = vmatprep.mubr.msk.f32.mxu0 %vm15088_vm1, %v15087_v1  ;;  %14225 = vmatprep.mubr.msk.f32.mxu1 %vm15088_vm1, %v15087_v1 }
 0x249   : > { %v13828_v40 = vpop.f32.mrf.mxu0  ;;  %v3364_v25 = vld [vmem:[#allocation2 + $0x58] sm:$0xff]  ;;  %v13959_v46 = vpop.f32.mrf.mxu1 }
 0x24a   : > { %2907 = vst.msk [vmem:[#allocation2 + $0x68] sm:$0xff] %vm303_vm3, %v2868_v29  ;;  %v3403_v42 = vadd.f32 %v3364_v25, %v16696_v35  ;;  %v4040_v25 = vld [vmem:[%s15154_s7 + $0x12e] sm:$0xff] }
 0x24b   : > { %v2692_v44 = vpop.f32.mrf.mxu0  ;;  %14095 = vmatmul.mubr.msk.f32.gmra.mxu0 %vm364_vm2, %v3493_v31  ;;  %v16787_v43 = vpop.f32.mrf.mxu1  ;;  %14226 = vmatmul.mubr.msk.f32.gmra.mxu1 %vm364_vm2, %v4034_v28  ;;  %v2836_v28 = vld [vmem:[#allocation2 + $0xa0] sm:$0xff]  ;;  %v3500_v46 = vld [vmem:[%s15154_s7 + $0x115] sm:$0xff] }
 0x24c   : > { %3442 = vst.msk [vmem:[#allocation2 + $0x58] sm:$0xff] %vm303_vm3, %v3403_v42  ;;  %v2869_v39 = vadd.f32 %v2830_v38, %v2692_v44  ;;  %14097 = vmatprep.mubr.msk.f32.mxu0 %vm15088_vm1, %v15087_v1  ;;  %14228 = vmatprep.mubr.msk.f32.mxu1 %vm15088_vm1, %v15087_v1 }
 0x24d   : > { %v13831_v50 = vpop.f32.mrf.mxu0  ;;  %v3365_v35 = vld [vmem:[#allocation2 + $0x60] sm:$0xff]  ;;  %v13962_v57 = vpop.f32.mrf.mxu1 }
 0x24e   : > { %2908 = vst.msk [vmem:[#allocation2 + $0x70] sm:$0xff] %vm303_vm3, %v2869_v39  ;;  %v3404_v52 = vadd.f32 %v3365_v35, %v16709_v45  ;;  %v4041_v35 = vld [vmem:[%s15154_s7 + $0x136] sm:$0xff] }
 0x24f   : > { %v2697_v54 = vpop.f32.mrf.mxu0  ;;  %14098 = vmatmul.mubr.msk.f32.gmra.mxu0 %vm364_vm2, %v3494_v41  ;;  %v16800_v53 = vpop.f32.mrf.mxu1  ;;  %14229 = vmatmul.mubr.msk.f32.gmra.mxu1 %vm364_vm2, %v4035_v37  ;;  %v2837_v37 = vld [vmem:[#allocation2 + $0xa8] sm:$0xff]  ;;  %v3501_v57 = vld [vmem:[%s15154_s7 + $0x11d] sm:$0xff] }
 0x250   : > { %3443 = vst.msk [vmem:[#allocation2 + $0x60] sm:$0xff] %vm303_vm3, %v3404_v52  ;;  %v2870_v48 = vadd.f32 %v2831_v49, %v2697_v54  ;;  %14100 = vmatprep.mubr.msk.f32.mxu0 %vm15088_vm1, %v15087_v1  ;;  %14231 = vmatprep.mubr.msk.f32.mxu1 %vm15088_vm1, %v15087_v1 }
 0x251   : > { %v13834_v51 = vpop.f32.mrf.mxu0  ;;  %v3366_v45 = vld [vmem:[#allocation2 + $0x68] sm:$0xff]  ;;  %v13965_v4 = vpop.f32.mrf.mxu1 }
 0x252   : > { %2909 = vst.msk [vmem:[#allocation2 + $0x78] sm:$0xff] %vm303_vm3, %v2870_v48  ;;  %v3405_v62 = vadd.f32 %v3366_v45, %v16722_v55  ;;  %v4042_v45 = vld [vmem:[%s15154_s7 + $0x13e] sm:$0xff] }
 0x253   : > { %v2702_v0 = vpop.f32.mrf.mxu0  ;;  %14101 = vmatmul.mubr.msk.f32.gmra.mxu0 %vm364_vm2, %v3495_v60  ;;  %v16813_v63 = vpop.f32.mrf.mxu1  ;;  %14232 = vmatmul.mubr.msk.f32.gmra.mxu1 %vm364_vm2, %v4036_v47  ;;  %v2838_v47 = vld [vmem:[#allocation2 + $0xb0] sm:$0xff]  ;;  %v3502_v4 = vld [vmem:[%s15154_s7 + $0x125] sm:$0xff] }
 0x254   : > { %3444 = vst.msk [vmem:[#allocation2 + $0x68] sm:$0xff] %vm303_vm3, %v3405_v62  ;;  %v2871_v56 = vadd.f32 %v2832_v58, %v2702_v0  ;;  %14103 = vmatprep.mubr.msk.f32.mxu0 %vm15088_vm1, %v15087_v1  ;;  %14234 = vmatprep.mubr.msk.f32.mxu1 %vm15088_vm1, %v15087_v1 }
 0x255   : > { %v13837_v6 = vpop.f32.mrf.mxu0  ;;  %v3367_v55 = vld [vmem:[#allocation2 + $0x70] sm:$0xff]  ;;  %v13968_v14 = vpop.f32.mrf.mxu1 }
 0x256   : > { %2910 = vst.msk [vmem:[#allocation2 + $0x80] sm:$0xff] %vm303_vm3, %v2871_v56  ;;  %v3406_v9 = vadd.f32 %v3367_v55, %v16735_v2  ;;  %v4043_v55 = vld [vmem:[%s15154_s7 + $0x146] sm:$0xff] }
 0x257   : > { %v2707_v11 = vpop.f32.mrf.mxu0  ;;  %14104 = vmatmul.mubr.msk.f32.gmra.mxu0 %vm364_vm2, %v3496_v61  ;;  %v16826_v10 = vpop.f32.mrf.mxu1  ;;  %14235 = vmatmul.mubr.msk.f32.gmra.mxu1 %vm364_vm2, %v4037_v59  ;;  %v2839_v59 = vld [vmem:[#allocation2 + $0xb8] sm:$0xff]  ;;  %v3503_v14 = vld [vmem:[%s15154_s7 + $0x12d] sm:$0xff] }
 0x258   : > { %3445 = vst.msk [vmem:[#allocation2 + $0x70] sm:$0xff] %vm303_vm3, %v3406_v9  ;;  %v2872_v7 = vadd.f32 %v2833_v3, %v2707_v11  ;;  %14106 = vmatprep.mubr.msk.f32.mxu0 %vm15088_vm1, %v15087_v1  ;;  %14237 = vmatprep.mubr.msk.f32.mxu1 %vm15088_vm1, %v15087_v1 }
 0x259   : > { %v13840_v8 = vpop.f32.mrf.mxu0  ;;  %v3368_v2 = vld [vmem:[#allocation2 + $0x78] sm:$0xff]  ;;  %v13971_v24 = vpop.f32.mrf.mxu1 }
 0x25a   : > { %2911 = vst.msk [vmem:[#allocation2 + $0x88] sm:$0xff] %vm303_vm3, %v2872_v7  ;;  %v3407_v19 = vadd.f32 %v3368_v2, %v16748_v12  ;;  %v2840_v24 = vld [vmem:[#allocation2 + $0xc0] sm:$0xff] }
 0x25b   : > { %v2712_v22 = vpop.f32.mrf.mxu0  ;;  %14107 = vmatmul.mubr.msk.f32.gmra.mxu0 %vm364_vm2, %v3497_v16  ;;  %v16839_v21 = vpop.f32.mrf.mxu1  ;;  %14238 = vmatmul.mubr.msk.f32.gmra.mxu1 %vm364_vm2, %v4038_v5  ;;  %v15089_v5 = vmov 0  }
 0x25c   : > { %3446 = vst.msk [vmem:[#allocation2 + $0x78] sm:$0xff] %vm303_vm3, %v3407_v19  ;;  %v2873_v17 = vadd.f32 %v2834_v13, %v2712_v22  ;;  %14109 = vmatprep.mubr.msk.f32.mxu0 %vm15088_vm1, %v15087_v1  ;;  %14240 = vmatprep.mubr.msk.f32.mxu1 %vm15088_vm1, %v15087_v1  ;;  %v4044_v19 = vld [vmem:[%s15154_s7 + $0x14e] sm:$0xff] }
 0x25d   : > { %v13843_v18 = vpop.f32.mrf.mxu0  ;;  %v3369_v12 = vld [vmem:[#allocation2 + $0x80] sm:$0xff]  ;;  %v13974_v34 = vpop.f32.mrf.mxu1  ;;  %15059 = vset.pattern.permute.xlu0 %v15089_v5  ;;  %15060 = vset.pattern.permute.xlu1 %v15089_v5 }
 0x25e   : > { %2912 = vst.msk [vmem:[#allocation2 + $0x90] sm:$0xff] %vm303_vm3, %v2873_v17  ;;  %v3408_v30 = vadd.f32 %v3369_v12, %v16761_v23  ;;  %v2841_v34 = vld [vmem:[#allocation2 + $0xc8] sm:$0xff] }
 0x25f   : > { %v2717_v32 = vpop.f32.mrf.mxu0  ;;  %14110 = vmatmul.mubr.msk.f32.gmra.mxu0 %vm364_vm2, %v3498_v26  ;;  %v16852_v31 = vpop.f32.mrf.mxu1  ;;  %14241 = vmatmul.mubr.msk.f32.gmra.mxu1 %vm364_vm2, %v4039_v15 }
 0x260   : > { %3447 = vst.msk [vmem:[#allocation2 + $0x80] sm:$0xff] %vm303_vm3, %v3408_v30  ;;  %v2874_v27 = vadd.f32 %v2835_v20, %v2717_v32  ;;  %14112 = vmatprep.mubr.msk.f32.mxu0 %vm15088_vm1, %v15087_v1  ;;  %14243 = vmatprep.mubr.msk.f32.mxu1 %vm15088_vm1, %v15087_v1  ;;  %v4045_v32 = vld [vmem:[%s15154_s7 + $0x156] sm:$0xff] }
 0x261   : > { %v13846_v29 = vpop.f32.mrf.mxu0  ;;  %v3370_v23 = vld [vmem:[#allocation2 + $0x88] sm:$0xff]  ;;  %v13977_v44 = vpop.f32.mrf.mxu1 }
 0x262   : > { %2913 = vst.msk [vmem:[#allocation2 + $0x98] sm:$0xff] %vm303_vm3, %v2874_v27  ;;  %v3409_v40 = vadd.f32 %v3370_v23, %v16774_v33  ;;  %v3505_v29 = vld [vmem:[%s15154_s7 + $0x13d] sm:$0xff] }
 0x263   : > { %v2722_v42 = vpop.f32.mrf.mxu0  ;;  %14113 = vmatmul.mubr.msk.f32.gmra.mxu0 %vm364_vm2, %v3499_v36  ;;  %v16865_v41 = vpop.f32.mrf.mxu1  ;;  %14244 = vmatmul.mubr.msk.f32.gmra.mxu1 %vm364_vm2, %v4040_v25 }
 0x264   : > { %3448 = vst.msk [vmem:[#allocation2 + $0x88] sm:$0xff] %vm303_vm3, %v3409_v40  ;;  %v2875_v38 = vadd.f32 %v2836_v28, %v2722_v42  ;;  %14115 = vmatprep.mubr.msk.f32.mxu0 %vm15088_vm1, %v15087_v1  ;;  %14246 = vmatprep.mubr.msk.f32.mxu1 %vm15088_vm1, %v15087_v1 }
 0x265   : > { %v13849_v39 = vpop.f32.mrf.mxu0  ;;  %v3371_v33 = vld [vmem:[#allocation2 + $0x90] sm:$0xff]  ;;  %v13980_v54 = vpop.f32.mrf.mxu1 }
 0x266   : > { %2914 = vst.msk [vmem:[#allocation2 + $0xa0] sm:$0xff] %vm303_vm3, %v2875_v38  ;;  %v3410_v50 = vadd.f32 %v3371_v33, %v16787_v43  ;;  %v2842_v38 = vld [vmem:[#allocation2 + $0xd0] sm:$0xff]  ;;  %v3506_v33 = vld [vmem:[%s15154_s7 + $0x145] sm:$0xff]  ;;  %v2843_v54 = vld [vmem:[#allocation2 + $0xd8] sm:$0xff] }
 0x267   : > { %v2727_v52 = vpop.f32.mrf.mxu0  ;;  %14116 = vmatmul.mubr.msk.f32.gmra.mxu0 %vm364_vm2, %v3500_v46  ;;  %v16878_v60 = vpop.f32.mrf.mxu1  ;;  %14247 = vmatmul.mubr.msk.f32.gmra.mxu1 %vm364_vm2, %v4041_v35 }
 0x268   : > { %3449 = vst.msk [vmem:[#allocation2 + $0x90] sm:$0xff] %vm303_vm3, %v3410_v50  ;;  %v2876_v49 = vadd.f32 %v2837_v37, %v2727_v52  ;;  %14118 = vmatprep.mubr.msk.f32.mxu0 %vm15088_vm1, %v15087_v1  ;;  %14249 = vmatprep.mubr.msk.f32.mxu1 %vm15088_vm1, %v15087_v1 }
 0x269   : > { %v13852_v48 = vpop.f32.mrf.mxu0  ;;  %v3372_v43 = vld [vmem:[#allocation2 + $0x98] sm:$0xff]  ;;  %v13983_v0 = vpop.f32.mrf.mxu1 }
 0x26a   : > { %2915 = vst.msk [vmem:[#allocation2 + $0xa8] sm:$0xff] %vm303_vm3, %v2876_v49  ;;  %v3411_v51 = vadd.f32 %v3372_v43, %v16800_v53  ;;  %v3507_v48 = vld [vmem:[%s15154_s7 + $0x14d] sm:$0xff] }
 0x26b   : > { %v2732_v62 = vpop.f32.mrf.mxu0  ;;  %14119 = vmatmul.mubr.msk.f32.gmra.mxu0 %vm364_vm2, %v3501_v57  ;;  %v16891_v61 = vpop.f32.mrf.mxu1  ;;  %14250 = vmatmul.mubr.msk.f32.gmra.mxu1 %vm364_vm2, %v4042_v45  ;;  %v261_v43 = vld [vmem:[%s19197_s5 + $0x10] sm:$0xff] }
 0x26c   : > { %3450 = vst.msk [vmem:[#allocation2 + $0x98] sm:$0xff] %vm303_vm3, %v3411_v51  ;;  %v2877_v58 = vadd.f32 %v2838_v47, %v2732_v62  ;;  %14121 = vmatprep.mubr.msk.f32.mxu0 %vm15088_vm1, %v15087_v1  ;;  %14252 = vmatprep.mubr.msk.f32.mxu1 %vm15088_vm1, %v15087_v1  ;;  %vm283_vm6 = vcmp.gt.f32.partialorder %v261_v43, 0.0 }
 0x26d   : > { %v13855_v56 = vpop.f32.mrf.mxu0  ;;  %v3373_v53 = vld [vmem:[#allocation2 + $0xa0] sm:$0xff]  ;;  %v13986_v11 = vpop.f32.mrf.mxu1  ;;  %v5398_v47 = vsel %vm283_vm6, 1, %v15089_v5 }
 0x26e   : > { %2916 = vst.msk [vmem:[#allocation2 + $0xb0] sm:$0xff] %vm303_vm3, %v2877_v58  ;;  %v3412_v6 = vadd.f32 %v3373_v53, %v16813_v63  ;;  %v259_v63 = vld [vmem:[%s19197_s5] sm:$0xff]  ;;  %5425 = vperm.xlu1 %15060, %v5398_v47   ;;  %v3508_v53 = vld [vmem:[%s15154_s7 + $0x155] sm:$0xff]  ;;  %v2845_v11 = vld [vmem:[#allocation2 + $0xe8] sm:$0xff] }
 0x26f   : > { %v2737_v9 = vpop.f32.mrf.mxu0  ;;  %14122 = vmatmul.mubr.msk.f32.gmra.mxu0 %vm364_vm2, %v3502_v4  ;;  %v16907_v8 = vpop.f32.mrf.mxu1  ;;  %14253 = vmatmul.mubr.msk.f32.gmra.mxu1 %vm364_vm2, %v4043_v55  ;;  %vm281_vm4 = vcmp.gt.f32.partialorder %v259_v63, 0.0  ;;  %v2844_v58 = vld [vmem:[#allocation2 + $0xe0] sm:$0xff] }
 0x270   : > { %3451 = vst.msk [vmem:[#allocation2 + $0xa0] sm:$0xff] %vm303_vm3, %v3412_v6  ;;  %v2878_v3 = vadd.f32 %v2839_v59, %v2737_v9  ;;  %14124 = vmatprep.mubr.msk.f32.mxu0 %vm15088_vm1, %v15087_v1  ;;  %14255 = vmatprep.mubr.msk.f32.mxu1 %vm15088_vm1, %v15087_v1  ;;  %v5396_v22 = vsel %vm281_vm4, 1, %v15089_v5  ;;  %v4544_v63 = vld [vmem:[%s15154_s7 + $0x27] sm:$0xff] }
 0x271   : > { %v13858_v7 = vpop.f32.mrf.mxu0  ;;  %v3374_v16 = vld [vmem:[#allocation2 + $0xa8] sm:$0xff]  ;;  %v13989_v17 = vpop.f32.mrf.mxu1  ;;  %5419 = vperm.xlu0 %15059, %v5396_v22  }
 0x272   : > { %2917 = vst.msk [vmem:[#allocation2 + $0xb8] sm:$0xff] %vm303_vm3, %v2878_v3  ;;  %v3413_v2 = vadd.f32 %v3374_v16, %v16826_v10  ;;  %v3504_v10 = vld [vmem:[%s15154_s7 + $0x135] sm:$0xff] }
 0x273   : > { %v2742_v13 = vpop.f32.mrf.mxu0  ;;  %14125 = vmatmul.mubr.msk.f32.gmra.mxu0 %vm364_vm2, %v3503_v14  ;;  %v16923_v30 = vpop.f32.mrf.mxu1  ;;  %14256 = vmatmul.mubr.msk.f32.gmra.mxu1 %vm364_vm2, %v4044_v19  ;;  %v262_v7 = vld [vmem:[%s19197_s5 + $0x18] sm:$0xff] }
 0x274   : > { %3452 = vst.msk [vmem:[#allocation2 + $0xa8] sm:$0xff] %vm303_vm3, %v3413_v2  ;;  %v2879_v26 = vadd.f32 %v2840_v24, %v2742_v13  ;;  %14127 = vmatprep.mubr.msk.f32.mxu0 %vm15088_vm1, %v15087_v1  ;;  %14258 = vmatprep.mubr.msk.f32.mxu1 %vm15088_vm1, %v15087_v1  ;;  %vm284_vm7 = vcmp.gt.f32.partialorder %v262_v7, 0.0  ;;  %v2846_v24 = vld [vmem:[#allocation2 + $0xf0] sm:$0xff] }
 0x275   : > { %v13861_v18 = vpop.f32.mrf.mxu0  ;;  %v3375_v12 = vld [vmem:[#allocation2 + $0xb0] sm:$0xff]  ;;  %v13992_v27 = vpop.f32.mrf.mxu1  ;;  %v5399_v22 = vsel %vm284_vm7, 1, %v15089_v5 }
 0x276   : > { %2918 = vst.msk [vmem:[#allocation2 + $0xc0] sm:$0xff] %vm303_vm3, %v2879_v26  ;;  %v3414_v15 = vadd.f32 %v3375_v12, %v16839_v21  ;;  %v260_v21 = vld [vmem:[%s19197_s5 + $0x8] sm:$0xff]  ;;  %5428 = vperm.xlu1 %15060, %v5399_v22  }
 0x277   : > { %v2747_v20 = vpop.f32.mrf.mxu0  ;;  %14128 = vmatmul.mubr.msk.f32.gmra.mxu0 %vm364_vm2, %v3504_v10  ;;  %v16939_v25 = vpop.f32.mrf.mxu1  ;;  %14259 = vmatmul.mubr.msk.f32.gmra.mxu1 %vm364_vm2, %v4045_v32  ;;  %vm282_vm5 = vcmp.gt.f32.partialorder %v260_v21, 0.0  ;;  %v4545_v10 = vld [vmem:[%s15154_s7 + $0x2f] sm:$0xff] }
 0x278   : > { %3453 = vst.msk [vmem:[#allocation2 + $0xb0] sm:$0xff] %vm303_vm3, %v3414_v15  ;;  %v2880_v36 = vadd.f32 %v2841_v34, %v2747_v20  ;;  %14130 = vmatprep.mubr.msk.f32.mxu0 %vm15088_vm1, %v15087_v1  ;;  %v5397_v28 = vsel %vm282_vm5, 1, %v15089_v5  ;;  %v2847_v20 = vld [vmem:[#allocation2 + $0xf8] sm:$0xff] }
 0x279   : > { %v13864_v23 = vpop.f32.mrf.mxu0  ;;  %v3376_v40 = vld [vmem:[#allocation2 + $0xb8] sm:$0xff]  ;;  %v13995_v46 = vpop.f32.mrf.mxu1  ;;  %5422 = vperm.xlu0 %15059, %v5397_v28  }
 0x27a   : > { %2919 = vst.msk [vmem:[#allocation2 + $0xc8] sm:$0xff] %vm303_vm3, %v2880_v36  ;;  %v3415_v42 = vadd.f32 %v3376_v40, %v16852_v31  ;;  %v4546_v36 = vld [vmem:[%s15154_s7 + $0x37] sm:$0xff] }
 0x27b   : > { %v2752_v44 = vpop.f32.mrf.mxu0  ;;  %14131 = vmatmul.mubr.msk.f32.gmra.mxu0 %vm364_vm2, %v3505_v29  ;;  %v16950_v52 = vpop.f32.mrf.mxu1  ;;  %v263_v29 = vld [vmem:[%s19197_s5 + $0x20] sm:$0xff] }
 0x27c   : > { %3454 = vst.msk [vmem:[#allocation2 + $0xb8] sm:$0xff] %vm303_vm3, %v3415_v42  ;;  %v2881_v39 = vadd.f32 %v2842_v38, %v2752_v44  ;;  %14133 = vmatprep.mubr.msk.f32.mxu0 %vm15088_vm1, %v15087_v1  ;;  %vm285_vm8 = vcmp.gt.f32.partialorder %v263_v29, 0.0  ;;  %v2848_v44 = vld [vmem:[#allocation2 + $0x100] sm:$0xff] }
 0x27d   : > { %v13867_v50 = vpop.f32.mrf.mxu0  ;;  %v3377_v35 = vld [vmem:[#allocation2 + $0xc0] sm:$0xff]  ;;  %v13998_v49 = vpop.f32.mrf.mxu1  ;;  %v5400_v42 = vsel %vm285_vm8, 1, %v15089_v5 }
 0x27e   : > { %2920 = vst.msk [vmem:[#allocation2 + $0xd0] sm:$0xff] %vm303_vm3, %v2881_v39  ;;  %v3416_v31 = vadd.f32 %v3377_v35, %v16865_v41  ;;  %5431 = vperm.xlu0 %15059, %v5400_v42   ;;  %v4547_v39 = vld [vmem:[%s15154_s7 + $0x3f] sm:$0xff] }
 0x27f   : > { %v2757_v37 = vpop.f32.mrf.mxu0  ;;  %14134 = vmatmul.mubr.msk.f32.gmra.mxu0 %vm364_vm2, %v3506_v33  ;;  %v16962_v41 = vpop.f32.mrf.mxu1 }
 0x280   : > { %3455 = vst.msk [vmem:[#allocation2 + $0xc0] sm:$0xff] %vm303_vm3, %v3416_v31  ;;  %v2882_v57 = vadd.f32 %v2843_v54, %v2757_v37  ;;  %14136 = vmatprep.mubr.msk.f32.mxu0 %vm15088_vm1, %v15087_v1  ;;  %v2849_v37 = vld [vmem:[#allocation2 + $0x108] sm:$0xff] }
 0x281   : > { %v13870_v51 = vpop.f32.mrf.mxu0  ;;  %v3378_v45 = vld [vmem:[#allocation2 + $0xc8] sm:$0xff]  ;;  %v14001_v4 = vpop.f32.mrf.mxu1 }
 0x282   : > { %2921 = vst.msk [vmem:[#allocation2 + $0xd8] sm:$0xff] %vm303_vm3, %v2882_v57  ;;  %v3417_v62 = vadd.f32 %v3378_v45, %v16878_v60  ;;  %v4548_v57 = vld [vmem:[%s15154_s7 + $0x47] sm:$0xff] }
 0x283   : > { %v2762_v0 = vpop.f32.mrf.mxu0  ;;  %14137 = vmatmul.mubr.msk.f32.gmra.mxu0 %vm364_vm2, %v3507_v48  ;;  %v16972_v9 = vpop.f32.mrf.mxu1  ;;  %v264_v48 = vld [vmem:[%s19197_s5 + $0x28] sm:$0xff] }
 0x284   : > { %3456 = vst.msk [vmem:[#allocation2 + $0xc8] sm:$0xff] %vm303_vm3, %v3417_v62  ;;  %v2883_v56 = vadd.f32 %v2844_v58, %v2762_v0  ;;  %14139 = vmatprep.mubr.msk.f32.mxu0 %vm15088_vm1, %v15087_v1  ;;  %vm286_vm9 = vcmp.gt.f32.partialorder %v264_v48, 0.0  ;;  %v2850_v0 = vld [vmem:[#allocation2 + $0x110] sm:$0xff] }
 0x285   : > { %v13873_v6 = vpop.f32.mrf.mxu0  ;;  %v3379_v55 = vld [vmem:[#allocation2 + $0xd0] sm:$0xff]  ;;  %v14004_v3 = vpop.f32.mrf.mxu1  ;;  %v5401_v62 = vsel %vm286_vm9, 1, %v15089_v5 }
 0x286   : > { %2922 = vst.msk [vmem:[#allocation2 + $0xe0] sm:$0xff] %vm303_vm3, %v2883_v56  ;;  %v3418_v60 = vadd.f32 %v3379_v55, %v16891_v61  ;;  %5434 = vperm.xlu1 %15060, %v5401_v62   ;;  %v4549_v56 = vld [vmem:[%s15154_s7 + $0x4f] sm:$0xff] }
 0x287   : > { %v2767_v59 = vpop.f32.mrf.mxu0  ;;  %14140 = vmatmul.mubr.msk.f32.gmra.mxu0 %vm364_vm2, %v3508_v53  ;;  %v16984_v61 = vpop.f32.mrf.mxu1 }
 0x288   : > { %3457 = vst.msk [vmem:[#allocation2 + $0xd0] sm:$0xff] %vm303_vm3, %v3418_v60  ;;  %v2884_v14 = vadd.f32 %v2845_v11, %v2767_v59  ;;  %14263 = vmatprep.mubr.msk.f32.mxu0 %vm15088_vm1, %v15087_v1  ;;  %v2851_v59 = vld [vmem:[#allocation2 + $0x118] sm:$0xff] }
 0x289   : > { %v13876_v16 = vpop.f32.mrf.mxu0  ;;  %v3380_v2 = vld [vmem:[#allocation2 + $0xd8] sm:$0xff]  ;;  %v14007_v17 = vpop.f32.mrf.mxu1 }
 0x28a   : > { %2923 = vst.msk [vmem:[#allocation2 + $0xe8] sm:$0xff] %vm303_vm3, %v2884_v14  ;;  %v3419_v19 = vadd.f32 %v3380_v2, %v16907_v8  ;;  %v4550_v14 = vld [vmem:[%s15154_s7 + $0x57] sm:$0xff] }
 0x28b   : > { %v2772_v13 = vpop.f32.mrf.mxu0  ;;  %14264 = vmatmul.mubr.msk.f32.vlgmr.msra.gmra.mxu0 %vm364_vm2, %v4544_v63  ;;  %v16994_v15 = vpop.f32.mrf.mxu1  ;;  %v265_v63 = vld [vmem:[%s19197_s5 + $0x30] sm:$0xff] }
 0x28c   : > { %3458 = vst.msk [vmem:[#allocation2 + $0xd8] sm:$0xff] %vm303_vm3, %v3419_v19  ;;  %v2885_v26 = vadd.f32 %v2846_v24, %v2772_v13  ;;  %14266 = vmatprep.mubr.msk.f32.mxu0 %vm15088_vm1, %v15087_v1  ;;  %vm287_vm10 = vcmp.gt.f32.partialorder %v265_v63, 0.0  ;;  %v2852_v13 = vld [vmem:[#allocation2 + $0x120] sm:$0xff] }
 0x28d   : > { %v13879_v18 = vpop.f32.mrf.mxu0  ;;  %v3381_v12 = vld [vmem:[#allocation2 + $0xe0] sm:$0xff]  ;;  %v14010_v34 = vpop.f32.mrf.mxu1  ;;  %v5402_v19 = vsel %vm287_vm10, 1, %v15089_v5 }
 0x28e   : > { %2924 = vst.msk [vmem:[#allocation2 + $0xf0] sm:$0xff] %vm303_vm3, %v2885_v26  ;;  %v3420_v8 = vadd.f32 %v3381_v12, %v16923_v30  ;;  %5437 = vperm.xlu0 %15059, %v5402_v19   ;;  %v4551_v26 = vld [vmem:[%s15154_s7 + $0x5f] sm:$0xff] }
 0x28f   : > { %v2777_v32 = vpop.f32.mrf.mxu0  ;;  %14267 = vmatmul.mubr.msk.f32.gmra.mxu0 %vm364_vm2, %v4545_v10  ;;  %v17006_v30 = vpop.f32.mrf.mxu1 }
 0x290   : > { %3459 = vst.msk [vmem:[#allocation2 + $0xe0] sm:$0xff] %vm303_vm3, %v3420_v8  ;;  %v2886_v27 = vadd.f32 %v2847_v20, %v2777_v32  ;;  %14269 = vmatprep.mubr.msk.f32.mxu0 %vm15088_vm1, %v15087_v1  ;;  %v2853_v32 = vld [vmem:[#allocation2 + $0x128] sm:$0xff] }
 0x291   : > { %v13882_v21 = vpop.f32.mrf.mxu0  ;;  %v3382_v23 = vld [vmem:[#allocation2 + $0xe8] sm:$0xff]  ;;  %v14013_v38 = vpop.f32.mrf.mxu1 }
 0x292   : > { %2925 = vst.msk [vmem:[#allocation2 + $0xf8] sm:$0xff] %vm303_vm3, %v2886_v27  ;;  %v3421_v40 = vadd.f32 %v3382_v23, %v16939_v25  ;;  %v4552_v27 = vld [vmem:[%s15154_s7 + $0x67] sm:$0xff] }
 0x293   : > { %v2782_v28 = vpop.f32.mrf.mxu0  ;;  %14270 = vmatmul.mubr.msk.f32.gmra.mxu0 %vm364_vm2, %v4546_v36  ;;  %v17016_v35 = vpop.f32.mrf.mxu1  ;;  %v266_v36 = vld [vmem:[%s19197_s5 + $0x38] sm:$0xff] }
 0x294   : > { %3460 = vst.msk [vmem:[#allocation2 + $0xe8] sm:$0xff] %vm303_vm3, %v3421_v40  ;;  %v2887_v46 = vadd.f32 %v2848_v44, %v2782_v28  ;;  %14272 = vmatprep.mubr.msk.f32.mxu0 %vm15088_vm1, %v15087_v1  ;;  %vm288_vm11 = vcmp.gt.f32.partialorder %v266_v36, 0.0  ;;  %v2854_v28 = vld [vmem:[#allocation2 + $0x130] sm:$0xff] }
 0x295   : > { %v13885_v33 = vpop.f32.mrf.mxu0  ;;  %v3383_v50 = vld [vmem:[#allocation2 + $0xf0] sm:$0xff]  ;;  %v14016_v54 = vpop.f32.mrf.mxu1  ;;  %v5403_v40 = vsel %vm288_vm11, 1, %v15089_v5 }
 0x296   : > { %2926 = vst.msk [vmem:[#allocation2 + $0x100] sm:$0xff] %vm303_vm3, %v2887_v46  ;;  %v3422_v25 = vadd.f32 %v3383_v50, %v16950_v52  ;;  %5440 = vperm.xlu1 %15060, %v5403_v40   ;;  %v4553_v46 = vld [vmem:[%s15154_s7 + $0x6f] sm:$0xff] }
 0x297   : > { %v2787_v31 = vpop.f32.mrf.mxu0  ;;  %14273 = vmatmul.mubr.msk.f32.gmra.mxu0 %vm364_vm2, %v4547_v39  ;;  %v17028_v52 = vpop.f32.mrf.mxu1  ;;  %v5573_v40 = vld [vmem:[%s19194_s2 + $0x8] sm:$0xff] }
 0x298   : > { %3461 = vst.msk [vmem:[#allocation2 + $0xf0] sm:$0xff] %vm303_vm3, %v3422_v25  ;;  %v2888_v49 = vadd.f32 %v2849_v37, %v2787_v31  ;;  %14275 = vmatprep.mubr.msk.f32.mxu0 %vm15088_vm1, %v15087_v1  ;;  %v3890_v31 = vld [vmem:[#allocation2] sm:$0xff]  ;;  %14380 = vmatprep.subr.mxu1 %v5573_v40 }
 0x299   : > { %v13888_v43 = vpop.f32.mrf.mxu0  ;;  %v3384_v51 = vld [vmem:[#allocation2 + $0xf8] sm:$0xff]  ;;  %v14019_v58 = vpop.f32.mrf.mxu1  ;;  %14381 = vmatpush3.msra.mxu1 %v5573_v40 }
 0x29a   : > { %2927 = vst.msk [vmem:[#allocation2 + $0x108] sm:$0xff] %vm303_vm3, %v2888_v49  ;;  %v3423_v45 = vadd.f32 %v3384_v51, %v16962_v41  ;;  %v4554_v49 = vld [vmem:[%s15154_s7 + $0x77] sm:$0xff]  ;;  %v4563_v40 = vld [vmem:[%s15154_s7 + $0xbf] sm:$0xff] }
 0x29b   : > { %v2792_v47 = vpop.f32.mrf.mxu0  ;;  %14276 = vmatmul.mubr.msk.f32.gmra.mxu0 %vm364_vm2, %v4548_v57  ;;  %v17038_v55 = vpop.f32.mrf.mxu1  ;;  %v267_v57 = vld [vmem:[%s19197_s5 + $0x40] sm:$0xff] }
 0x29c   : > { %3462 = vst.msk [vmem:[#allocation2 + $0xf8] sm:$0xff] %vm303_vm3, %v3423_v45  ;;  %v2889_v4 = vadd.f32 %v2850_v0, %v2792_v47  ;;  %14278 = vmatprep.mubr.msk.f32.mxu0 %vm15088_vm1, %v15087_v1  ;;  %vm289_vm12 = vcmp.gt.f32.partialorder %v267_v57, 0.0  ;;  %v3891_v47 = vld [vmem:[#allocation2 + $0x8] sm:$0xff] }
 0x29d   : > { %v13891_v53 = vpop.f32.mrf.mxu0  ;;  %v3385_v6 = vld [vmem:[#allocation2 + $0x100] sm:$0xff]  ;;  %v14022_v11 = vpop.f32.mrf.mxu1  ;;  %v5404_v45 = vsel %vm289_vm12, 1, %v15089_v5 }
 0x29e   : > { %2928 = vst.msk [vmem:[#allocation2 + $0x110] sm:$0xff] %vm303_vm3, %v2889_v4  ;;  %v3424_v41 = vadd.f32 %v3385_v6, %v16972_v9  ;;  %5443 = vperm.xlu0 %15059, %v5404_v45   ;;  %v4555_v4 = vld [vmem:[%s15154_s7 + $0x7f] sm:$0xff] }
 0x29f   : > { %v2797_v60 = vpop.f32.mrf.mxu0  ;;  %14279 = vmatmul.mubr.msk.f32.gmra.mxu0 %vm364_vm2, %v4549_v56  ;;  %v17050_v9 = vpop.f32.mrf.mxu1 }
 0x2a0   : > { %3463 = vst.msk [vmem:[#allocation2 + $0x100] sm:$0xff] %vm303_vm3, %v3424_v41  ;;  %v2890_v3 = vadd.f32 %v2851_v59, %v2797_v60  ;;  %14281 = vmatprep.mubr.msk.f32.mxu0 %vm15088_vm1, %v15087_v1  ;;  %v3892_v60 = vld [vmem:[#allocation2 + $0x10] sm:$0xff] }
 0x2a1   : > { %v13894_v7 = vpop.f32.mrf.mxu0  ;;  %v3386_v16 = vld [vmem:[#allocation2 + $0x108] sm:$0xff]  ;;  %v14146_v24 = vpop.f32.mrf.mxu1 }
 0x2a2   : > { %2929 = vst.msk [vmem:[#allocation2 + $0x118] sm:$0xff] %vm303_vm3, %v2890_v3  ;;  %v3425_v2 = vadd.f32 %v3386_v16, %v16984_v61  ;;  %v4556_v3 = vld [vmem:[%s15154_s7 + $0x87] sm:$0xff] }
 0x2a3   : > { %v2802_v22 = vpop.f32.mrf.mxu0  ;;  %14282 = vmatmul.mubr.msk.f32.gmra.mxu0 %vm364_vm2, %v4550_v14  ;;  %v17060_v12 = vpop.f32.mrf.mxu1  ;;  %v268_v14 = vld [vmem:[%s19197_s5 + $0x48] sm:$0xff] }
 0x2a4   : > { %3464 = vst.msk [vmem:[#allocation2 + $0x108] sm:$0xff] %vm303_vm3, %v3425_v2  ;;  %v2891_v17 = vadd.f32 %v2852_v13, %v2802_v22  ;;  %14284 = vmatprep.mubr.msk.f32.mxu0 %vm15088_vm1, %v15087_v1  ;;  %vm290_vm13 = vcmp.gt.f32.partialorder %v268_v14, 0.0  ;;  %v3893_v22 = vld [vmem:[#allocation2 + $0x18] sm:$0xff]  ;;  %v275_v14 = vld [vmem:[%s19197_s5 + $0x80] sm:$0xff] }
 0x2a5   : > { %v13897_v10 = vpop.f32.mrf.mxu0  ;;  %v3387_v18 = vld [vmem:[#allocation2 + $0x110] sm:$0xff]  ;;  %v14149_v20 = vpop.f32.mrf.mxu1  ;;  %v5405_v2 = vsel %vm290_vm13, 1, %v15089_v5  ;;  %vm297_vm8 = vcmp.gt.f32.partialorder %v275_v14, 0.0 }
 0x2a6   : > { %2930 = vst.msk [vmem:[#allocation2 + $0x120] sm:$0xff] %vm303_vm3, %v2891_v17  ;;  %v3426_v61 = vadd.f32 %v3387_v18, %v16994_v15  ;;  %5446 = vperm.xlu1 %15060, %v5405_v2   ;;  %v4557_v17 = vld [vmem:[%s15154_s7 + $0x8f] sm:$0xff] }
 0x2a7   : > { %v2807_v8 = vpop.f32.mrf.mxu0  ;;  %14285 = vmatmul.mubr.msk.f32.gmra.mxu0 %vm364_vm2, %v4551_v26  ;;  %v17072_v15 = vpop.f32.mrf.mxu1 }
 0x2a8   : > { %3465 = vst.msk [vmem:[#allocation2 + $0x110] sm:$0xff] %vm303_vm3, %v3426_v61  ;;  %v2892_v34 = vadd.f32 %v2853_v32, %v2807_v8  ;;  %14287 = vmatprep.mubr.msk.f32.mxu0 %vm15088_vm1, %v15087_v1  ;;  %v3894_v8 = vld [vmem:[#allocation2 + $0x20] sm:$0xff] }
 0x2a9   : > { %v13900_v29 = vpop.f32.mrf.mxu0  ;;  %v3388_v21 = vld [vmem:[#allocation2 + $0x118] sm:$0xff]  ;;  %v14152_v44 = vpop.f32.mrf.mxu1 }
 0x2aa   : > { %2931 = vst.msk [vmem:[#allocation2 + $0x128] sm:$0xff] %vm303_vm3, %v2892_v34  ;;  %v3427_v23 = vadd.f32 %v3388_v21, %v17006_v30  ;;  %v4558_v34 = vld [vmem:[%s15154_s7 + $0x97] sm:$0xff] }
 0x2ab   : > { %v2812_v42 = vpop.f32.mrf.mxu0  ;;  %14288 = vmatmul.mubr.msk.f32.gmra.mxu0 %vm364_vm2, %v4552_v27  ;;  %v17082_v50 = vpop.f32.mrf.mxu1  ;;  %v270_v27 = vld [vmem:[%s19197_s5 + $0x58] sm:$0xff] }
 0x2ac   : > { %3466 = vst.msk [vmem:[#allocation2 + $0x118] sm:$0xff] %vm303_vm3, %v3427_v23  ;;  %v2893_v38 = vadd.f32 %v2854_v28, %v2812_v42  ;;  %14290 = vmatprep.mubr.msk.f32.mxu0 %vm15088_vm1, %v15087_v1  ;;  %vm292_vm14 = vcmp.gt.f32.partialorder %v270_v27, 0.0 }
 0x2ad   : > { %v13903_v39 = vpop.f32.mrf.mxu0  ;;  %v3389_v33 = vld [vmem:[#allocation2 + $0x120] sm:$0xff]  ;;  %v14155_v37 = vpop.f32.mrf.mxu1  ;;  %v5407_v42 = vsel %vm292_vm14, 1, %v15089_v5 }
 0x2ae   : > { %2932 = vst.msk [vmem:[#allocation2 + $0x130] sm:$0xff] %vm303_vm3, %v2893_v38  ;;  %v3428_v30 = vadd.f32 %v3389_v33, %v17016_v35  ;;  %v3895_v38 = vld [vmem:[#allocation2 + $0x28] sm:$0xff]  ;;  %5452 = vperm.xlu1 %15060, %v5407_v42   ;;  %v279_v42 = vld [vmem:[%s19197_s5 + $0xa0] sm:$0xff] }
 0x2af   : > { %v3696_v25 = vpop.f32.mrf.mxu0  ;;  %14291 = vmatmul.mubr.msk.f32.gmra.mxu0 %vm364_vm2, %v4553_v46  ;;  %v17094_v35 = vpop.f32.mrf.mxu1  ;;  %v272_v33 = vld [vmem:[%s19197_s5 + $0x68] sm:$0xff]  ;;  %vm301_vm12 = vcmp.gt.f32.partialorder %v279_v42, 0.0 }
 0x2b0   : > { %3467 = vst.msk [vmem:[#allocation2 + $0x120] sm:$0xff] %vm303_vm3, %v3428_v30  ;;  %v3929_v54 = vadd.f32 %v3890_v31, %v3696_v25  ;;  %14293 = vmatprep.mubr.msk.f32.mxu0 %vm15088_vm1, %v15087_v1  ;;  %v271_v30 = vld [vmem:[%s19197_s5 + $0x60] sm:$0xff]  ;;  %vm294_vm0 = vcmp.gt.f32.partialorder %v272_v33, 0.0 }
 0x2b1   : > { %v3390_v48 = vld [vmem:[#allocation2 + $0x128] sm:$0xff]  ;;  %v14027_v43 = vpop.f32.mrf.mxu0  ;;  %v14158_v0 = vpop.f32.mrf.mxu1  ;;  %vm293_vm4 = vcmp.gt.f32.partialorder %v271_v30, 0.0  ;;  %v3900_v30 = vld [vmem:[#allocation2 + $0x50] sm:$0xff] }
 0x2b2   : > { %3968 = vst.msk [vmem:[#allocation2] sm:$0xff] %vm303_vm3, %v3929_v54  ;;  %v3429_v51 = vadd.f32 %v3390_v48, %v17028_v52  ;;  %v5408_v57 = vsel %vm293_vm4, 1, %v15089_v5  ;;  %v3896_v43 = vld [vmem:[#allocation2 + $0x30] sm:$0xff] }
 0x2b3   : > { %v3701_v62 = vpop.f32.mrf.mxu0  ;;  %14294 = vmatmul.mubr.msk.f32.gmra.mxu0 %vm364_vm2, %v4554_v49  ;;  %v17104_v6 = vpop.f32.mrf.mxu1  ;;  %v5409_v49 = vsel %vm294_vm0, 1, %v15089_v5 }
 0x2b4   : > { %3468 = vst.msk [vmem:[#allocation2 + $0x128] sm:$0xff] %vm303_vm3, %v3429_v51  ;;  %v3930_v58 = vadd.f32 %v3891_v47, %v3701_v62  ;;  %14296 = vmatprep.mubr.msk.f32.mxu0 %vm15088_vm1, %v15087_v1  ;;  %v4560_v62 = vld [vmem:[%s15154_s7 + $0xa7] sm:$0xff]  ;;  %v273_v47 = vld [vmem:[%s19197_s5 + $0x70] sm:$0xff]  ;;  %5458 = vperm.xlu1 %15060, %v5409_v49  }
 0x2b5   : > { %v3391_v56 = vld [vmem:[#allocation2 + $0x130] sm:$0xff]  ;;  %v14030_v53 = vpop.f32.mrf.mxu0  ;;  %v14161_v59 = vpop.f32.mrf.mxu1  ;;  %vm295_vm6 = vcmp.gt.f32.partialorder %v273_v47, 0.0 }
 0x2b6   : > { %3969 = vst.msk [vmem:[#allocation2 + $0x8] sm:$0xff] %vm303_vm3, %v3930_v58  ;;  %v3430_v52 = vadd.f32 %v3391_v56, %v17038_v55 }
 0x2b7   : > { %v3706_v41 = vpop.f32.mrf.mxu0  ;;  %14297 = vmatmul.mubr.msk.f32.gmra.mxu0 %vm364_vm2, %v4555_v4  ;;  %v17116_v55 = vpop.f32.mrf.mxu1 }
 0x2b8   : > { %3469 = vst.msk [vmem:[#allocation2 + $0x130] sm:$0xff] %vm303_vm3, %v3430_v52  ;;  %v3931_v11 = vadd.f32 %v3892_v60, %v3706_v41  ;;  %14299 = vmatprep.mubr.msk.f32.mxu0 %vm15088_vm1, %v15087_v1  ;;  %v5410_v52 = vsel %vm295_vm6, 1, %v15089_v5  ;;  %v3897_v60 = vld [vmem:[#allocation2 + $0x38] sm:$0xff] }
 0x2b9   : > { %v14033_v63 = vpop.f32.mrf.mxu0  ;;  %v4427_v7 = vld [vmem:[#allocation2] sm:$0xff]  ;;  %v14164_v13 = vpop.f32.mrf.mxu1 }
 0x2ba   : > { %3970 = vst.msk [vmem:[#allocation2 + $0x10] sm:$0xff] %vm303_vm3, %v3931_v11  ;;  %v4466_v16 = vadd.f32 %v4427_v7, %v17050_v9 }
 0x2bb   : > { %v3711_v19 = vpop.f32.mrf.mxu0  ;;  %14300 = vmatmul.mubr.msk.f32.gmra.mxu0 %vm364_vm2, %v4556_v3  ;;  %v17126_v18 = vpop.f32.mrf.mxu1  ;;  %v4561_v3 = vld [vmem:[%s15154_s7 + $0xaf] sm:$0xff] }
 0x2bc   : > { %4505 = vst.msk [vmem:[#allocation2] sm:$0xff] %vm303_vm3, %v4466_v16  ;;  %v3932_v24 = vadd.f32 %v3893_v22, %v3711_v19  ;;  %14302 = vmatprep.mubr.msk.f32.mxu0 %vm15088_vm1, %v15087_v1  ;;  %v5412_v22 = vsel %vm297_vm8, 1, %v15089_v5 }
 0x2bd   : > { %v14036_v26 = vpop.f32.mrf.mxu0  ;;  %v4428_v10 = vld [vmem:[#allocation2 + $0x8] sm:$0xff]  ;;  %v14167_v32 = vpop.f32.mrf.mxu1 }
 0x2be   : > { %3971 = vst.msk [vmem:[#allocation2 + $0x18] sm:$0xff] %vm303_vm3, %v3932_v24  ;;  %v4467_v9 = vadd.f32 %v4428_v10, %v17060_v12  ;;  %v269_v12 = vld [vmem:[%s19197_s5 + $0x50] sm:$0xff]  ;;  %v3898_v24 = vld [vmem:[#allocation2 + $0x40] sm:$0xff] }
 0x2bf   : > { %v3716_v61 = vpop.f32.mrf.mxu0  ;;  %14303 = vmatmul.mubr.msk.f32.gmra.mxu0 %vm364_vm2, %v4557_v17  ;;  %v17141_v21 = vpop.f32.mrf.mxu1  ;;  %vm291_vm15 = vcmp.gt.f32.partialorder %v269_v12, 0.0  ;;  %v4562_v10 = vld [vmem:[%s15154_s7 + $0xb7] sm:$0xff] }
 0x2c0   : > { %4506 = vst.msk [vmem:[#allocation2 + $0x8] sm:$0xff] %vm303_vm3, %v4467_v9  ;;  %v3933_v20 = vadd.f32 %v3894_v8, %v3716_v61  ;;  %14305 = vmatprep.mubr.msk.f32.mxu0 %vm15088_vm1, %v15087_v1  ;;  %v5406_v28 = vsel %vm291_vm15, 1, %v15089_v5  ;;  %v277_v9 = vld [vmem:[%s19197_s5 + $0x90] sm:$0xff] }
 0x2c1   : > { %v14039_v36 = vpop.f32.mrf.mxu0  ;;  %v4429_v29 = vld [vmem:[#allocation2 + $0x10] sm:$0xff]  ;;  %v14170_v46 = vpop.f32.mrf.mxu1  ;;  %5449 = vperm.xlu0 %15059, %v5406_v28   ;;  %vm299_vm10 = vcmp.gt.f32.partialorder %v277_v9, 0.0 }
 0x2c2   : > { %3972 = vst.msk [vmem:[#allocation2 + $0x20] sm:$0xff] %vm303_vm3, %v3933_v20  ;;  %v4468_v23 = vadd.f32 %v4429_v29, %v17072_v15  ;;  %v4559_v15 = vld [vmem:[%s15154_s7 + $0x9f] sm:$0xff]  ;;  %v5414_v27 = vsel %vm299_vm10, 1, %v15089_v5  ;;  %v3899_v36 = vld [vmem:[#allocation2 + $0x48] sm:$0xff] }
 0x2c3   : > { %v3721_v44 = vpop.f32.mrf.mxu0  ;;  %14306 = vmatmul.mubr.msk.f32.gmra.mxu0 %vm364_vm2, %v4558_v34  ;;  %v17161_v37 = vpop.f32.mrf.mxu1 }
 0x2c4   : > { %4507 = vst.msk [vmem:[#allocation2 + $0x10] sm:$0xff] %vm303_vm3, %v4468_v23  ;;  %v3934_v39 = vadd.f32 %v3895_v38, %v3721_v44  ;;  %14308 = vmatprep.mubr.msk.f32.mxu0 %vm15088_vm1, %v15087_v1 }
 0x2c5   : > { %v14042_v25 = vpop.f32.mrf.mxu0  ;;  %v4430_v31 = vld [vmem:[#allocation2 + $0x18] sm:$0xff]  ;;  %v14173_v51 = vpop.f32.mrf.mxu1  ;;  %5455 = vperm.xlu0 %15059, %v5408_v57  }
 0x2c6   : > { %3973 = vst.msk [vmem:[#allocation2 + $0x28] sm:$0xff] %vm303_vm3, %v3934_v39  ;;  %v4469_v54 = vadd.f32 %v4430_v31, %v17082_v50  ;;  %v274_v50 = vld [vmem:[%s19197_s5 + $0x78] sm:$0xff] }
 0x2c7   : > { %v3726_v48 = vpop.f32.mrf.mxu0  ;;  %14309 = vmatmul.mubr.msk.f32.gmra.mxu0 %vm364_vm2, %v4559_v15  ;;  %v17178_v4 = vpop.f32.mrf.mxu1  ;;  %vm296_vm5 = vcmp.gt.f32.partialorder %v274_v50, 0.0  ;;  %v5416_v15 = vsel %vm301_vm12, 1, %v15089_v5 }
 0x2c8   : > { %4508 = vst.msk [vmem:[#allocation2 + $0x18] sm:$0xff] %vm303_vm3, %v4469_v54  ;;  %v3935_v45 = vadd.f32 %v3896_v43, %v3726_v48  ;;  %14311 = vmatprep.mubr.msk.f32.mxu0 %vm15088_vm1, %v15087_v1  ;;  %v5411_v53 = vsel %vm296_vm5, 1, %v15089_v5  ;;  %v4564_v54 = vld [vmem:[%s15154_s7 + $0xc7] sm:$0xff]  ;;  %v3901_v43 = vld [vmem:[#allocation2 + $0x58] sm:$0xff] }
 0x2c9   : > { %v14045_v0 = vpop.f32.mrf.mxu0  ;;  %v4431_v58 = vld [vmem:[#allocation2 + $0x20] sm:$0xff]  ;;  %v14176_v59 = vpop.f32.mrf.mxu1  ;;  %5464 = vperm.xlu1 %15060, %v5411_v53   ;;  %5461 = vperm.xlu0 %15059, %v5410_v52  }
 0x2ca   : > { %3974 = vst.msk [vmem:[#allocation2 + $0x30] sm:$0xff] %vm303_vm3, %v3935_v45  ;;  %v4470_v56 = vadd.f32 %v4431_v58, %v17094_v35  ;;  %v276_v35 = vld [vmem:[%s19197_s5 + $0x88] sm:$0xff] }
 0x2cb   : > { %v3731_v41 = vpop.f32.mrf.mxu0  ;;  %14312 = vmatmul.mubr.msk.f32.gmra.mxu0 %vm364_vm2, %v4560_v62  ;;  %v17195_v16 = vpop.f32.mrf.mxu1  ;;  %vm298_vm7 = vcmp.gt.f32.partialorder %v276_v35, 0.0  ;;  %v4565_v62 = vld [vmem:[%s15154_s7 + $0xcf] sm:$0xff] }
 0x2cc   : > { %4509 = vst.msk [vmem:[#allocation2 + $0x20] sm:$0xff] %vm303_vm3, %v4470_v56  ;;  %v3936_v11 = vadd.f32 %v3897_v60, %v3731_v41  ;;  %14314 = vmatprep.mubr.msk.f32.mxu0 %vm15088_vm1, %v15087_v1  ;;  %v5413_v19 = vsel %vm298_vm7, 1, %v15089_v5  ;;  %v3902_v56 = vld [vmem:[#allocation2 + $0x60] sm:$0xff]  ;;  %v4566_v41 = vld [vmem:[%s15154_s7 + $0xd7] sm:$0xff]  ;;  %v3903_v35 = vld [vmem:[#allocation2 + $0x68] sm:$0xff] }
 0x2cd   : > { %v14048_v63 = vpop.f32.mrf.mxu0  ;;  %v4432_v7 = vld [vmem:[#allocation2 + $0x28] sm:$0xff]  ;;  %v14179_v17 = vpop.f32.mrf.mxu1  ;;  %5470 = vperm.xlu1 %15060, %v5413_v19   ;;  %5467 = vperm.xlu0 %15059, %v5412_v22  }
 0x2ce   : > { %3975 = vst.msk [vmem:[#allocation2 + $0x38] sm:$0xff] %vm303_vm3, %v3936_v11  ;;  %v4471_v2 = vadd.f32 %v4432_v7, %v17104_v6  ;;  %v278_v6 = vld [vmem:[%s19197_s5 + $0x98] sm:$0xff] }
 0x2cf   : > { %v3736_v13 = vpop.f32.mrf.mxu0  ;;  %14315 = vmatmul.mubr.msk.f32.gmra.mxu0 %vm364_vm2, %v4561_v3  ;;  %v17212_v32 = vpop.f32.mrf.mxu1  ;;  %vm300_vm9 = vcmp.gt.f32.partialorder %v278_v6, 0.0  ;;  %v4567_v7 = vld [vmem:[%s15154_s7 + $0xdf] sm:$0xff] }
 0x2d0   : > { %4510 = vst.msk [vmem:[#allocation2 + $0x28] sm:$0xff] %vm303_vm3, %v4471_v2  ;;  %v3937_v26 = vadd.f32 %v3898_v24, %v3736_v13  ;;  %14317 = vmatprep.mubr.msk.f32.mxu0 %vm15088_vm1, %v15087_v1  ;;  %v5415_v34 = vsel %vm300_vm9, 1, %v15089_v5  ;;  %v3904_v24 = vld [vmem:[#allocation2 + $0x70] sm:$0xff] }
 0x2d1   : > { %v14051_v61 = vpop.f32.mrf.mxu0  ;;  %v4433_v8 = vld [vmem:[#allocation2 + $0x30] sm:$0xff]  ;;  %v14182_v29 = vpop.f32.mrf.mxu1  ;;  %5476 = vperm.xlu1 %15060, %v5415_v34   ;;  %5473 = vperm.xlu0 %15059, %v5414_v27  }
 0x2d2   : > { %3976 = vst.msk [vmem:[#allocation2 + $0x40] sm:$0xff] %vm303_vm3, %v3937_v26  ;;  %v4472_v20 = vadd.f32 %v4433_v8, %v17116_v55  ;;  %v280_v55 = vld [vmem:[%s19197_s5 + $0xa8] sm:$0xff] }
 0x2d3   : > { %v3741_v12 = vpop.f32.mrf.mxu0  ;;  %14318 = vmatmul.mubr.msk.f32.gmra.mxu0 %vm364_vm2, %v4562_v10  ;;  %v17229_v38 = vpop.f32.mrf.mxu1  ;;  %vm302_vm11 = vcmp.gt.f32.partialorder %v280_v55, 0.0  ;;  %v4568_v10 = vld [vmem:[%s15154_s7 + $0xe7] sm:$0xff] }
 0x2d4   : > { %4511 = vst.msk [vmem:[#allocation2 + $0x30] sm:$0xff] %vm303_vm3, %v4472_v20  ;;  %v3938_v23 = vadd.f32 %v3899_v36, %v3741_v12  ;;  %14320 = vmatprep.mubr.msk.f32.mxu0 %vm15088_vm1, %v15087_v1  ;;  %v5417_v39 = vsel %vm302_vm11, 1, %v15089_v5  ;;  %v3905_v20 = vld [vmem:[#allocation2 + $0x78] sm:$0xff]  ;;  %v4569_v12 = vld [vmem:[%s15154_s7 + $0xef] sm:$0xff]  ;;  %v3906_v55 = vld [vmem:[#allocation2 + $0x80] sm:$0xff] }
 0x2d5   : > { %v14054_v28 = vpop.f32.mrf.mxu0  ;;  %v4434_v44 = vld [vmem:[#allocation2 + $0x38] sm:$0xff]  ;;  %v14185_v25 = vpop.f32.mrf.mxu1  ;;  %5482 = vperm.xlu1 %15060, %v5417_v39   ;;  %5479 = vperm.xlu0 %15059, %v5416_v15  }
 0x2d6   : > { %3977 = vst.msk [vmem:[#allocation2 + $0x48] sm:$0xff] %vm303_vm3, %v3938_v23  ;;  %v4473_v46 = vadd.f32 %v4434_v44, %v17126_v18  ;;  %v4570_v44 = vld [vmem:[%s15154_s7 + $0xf7] sm:$0xff] }
 0x2d7   : > { %v3746_v33 = vpop.f32.mrf.mxu0  ;;  %14321 = vmatmul.mubr.msk.f32.gmra.mxu0 %vm364_vm2, %v4563_v40  ;;  %v17240_v18 = vpop.f32.mrf.mxu1 }
 0x2d8   : > { %4512 = vst.msk [vmem:[#allocation2 + $0x38] sm:$0xff] %vm303_vm3, %v4473_v46  ;;  %v3939_v31 = vadd.f32 %v3900_v30, %v3746_v33  ;;  %14323 = vmatprep.mubr.msk.f32.mxu0 %vm15088_vm1, %v15087_v1  ;;  %v3907_v30 = vld [vmem:[#allocation2 + $0x88] sm:$0xff] }
 0x2d9   : > { %v14057_v49 = vpop.f32.mrf.mxu0  ;;  %v4435_v57 = vld [vmem:[#allocation2 + $0x40] sm:$0xff]  ;;  %v14188_v51 = vpop.f32.mrf.mxu1 }
 0x2da   : > { %3978 = vst.msk [vmem:[#allocation2 + $0x50] sm:$0xff] %vm303_vm3, %v3939_v31  ;;  %v4474_v5 = vadd.f32 %v4435_v57, %v17141_v21 }
 0x2db   : > { %v3751_v48 = vpop.f32.mrf.mxu0  ;;  %14324 = vmatmul.mubr.msk.f32.gmra.mxu0 %vm364_vm2, %v4564_v54  ;;  %v17249_v0 = vpop.f32.mrf.mxu1  ;;  %v4571_v54 = vld [vmem:[%s15154_s7 + $0xff] sm:$0xff] }
 0x2dc   : > { %4513 = vst.msk [vmem:[#allocation2 + $0x40] sm:$0xff] %vm303_vm3, %v4474_v5  ;;  %v3940_v45 = vadd.f32 %v3901_v43, %v3751_v48  ;;  %14326 = vmatprep.mubr.msk.f32.mxu0 %vm15088_vm1, %v15087_v1  ;;  %v5550_v43 = vld [vmem:[#allocation4 + $0x5] sm:$0xff] }
 0x2dd   : > { %v14060_v50 = vpop.f32.mrf.mxu0  ;;  %v4436_v47 = vld [vmem:[#allocation2 + $0x48] sm:$0xff]  ;;  %v14191_v53 = vpop.f32.mrf.mxu1  ;;  %14384 = vmatprep.mubr.msk.f32.mxu1 %vm303_vm3, %v5550_v43  ;;  %v4578_v43 = vld [vmem:[%s15154_s7 + $0x137] sm:$0xff] }
 0x2de   : > { %3979 = vst.msk [vmem:[#allocation2 + $0x58] sm:$0xff] %vm303_vm3, %v3940_v45  ;;  %v4475_v21 = vadd.f32 %v4436_v47, %v17161_v37  ;;  %v3908_v45 = vld [vmem:[#allocation2 + $0x90] sm:$0xff] }
 0x2df   : > { %v3756_v58 = vpop.f32.mrf.mxu0  ;;  %14327 = vmatmul.mubr.msk.f32.gmra.mxu0 %vm364_vm2, %v4565_v62  ;;  %v17258_v11 = vpop.f32.mrf.mxu1  ;;  %v5551_v50 = vld [vmem:[#allocation4 + $0xd] sm:$0xff] }
 0x2e0   : > { %4514 = vst.msk [vmem:[#allocation2 + $0x48] sm:$0xff] %vm303_vm3, %v4475_v21  ;;  %v3941_v52 = vadd.f32 %v3902_v56, %v3756_v58  ;;  %14329 = vmatprep.mubr.msk.f32.mxu0 %vm15088_vm1, %v15087_v1  ;;  %v4572_v21 = vld [vmem:[%s15154_s7 + $0x107] sm:$0xff] }
 0x2e1   : > { %v14063_v60 = vpop.f32.mrf.mxu0  ;;  %v4437_v59 = vld [vmem:[#allocation2 + $0x50] sm:$0xff]  ;;  %v14194_v14 = vpop.f32.mrf.mxu1 }
 0x2e2   : > { %3980 = vst.msk [vmem:[#allocation2 + $0x60] sm:$0xff] %vm303_vm3, %v3941_v52  ;;  %v4476_v37 = vadd.f32 %v4437_v59, %v17178_v4 }
 0x2e3   : > { %v3761_v3 = vpop.f32.mrf.mxu0  ;;  %14330 = vmatmul.mubr.msk.f32.gmra.mxu0 %vm364_vm2, %v4566_v41  ;;  %v17267_v22 = vpop.f32.mrf.mxu1  ;;  %v3909_v41 = vld [vmem:[#allocation2 + $0x98] sm:$0xff] }
 0x2e4   : > { %4515 = vst.msk [vmem:[#allocation2 + $0x50] sm:$0xff] %vm303_vm3, %v4476_v37  ;;  %v3942_v63 = vadd.f32 %v3903_v35, %v3761_v3  ;;  %14332 = vmatprep.mubr.msk.f32.mxu0 %vm15088_vm1, %v15087_v1  ;;  %v4573_v37 = vld [vmem:[%s15154_s7 + $0x10f] sm:$0xff] }
 0x2e5   : > { %v14066_v2 = vpop.f32.mrf.mxu0  ;;  %v4438_v19 = vld [vmem:[#allocation2 + $0x58] sm:$0xff]  ;;  %v14197_v17 = vpop.f32.mrf.mxu1  ;;  %v6853_v3 = vld [vmem:[%s19194_s2 + $0x48] sm:$0xff] }
 0x2e6   : > { %3981 = vst.msk [vmem:[#allocation2 + $0x68] sm:$0xff] %vm303_vm3, %v3942_v63  ;;  %v4477_v4 = vadd.f32 %v4438_v19, %v17195_v16  ;;  %14528 = vmatprep.subr.mxu0 %v6853_v3  ;;  %v3910_v19 = vld [vmem:[#allocation2 + $0xa0] sm:$0xff] }
 0x2e7   : > { %v3766_v13 = vpop.f32.mrf.mxu0  ;;  %14333 = vmatmul.mubr.msk.f32.gmra.mxu0 %vm364_vm2, %v4567_v7  ;;  %v17276_v61 = vpop.f32.mrf.mxu1  ;;  %v6852_v7 = vld [vmem:[%s19194_s2 + $0x40] sm:$0xff] }
 0x2e8   : > { %4516 = vst.msk [vmem:[#allocation2 + $0x58] sm:$0xff] %vm303_vm3, %v4477_v4  ;;  %v3943_v26 = vadd.f32 %v3904_v24, %v3766_v13  ;;  %14335 = vmatprep.mubr.msk.f32.mxu0 %vm15088_vm1, %v15087_v1  ;;  %14529 = vmatpush3.msra.mxu0 %v6853_v3  ;;  %v4574_v24 = vld [vmem:[%s15154_s7 + $0x117] sm:$0xff] }
 0x2e9   : > { %v14069_v6 = vpop.f32.mrf.mxu0  ;;  %v4439_v9 = vld [vmem:[#allocation2 + $0x60] sm:$0xff]  ;;  %v14200_v34 = vpop.f32.mrf.mxu1  ;;  %14530 = vmatprep.subr.mxu0 %v6852_v7 }
 0x2ea   : > { %3982 = vst.msk [vmem:[#allocation2 + $0x70] sm:$0xff] %vm303_vm3, %v3943_v26  ;;  %v4478_v16 = vadd.f32 %v4439_v9, %v17212_v32  ;;  %14531 = vmatpush3.msra.mxu0 %v6852_v7  ;;  %v3911_v9 = vld [vmem:[#allocation2 + $0xa8] sm:$0xff] }
 0x2eb   : > { %v3771_v8 = vpop.f32.mrf.mxu0  ;;  %14336 = vmatmul.mubr.msk.f32.gmra.mxu0 %vm364_vm2, %v4568_v10  ;;  %v17285_v23 = vpop.f32.mrf.mxu1 }
 0x2ec   : > { %4517 = vst.msk [vmem:[#allocation2 + $0x60] sm:$0xff] %vm303_vm3, %v4478_v16  ;;  %v3944_v27 = vadd.f32 %v3905_v20, %v3771_v8  ;;  %14338 = vmatprep.mubr.msk.f32.mxu0 %vm15088_vm1, %v15087_v1  ;;  %v4575_v20 = vld [vmem:[%s15154_s7 + $0x11f] sm:$0xff] }
 0x2ed   : > { %v14072_v36 = vpop.f32.mrf.mxu0  ;;  %v4440_v29 = vld [vmem:[#allocation2 + $0x68] sm:$0xff]  ;;  %v14203_v42 = vpop.f32.mrf.mxu1 }
 0x2ee   : > { %3983 = vst.msk [vmem:[#allocation2 + $0x78] sm:$0xff] %vm303_vm3, %v3944_v27  ;;  %v4479_v32 = vadd.f32 %v4440_v29, %v17229_v38  ;;  %v3912_v29 = vld [vmem:[#allocation2 + $0xb0] sm:$0xff] }
 0x2ef   : > { %v3776_v40 = vpop.f32.mrf.mxu0  ;;  %14339 = vmatmul.mubr.msk.f32.gmra.mxu0 %vm364_vm2, %v4569_v12  ;;  %v17294_v15 = vpop.f32.mrf.mxu1 }
 0x2f0   : > { %4518 = vst.msk [vmem:[#allocation2 + $0x68] sm:$0xff] %vm303_vm3, %v4479_v32  ;;  %v3945_v28 = vadd.f32 %v3906_v55, %v3776_v40  ;;  %14341 = vmatprep.mubr.msk.f32.mxu0 %vm15088_vm1, %v15087_v1  ;;  %v4576_v55 = vld [vmem:[%s15154_s7 + $0x127] sm:$0xff] }
 0x2f1   : > { %v14075_v46 = vpop.f32.mrf.mxu0  ;;  %v4441_v39 = vld [vmem:[#allocation2 + $0x70] sm:$0xff]  ;;  %v14206_v25 = vpop.f32.mrf.mxu1 }
 0x2f2   : > { %3984 = vst.msk [vmem:[#allocation2 + $0x80] sm:$0xff] %vm303_vm3, %v3945_v28  ;;  %v4480_v38 = vadd.f32 %v4441_v39, %v17240_v18  ;;  %v5572_v18 = vld [vmem:[%s19194_s2] sm:$0xff]  ;;  %v3913_v39 = vld [vmem:[#allocation2 + $0xb8] sm:$0xff] }
 0x2f3   : > { %v3781_v33 = vpop.f32.mrf.mxu0  ;;  %14342 = vmatmul.mubr.msk.f32.gmra.mxu0 %vm364_vm2, %v4570_v44  ;;  %v17303_v5 = vpop.f32.mrf.mxu1  ;;  %14382 = vmatprep.subr.mxu1 %v5572_v18 }
 0x2f4   : > { %4519 = vst.msk [vmem:[#allocation2 + $0x70] sm:$0xff] %vm303_vm3, %v4480_v38  ;;  %v3946_v31 = vadd.f32 %v3907_v30, %v3781_v33  ;;  %14344 = vmatprep.mubr.msk.f32.mxu0 %vm15088_vm1, %v15087_v1  ;;  %14383 = vmatpush3.msra.mxu1 %v5572_v18  ;;  %v4577_v30 = vld [vmem:[%s15154_s7 + $0x12f] sm:$0xff] }
 0x2f5   : > { %v14078_v49 = vpop.f32.mrf.mxu0  ;;  %v4442_v57 = vld [vmem:[#allocation2 + $0x78] sm:$0xff]  ;;  %v14209_v62 = vpop.f32.mrf.mxu1  ;;  %14385 = vmatmul.mubr.msk.f32.vlgmr.msra.gmra.mxu1 %vm303_vm3, %v5551_v50 }
 0x2f6   : > { %3985 = vst.msk [vmem:[#allocation2 + $0x88] sm:$0xff] %vm303_vm3, %v3946_v31  ;;  %v4481_v48 = vadd.f32 %v4442_v57, %v17249_v0  ;;  %v3914_v57 = vld [vmem:[#allocation2 + $0xc0] sm:$0xff] }
 0x2f7   : > { %v3786_v51 = vpop.f32.mrf.mxu0  ;;  %14345 = vmatmul.mubr.msk.f32.gmra.mxu0 %vm364_vm2, %v4571_v54  ;;  %v17316_v56 = vpop.f32.mrf.mxu1 }
 0x2f8   : > { %4520 = vst.msk [vmem:[#allocation2 + $0x78] sm:$0xff] %vm303_vm3, %v4481_v48  ;;  %v3947_v47 = vadd.f32 %v3908_v45, %v3786_v51  ;;  %14347 = vmatprep.mubr.msk.f32.mxu0 %vm15088_vm1, %v15087_v1 }
 0x2f9   : > { %v14081_v0 = vpop.f32.mrf.mxu0  ;;  %v4443_v58 = vld [vmem:[#allocation2 + $0x80] sm:$0xff]  ;;  %v14212_v60 = vpop.f32.mrf.mxu1 }
 0x2fa   : > { %3986 = vst.msk [vmem:[#allocation2 + $0x90] sm:$0xff] %vm303_vm3, %v3947_v47  ;;  %v4482_v53 = vadd.f32 %v4443_v58, %v17258_v11  ;;  %v3915_v47 = vld [vmem:[#allocation2 + $0xc8] sm:$0xff]  ;;  %v4579_v58 = vld [vmem:[%s15154_s7 + $0x13f] sm:$0xff] }
 0x2fb   : > { %v3791_v52 = vpop.f32.mrf.mxu0  ;;  %14348 = vmatmul.mubr.msk.f32.gmra.mxu0 %vm364_vm2, %v4572_v21  ;;  %v17329_v11 = vpop.f32.mrf.mxu1 }
 0x2fc   : > { %4521 = vst.msk [vmem:[#allocation2 + $0x80] sm:$0xff] %vm303_vm3, %v4482_v53  ;;  %v3948_v59 = vadd.f32 %v3909_v41, %v3791_v52  ;;  %14350 = vmatprep.mubr.msk.f32.mxu0 %vm15088_vm1, %v15087_v1 }
 0x2fd   : > { %v14084_v35 = vpop.f32.mrf.mxu0  ;;  %v4444_v14 = vld [vmem:[#allocation2 + $0x88] sm:$0xff]  ;;  %v14215_v4 = vpop.f32.mrf.mxu1 }
 0x2fe   : > { %3987 = vst.msk [vmem:[#allocation2 + $0x98] sm:$0xff] %vm303_vm3, %v3948_v59  ;;  %v4483_v63 = vadd.f32 %v4444_v14, %v17267_v22  ;;  %v3916_v59 = vld [vmem:[#allocation2 + $0xd0] sm:$0xff]  ;;  %v4580_v35 = vld [vmem:[%s15154_s7 + $0x147] sm:$0xff] }
 0x2ff   : > { %v3796_v2 = vpop.f32.mrf.mxu0  ;;  %14351 = vmatmul.mubr.msk.f32.gmra.mxu0 %vm364_vm2, %v4573_v37  ;;  %v17341_v26 = vpop.f32.mrf.mxu1 }
 0x300   : > { %4522 = vst.msk [vmem:[#allocation2 + $0x88] sm:$0xff] %vm303_vm3, %v4483_v63  ;;  %v3949_v13 = vadd.f32 %v3910_v19, %v3796_v2  ;;  %14353 = vmatprep.mubr.msk.f32.mxu0 %vm15088_vm1, %v15087_v1  ;;  %v3917_v19 = vld [vmem:[#allocation2 + $0xd8] sm:$0xff] }
 0x301   : > { %v14087_v22 = vpop.f32.mrf.mxu0  ;;  %v4445_v17 = vld [vmem:[#allocation2 + $0x90] sm:$0xff]  ;;  %v14218_v16 = vpop.f32.mrf.mxu1 }
 0x302   : > { %3988 = vst.msk [vmem:[#allocation2 + $0xa0] sm:$0xff] %vm303_vm3, %v3949_v13  ;;  %v4484_v10 = vadd.f32 %v4445_v17, %v17276_v61 }
 0x303   : > { %v3801_v6 = vpop.f32.mrf.mxu0  ;;  %14354 = vmatmul.mubr.msk.f32.gmra.mxu0 %vm364_vm2, %v4574_v24  ;;  %v17350_v12 = vpop.f32.mrf.mxu1  ;;  %v4581_v24 = vld [vmem:[%s15154_s7 + $0x14f] sm:$0xff] }
 0x304   : > { %4523 = vst.msk [vmem:[#allocation2 + $0x90] sm:$0xff] %vm303_vm3, %v4484_v10  ;;  %v3950_v8 = vadd.f32 %v3911_v9, %v3801_v6  ;;  %14356 = vmatprep.mubr.msk.f32.mxu0 %vm15088_vm1, %v15087_v1  ;;  %v3918_v9 = vld [vmem:[#allocation2 + $0xe0] sm:$0xff] }
 0x305   : > { %v14090_v34 = vpop.f32.mrf.mxu0  ;;  %v4446_v27 = vld [vmem:[#allocation2 + $0x98] sm:$0xff]  ;;  %v14221_v32 = vpop.f32.mrf.mxu1 }
 0x306   : > { %3989 = vst.msk [vmem:[#allocation2 + $0xa8] sm:$0xff] %vm303_vm3, %v3950_v8  ;;  %v4485_v61 = vadd.f32 %v4446_v27, %v17285_v23 }
 0x307   : > { %v3806_v36 = vpop.f32.mrf.mxu0  ;;  %14357 = vmatmul.mubr.msk.f32.gmra.mxu0 %vm364_vm2, %v4575_v20  ;;  %v17359_v44 = vpop.f32.mrf.mxu1  ;;  %v4582_v20 = vld [vmem:[%s15154_s7 + $0x157] sm:$0xff] }
 0x308   : > { %4524 = vst.msk [vmem:[#allocation2 + $0x98] sm:$0xff] %vm303_vm3, %v4485_v61  ;;  %v3951_v40 = vadd.f32 %v3912_v29, %v3806_v36  ;;  %14359 = vmatprep.mubr.msk.f32.mxu0 %vm15088_vm1, %v15087_v1  ;;  %v3919_v29 = vld [vmem:[#allocation2 + $0xe8] sm:$0xff] }
 0x309   : > { %v14093_v42 = vpop.f32.mrf.mxu0  ;;  %v4447_v28 = vld [vmem:[#allocation2 + $0xa0] sm:$0xff]  ;;  %v14224_v38 = vpop.f32.mrf.mxu1 }
 0x30a   : > { %3990 = vst.msk [vmem:[#allocation2 + $0xb0] sm:$0xff] %vm303_vm3, %v3951_v40  ;;  %v4486_v23 = vadd.f32 %v4447_v28, %v17294_v15 }
 0x30b   : > { %v3811_v46 = vpop.f32.mrf.mxu0  ;;  %14360 = vmatmul.mubr.msk.f32.gmra.mxu0 %vm364_vm2, %v4576_v55  ;;  %v17368_v54 = vpop.f32.mrf.mxu1 }
 0x30c   : > { %4525 = vst.msk [vmem:[#allocation2 + $0xa0] sm:$0xff] %vm303_vm3, %v4486_v23  ;;  %v3952_v33 = vadd.f32 %v3913_v39, %v3811_v46  ;;  %14362 = vmatprep.mubr.msk.f32.mxu0 %vm15088_vm1, %v15087_v1  ;;  %v3920_v46 = vld [vmem:[#allocation2 + $0xf0] sm:$0xff] }
 0x30d   : > { %v14096_v25 = vpop.f32.mrf.mxu0  ;;  %v4448_v31 = vld [vmem:[#allocation2 + $0xa8] sm:$0xff]  ;;  %v14227_v18 = vpop.f32.mrf.mxu1 }
 0x30e   : > { %3991 = vst.msk [vmem:[#allocation2 + $0xb8] sm:$0xff] %vm303_vm3, %v3952_v33  ;;  %v4487_v15 = vadd.f32 %v4448_v31, %v17303_v5  ;;  %v17431_v18 = vpop.permute.xlu1 %5425 }
 0x30f   : > { %v3816_v49 = vpop.f32.mrf.mxu0  ;;  %14363 = vmatmul.mubr.msk.f32.gmra.mxu0 %vm364_vm2, %v4577_v30  ;;  %v17377_v62 = vpop.f32.mrf.mxu1  ;;  %vm5486_vm15 = vcmp.eq.s32.totalorder %v17431_v18, 1 }
 0x310   : > { %4526 = vst.msk [vmem:[#allocation2 + $0xa8] sm:$0xff] %vm303_vm3, %v4487_v15  ;;  %v3953_v48 = vadd.f32 %v3914_v57, %v3816_v49  ;;  %14365 = vmatprep.mubr.msk.f32.mxu0 %vm15088_vm1, %v15087_v1  ;;  %v3921_v15 = vld [vmem:[#allocation2 + $0xf8] sm:$0xff]  ;;  %v17429_v57 = vpop.permute.xlu0 %5419 }
 0x311   : > { %v14099_v51 = vpop.f32.mrf.mxu0  ;;  %v4449_v45 = vld [vmem:[#allocation2 + $0xb0] sm:$0xff]  ;;  %v14230_v21 = vpop.f32.mrf.mxu1  ;;  %vm5484_vm13 = vcmp.eq.s32.totalorder %v17429_v57, 1 }
 0x312   : > { %3992 = vst.msk [vmem:[#allocation2 + $0xc0] sm:$0xff] %vm303_vm3, %v3953_v48  ;;  %v4488_v5 = vadd.f32 %v4449_v45, %v17316_v56 }
 0x313   : > { %v3821_v50 = vpop.f32.mrf.mxu0  ;;  %14366 = vmatmul.mubr.msk.f32.gmra.mxu0 %vm364_vm2, %v4578_v43  ;;  %v17386_v41 = vpop.f32.mrf.mxu1 }
 0x314   : > { %4527 = vst.msk [vmem:[#allocation2 + $0xb0] sm:$0xff] %vm303_vm3, %v4488_v5  ;;  %v3954_v0 = vadd.f32 %v3915_v47, %v3821_v50  ;;  %14368 = vmatprep.mubr.msk.f32.mxu0 %vm15088_vm1, %v15087_v1  ;;  %v17438_v21 = vpop.permute.xlu0 %5422 }
 0x315   : > { %v14102_v53 = vpop.f32.mrf.mxu0  ;;  %v4450_v52 = vld [vmem:[#allocation2 + $0xb8] sm:$0xff]  ;;  %v14233_v37 = vpop.f32.mrf.mxu1  ;;  %vm5485_vm14 = vcmp.eq.s32.totalorder %v17438_v21, 1 }
 0x316   : > { %3993 = vst.msk [vmem:[#allocation2 + $0xc8] sm:$0xff] %vm303_vm3, %v3954_v0  ;;  %v4489_v56 = vadd.f32 %v4450_v52, %v17329_v11  ;;  %v17440_v0 = vpop.permute.xlu1 %5428 }
 0x317   : > { %v3826_v60 = vpop.f32.mrf.mxu0  ;;  %14369 = vmatmul.mubr.msk.f32.gmra.mxu0 %vm364_vm2, %v4579_v58  ;;  %v17395_v7 = vpop.f32.mrf.mxu1  ;;  %vm5487_vm0 = vcmp.eq.s32.totalorder %v17440_v0, 1 }
 0x318   : > { %4528 = vst.msk [vmem:[#allocation2 + $0xb8] sm:$0xff] %vm303_vm3, %v4489_v56  ;;  %v3955_v3 = vadd.f32 %v3916_v59, %v3826_v60  ;;  %14371 = vmatprep.mubr.msk.f32.mxu0 %vm15088_vm1, %v15087_v1 }
 0x319   : > { %v14105_v14 = vpop.f32.mrf.mxu0  ;;  %v4451_v63 = vld [vmem:[#allocation2 + $0xc0] sm:$0xff]  ;;  %v14236_v4 = vpop.f32.mrf.mxu1 }
 0x31a   : > { %3994 = vst.msk [vmem:[#allocation2 + $0xd0] sm:$0xff] %vm303_vm3, %v3955_v3  ;;  %v4490_v11 = vadd.f32 %v4451_v63, %v17341_v26  ;;  %v17447_v3 = vpop.permute.xlu0 %5431 }
 0x31b   : > { %v3831_v2 = vpop.f32.mrf.mxu0  ;;  %14372 = vmatmul.mubr.msk.f32.gmra.mxu0 %vm364_vm2, %v4580_v35  ;;  %v17404_v10 = vpop.f32.mrf.mxu1  ;;  %vm5488_vm4 = vcmp.eq.s32.totalorder %v17447_v3, 1 }
 0x31c   : > { %4529 = vst.msk [vmem:[#allocation2 + $0xc0] sm:$0xff] %vm303_vm3, %v4490_v11  ;;  %v3956_v13 = vadd.f32 %v3917_v19, %v3831_v2  ;;  %14374 = vmatprep.mubr.msk.f32.mxu0 %vm15088_vm1, %v15087_v1  ;;  %v17449_v35 = vpop.permute.xlu1 %5434 }
 0x31d   : > { %v14108_v22 = vpop.f32.mrf.mxu0  ;;  %v4452_v17 = vld [vmem:[#allocation2 + $0xc8] sm:$0xff]  ;;  %v14239_v16 = vpop.f32.mrf.mxu1  ;;  %vm5489_vm5 = vcmp.eq.s32.totalorder %v17449_v35, 1 }
 0x31e   : > { %3995 = vst.msk [vmem:[#allocation2 + $0xd8] sm:$0xff] %vm303_vm3, %v3956_v13  ;;  %v4491_v26 = vadd.f32 %v4452_v17, %v17350_v12 }
 0x31f   : > { %v3836_v6 = vpop.f32.mrf.mxu0  ;;  %14375 = vmatmul.mubr.msk.f32.gmra.mxu0 %vm364_vm2, %v4581_v24  ;;  %v17413_v61 = vpop.f32.mrf.mxu1 }
 0x320   : > { %4530 = vst.msk [vmem:[#allocation2 + $0xc8] sm:$0xff] %vm303_vm3, %v4491_v26  ;;  %v3957_v8 = vadd.f32 %v3918_v9, %v3836_v6  ;;  %14377 = vmatprep.mubr.msk.f32.mxu0 %vm15088_vm1, %v15087_v1  ;;  %v17456_v24 = vpop.permute.xlu0 %5437  ;;  %v17458_v22 = vpop.permute.xlu1 %5440 }
 0x321   : > { %v14111_v34 = vpop.f32.mrf.mxu0  ;;  %v4453_v27 = vld [vmem:[#allocation2 + $0xd0] sm:$0xff]  ;;  %v14242_v32 = vpop.f32.mrf.mxu1  ;;  %vm5490_vm6 = vcmp.eq.s32.totalorder %v17456_v24, 1  ;;  %vm5491_vm7 = vcmp.eq.s32.totalorder %v17458_v22, 1 }
 0x322   : > { %3996 = vst.msk [vmem:[#allocation2 + $0xe0] sm:$0xff] %vm303_vm3, %v3957_v8  ;;  %v4492_v12 = vadd.f32 %v4453_v27, %v17359_v44 }
 0x323   : > { %v3841_v36 = vpop.f32.mrf.mxu0  ;;  %14378 = vmatmul.mubr.msk.f32.gmra.mxu0 %vm364_vm2, %v4582_v20  ;;  %v17419_v1 = vpop.f32.mrf.mxu1 }
 0x324   : > { %4531 = vst.msk [vmem:[#allocation2 + $0xd0] sm:$0xff] %vm303_vm3, %v4492_v12  ;;  %v3958_v40 = vadd.f32 %v3919_v29, %v3841_v36  ;;  %v17465_v34 = vpop.permute.xlu0 %5443  ;;  %v17467_v27 = vpop.permute.xlu1 %5446 }
 0x325   : > { %v14114_v55 = vpop.f32.mrf.mxu0  ;;  %v4454_v42 = vld [vmem:[#allocation2 + $0xd8] sm:$0xff]  ;;  %v14245_v39 = vpop.f32.mrf.mxu1  ;;  %vm5492_vm8 = vcmp.eq.s32.totalorder %v17465_v34, 1  ;;  %vm5493_vm9 = vcmp.eq.s32.totalorder %v17467_v27, 1 }
 0x326   : > { %3997 = vst.msk [vmem:[#allocation2 + $0xe8] sm:$0xff] %vm303_vm3, %v3958_v40  ;;  %v4493_v28 = vadd.f32 %v4454_v42, %v17368_v54  ;;  %v3926_v40 = vld [vmem:[#allocation2 + $0x120] sm:$0xff] }
 0x327   : > { %v3846_v23 = vpop.f32.mrf.mxu0  ;;  %v17424_v30 = vpop.f32.mrf.mxu1 }
 0x328   : > { %4532 = vst.msk [vmem:[#allocation2 + $0xd8] sm:$0xff] %vm303_vm3, %v4493_v28  ;;  %v3959_v44 = vadd.f32 %v3920_v46, %v3846_v23 }
 0x329   : > { %v14117_v38 = vpop.f32.mrf.mxu0  ;;  %v4455_v33 = vld [vmem:[#allocation2 + $0xe0] sm:$0xff]  ;;  %v14248_v49 = vpop.f32.mrf.mxu1 }
 0x32a   : > { %3998 = vst.msk [vmem:[#allocation2 + $0xf0] sm:$0xff] %vm303_vm3, %v3959_v44  ;;  %v4494_v25 = vadd.f32 %v4455_v33, %v17377_v62  ;;  %v3922_v62 = vld [vmem:[#allocation2 + $0x100] sm:$0xff]  ;;  %v17472_v55 = vpop.permute.xlu1 %5452  ;;  %v3927_v44 = vld [vmem:[#allocation2 + $0x128] sm:$0xff] }
 0x32b   : > { %v3851_v31 = vpop.f32.mrf.mxu0  ;;  %v17433_v51 = vpop.f32.mrf.mxu1  ;;  %vm5495_vm11 = vcmp.eq.s32.totalorder %v17472_v55, 1 }
 0x32c   : > { %4533 = vst.msk [vmem:[#allocation2 + $0xe0] sm:$0xff] %vm303_vm3, %v4494_v25  ;;  %v3960_v54 = vadd.f32 %v3921_v15, %v3851_v31 }
 0x32d   : > { %v14120_v48 = vpop.f32.mrf.mxu0  ;;  %v4456_v43 = vld [vmem:[#allocation2 + $0xe8] sm:$0xff]  ;;  %v14251_v50 = vpop.f32.mrf.mxu1 }
 0x32e   : > { %3999 = vst.msk [vmem:[#allocation2 + $0xf8] sm:$0xff] %vm303_vm3, %v3960_v54  ;;  %v4495_v45 = vadd.f32 %v4456_v43, %v17386_v41  ;;  %v3923_v41 = vld [vmem:[#allocation2 + $0x108] sm:$0xff]  ;;  %v3928_v54 = vld [vmem:[#allocation2 + $0x130] sm:$0xff] }
 0x32f   : > { %v3856_v5 = vpop.f32.mrf.mxu0  ;;  %v17442_v52 = vpop.f32.mrf.mxu1  ;;  %v5123_v50 = vld [vmem:[#allocation2 + $0x150] ss:$2 sm:$0xff] }
 0x330   : > { %4534 = vst.msk [vmem:[#allocation2 + $0xe8] sm:$0xff] %vm303_vm3, %v4495_v45  ;;  %v3961_v47 = vadd.f32 %v3922_v62, %v3856_v5  ;;  %v17479_v38 = vpop.permute.xlu1 %5458  ;;  %v4964_v62 = vld [vmem:[#allocation2] sm:$0xff] }
 0x331   : > { %v14123_v58 = vpop.f32.mrf.mxu0  ;;  %v4457_v53 = vld [vmem:[#allocation2 + $0xf0] sm:$0xff]  ;;  %v14254_v59 = vpop.f32.mrf.mxu1 }
 0x332   : > { %4000 = vst.msk [vmem:[#allocation2 + $0x100] sm:$0xff] %vm303_vm3, %v3961_v47  ;;  %v4496_v56 = vadd.f32 %v4457_v53, %v17395_v7  ;;  %v3924_v7 = vld [vmem:[#allocation2 + $0x110] sm:$0xff] }
 0x333   : > { %v3861_v60 = vpop.f32.mrf.mxu0  ;;  %v17451_v11 = vpop.f32.mrf.mxu1  ;;  %v5167_v47 = vld [vmem:[#allocation2 + $0x151] ss:$2 sm:$0xff]  ;;  %v5211_v53 = vld [vmem:[#allocation2 + $0x162] ss:$2 sm:$0xff] }
 0x334   : > { %4535 = vst.msk [vmem:[#allocation2 + $0xf0] sm:$0xff] %vm303_vm3, %v4496_v56  ;;  %v3962_v37 = vadd.f32 %v3923_v41, %v3861_v60  ;;  %v5277_v56 = vmax.f32 %v5123_v50, %v5167_v47  ;;  %v5121_v60 = vld [vmem:[#allocation2 + $0x140] ss:$2 sm:$0xff] }
 0x335   : > { %v14126_v14 = vpop.f32.mrf.mxu0  ;;  %v4458_v63 = vld [vmem:[#allocation2 + $0xf8] sm:$0xff]  ;;  %v14257_v4 = vpop.f32.mrf.mxu1 }
 0x336   : > { %4001 = vst.msk [vmem:[#allocation2 + $0x108] sm:$0xff] %vm303_vm3, %v3962_v37  ;;  %v4497_v2 = vadd.f32 %v4458_v63, %v17404_v10  ;;  %v3925_v10 = vld [vmem:[#allocation2 + $0x118] sm:$0xff]  ;;  %v5165_v37 = vld [vmem:[#allocation2 + $0x141] ss:$2 sm:$0xff] }
 0x337   : > { %v3866_v19 = vpop.f32.mrf.mxu0  ;;  %v17460_v6 = vpop.f32.mrf.mxu1  ;;  %v5209_v14 = vld [vmem:[#allocation2 + $0x152] ss:$2 sm:$0xff]  ;;  %v5253_v63 = vld [vmem:[#allocation2 + $0x153] ss:$2 sm:$0xff]  ;;  %v5276_v4 = vmax.f32 %v5121_v60, %v5165_v37 }
 0x338   : > { %4536 = vst.msk [vmem:[#allocation2 + $0xf8] sm:$0xff] %vm303_vm3, %v4497_v2  ;;  %v3963_v13 = vadd.f32 %v3924_v7, %v3866_v19 }
 0x339   : > { %v14129_v17 = vpop.f32.mrf.mxu0  ;;  %v4459_v26 = vld [vmem:[#allocation2 + $0x100] sm:$0xff]  ;;  %v14260_v8 = vpop.f32.mrf.mxu1 }
 0x33a   : > { %4002 = vst.msk [vmem:[#allocation2 + $0x110] sm:$0xff] %vm303_vm3, %v3963_v13  ;;  %v4498_v9 = vadd.f32 %v4459_v26, %v17413_v61  ;;  %v5298_v13 = vmax.f32 %v5209_v14, %v5253_v63  ;;  %v4970_v63 = vld [vmem:[#allocation2 + $0x30] sm:$0xff] }
 0x33b   : > { %v3871_v16 = vpop.f32.mrf.mxu0 }
 0x33c   : > { %4537 = vst.msk [vmem:[#allocation2 + $0x100] sm:$0xff] %vm303_vm3, %v4498_v9  ;;  %v3964_v20 = vadd.f32 %v3925_v10, %v3871_v16  ;;  %v17474_v42 = vpop.permute.xlu0 %5449  ;;  %v17502_v16 = vld [vmem:[%s19196_s4] ss:$0 sm:$0xff]  ;;  %v5320_v10 = vmax.f32 %v5276_v4, %v5298_v13 }
 0x33d   : > { %v14132_v12 = vpop.f32.mrf.mxu0  ;;  %v4460_v36 = vld [vmem:[#allocation2 + $0x108] sm:$0xff]  ;;  %vm5494_vm10 = vcmp.eq.s32.totalorder %v17474_v42, 1 }
 0x33e   : > { %4003 = vst.msk [vmem:[#allocation2 + $0x118] sm:$0xff] %vm303_vm3, %v3964_v20  ;;  %v4499_v29 = vadd.f32 %v4460_v36, %v17419_v1  ;;  %v4965_v20 = vld [vmem:[#allocation2 + $0x8] sm:$0xff] }
 0x33f   : > { %v3876_v32 = vpop.f32.mrf.mxu0 }
 0x340   : > { %4538 = vst.msk [vmem:[#allocation2 + $0x108] sm:$0xff] %vm303_vm3, %v4499_v29  ;;  %v3965_v61 = vadd.f32 %v3926_v40, %v3876_v32  ;;  %v17481_v33 = vpop.permute.xlu0 %5455  ;;  %v17509_v29 = vld [vmem:[%s19196_s4 + $0x1] ss:$0 sm:$0xff]  ;;  %v5346_v40 = vmul.f32 %v17502_v16, %v5320_v10 }
 0x341   : > { %v14135_v28 = vpop.f32.mrf.mxu0  ;;  %v4461_v23 = vld [vmem:[#allocation2 + $0x110] sm:$0xff]  ;;  %vm19203_vm12 = vcmp.eq.s32.totalorder %v17481_v33, 1 }
 0x342   : > { %4004 = vst.msk [vmem:[#allocation2 + $0x120] sm:$0xff] %vm303_vm3, %v3965_v61  ;;  %v4500_v46 = vadd.f32 %v4461_v23, %v17424_v30 }
 0x343   : > { %v3881_v39 = vpop.f32.mrf.mxu0 }
 0x344   : > { %4539 = vst.msk [vmem:[#allocation2 + $0x110] sm:$0xff] %vm303_vm3, %v4500_v46  ;;  %v3966_v1 = vadd.f32 %v3927_v44, %v3881_v39  ;;  %v17486_v48 = vpop.permute.xlu1 %5464  ;;  %v17488_v43 = vpop.permute.xlu0 %5461  ;;  %v5372_v39 = vadd.f32 %v17509_v29, %v5346_v40  ;;  %v5860_v40 = vld [vmem:[%s19194_s2 + $0x18] sm:$0xff] }
 0x345   : > { %v14138_v25 = vpop.f32.mrf.mxu0  ;;  %v4462_v31 = vld [vmem:[#allocation2 + $0x118] sm:$0xff]  ;;  %14417 = vmatprep.subr.mxu1 %v5860_v40 }
 0x346   : > { %4005 = vst.msk [vmem:[#allocation2 + $0x128] sm:$0xff] %vm303_vm3, %v3966_v1  ;;  %v4501_v15 = vadd.f32 %v4462_v31, %v17433_v51  ;;  %v5255_v51 = vld [vmem:[#allocation2 + $0x163] ss:$2 sm:$0xff]  ;;  %14418 = vmatpush3.msra.mxu1 %v5860_v40 }
 0x347   : > { %v3886_v49 = vpop.f32.mrf.mxu0  ;;  %v5299_v59 = vmax.f32 %v5211_v53, %v5255_v51  ;;  %v4966_v1 = vld [vmem:[#allocation2 + $0x10] sm:$0xff]  ;;  %v4968_v53 = vld [vmem:[#allocation2 + $0x20] sm:$0xff] }
 0x348   : > { %4540 = vst.msk [vmem:[#allocation2 + $0x118] sm:$0xff] %vm303_vm3, %v4501_v15  ;;  %v3967_v30 = vadd.f32 %v3928_v54, %v3886_v49  ;;  %v17493_v19 = vpop.permute.xlu1 %5470  ;;  %v17495_v7 = vpop.permute.xlu0 %5467  ;;  %v5394_v54 = vmax.f32 %v5372_v39, 0.0 }
 0x349   : > { %v14141_v45 = vpop.f32.mrf.mxu0  ;;  %v4463_v5 = vld [vmem:[#allocation2 + $0x120] sm:$0xff]  ;;  %19211 = vst [vmem:[#allocation6_spill] sm:$0xff] %v17495_v7  ;;  %v5321_v26 = vmax.f32 %v5277_v56, %v5299_v59 }
 0x34a   : > { %4006 = vst.msk [vmem:[#allocation2 + $0x130] sm:$0xff] %vm303_vm3, %v3967_v30  ;;  %v4502_v58 = vadd.f32 %v4463_v5, %v17442_v52 }
 0x34b   : > { %v4770_v41 = vpop.f32.mrf.mxu0  ;;  %v5347_v12 = vmul.f32 %v17502_v16, %v5321_v26 }
 0x34c   : > { %4541 = vst.msk [vmem:[#allocation2 + $0x120] sm:$0xff] %vm303_vm3, %v4502_v58  ;;  %v5003_v2 = vadd.f32 %v4964_v62, %v4770_v41  ;;  %v17511_v32 = vpop.permute.xlu1 %5476  ;;  %v4967_v62 = vld [vmem:[#allocation2 + $0x18] sm:$0xff]  ;;  %v4969_v41 = vld [vmem:[#allocation2 + $0x28] sm:$0xff] }
 0x34d   : > { %v4464_v17 = vld [vmem:[#allocation2 + $0x128] sm:$0xff]  ;;  %v14265_v52 = vpop.f32.mrf.mxu0  ;;  %19212 = vst [vmem:[#allocation7_spill] sm:$0xff] %v17511_v32  ;;  %v5373_v23 = vadd.f32 %v17509_v29, %v5347_v12 }
 0x34e   : > { %5042 = vst.msk [vmem:[#allocation2] sm:$0xff] %vm303_vm3, %v5003_v2  ;;  %v4503_v9 = vadd.f32 %v4464_v17, %v17451_v11  ;;  %v17513_v11 = vpop.permute.xlu0 %5473 }
 0x34f   : > { %v4775_v8 = vpop.f32.mrf.mxu0  ;;  %19213 = vst [vmem:[#allocation8_spill] sm:$0xff] %v17513_v11  ;;  %v5395_v25 = vmax.f32 %v5373_v23, 0.0 }
 0x350   : > { %4542 = vst.msk [vmem:[#allocation2 + $0x128] sm:$0xff] %vm303_vm3, %v4503_v9  ;;  %v5004_v36 = vadd.f32 %v4965_v20, %v4775_v8  ;;  %v17521_v15 = vpop.permute.xlu1 %5482  ;;  %v4971_v20 = vld [vmem:[#allocation2 + $0x38] sm:$0xff] }
 0x351   : > { %v4465_v61 = vld [vmem:[#allocation2 + $0x130] sm:$0xff]  ;;  %v14268_v28 = vpop.f32.mrf.mxu0  ;;  %19214 = vst [vmem:[#allocation9_spill] sm:$0xff] %v17521_v15  ;;  %vm19200_vm1 = vcmp.eq.s32.totalorder %v17521_v15, 1 }
 0x352   : > { %5043 = vst.msk [vmem:[#allocation2 + $0x8] sm:$0xff] %vm303_vm3, %v5004_v36  ;;  %v4504_v46 = vadd.f32 %v4465_v61, %v17460_v6  ;;  %v17523_v49 = vpop.permute.xlu0 %5479  ;;  %v5527_v6 = vsel %vm19200_vm1, %v5395_v25, 0.0  ;;  %vm19201_vm1 = vcmp.eq.s32.totalorder %v17488_v43, 1 }
 0x353   : > { %v4780_v44 = vpop.f32.mrf.mxu0  ;;  %19215 = vst [vmem:[#allocation10_spill] sm:$0xff] %v17523_v49  ;;  %vm19199_vm2 = vcmp.eq.s32.totalorder %v17523_v49, 1  ;;  %5549 = vst.msk [vmem:[#allocation4 + $0xc0] sm:$0xff] %vm303_vm3, %v5527_v6 }
 0x354   : > { %4543 = vst.msk [vmem:[#allocation2 + $0x130] sm:$0xff] %vm303_vm3, %v4504_v46  ;;  %v5005_v31 = vadd.f32 %v4966_v1, %v4780_v44  ;;  %v5526_v45 = vsel %vm19199_vm2, %v5394_v54, 0.0  ;;  %v4972_v46 = vld [vmem:[#allocation2 + $0x40] sm:$0xff]  ;;  %vm19205_vm2 = vcmp.eq.s32.totalorder %v17479_v38, 1 }
 0x355   : > { %v14271_v30 = vpop.f32.mrf.mxu0  ;;  %5548 = vst.msk [vmem:[#allocation4 + $0xb8] sm:$0xff] %vm303_vm3, %v5526_v45 }
 0x356   : > { %5044 = vst.msk [vmem:[#allocation2 + $0x10] sm:$0xff] %vm303_vm3, %v5005_v31 }
 0x357   : > { %v4785_v5 = vpop.f32.mrf.mxu0 }
 0x358   : > { %v5006_v50 = vadd.f32 %v4967_v62, %v4785_v5 }
 0x359   : > { %v14274_v47 = vpop.f32.mrf.mxu0  ;;  %v5081_v2 = vld [vmem:[#allocation2] ss:$2 sm:$0xff]  ;;  %v5125_v4 = vld [vmem:[#allocation2 + $0x1] ss:$2 sm:$0xff] }
 0x35a   : > { %5045 = vst.msk [vmem:[#allocation2 + $0x18] sm:$0xff] %vm303_vm3, %v5006_v50  ;;  %v5256_v9 = vmax.f32 %v5081_v2, %v5125_v4  ;;  %v4973_v50 = vld [vmem:[#allocation2 + $0x48] sm:$0xff] }
 0x35b   : > { %v4790_v58 = vpop.f32.mrf.mxu0 }
 0x35c   : > { %v5007_v51 = vadd.f32 %v4968_v53, %v4790_v58 }
 0x35d   : > { %v14277_v56 = vpop.f32.mrf.mxu0 }
 0x35e   : > { %5046 = vst.msk [vmem:[#allocation2 + $0x20] sm:$0xff] %vm303_vm3, %v5007_v51  ;;  %v4974_v56 = vld [vmem:[#allocation2 + $0x50] sm:$0xff] }
 0x35f   : > { %v4795_v60 = vpop.f32.mrf.mxu0 }
 0x360   : > { %v5008_v59 = vadd.f32 %v4969_v41, %v4795_v60 }
 0x361   : > { %v14280_v37 = vpop.f32.mrf.mxu0  ;;  %v5083_v39 = vld [vmem:[#allocation2 + $0x10] ss:$2 sm:$0xff]  ;;  %v5127_v44 = vld [vmem:[#allocation2 + $0x11] ss:$2 sm:$0xff] }
 0x362   : > { %5047 = vst.msk [vmem:[#allocation2 + $0x28] sm:$0xff] %vm303_vm3, %v5008_v59  ;;  %v5257_v45 = vmax.f32 %v5083_v39, %v5127_v44  ;;  %v4976_v39 = vld [vmem:[#allocation2 + $0x60] sm:$0xff] }
 0x363   : > { %v4800_v14 = vpop.f32.mrf.mxu0 }
 0x364   : > { %v5009_v13 = vadd.f32 %v4970_v63, %v4800_v14  ;;  %v5859_v14 = vld [vmem:[%s19194_s2 + $0x10] sm:$0xff] }
 0x365   : > { %v14283_v17 = vpop.f32.mrf.mxu0  ;;  %v5169_v52 = vld [vmem:[#allocation2 + $0x12] ss:$2 sm:$0xff]  ;;  %v5213_v26 = vld [vmem:[#allocation2 + $0x13] ss:$2 sm:$0xff]  ;;  %14419 = vmatprep.subr.mxu1 %v5859_v14 }
 0x366   : > { %5048 = vst.msk [vmem:[#allocation2 + $0x30] sm:$0xff] %vm303_vm3, %v5009_v13  ;;  %v5278_v10 = vmax.f32 %v5169_v52, %v5213_v26  ;;  %14420 = vmatpush3.msra.mxu1 %v5859_v14  ;;  %v4978_v14 = vld [vmem:[#allocation2 + $0x70] sm:$0xff] }
 0x367   : > { %v4805_v8 = vpop.f32.mrf.mxu0 }
 0x368   : > { %v5010_v12 = vadd.f32 %v4971_v20, %v4805_v8  ;;  %v5300_v36 = vmax.f32 %v5256_v9, %v5278_v10  ;;  %v4975_v8 = vld [vmem:[#allocation2 + $0x58] sm:$0xff] }
 0x369   : > { %v14286_v61 = vpop.f32.mrf.mxu0  ;;  %v5085_v59 = vld [vmem:[#allocation2 + $0x20] ss:$2 sm:$0xff]  ;;  %v5129_v37 = vld [vmem:[#allocation2 + $0x21] ss:$2 sm:$0xff] }
 0x36a   : > { %5049 = vst.msk [vmem:[#allocation2 + $0x38] sm:$0xff] %vm303_vm3, %v5010_v12  ;;  %v5326_v28 = vmul.f32 %v17502_v16, %v5300_v36  ;;  %v5258_v26 = vmax.f32 %v5085_v59, %v5129_v37 }
 0x36b   : > { %v4810_v23 = vpop.f32.mrf.mxu0 }
 0x36c   : > { %v5011_v1 = vadd.f32 %v4972_v46, %v4810_v23  ;;  %v5352_v25 = vadd.f32 %v17509_v29, %v5326_v28 }
 0x36d   : > { %v14289_v31 = vpop.f32.mrf.mxu0  ;;  %v5171_v54 = vld [vmem:[#allocation2 + $0x22] ss:$2 sm:$0xff]  ;;  %v5215_v30 = vld [vmem:[#allocation2 + $0x23] ss:$2 sm:$0xff] }
 0x36e   : > { %5050 = vst.msk [vmem:[#allocation2 + $0x40] sm:$0xff] %vm303_vm3, %v5011_v1  ;;  %v5374_v6 = vmax.f32 %v5352_v25, 0.0  ;;  %v5279_v5 = vmax.f32 %v5171_v54, %v5215_v30 }
 0x36f   : > { %v4815_v62 = vpop.f32.mrf.mxu0 }
 0x370   : > { %v5506_v47 = vsel %vm5484_vm13, %v5374_v6, 0.0  ;;  %v5012_v58 = vadd.f32 %v4973_v50, %v4815_v62  ;;  %v5301_v53 = vmax.f32 %v5257_v45, %v5279_v5 }
 0x371   : > { %5528 = vst.msk [vmem:[#allocation4 + $0x18] sm:$0xff] %vm303_vm3, %v5506_v47  ;;  %v14292_v51 = vpop.f32.mrf.mxu0  ;;  %v5087_v44 = vld [vmem:[#allocation2 + $0x30] ss:$2 sm:$0xff]  ;;  %v5131_v1 = vld [vmem:[#allocation2 + $0x31] ss:$2 sm:$0xff]  ;;  %v4977_v47 = vld [vmem:[#allocation2 + $0x68] sm:$0xff] }
 0x372   : > { %5051 = vst.msk [vmem:[#allocation2 + $0x48] sm:$0xff] %vm303_vm3, %v5012_v58  ;;  %v5327_v60 = vmul.f32 %v17502_v16, %v5301_v53  ;;  %v5259_v5 = vmax.f32 %v5087_v44, %v5131_v1  ;;  %v7515_v1 = vld [vmem:[%s19194_s2 + $0x68] sm:$0xff] }
 0x373   : > { %v4820_v41 = vpop.f32.mrf.mxu0  ;;  %14602 = vmatprep.subr.mxu0 %v7515_v1 }
 0x374   : > { %v5013_v63 = vadd.f32 %v4974_v56, %v4820_v41  ;;  %v5353_v2 = vadd.f32 %v17509_v29, %v5327_v60 }
 0x375   : > { %v14295_v4 = vpop.f32.mrf.mxu0  ;;  %v5173_v13 = vld [vmem:[#allocation2 + $0x32] ss:$2 sm:$0xff]  ;;  %v5217_v17 = vld [vmem:[#allocation2 + $0x33] ss:$2 sm:$0xff] }
 0x376   : > { %5052 = vst.msk [vmem:[#allocation2 + $0x50] sm:$0xff] %vm303_vm3, %v5013_v63  ;;  %v5375_v52 = vmax.f32 %v5353_v2, 0.0  ;;  %v5280_v9 = vmax.f32 %v5173_v13, %v5217_v17 }
 0x377   : > { %v4825_v10 = vpop.f32.mrf.mxu0 }
 0x378   : > { %v11534_v20 = vld [vmem:[#allocation4 + $0x18] sm:$0xff]  ;;  %v5507_v12 = vsel %vm5485_vm14, %v5375_v52, 0.0  ;;  %v5014_v36 = vadd.f32 %v4975_v8, %v4825_v10  ;;  %v5302_v61 = vmax.f32 %v5258_v26, %v5280_v9 }
 0x379   : > { %v5552_v40 = vld [vmem:[#allocation4 + $0x15] sm:$0xff]  ;;  %5529 = vst.msk [vmem:[#allocation4 + $0x20] sm:$0xff] %vm303_vm3, %v5507_v12  ;;  %v14298_v28 = vpop.f32.mrf.mxu0  ;;  %14532 = vmatprep.mubr.msk.f32.mxu0 %vm303_vm3, %v11534_v20 }
 0x37a   : > { %14387 = vmatprep.mubr.msk.f32.mxu1 %vm303_vm3, %v5552_v40  ;;  %5053 = vst.msk [vmem:[#allocation2 + $0x58] sm:$0xff] %vm303_vm3, %v5014_v36  ;;  %v5328_v23 = vmul.f32 %v17502_v16, %v5302_v61  ;;  %v5089_v63 = vld [vmem:[#allocation2 + $0x40] ss:$2 sm:$0xff]  ;;  %v5133_v2 = vld [vmem:[#allocation2 + $0x41] ss:$2 sm:$0xff]  ;;  %v4979_v12 = vld [vmem:[#allocation2 + $0x78] sm:$0xff] }
 0x37b   : > { %v4830_v46 = vpop.f32.mrf.mxu0  ;;  %v5260_v10 = vmax.f32 %v5089_v63, %v5133_v2  ;;  %v17580_v36 = vld [vmem:[%s19194_s2 + $0x28] sm:$0xff] }
 0x37c   : > { %v5015_v25 = vadd.f32 %v4976_v39, %v4830_v46  ;;  %v5354_v31 = vadd.f32 %v17509_v29, %v5328_v23  ;;  %14454 = vmatprep.subr.mxu1 %v17580_v36 }
 0x37d   : > { %v14301_v54 = vpop.f32.mrf.mxu0  ;;  %v5175_v30 = vld [vmem:[#allocation2 + $0x42] ss:$2 sm:$0xff]  ;;  %v5219_v6 = vld [vmem:[#allocation2 + $0x43] ss:$2 sm:$0xff] }
 0x37e   : > { %5054 = vst.msk [vmem:[#allocation2 + $0x60] sm:$0xff] %vm303_vm3, %v5015_v25  ;;  %v5376_v45 = vmax.f32 %v5354_v31, 0.0  ;;  %v5281_v62 = vmax.f32 %v5175_v30, %v5219_v6  ;;  %v4980_v31 = vld [vmem:[#allocation2 + $0x80] sm:$0xff] }
 0x37f   : > { %v4835_v50 = vpop.f32.mrf.mxu0 }
 0x380   : > { %v11535_v58 = vld [vmem:[#allocation4 + $0x20] sm:$0xff]  ;;  %v5508_v53 = vsel %vm5486_vm15, %v5376_v45, 0.0  ;;  %v5016_v51 = vadd.f32 %v4977_v47, %v4835_v50  ;;  %v5303_v60 = vmax.f32 %v5259_v5, %v5281_v62  ;;  %v7514_v5 = vld [vmem:[%s19194_s2 + $0x60] sm:$0xff] }
 0x381   : > { %v5553_v56 = vld [vmem:[#allocation4 + $0x1d] sm:$0xff]  ;;  %5530 = vst.msk [vmem:[#allocation4 + $0x28] sm:$0xff] %vm303_vm3, %v5508_v53  ;;  %v14304_v41 = vpop.f32.mrf.mxu0  ;;  %14533 = vmatmul.mubr.msk.f32.vlgmr.msra.gmra.mxu0 %vm303_vm3, %v11535_v58  ;;  %v5091_v54 = vld [vmem:[#allocation2 + $0x50] ss:$2 sm:$0xff]  ;;  %v5135_v30 = vld [vmem:[#allocation2 + $0x51] ss:$2 sm:$0xff] }
 0x382   : > { %14388 = vmatmul.mubr.msk.f32.gmra.mxu1 %vm303_vm3, %v5553_v56  ;;  %5055 = vst.msk [vmem:[#allocation2 + $0x68] sm:$0xff] %vm303_vm3, %v5016_v51  ;;  %v5329_v59 = vmul.f32 %v17502_v16, %v5303_v60  ;;  %14603 = vmatpush3.msra.mxu0 %v7515_v1  ;;  %v5261_v53 = vmax.f32 %v5091_v54, %v5135_v30  ;;  %v4981_v60 = vld [vmem:[#allocation2 + $0x88] sm:$0xff] }
 0x383   : > { %v4840_v37 = vpop.f32.mrf.mxu0  ;;  %14604 = vmatprep.subr.mxu0 %v7514_v5 }
 0x384   : > { %v5017_v4 = vadd.f32 %v4978_v14, %v4840_v37  ;;  %v5355_v13 = vadd.f32 %v17509_v29, %v5329_v59  ;;  %14605 = vmatpush3.msra.mxu0 %v7514_v5 }
 0x385   : > { %v14307_v17 = vpop.f32.mrf.mxu0  ;;  %v5177_v52 = vld [vmem:[#allocation2 + $0x52] ss:$2 sm:$0xff]  ;;  %v5221_v26 = vld [vmem:[#allocation2 + $0x53] ss:$2 sm:$0xff] }
 0x386   : > { %5056 = vst.msk [vmem:[#allocation2 + $0x70] sm:$0xff] %vm303_vm3, %v5017_v4  ;;  %v5377_v9 = vmax.f32 %v5355_v13, 0.0  ;;  %v5282_v8 = vmax.f32 %v5177_v52, %v5221_v26  ;;  %v4982_v17 = vld [vmem:[#allocation2 + $0x90] sm:$0xff] }
 0x387   : > { %v4845_v20 = vpop.f32.mrf.mxu0 }
 0x388   : > { %v11536_v40 = vld [vmem:[#allocation4 + $0x28] sm:$0xff]  ;;  %v5509_v61 = vsel %vm5487_vm0, %v5377_v9, 0.0  ;;  %v5018_v28 = vadd.f32 %v4979_v12, %v4845_v20  ;;  %v5304_v46 = vmax.f32 %v5260_v10, %v5282_v8 }
 0x389   : > { %v5554_v23 = vld [vmem:[#allocation4 + $0x25] sm:$0xff]  ;;  %5531 = vst.msk [vmem:[#allocation4 + $0x30] sm:$0xff] %vm303_vm3, %v5509_v61  ;;  %v14310_v39 = vpop.f32.mrf.mxu0  ;;  %14535 = vmatprep.mubr.msk.f32.mxu0 %vm303_vm3, %v11536_v40 }
 0x38a   : > { %14390 = vmatprep.mubr.msk.f32.mxu1 %vm303_vm3, %v5554_v23  ;;  %5057 = vst.msk [vmem:[#allocation2 + $0x78] sm:$0xff] %vm303_vm3, %v5018_v28  ;;  %v5330_v44 = vmul.f32 %v17502_v16, %v5304_v46  ;;  %v5093_v52 = vld [vmem:[#allocation2 + $0x60] ss:$2 sm:$0xff]  ;;  %v5137_v26 = vld [vmem:[#allocation2 + $0x61] ss:$2 sm:$0xff]  ;;  %v4983_v46 = vld [vmem:[#allocation2 + $0x98] sm:$0xff] }
 0x38b   : > { %v4850_v25 = vpop.f32.mrf.mxu0  ;;  %v5262_v61 = vmax.f32 %v5093_v52, %v5137_v26 }
 0x38c   : > { %v5019_v6 = vadd.f32 %v4980_v31, %v4850_v25  ;;  %v5356_v45 = vadd.f32 %v17509_v29, %v5330_v44 }
 0x38d   : > { %v14313_v62 = vpop.f32.mrf.mxu0  ;;  %v5179_v50 = vld [vmem:[#allocation2 + $0x62] ss:$2 sm:$0xff]  ;;  %v5223_v47 = vld [vmem:[#allocation2 + $0x63] ss:$2 sm:$0xff] }
 0x38e   : > { %5058 = vst.msk [vmem:[#allocation2 + $0x80] sm:$0xff] %vm303_vm3, %v5019_v6  ;;  %v5378_v58 = vmax.f32 %v5356_v45, 0.0  ;;  %v5283_v51 = vmax.f32 %v5179_v50, %v5223_v47  ;;  %v4984_v45 = vld [vmem:[#allocation2 + $0xa0] sm:$0xff] }
 0x38f   : > { %v4855_v56 = vpop.f32.mrf.mxu0 }
 0x390   : > { %v11537_v41 = vld [vmem:[#allocation4 + $0x30] sm:$0xff]  ;;  %v5510_v59 = vsel %vm5488_vm4, %v5378_v58, 0.0  ;;  %v5020_v37 = vadd.f32 %v4981_v60, %v4855_v56  ;;  %v5305_v63 = vmax.f32 %v5261_v53, %v5283_v51 }
 0x391   : > { %v5555_v14 = vld [vmem:[#allocation4 + $0x2d] sm:$0xff]  ;;  %5532 = vst.msk [vmem:[#allocation4 + $0x38] sm:$0xff] %vm303_vm3, %v5510_v59  ;;  %v14316_v2 = vpop.f32.mrf.mxu0  ;;  %14536 = vmatmul.mubr.msk.f32.gmra.mxu0 %vm303_vm3, %v11537_v41 }
 0x392   : > { %14391 = vmatmul.mubr.msk.f32.gmra.mxu1 %vm303_vm3, %v5555_v14  ;;  %5059 = vst.msk [vmem:[#allocation2 + $0x88] sm:$0xff] %vm303_vm3, %v5020_v37  ;;  %v5331_v4 = vmul.f32 %v17502_v16, %v5305_v63  ;;  %v5095_v5 = vld [vmem:[#allocation2 + $0x70] ss:$2 sm:$0xff]  ;;  %v5139_v62 = vld [vmem:[#allocation2 + $0x71] ss:$2 sm:$0xff]  ;;  %v4985_v37 = vld [vmem:[#allocation2 + $0xa8] sm:$0xff] }
 0x393   : > { %v4860_v13 = vpop.f32.mrf.mxu0  ;;  %v5263_v60 = vmax.f32 %v5095_v5, %v5139_v62 }
 0x394   : > { %v5021_v9 = vadd.f32 %v4982_v17, %v4860_v13  ;;  %v5357_v10 = vadd.f32 %v17509_v29, %v5331_v4 }
 0x395   : > { %v14319_v8 = vpop.f32.mrf.mxu0  ;;  %v5181_v20 = vld [vmem:[#allocation2 + $0x72] ss:$2 sm:$0xff]  ;;  %v5225_v12 = vld [vmem:[#allocation2 + $0x73] ss:$2 sm:$0xff] }
 0x396   : > { %5060 = vst.msk [vmem:[#allocation2 + $0x90] sm:$0xff] %vm303_vm3, %v5021_v9  ;;  %v5379_v40 = vmax.f32 %v5357_v10, 0.0  ;;  %v5284_v28 = vmax.f32 %v5181_v20, %v5225_v12  ;;  %v4986_v9 = vld [vmem:[#allocation2 + $0xb0] sm:$0xff] }
 0x397   : > { %v4865_v23 = vpop.f32.mrf.mxu0 }
 0x398   : > { %v11538_v39 = vld [vmem:[#allocation4 + $0x38] sm:$0xff]  ;;  %v5511_v44 = vsel %vm5489_vm5, %v5379_v40, 0.0  ;;  %v5022_v1 = vadd.f32 %v4983_v46, %v4865_v23  ;;  %v5306_v31 = vmax.f32 %v5262_v61, %v5284_v28 }
 0x399   : > { %v5556_v25 = vld [vmem:[#allocation4 + $0x35] sm:$0xff]  ;;  %5533 = vst.msk [vmem:[#allocation4 + $0x40] sm:$0xff] %vm303_vm3, %v5511_v44  ;;  %v14322_v54 = vpop.f32.mrf.mxu0  ;;  %14538 = vmatprep.mubr.msk.f32.mxu0 %vm303_vm3, %v11538_v39 }
 0x39a   : > { %14393 = vmatprep.mubr.msk.f32.mxu1 %vm303_vm3, %v5556_v25  ;;  %5061 = vst.msk [vmem:[#allocation2 + $0x98] sm:$0xff] %vm303_vm3, %v5022_v1  ;;  %v5332_v30 = vmul.f32 %v17502_v16, %v5306_v31  ;;  %v5097_v10 = vld [vmem:[#allocation2 + $0x80] ss:$2 sm:$0xff]  ;;  %v5141_v8 = vld [vmem:[#allocation2 + $0x81] ss:$2 sm:$0xff]  ;;  %v4987_v1 = vld [vmem:[#allocation2 + $0xb8] sm:$0xff] }
 0x39b   : > { %v4870_v6 = vpop.f32.mrf.mxu0  ;;  %v5264_v46 = vmax.f32 %v5097_v10, %v5141_v8 }
 0x39c   : > { %v5023_v50 = vadd.f32 %v4984_v45, %v4870_v6  ;;  %v5358_v47 = vadd.f32 %v17509_v29, %v5332_v30 }
 0x39d   : > { %v14325_v58 = vpop.f32.mrf.mxu0  ;;  %v5183_v53 = vld [vmem:[#allocation2 + $0x82] ss:$2 sm:$0xff]  ;;  %v5227_v51 = vld [vmem:[#allocation2 + $0x83] ss:$2 sm:$0xff] }
 0x39e   : > { %5062 = vst.msk [vmem:[#allocation2 + $0xa0] sm:$0xff] %vm303_vm3, %v5023_v50  ;;  %v5380_v56 = vmax.f32 %v5358_v47, 0.0  ;;  %v5285_v41 = vmax.f32 %v5183_v53, %v5227_v51  ;;  %v4988_v50 = vld [vmem:[#allocation2 + $0xc0] sm:$0xff] }
 0x39f   : > { %v4875_v59 = vpop.f32.mrf.mxu0 }
 0x3a0   : > { %v11539_v14 = vld [vmem:[#allocation4 + $0x40] sm:$0xff]  ;;  %v5512_v63 = vsel %vm5490_vm6, %v5380_v56, 0.0  ;;  %v5024_v2 = vadd.f32 %v4985_v37, %v4875_v59  ;;  %v5307_v13 = vmax.f32 %v5263_v60, %v5285_v41 }
 0x3a1   : > { %v5557_v4 = vld [vmem:[#allocation4 + $0x3d] sm:$0xff]  ;;  %5534 = vst.msk [vmem:[#allocation4 + $0x48] sm:$0xff] %vm303_vm3, %v5512_v63  ;;  %v14328_v17 = vpop.f32.mrf.mxu0  ;;  %14539 = vmatmul.mubr.msk.f32.gmra.mxu0 %vm303_vm3, %v11539_v14  ;;  %v5099_v47 = vld [vmem:[#allocation2 + $0x90] ss:$2 sm:$0xff]  ;;  %v5143_v58 = vld [vmem:[#allocation2 + $0x91] ss:$2 sm:$0xff] }
 0x3a2   : > { %14394 = vmatmul.mubr.msk.f32.gmra.mxu1 %vm303_vm3, %v5557_v4  ;;  %5063 = vst.msk [vmem:[#allocation2 + $0xa8] sm:$0xff] %vm303_vm3, %v5024_v2  ;;  %v5333_v52 = vmul.f32 %v17502_v16, %v5307_v13  ;;  %v5265_v37 = vmax.f32 %v5099_v47, %v5143_v58  ;;  %v4989_v2 = vld [vmem:[#allocation2 + $0xc8] sm:$0xff] }
 0x3a3   : > { %v4880_v26 = vpop.f32.mrf.mxu0 }
 0x3a4   : > { %v5025_v20 = vadd.f32 %v4986_v9, %v4880_v26  ;;  %v5359_v12 = vadd.f32 %v17509_v29, %v5333_v52 }
 0x3a5   : > { %v14331_v40 = vpop.f32.mrf.mxu0  ;;  %v5185_v61 = vld [vmem:[#allocation2 + $0x92] ss:$2 sm:$0xff]  ;;  %v5229_v28 = vld [vmem:[#allocation2 + $0x93] ss:$2 sm:$0xff] }
 0x3a6   : > { %5064 = vst.msk [vmem:[#allocation2 + $0xb0] sm:$0xff] %vm303_vm3, %v5025_v20  ;;  %v5381_v23 = vmax.f32 %v5359_v12, 0.0  ;;  %v5286_v39 = vmax.f32 %v5185_v61, %v5229_v28  ;;  %v4990_v20 = vld [vmem:[#allocation2 + $0xd0] sm:$0xff] }
 0x3a7   : > { %v4885_v44 = vpop.f32.mrf.mxu0 }
 0x3a8   : > { %v11540_v25 = vld [vmem:[#allocation4 + $0x48] sm:$0xff]  ;;  %v5513_v31 = vsel %vm5491_vm7, %v5381_v23, 0.0  ;;  %v5026_v54 = vadd.f32 %v4987_v1, %v4885_v44  ;;  %v5308_v6 = vmax.f32 %v5264_v46, %v5286_v39 }
 0x3a9   : > { %v5558_v30 = vld [vmem:[#allocation4 + $0x45] sm:$0xff]  ;;  %5535 = vst.msk [vmem:[#allocation4 + $0x50] sm:$0xff] %vm303_vm3, %v5513_v31  ;;  %v14334_v45 = vpop.f32.mrf.mxu0  ;;  %14541 = vmatprep.mubr.msk.f32.mxu0 %vm303_vm3, %v11540_v25 }
 0x3aa   : > { %14396 = vmatprep.mubr.msk.f32.mxu1 %vm303_vm3, %v5558_v30  ;;  %5065 = vst.msk [vmem:[#allocation2 + $0xb8] sm:$0xff] %vm303_vm3, %v5026_v54  ;;  %v5334_v5 = vmul.f32 %v17502_v16, %v5308_v6  ;;  %v5101_v12 = vld [vmem:[#allocation2 + $0xa0] ss:$2 sm:$0xff]  ;;  %v5145_v40 = vld [vmem:[#allocation2 + $0xa1] ss:$2 sm:$0xff]  ;;  %v4991_v54 = vld [vmem:[#allocation2 + $0xd8] sm:$0xff] }
 0x3ab   : > { %v4890_v62 = vpop.f32.mrf.mxu0  ;;  %v5266_v1 = vmax.f32 %v5101_v12, %v5145_v40  ;;  %v17652_v30 = vld [vmem:[%s19194_s2 + $0x88] sm:$0xff] }
 0x3ac   : > { %v5027_v53 = vadd.f32 %v4988_v50, %v4890_v62  ;;  %v5360_v51 = vadd.f32 %v17509_v29, %v5334_v5  ;;  %14676 = vmatprep.subr.mxu0 %v17652_v30 }
 0x3ad   : > { %v14337_v56 = vpop.f32.mrf.mxu0  ;;  %v5187_v60 = vld [vmem:[#allocation2 + $0xa2] ss:$2 sm:$0xff]  ;;  %v5231_v41 = vld [vmem:[#allocation2 + $0xa3] ss:$2 sm:$0xff] }
 0x3ae   : > { %5066 = vst.msk [vmem:[#allocation2 + $0xc0] sm:$0xff] %vm303_vm3, %v5027_v53  ;;  %v5382_v59 = vmax.f32 %v5360_v51, 0.0  ;;  %v5287_v14 = vmax.f32 %v5187_v60, %v5231_v41  ;;  %v4992_v51 = vld [vmem:[#allocation2 + $0xe0] sm:$0xff] }
 0x3af   : > { %v4895_v63 = vpop.f32.mrf.mxu0 }
 0x3b0   : > { %v11541_v4 = vld [vmem:[#allocation4 + $0x50] sm:$0xff]  ;;  %v5514_v13 = vsel %vm5492_vm8, %v5382_v59, 0.0  ;;  %v5028_v17 = vadd.f32 %v4989_v2, %v4895_v63  ;;  %v5309_v26 = vmax.f32 %v5265_v37, %v5287_v14 }
 0x3b1   : > { %v5559_v52 = vld [vmem:[#allocation4 + $0x4d] sm:$0xff]  ;;  %5536 = vst.msk [vmem:[#allocation4 + $0x58] sm:$0xff] %vm303_vm3, %v5514_v13  ;;  %v14340_v9 = vpop.f32.mrf.mxu0  ;;  %14542 = vmatmul.mubr.msk.f32.gmra.mxu0 %vm303_vm3, %v11541_v4 }
 0x3b2   : > { %14397 = vmatmul.mubr.msk.f32.gmra.mxu1 %vm303_vm3, %v5559_v52  ;;  %5067 = vst.msk [vmem:[#allocation2 + $0xc8] sm:$0xff] %vm303_vm3, %v5028_v17  ;;  %v5335_v10 = vmul.f32 %v17502_v16, %v5309_v26  ;;  %v5103_v56 = vld [vmem:[#allocation2 + $0xb0] ss:$2 sm:$0xff]  ;;  %v5147_v60 = vld [vmem:[#allocation2 + $0xb1] ss:$2 sm:$0xff]  ;;  %v4993_v26 = vld [vmem:[#allocation2 + $0xe8] sm:$0xff] }
 0x3b3   : > { %v4900_v8 = vpop.f32.mrf.mxu0  ;;  %v5267_v4 = vmax.f32 %v5103_v56, %v5147_v60 }
 0x3b4   : > { %v5029_v61 = vadd.f32 %v4990_v20, %v4900_v8  ;;  %v5361_v28 = vadd.f32 %v17509_v29, %v5335_v10 }
 0x3b5   : > { %v14343_v23 = vpop.f32.mrf.mxu0  ;;  %v5189_v46 = vld [vmem:[#allocation2 + $0xb2] ss:$2 sm:$0xff]  ;;  %v5233_v39 = vld [vmem:[#allocation2 + $0xb3] ss:$2 sm:$0xff]  ;;  %v14386_v41 = vpop.f32.mrf.mxu1 }
 0x3b6   : > { %5068 = vst.msk [vmem:[#allocation2 + $0xd0] sm:$0xff] %vm303_vm3, %v5029_v61  ;;  %v5383_v44 = vmax.f32 %v5361_v28, 0.0  ;;  %v5288_v25 = vmax.f32 %v5189_v46, %v5233_v39  ;;  %5816 = vst.msk [vmem:[#allocation3 + $0x8] sm:$0xff] %vm303_vm3, %v14386_v41 }
 0x3b7   : > { %v4905_v31 = vpop.f32.mrf.mxu0  ;;  %v5706_v9 = vpop.f32.mrf.mxu1 }
 0x3b8   : > { %v11542_v6 = vld [vmem:[#allocation4 + $0x58] sm:$0xff]  ;;  %v5515_v45 = vsel %vm5493_vm9, %v5383_v44, 0.0  ;;  %v5030_v5 = vadd.f32 %v4991_v54, %v4905_v31  ;;  %v5310_v50 = vmax.f32 %v5266_v1, %v5288_v25  ;;  %5815 = vst.msk [vmem:[#allocation3] sm:$0xff] %vm303_vm3, %v5706_v9  ;;  %v4994_v44 = vld [vmem:[#allocation2 + $0xf0] sm:$0xff] }
 0x3b9   : > { %v5560_v62 = vld [vmem:[#allocation4 + $0x55] sm:$0xff]  ;;  %5537 = vst.msk [vmem:[#allocation4 + $0x60] sm:$0xff] %vm303_vm3, %v5515_v45  ;;  %v14346_v47 = vpop.f32.mrf.mxu0  ;;  %14544 = vmatprep.mubr.msk.f32.mxu0 %vm303_vm3, %v11542_v6 }
 0x3ba   : > { %14399 = vmatprep.mubr.msk.f32.mxu1 %vm303_vm3, %v5560_v62  ;;  %5069 = vst.msk [vmem:[#allocation2 + $0xd8] sm:$0xff] %vm303_vm3, %v5030_v5  ;;  %v5336_v58 = vmul.f32 %v17502_v16, %v5310_v50  ;;  %v5105_v23 = vld [vmem:[#allocation2 + $0xc0] ss:$2 sm:$0xff]  ;;  %v5149_v46 = vld [vmem:[#allocation2 + $0xc1] ss:$2 sm:$0xff]  ;;  %v4995_v47 = vld [vmem:[#allocation2 + $0xf8] sm:$0xff] }
 0x3bb   : > { %v4910_v53 = vpop.f32.mrf.mxu0  ;;  %v5268_v5 = vmax.f32 %v5105_v23, %v5149_v46 }
 0x3bc   : > { %v5031_v59 = vadd.f32 %v4992_v51, %v4910_v53  ;;  %v5362_v37 = vadd.f32 %v17509_v29, %v5336_v58 }
 0x3bd   : > { %v14349_v14 = vpop.f32.mrf.mxu0  ;;  %v5191_v63 = vld [vmem:[#allocation2 + $0xc2] ss:$2 sm:$0xff]  ;;  %v5235_v2 = vld [vmem:[#allocation2 + $0xc3] ss:$2 sm:$0xff] }
 0x3be   : > { %5070 = vst.msk [vmem:[#allocation2 + $0xe0] sm:$0xff] %vm303_vm3, %v5031_v59  ;;  %v5289_v13 = vmax.f32 %v5191_v63, %v5235_v2  ;;  %v5384_v17 = vmax.f32 %v5362_v37, 0.0  ;;  %v4996_v2 = vld [vmem:[#allocation2 + $0x100] sm:$0xff] }
 0x3bf   : > { %v4915_v52 = vpop.f32.mrf.mxu0 }
 0x3c0   : > { %v11543_v10 = vld [vmem:[#allocation4 + $0x60] sm:$0xff]  ;;  %v5311_v8 = vmax.f32 %v5267_v4, %v5289_v13  ;;  %v5516_v20 = vsel %vm5494_vm10, %v5384_v17, 0.0  ;;  %v5032_v12 = vadd.f32 %v4993_v26, %v4915_v52 }
 0x3c1   : > { %v5561_v40 = vld [vmem:[#allocation4 + $0x5d] sm:$0xff]  ;;  %5538 = vst.msk [vmem:[#allocation4 + $0x68] sm:$0xff] %vm303_vm3, %v5516_v20  ;;  %v14352_v61 = vpop.f32.mrf.mxu0  ;;  %14545 = vmatmul.mubr.msk.f32.gmra.mxu0 %vm303_vm3, %v11543_v10  ;;  %v5107_v37 = vld [vmem:[#allocation2 + $0xd0] ss:$2 sm:$0xff]  ;;  %v5151_v14 = vld [vmem:[#allocation2 + $0xd1] ss:$2 sm:$0xff] }
 0x3c2   : > { %14400 = vmatmul.mubr.msk.f32.gmra.mxu1 %vm303_vm3, %v5561_v40  ;;  %v5337_v28 = vmul.f32 %v17502_v16, %v5311_v8  ;;  %5071 = vst.msk [vmem:[#allocation2 + $0xe8] sm:$0xff] %vm303_vm3, %v5032_v12  ;;  %v5269_v9 = vmax.f32 %v5107_v37, %v5151_v14  ;;  %v4997_v12 = vld [vmem:[#allocation2 + $0x108] sm:$0xff] }
 0x3c3   : > { %v4920_v39 = vpop.f32.mrf.mxu0 }
 0x3c4   : > { %v5363_v1 = vadd.f32 %v17509_v29, %v5337_v28  ;;  %v5033_v25 = vadd.f32 %v4994_v44, %v4920_v39 }
 0x3c5   : > { %v5193_v31 = vld [vmem:[#allocation2 + $0xd2] ss:$2 sm:$0xff]  ;;  %v5237_v54 = vld [vmem:[#allocation2 + $0xd3] ss:$2 sm:$0xff]  ;;  %v14355_v6 = vpop.f32.mrf.mxu0 }
 0x3c6   : > { %v5385_v45 = vmax.f32 %v5363_v1, 0.0  ;;  %v5290_v62 = vmax.f32 %v5193_v31, %v5237_v54  ;;  %5072 = vst.msk [vmem:[#allocation2 + $0xf0] sm:$0xff] %vm303_vm3, %v5033_v25  ;;  %v4998_v54 = vld [vmem:[#allocation2 + $0x110] sm:$0xff] }
 0x3c7   : > { %v4925_v50 = vpop.f32.mrf.mxu0 }
 0x3c8   : > { %v5517_v58 = vsel %vm5495_vm11, %v5385_v45, 0.0  ;;  %v11544_v53 = vld [vmem:[#allocation4 + $0x68] sm:$0xff]  ;;  %v5312_v51 = vmax.f32 %v5268_v5, %v5290_v62  ;;  %v5034_v56 = vadd.f32 %v4995_v47, %v4925_v50 }
 0x3c9   : > { %v5562_v60 = vld [vmem:[#allocation4 + $0x65] sm:$0xff]  ;;  %5539 = vst.msk [vmem:[#allocation4 + $0x70] sm:$0xff] %vm303_vm3, %v5517_v58  ;;  %v14358_v41 = vpop.f32.mrf.mxu0  ;;  %14547 = vmatprep.mubr.msk.f32.mxu0 %vm303_vm3, %v11544_v53 }
 0x3ca   : > { %14402 = vmatprep.mubr.msk.f32.mxu1 %vm303_vm3, %v5562_v60  ;;  %v5338_v59 = vmul.f32 %v17502_v16, %v5312_v51  ;;  %5073 = vst.msk [vmem:[#allocation2 + $0xf8] sm:$0xff] %vm303_vm3, %v5034_v56  ;;  %v5109_v1 = vld [vmem:[#allocation2 + $0xe0] ss:$2 sm:$0xff]  ;;  %v5153_v25 = vld [vmem:[#allocation2 + $0xe1] ss:$2 sm:$0xff]  ;;  %v4999_v56 = vld [vmem:[#allocation2 + $0x118] sm:$0xff] }
 0x3cb   : > { %v4930_v63 = vpop.f32.mrf.mxu0  ;;  %v5270_v47 = vmax.f32 %v5109_v1, %v5153_v25 }
 0x3cc   : > { %v5364_v4 = vadd.f32 %v17509_v29, %v5338_v59  ;;  %v5035_v13 = vadd.f32 %v4996_v2, %v4930_v63 }
 0x3cd   : > { %v5195_v17 = vld [vmem:[#allocation2 + $0xe2] ss:$2 sm:$0xff]  ;;  %v5239_v52 = vld [vmem:[#allocation2 + $0xe3] ss:$2 sm:$0xff]  ;;  %v14361_v26 = vpop.f32.mrf.mxu0 }
 0x3ce   : > { %v5386_v10 = vmax.f32 %v5364_v4, 0.0  ;;  %v5291_v8 = vmax.f32 %v5195_v17, %v5239_v52  ;;  %5074 = vst.msk [vmem:[#allocation2 + $0x100] sm:$0xff] %vm303_vm3, %v5035_v13  ;;  %v5000_v52 = vld [vmem:[#allocation2 + $0x120] sm:$0xff] }
 0x3cf   : > { %v4935_v20 = vpop.f32.mrf.mxu0 }
 0x3d0   : > { %v11545_v40 = vld [vmem:[#allocation4 + $0x70] sm:$0xff]  ;;  %v5518_v61 = vsel %vm19203_vm12, %v5386_v10, 0.0  ;;  %v5313_v28 = vmax.f32 %v5269_v9, %v5291_v8  ;;  %v5036_v23 = vadd.f32 %v4997_v12, %v4935_v20  ;;  %vm5503_vm12 = vcmp.eq.s32.totalorder %v17511_v32, 1 }
 0x3d1   : > { %v5563_v46 = vld [vmem:[#allocation4 + $0x6d] sm:$0xff]  ;;  %5540 = vst.msk [vmem:[#allocation4 + $0x78] sm:$0xff] %vm303_vm3, %v5518_v61  ;;  %v14364_v39 = vpop.f32.mrf.mxu0  ;;  %14548 = vmatmul.mubr.msk.f32.gmra.mxu0 %vm303_vm3, %v11545_v40 }
 0x3d2   : > { %14403 = vmatmul.mubr.msk.f32.gmra.mxu1 %vm303_vm3, %v5563_v46  ;;  %v5339_v44 = vmul.f32 %v17502_v16, %v5313_v28  ;;  %5075 = vst.msk [vmem:[#allocation2 + $0x108] sm:$0xff] %vm303_vm3, %v5036_v23  ;;  %v5111_v4 = vld [vmem:[#allocation2 + $0xf0] ss:$2 sm:$0xff]  ;;  %v5155_v13 = vld [vmem:[#allocation2 + $0xf1] ss:$2 sm:$0xff]  ;;  %v5001_v23 = vld [vmem:[#allocation2 + $0x128] sm:$0xff] }
 0x3d3   : > { %v4940_v31 = vpop.f32.mrf.mxu0  ;;  %v5271_v12 = vmax.f32 %v5111_v4, %v5155_v13  ;;  %v5251_v4 = vld [vmem:[#allocation2 + $0x143] ss:$2 sm:$0xff] }
 0x3d4   : > { %v5037_v6 = vadd.f32 %v4998_v54, %v4940_v31  ;;  %v5365_v45 = vadd.f32 %v17509_v29, %v5339_v44 }
 0x3d5   : > { %v5197_v5 = vld [vmem:[#allocation2 + $0xf2] ss:$2 sm:$0xff]  ;;  %v5241_v62 = vld [vmem:[#allocation2 + $0xf3] ss:$2 sm:$0xff]  ;;  %v14367_v50 = vpop.f32.mrf.mxu0 }
 0x3d6   : > { %v5292_v58 = vmax.f32 %v5197_v5, %v5241_v62  ;;  %5076 = vst.msk [vmem:[#allocation2 + $0x110] sm:$0xff] %vm303_vm3, %v5037_v6  ;;  %v5387_v53 = vmax.f32 %v5365_v45, 0.0  ;;  %v5002_v62 = vld [vmem:[#allocation2 + $0x130] sm:$0xff] }
 0x3d7   : > { %v4945_v51 = vpop.f32.mrf.mxu0 }
 0x3d8   : > { %v11546_v60 = vld [vmem:[#allocation4 + $0x78] sm:$0xff]  ;;  %v5314_v41 = vmax.f32 %v5270_v47, %v5292_v58  ;;  %v5038_v59 = vadd.f32 %v4999_v56, %v4945_v51  ;;  %v5519_v14 = vsel %vm19205_vm2, %v5387_v53, 0.0  ;;  %vm5502_vm2 = vcmp.eq.s32.totalorder %v17513_v11, 1 }
 0x3d9   : > { %v5564_v37 = vld [vmem:[#allocation4 + $0x75] sm:$0xff]  ;;  %v14370_v63 = vpop.f32.mrf.mxu0  ;;  %14550 = vmatprep.mubr.msk.f32.mxu0 %vm303_vm3, %v11546_v60  ;;  %5541 = vst.msk [vmem:[#allocation4 + $0x80] sm:$0xff] %vm303_vm3, %v5519_v14 }
 0x3da   : > { %14405 = vmatprep.mubr.msk.f32.mxu1 %vm303_vm3, %v5564_v37  ;;  %5077 = vst.msk [vmem:[#allocation2 + $0x118] sm:$0xff] %vm303_vm3, %v5038_v59  ;;  %v5340_v2 = vmul.f32 %v17502_v16, %v5314_v41  ;;  %v5113_v6 = vld [vmem:[#allocation2 + $0x100] ss:$2 sm:$0xff]  ;;  %v5157_v45 = vld [vmem:[#allocation2 + $0x101] ss:$2 sm:$0xff] }
 0x3db   : > { %v4950_v17 = vpop.f32.mrf.mxu0  ;;  %v5272_v56 = vmax.f32 %v5113_v6, %v5157_v45 }
 0x3dc   : > { %v5039_v26 = vadd.f32 %v5000_v52, %v4950_v17  ;;  %v5366_v9 = vadd.f32 %v17509_v29, %v5340_v2  ;;  %v5207_v2 = vld [vmem:[#allocation2 + $0x142] ss:$2 sm:$0xff] }
 0x3dd   : > { %v5199_v10 = vld [vmem:[#allocation2 + $0x102] ss:$2 sm:$0xff]  ;;  %v5243_v8 = vld [vmem:[#allocation2 + $0x103] ss:$2 sm:$0xff]  ;;  %v14373_v20 = vpop.f32.mrf.mxu0 }
 0x3de   : > { %v5293_v40 = vmax.f32 %v5199_v10, %v5243_v8  ;;  %5078 = vst.msk [vmem:[#allocation2 + $0x120] sm:$0xff] %vm303_vm3, %v5039_v26  ;;  %v5388_v61 = vmax.f32 %v5366_v9, 0.0  ;;  %v5297_v10 = vmax.f32 %v5207_v2, %v5251_v4 }
 0x3df   : > { %v4955_v28 = vpop.f32.mrf.mxu0 }
 0x3e0   : > { %v5315_v46 = vmax.f32 %v5271_v12, %v5293_v40  ;;  %v5040_v39 = vadd.f32 %v5001_v23, %v4955_v28  ;;  %v5565_v44 = vld [vmem:[#allocation4 + $0x7d] sm:$0xff]  ;;  %v5520_v25 = vsel %vm19201_vm1, %v5388_v61, 0.0  ;;  %vm19202_vm1 = vcmp.eq.s32.totalorder %v17486_v48, 1 }
 0x3e1   : > { %v6843_v1 = vld [vmem:[#allocation4 + $0x80] sm:$0xff]  ;;  %v14376_v31 = vpop.f32.mrf.mxu0  ;;  %14406 = vmatmul.mubr.msk.f32.gmra.mxu1 %vm303_vm3, %v5565_v44  ;;  %5542 = vst.msk [vmem:[#allocation4 + $0x88] sm:$0xff] %vm303_vm3, %v5520_v25  ;;  %v5115_v17 = vld [vmem:[#allocation2 + $0x110] ss:$2 sm:$0xff]  ;;  %v5159_v52 = vld [vmem:[#allocation2 + $0x111] ss:$2 sm:$0xff] }
 0x3e2   : > { %14551 = vmatmul.mubr.msk.f32.gmra.mxu0 %vm303_vm3, %v6843_v1  ;;  %v5341_v54 = vmul.f32 %v17502_v16, %v5315_v46  ;;  %5079 = vst.msk [vmem:[#allocation2 + $0x128] sm:$0xff] %vm303_vm3, %v5040_v39  ;;  %v5273_v61 = vmax.f32 %v5115_v17, %v5159_v52 }
 0x3e3   : > { %v4960_v5 = vpop.f32.mrf.mxu0 }
 0x3e4   : > { %v5041_v50 = vadd.f32 %v5002_v62, %v4960_v5  ;;  %v5367_v47 = vadd.f32 %v17509_v29, %v5341_v54  ;;  %v15061_v62 = vld [vmem:[%s19196_s4] ss:$0 sm:$0xff] }
 0x3e5   : > { %v5201_v58 = vld [vmem:[#allocation2 + $0x112] ss:$2 sm:$0xff]  ;;  %v5245_v53 = vld [vmem:[#allocation2 + $0x113] ss:$2 sm:$0xff]  ;;  %v14379_v51 = vpop.f32.mrf.mxu0 }
 0x3e6   : > { %v5294_v60 = vmax.f32 %v5201_v58, %v5245_v53  ;;  %5080 = vst.msk [vmem:[#allocation2 + $0x130] sm:$0xff] %vm303_vm3, %v5041_v50  ;;  %v5389_v41 = vmax.f32 %v5367_v47, 0.0  ;;  %v15062_v53 = vld [vmem:[%s19196_s4 + $0x1] ss:$0 sm:$0xff] }
 0x3e8   : > { %v5316_v59 = vmax.f32 %v5272_v56, %v5294_v60  ;;  %v5566_v37 = vld [vmem:[#allocation4 + $0x85] sm:$0xff]  ;;  %v5521_v63 = vsel %vm19202_vm1, %v5389_v41, 0.0  ;;  %vm19204_vm1 = vcmp.eq.s32.totalorder %v17495_v7, 1 }
 0x3e9   : > { %v6844_v14 = vld [vmem:[#allocation4 + $0x88] sm:$0xff]  ;;  %14408 = vmatprep.mubr.msk.f32.mxu1 %vm303_vm3, %v5566_v37  ;;  %5543 = vst.msk [vmem:[#allocation4 + $0x90] sm:$0xff] %vm303_vm3, %v5521_v63  ;;  %v5117_v26 = vld [vmem:[#allocation2 + $0x120] ss:$2 sm:$0xff]  ;;  %v5161_v9 = vld [vmem:[#allocation2 + $0x121] ss:$2 sm:$0xff] }
 0x3ea   : > { %14553 = vmatprep.mubr.msk.f32.mxu0 %vm303_vm3, %v6844_v14  ;;  %v5342_v13 = vmul.f32 %v17502_v16, %v5316_v59  ;;  %v5274_v44 = vmax.f32 %v5117_v26, %v5161_v9 }
 0x3ec   : > { %v5368_v8 = vadd.f32 %v17509_v29, %v5342_v13 }
 0x3ed   : > { %v5119_v20 = vld [vmem:[#allocation2 + $0x130] ss:$2 sm:$0xff]  ;;  %v5163_v12 = vld [vmem:[#allocation2 + $0x131] ss:$2 sm:$0xff] }
 0x3ee   : > { %v5203_v40 = vld [vmem:[#allocation2 + $0x122] ss:$2 sm:$0xff]  ;;  %v5205_v28 = vld [vmem:[#allocation2 + $0x132] ss:$2 sm:$0xff]  ;;  %v5247_v23 = vld [vmem:[#allocation2 + $0x123] ss:$2 sm:$0xff]  ;;  %v5275_v39 = vmax.f32 %v5119_v20, %v5163_v12 }
 0x3ef   : > { %v5249_v46 = vld [vmem:[#allocation2 + $0x133] ss:$2 sm:$0xff]  ;;  %v5295_v1 = vmax.f32 %v5203_v40, %v5247_v23  ;;  %v5390_v31 = vmax.f32 %v5368_v8, 0.0 }
 0x3f0   : > { %v5296_v25 = vmax.f32 %v5205_v28, %v5249_v46  ;;  %v5319_v16 = vmax.f32 %v5275_v39, %v5297_v10  ;;  %v5567_v54 = vld [vmem:[#allocation4 + $0x8d] sm:$0xff]  ;;  %v11554_v12 = vld [vmem:[#allocation4 + $0xb8] sm:$0xff] }
 0x3f1   : > { %v6845_v6 = vld [vmem:[#allocation4 + $0x90] sm:$0xff]  ;;  %v5317_v45 = vmax.f32 %v5273_v61, %v5295_v1  ;;  %14409 = vmatmul.mubr.msk.f32.gmra.mxu1 %vm303_vm3, %v5567_v54  ;;  %v5522_v29 = vsel %vm19204_vm1, %v5390_v31, 0.0  ;;  %vm5501_vm1 = vcmp.eq.s32.totalorder %v17493_v19, 1  ;;  %v5837_v10 = vld [vmem:[#allocation4 + $0x6] sm:$0xff]  ;;  %v6190_v28 = vld [vmem:[%s19194_s2 + $0x20] sm:$0xff] }
 0x3f2   : > { %v5318_v5 = vmax.f32 %v5274_v44, %v5296_v25  ;;  %14554 = vmatmul.mubr.msk.f32.gmra.mxu0 %vm303_vm3, %v6845_v6  ;;  %v5345_v50 = vmul.f32 %v15061_v62, %v5319_v16  ;;  %5544 = vst.msk [vmem:[#allocation4 + $0x98] sm:$0xff] %vm303_vm3, %v5522_v29  ;;  %v5838_v40 = vld [vmem:[#allocation4 + $0xe] sm:$0xff]  ;;  %v11555_v61 = vld [vmem:[#allocation4 + $0xc0] sm:$0xff]  ;;  %v5839_v23 = vld [vmem:[#allocation4 + $0x16] sm:$0xff] }
 0x3f3   : > { %v5343_v47 = vmul.f32 %v15061_v62, %v5317_v45  ;;  %v17765_v46 = vld [vmem:[#allocation4 + $0x29] sm:$0xff]  ;;  %v5840_v39 = vld [vmem:[#allocation4 + $0x1e] sm:$0xff]  ;;  %v17769_v44 = vld [vmem:[#allocation4 + $0x31] sm:$0xff] }
 0x3f4   : > { %v5344_v58 = vmul.f32 %v15061_v62, %v5318_v5  ;;  %v5371_v51 = vadd.f32 %v15062_v53, %v5345_v50  ;;  %v17774_v1 = vld [vmem:[%s19194_s2 + $0x38] sm:$0xff]  ;;  %v17779_v25 = vld [vmem:[#allocation4 + $0x39] sm:$0xff]  ;;  %v17789_v54 = vld [vmem:[#allocation4 + $0x41] sm:$0xff] }
 0x3f5   : > { %v5369_v56 = vadd.f32 %v15062_v53, %v5343_v47  ;;  %v8176_v31 = vld [vmem:[%s19194_s2 + $0x80] sm:$0xff]  ;;  %v5842_v16 = vld [vmem:[#allocation4 + $0x2e] sm:$0xff]  ;;  %v5845_v29 = vld [vmem:[#allocation4 + $0x46] sm:$0xff] }
 0x3f6   : > { %v5370_v60 = vadd.f32 %v15062_v53, %v5344_v58  ;;  %v5393_v41 = vmax.f32 %v5371_v51, 0.0  ;;  %v5843_v6 = vld [vmem:[#allocation4 + $0x36] sm:$0xff]  ;;  %v17794_v45 = vld [vmem:[#allocation4 + $0x49] sm:$0xff]  ;;  %v5844_v5 = vld [vmem:[#allocation4 + $0x3e] sm:$0xff] }
 0x3f7   : > { %v5391_v59 = vmax.f32 %v5369_v56, 0.0  ;;  %v17804_v62 = vld [vmem:[#allocation4 + $0x59] sm:$0xff]  ;;  %v5846_v50 = vld [vmem:[#allocation4 + $0x4e] sm:$0xff]  ;;  %v17809_v47 = vld [vmem:[#allocation4 + $0x61] sm:$0xff] }
 0x3f8   : > { %v5392_v37 = vmax.f32 %v5370_v60, 0.0  ;;  %v5525_v14 = vsel %vm5503_vm12, %v5393_v41, 0.0  ;;  %v5847_v58 = vld [vmem:[#allocation4 + $0x56] sm:$0xff]  ;;  %v17814_v53 = vld [vmem:[#allocation4 + $0x69] sm:$0xff]  ;;  %v5848_v51 = vld [vmem:[#allocation4 + $0x5e] sm:$0xff] }
 0x3f9   : > { %v5568_v63 = vld [vmem:[#allocation4 + $0x95] sm:$0xff]  ;;  %v5523_v4 = vsel %vm5501_vm1, %v5391_v59, 0.0  ;;  %5547 = vst.msk [vmem:[#allocation4 + $0xb0] sm:$0xff] %vm303_vm3, %v5525_v14  ;;  %v5849_v60 = vld [vmem:[#allocation4 + $0x66] sm:$0xff] }
 0x3fa   : > { %v6846_v2 = vld [vmem:[#allocation4 + $0x98] sm:$0xff]  ;;  %v5524_v13 = vsel %vm5502_vm2, %v5392_v37, 0.0  ;;  %14411 = vmatprep.mubr.msk.f32.mxu1 %vm303_vm3, %v5568_v63  ;;  %5545 = vst.msk [vmem:[#allocation4 + $0xa0] sm:$0xff] %vm303_vm3, %v5523_v4  ;;  %v5850_v59 = vld [vmem:[#allocation4 + $0x6e] sm:$0xff]  ;;  %v17829_v37 = vld [vmem:[#allocation4 + $0x81] sm:$0xff] }
 0x3fb   : > { %14556 = vmatprep.mubr.msk.f32.mxu0 %vm303_vm3, %v6846_v2  ;;  %5546 = vst.msk [vmem:[#allocation4 + $0xa8] sm:$0xff] %vm303_vm3, %v5524_v13  ;;  %v17819_v56 = vld [vmem:[#allocation4 + $0x71] sm:$0xff]  ;;  %v17824_v41 = vld [vmem:[#allocation4 + $0x79] sm:$0xff]  ;;  %v17834_v63 = vld [vmem:[#allocation4 + $0x89] sm:$0xff] }
 0x3fc   : > { %v5851_v14 = vld [vmem:[#allocation4 + $0x76] sm:$0xff]  ;;  %v5852_v2 = vld [vmem:[#allocation4 + $0x7e] sm:$0xff]  ;;  %v5853_v13 = vld [vmem:[#allocation4 + $0x86] sm:$0xff] }
 0x3fd   : > { %v17839_v4 = vld [vmem:[#allocation4 + $0x91] sm:$0xff] }
 0x400   : > { %v6849_v20 = vld [vmem:[#allocation4 + $0xb0] sm:$0xff] }
 0x401   : > { %v5569_v17 = vld [vmem:[#allocation4 + $0x9d] sm:$0xff]  ;;  %v8171_v15 = vld [vmem:[#allocation4 + $0xb3] sm:$0xff] }
 0x402   : > { %v6847_v52 = vld [vmem:[#allocation4 + $0xa0] sm:$0xff]  ;;  %14412 = vmatmul.mubr.msk.f32.gmra.mxu1 %vm303_vm3, %v5569_v17  ;;  %v6848_v9 = vld [vmem:[#allocation4 + $0xa8] sm:$0xff] }
 0x403   : > { %v5570_v26 = vld [vmem:[#allocation4 + $0xa5] sm:$0xff]  ;;  %14557 = vmatmul.mubr.msk.f32.gmra.mxu0 %vm303_vm3, %v6847_v52  ;;  %v5571_v8 = vld [vmem:[#allocation4 + $0xad] sm:$0xff]  ;;  %v17844_v17 = vld [vmem:[#allocation4 + $0x99] sm:$0xff] }
 0x404   : > { %14414 = vmatprep.mubr.msk.f32.mxu1 %vm303_vm3, %v5570_v26  ;;  %14559 = vmatprep.mubr.msk.f32.mxu0 %vm303_vm3, %v6848_v9  ;;  %v5854_v52 = vld [vmem:[#allocation4 + $0x8e] sm:$0xff]  ;;  %v17849_v26 = vld [vmem:[#allocation4 + $0xa1] sm:$0xff]  ;;  %v5855_v9 = vld [vmem:[#allocation4 + $0x96] sm:$0xff] }
 0x405   : > { %v8170_v49 = vld [vmem:[#allocation4 + $0xab] sm:$0xff] }
 0x406   : > { %14415 = vmatmul.mubr.msk.f32.gmra.mxu1 %vm303_vm3, %v5571_v8  ;;  %v5856_v8 = vld [vmem:[#allocation4 + $0x9e] sm:$0xff]  ;;  %v6189_v11 = vld [vmem:[#allocation4 + $0xaf] sm:$0xff] }
 0x407   : > { %14560 = vmatmul.mubr.msk.f32.gmra.mxu0 %vm303_vm3, %v6849_v20  ;;  %14421 = vmatprep.mubr.msk.f32.mxu1 %vm303_vm3, %v5837_v10  ;;  %v17854_v10 = vld [vmem:[#allocation4 + $0xa9] sm:$0xff]  ;;  %v17859_v20 = vld [vmem:[#allocation4 + $0xb1] sm:$0xff] }
 0x408   : > { %14562 = vmatprep.mubr.msk.f32.mxu0 %vm303_vm3, %v11554_v12  ;;  %v5857_v12 = vld [vmem:[#allocation4 + $0xa6] sm:$0xff] }
 0x40a   : > { %14422 = vmatmul.mubr.msk.f32.vlgmr.msra.gmra.mxu1 %vm303_vm3, %v5838_v40  ;;  %v17864_v40 = vld [vmem:[#allocation4 + $0xb9] sm:$0xff] }
 0x40b   : > { %14563 = vmatmul.mubr.msk.f32.gmra.mxu0 %vm303_vm3, %v11555_v61  ;;  %14455 = vmatpush3.msra.mxu1 %v17580_v36  ;;  %v5841_v36 = vld [vmem:[#allocation4 + $0x26] sm:$0xff] }
 0x40c   : > { %14424 = vmatprep.mubr.msk.f32.mxu1 %vm303_vm3, %v5839_v23  ;;  %14606 = vmatprep.mubr.msk.f32.mxu0 %vm303_vm3, %v17765_v46  ;;  %v6168_v61 = vld [vmem:[#allocation4 + $0x7] sm:$0xff] }
 0x40d   : > { %14456 = vmatprep.subr.mxu1 %v6190_v28  ;;  %v5858_v23 = vld [vmem:[#allocation4 + $0xae] sm:$0xff] }
 0x40e   : > { %14457 = vmatpush3.msra.mxu1 %v6190_v28  ;;  %v7512_v28 = vld [vmem:[#allocation4 + $0xc9] sm:$0xff] }
 0x40f   : > { %14425 = vmatmul.mubr.msk.f32.gmra.mxu1 %vm303_vm3, %v5840_v39  ;;  %14607 = vmatmul.mubr.msk.f32.vlgmr.msra.gmra.mxu0 %vm303_vm3, %v17769_v44  ;;  %v17869_v39 = vld [vmem:[#allocation4 + $0xc1] sm:$0xff] }
 0x410   : > { %14427 = vmatprep.mubr.msk.f32.mxu1 %vm303_vm3, %v5841_v36  ;;  %14609 = vmatprep.mubr.msk.f32.mxu0 %vm303_vm3, %v17779_v25  ;;  %v6169_v36 = vld [vmem:[#allocation4 + $0xf] sm:$0xff] }
 0x411   : > { %14491 = vmatprep.subr.mxu1 %v17774_v1  ;;  %14677 = vmatpush3.msra.mxu0 %v17652_v30  ;;  %v17799_v30 = vld [vmem:[#allocation4 + $0x51] sm:$0xff] }
 0x412   : > { %14678 = vmatprep.subr.mxu0 %v8176_v31 }
 0x413   : > { %14428 = vmatmul.mubr.msk.f32.gmra.mxu1 %vm303_vm3, %v5842_v16  ;;  %14610 = vmatmul.mubr.msk.f32.gmra.mxu0 %vm303_vm3, %v17789_v54  ;;  %v6521_v16 = vld [vmem:[%s19194_s2 + $0x30] sm:$0xff] }
 0x414   : > { %14430 = vmatprep.mubr.msk.f32.mxu1 %vm303_vm3, %v5843_v6  ;;  %14612 = vmatprep.mubr.msk.f32.mxu0 %vm303_vm3, %v17794_v45  ;;  %v17881_v6 = vld [vmem:[#allocation4 + $0x17] sm:$0xff] }
 0x415   : > { %14679 = vmatpush3.msra.mxu0 %v8176_v31  ;;  %v7513_v31 = vld [vmem:[#allocation4 + $0xd1] sm:$0xff] }
 0x417   : > { %14431 = vmatmul.mubr.msk.f32.gmra.mxu1 %vm303_vm3, %v5844_v5  ;;  %14613 = vmatmul.mubr.msk.f32.gmra.mxu0 %vm303_vm3, %v17799_v30  ;;  %v8154_v5 = vld [vmem:[#allocation4 + $0x2b] sm:$0xff] }
 0x418   : > { %14433 = vmatprep.mubr.msk.f32.mxu1 %vm303_vm3, %v5845_v29  ;;  %14615 = vmatprep.mubr.msk.f32.mxu0 %vm303_vm3, %v17804_v62  ;;  %v17887_v29 = vld [vmem:[#allocation4 + $0x1f] sm:$0xff] }
 0x41b   : > { %14434 = vmatmul.mubr.msk.f32.gmra.mxu1 %vm303_vm3, %v5846_v50  ;;  %14616 = vmatmul.mubr.msk.f32.gmra.mxu0 %vm303_vm3, %v17809_v47  ;;  %v8155_v50 = vld [vmem:[#allocation4 + $0x33] sm:$0xff] }
 0x41c   : > { %14436 = vmatprep.mubr.msk.f32.mxu1 %vm303_vm3, %v5847_v58  ;;  %14618 = vmatprep.mubr.msk.f32.mxu0 %vm303_vm3, %v17814_v53  ;;  %v17892_v58 = vld [vmem:[%s19194_s2 + $0x58] sm:$0xff] }
 0x41f   : > { %14437 = vmatmul.mubr.msk.f32.gmra.mxu1 %vm303_vm3, %v5848_v51  ;;  %14619 = vmatmul.mubr.msk.f32.gmra.mxu0 %vm303_vm3, %v17819_v56  ;;  %v8156_v51 = vld [vmem:[#allocation4 + $0x3b] sm:$0xff] }
 0x420   : > { %14439 = vmatprep.mubr.msk.f32.mxu1 %vm303_vm3, %v5849_v60  ;;  %14621 = vmatprep.mubr.msk.f32.mxu0 %vm303_vm3, %v17824_v41  ;;  %v17903_v60 = vld [vmem:[#allocation4 + $0x2f] sm:$0xff] }
 0x423   : > { %14440 = vmatmul.mubr.msk.f32.gmra.mxu1 %vm303_vm3, %v5850_v59  ;;  %14622 = vmatmul.mubr.msk.f32.gmra.mxu0 %vm303_vm3, %v17829_v37  ;;  %v8157_v59 = vld [vmem:[#allocation4 + $0x43] sm:$0xff] }
 0x424   : > { %14442 = vmatprep.mubr.msk.f32.mxu1 %vm303_vm3, %v5851_v14  ;;  %14624 = vmatprep.mubr.msk.f32.mxu0 %vm303_vm3, %v17834_v63  ;;  %v17908_v14 = vld [vmem:[#allocation4 + $0x37] sm:$0xff] }
 0x427   : > { %14443 = vmatmul.mubr.msk.f32.gmra.mxu1 %vm303_vm3, %v5852_v2  ;;  %14625 = vmatmul.mubr.msk.f32.gmra.mxu0 %vm303_vm3, %v17839_v4  ;;  %v8158_v2 = vld [vmem:[#allocation4 + $0x4b] sm:$0xff] }
 0x428   : > { %14445 = vmatprep.mubr.msk.f32.mxu1 %vm303_vm3, %v5853_v13  ;;  %14627 = vmatprep.mubr.msk.f32.mxu0 %vm303_vm3, %v17844_v17 }
 0x42b   : > { %14446 = vmatmul.mubr.msk.f32.gmra.mxu1 %vm303_vm3, %v5854_v52  ;;  %14628 = vmatmul.mubr.msk.f32.gmra.mxu0 %vm303_vm3, %v17849_v26  ;;  %v17913_v52 = vld [vmem:[#allocation4 + $0x3f] sm:$0xff] }
 0x42c   : > { %14448 = vmatprep.mubr.msk.f32.mxu1 %vm303_vm3, %v5855_v9  ;;  %14630 = vmatprep.mubr.msk.f32.mxu0 %vm303_vm3, %v17854_v10  ;;  %v8159_v9 = vld [vmem:[#allocation4 + $0x53] sm:$0xff] }
 0x42f   : > { %14449 = vmatmul.mubr.msk.f32.gmra.mxu1 %vm303_vm3, %v5856_v8  ;;  %14631 = vmatmul.mubr.msk.f32.gmra.mxu0 %vm303_vm3, %v17859_v20  ;;  %v17919_v8 = vld [vmem:[#allocation4 + $0x47] sm:$0xff] }
 0x430   : > { %14451 = vmatprep.mubr.msk.f32.mxu1 %vm303_vm3, %v5857_v12  ;;  %14633 = vmatprep.mubr.msk.f32.mxu0 %vm303_vm3, %v17864_v40  ;;  %v8160_v12 = vld [vmem:[#allocation4 + $0x5b] sm:$0xff] }
 0x433   : > { %14452 = vmatmul.mubr.msk.f32.gmra.mxu1 %vm303_vm3, %v5858_v23  ;;  %14634 = vmatmul.mubr.msk.f32.gmra.mxu0 %vm303_vm3, %v17869_v39  ;;  %v8161_v23 = vld [vmem:[#allocation4 + $0x63] sm:$0xff] }
 0x434   : > { %14458 = vmatprep.mubr.msk.f32.mxu1 %vm303_vm3, %v6168_v61  ;;  %14636 = vmatprep.mubr.msk.f32.mxu0 %vm303_vm3, %v7512_v28  ;;  %v17925_v28 = vld [vmem:[#allocation4 + $0x4f] sm:$0xff] }
 0x437   : > { %14459 = vmatmul.mubr.msk.f32.vlgmr.msra.gmra.mxu1 %vm303_vm3, %v6169_v36  ;;  %14637 = vmatmul.mubr.msk.f32.gmra.mxu0 %vm303_vm3, %v7513_v31  ;;  %v17930_v36 = vld [vmem:[#allocation4 + $0x57] sm:$0xff]  ;;  %v8162_v31 = vld [vmem:[#allocation4 + $0x6b] sm:$0xff] }
 0x438   : > { %14492 = vmatpush3.msra.mxu1 %v17774_v1  ;;  %14461 = vmatprep.mubr.msk.f32.mxu1 %vm303_vm3, %v17881_v6  ;;  %v17897_v1 = vld [vmem:[#allocation4 + $0x27] sm:$0xff] }
 0x439   : > { %14680 = vmatprep.mubr.msk.f32.mxu0 %vm303_vm3, %v8154_v5  ;;  %14493 = vmatprep.subr.mxu1 %v6521_v16  ;;  %v8163_v5 = vld [vmem:[#allocation4 + $0x73] sm:$0xff] }
 0x43a   : > { %14494 = vmatpush3.msra.mxu1 %v6521_v16  ;;  %v17935_v16 = vld [vmem:[#allocation4 + $0x5f] sm:$0xff] }
 0x43b   : > { %14462 = vmatmul.mubr.msk.f32.gmra.mxu1 %vm303_vm3, %v17887_v29  ;;  %14681 = vmatmul.mubr.msk.f32.vlgmr.msra.gmra.mxu0 %vm303_vm3, %v8155_v50  ;;  %v17940_v50 = vld [vmem:[#allocation4 + $0x67] sm:$0xff] }
 0x43c   : > { %14464 = vmatprep.mubr.msk.f32.mxu1 %vm303_vm3, %v17897_v1  ;;  %14683 = vmatprep.mubr.msk.f32.mxu0 %vm303_vm3, %v8156_v51  ;;  %v8164_v51 = vld [vmem:[#allocation4 + $0x7b] sm:$0xff] }
 0x43d   : > { %14565 = vmatprep.subr.mxu1 %v17892_v58 }
 0x43f   : > { %14465 = vmatmul.mubr.msk.f32.gmra.mxu1 %vm303_vm3, %v17903_v60  ;;  %14684 = vmatmul.mubr.msk.f32.gmra.mxu0 %vm303_vm3, %v8157_v59  ;;  %v17945_v59 = vld [vmem:[#allocation4 + $0x6f] sm:$0xff] }
 0x440   : > { %14467 = vmatprep.mubr.msk.f32.mxu1 %vm303_vm3, %v17908_v14  ;;  %14686 = vmatprep.mubr.msk.f32.mxu0 %vm303_vm3, %v8158_v2  ;;  %v8165_v2 = vld [vmem:[#allocation4 + $0x83] sm:$0xff] }
 0x442   : > { %v14389_v13 = vpop.f32.mrf.mxu1 }
 0x443   : > { %5818 = vst.msk [vmem:[#allocation3 + $0x18] sm:$0xff] %vm303_vm3, %v14389_v13  ;;  %14468 = vmatmul.mubr.msk.f32.gmra.mxu1 %vm303_vm3, %v17913_v52  ;;  %14687 = vmatmul.mubr.msk.f32.gmra.mxu0 %vm303_vm3, %v8159_v9  ;;  %v17950_v13 = vld [vmem:[#allocation4 + $0x77] sm:$0xff]  ;;  %v8166_v9 = vld [vmem:[#allocation4 + $0x8b] sm:$0xff] }
 0x444   : > { %14470 = vmatprep.mubr.msk.f32.mxu1 %vm303_vm3, %v17919_v8  ;;  %14689 = vmatprep.mubr.msk.f32.mxu0 %vm303_vm3, %v8160_v12  ;;  %v5716_v61 = vpop.f32.mrf.mxu1 }
 0x445   : > { %5817 = vst.msk [vmem:[#allocation3 + $0x10] sm:$0xff] %vm303_vm3, %v5716_v61  ;;  %v6183_v61 = vld [vmem:[#allocation4 + $0x7f] sm:$0xff] }
 0x447   : > { %14471 = vmatmul.mubr.msk.f32.gmra.mxu1 %vm303_vm3, %v17925_v28  ;;  %14690 = vmatmul.mubr.msk.f32.gmra.mxu0 %vm303_vm3, %v8161_v23  ;;  %v8167_v23 = vld [vmem:[#allocation4 + $0x93] sm:$0xff] }
 0x448   : > { %14473 = vmatprep.mubr.msk.f32.mxu1 %vm303_vm3, %v17930_v36  ;;  %14692 = vmatprep.mubr.msk.f32.mxu0 %vm303_vm3, %v8162_v31  ;;  %v6184_v31 = vld [vmem:[#allocation4 + $0x87] sm:$0xff] }
 0x44b   : > { %14474 = vmatmul.mubr.msk.f32.gmra.mxu1 %vm303_vm3, %v17935_v16  ;;  %14693 = vmatmul.mubr.msk.f32.gmra.mxu0 %vm303_vm3, %v8163_v5  ;;  %v8168_v5 = vld [vmem:[#allocation4 + $0x9b] sm:$0xff] }
 0x44c   : > { %14476 = vmatprep.mubr.msk.f32.mxu1 %vm303_vm3, %v17940_v50  ;;  %14695 = vmatprep.mubr.msk.f32.mxu0 %vm303_vm3, %v8164_v51 }
 0x44f   : > { %14477 = vmatmul.mubr.msk.f32.gmra.mxu1 %vm303_vm3, %v17945_v59  ;;  %14696 = vmatmul.mubr.msk.f32.gmra.mxu0 %vm303_vm3, %v8165_v2  ;;  %v6185_v2 = vld [vmem:[#allocation4 + $0x8f] sm:$0xff] }
 0x450   : > { %14479 = vmatprep.mubr.msk.f32.mxu1 %vm303_vm3, %v17950_v13  ;;  %14698 = vmatprep.mubr.msk.f32.mxu0 %vm303_vm3, %v8166_v9  ;;  %v8169_v9 = vld [vmem:[#allocation4 + $0xa3] sm:$0xff] }
 0x452   : > { %v14392_v12 = vpop.f32.mrf.mxu1 }
 0x453   : > { %5820 = vst.msk [vmem:[#allocation3 + $0x28] sm:$0xff] %vm303_vm3, %v14392_v12  ;;  %14480 = vmatmul.mubr.msk.f32.gmra.mxu1 %vm303_vm3, %v6183_v61  ;;  %14699 = vmatmul.mubr.msk.f32.gmra.mxu0 %vm303_vm3, %v8167_v23  ;;  %v6186_v12 = vld [vmem:[#allocation4 + $0x97] sm:$0xff]  ;;  %v6187_v23 = vld [vmem:[#allocation4 + $0x9f] sm:$0xff] }
 0x454   : > { %14482 = vmatprep.mubr.msk.f32.mxu1 %vm303_vm3, %v6184_v31  ;;  %14701 = vmatprep.mubr.msk.f32.mxu0 %vm303_vm3, %v8168_v5  ;;  %v5726_v51 = vpop.f32.mrf.mxu1  ;;  %v6188_v5 = vld [vmem:[#allocation4 + $0xa7] sm:$0xff] }
 0x455   : > { %5819 = vst.msk [vmem:[#allocation3 + $0x20] sm:$0xff] %vm303_vm3, %v5726_v51  ;;  %v8172_v51 = vld [vmem:[#allocation4 + $0xbb] sm:$0xff] }
 0x457   : > { %14483 = vmatmul.mubr.msk.f32.gmra.mxu1 %vm303_vm3, %v6185_v2  ;;  %14702 = vmatmul.mubr.msk.f32.gmra.mxu0 %vm303_vm3, %v8169_v9  ;;  %v8173_v9 = vld [vmem:[#allocation4 + $0xc3] sm:$0xff] }
 0x458   : > { %14485 = vmatprep.mubr.msk.f32.mxu1 %vm303_vm3, %v6186_v12  ;;  %14704 = vmatprep.mubr.msk.f32.mxu0 %vm303_vm3, %v8170_v49 }
 0x45b   : > { %14486 = vmatmul.mubr.msk.f32.gmra.mxu1 %vm303_vm3, %v6187_v23  ;;  %14705 = vmatmul.mubr.msk.f32.gmra.mxu0 %vm303_vm3, %v8171_v15  ;;  %v7183_v15 = vld [vmem:[%s19194_s2 + $0x50] sm:$0xff] }
 0x45c   : > { %14488 = vmatprep.mubr.msk.f32.mxu1 %vm303_vm3, %v6188_v5  ;;  %14707 = vmatprep.mubr.msk.f32.mxu0 %vm303_vm3, %v8172_v51 }
 0x45f   : > { %14489 = vmatmul.mubr.msk.f32.gmra.mxu1 %vm303_vm3, %v6189_v11  ;;  %14708 = vmatmul.mubr.msk.f32.gmra.mxu0 %vm303_vm3, %v8173_v9 }
 0x460   : > { %14495 = vmatprep.mubr.msk.f32.mxu1 %vm303_vm3, %v17881_v6  ;;  %v7846_v6 = vld [vmem:[%s19194_s2 + $0x78] sm:$0xff] }
 0x462   : > { %v14395_v49 = vpop.f32.mrf.mxu1 }
 0x463   : > { %5822 = vst.msk [vmem:[#allocation3 + $0x38] sm:$0xff] %vm303_vm3, %v14395_v49  ;;  %14496 = vmatmul.mubr.msk.f32.vlgmr.msra.gmra.mxu1 %vm303_vm3, %v17887_v29  ;;  %v8174_v29 = vld [vmem:[#allocation4 + $0xcb] sm:$0xff] }
 0x464   : > { %14566 = vmatpush3.msra.mxu1 %v17892_v58  ;;  %14498 = vmatprep.mubr.msk.f32.mxu1 %vm303_vm3, %v17897_v1  ;;  %v5736_v51 = vpop.f32.mrf.mxu1  ;;  %v8175_v58 = vld [vmem:[#allocation4 + $0xd3] sm:$0xff] }
 0x465   : > { %5821 = vst.msk [vmem:[#allocation3 + $0x30] sm:$0xff] %vm303_vm3, %v5736_v51  ;;  %14567 = vmatprep.subr.mxu1 %v7183_v15  ;;  %14710 = vmatprep.mubr.msk.f32.mxu0 %vm303_vm3, %v8174_v29  ;;  %v6102_v51 = vld [vmem:[#allocation3] sm:$0xff]  ;;  %v7834_v29 = vld [vmem:[#allocation4 + $0x82] sm:$0xff] }
 0x466   : > { %14568 = vmatpush3.msra.mxu1 %v7183_v15  ;;  %14711 = vmatmul.mubr.msk.f32.gmra.mxu0 %vm303_vm3, %v8175_v58 }
 0x467   : > { %14499 = vmatmul.mubr.msk.f32.gmra.mxu1 %vm303_vm3, %v17903_v60  ;;  %14639 = vmatprep.subr.mxu1 %v7846_v6 }
 0x468   : > { %14501 = vmatprep.mubr.msk.f32.mxu1 %vm303_vm3, %v17908_v14 }
 0x46b   : > { %14502 = vmatmul.mubr.msk.f32.gmra.mxu1 %vm303_vm3, %v17913_v52 }
 0x46c   : > { %14504 = vmatprep.mubr.msk.f32.mxu1 %vm303_vm3, %v17919_v8  ;;  %v6519_v8 = vld [vmem:[#allocation4 + $0xb7] sm:$0xff] }
 0x46f   : > { %14505 = vmatmul.mubr.msk.f32.gmra.mxu1 %vm303_vm3, %v17925_v28  ;;  %v6520_v28 = vld [vmem:[#allocation4 + $0xbf] sm:$0xff] }
 0x470   : > { %14507 = vmatprep.mubr.msk.f32.mxu1 %vm303_vm3, %v17930_v36  ;;  %v7161_v36 = vld [vmem:[#allocation4 + $0x19] sm:$0xff] }
 0x472   : > { %v14398_v1 = vpop.f32.mrf.mxu1 }
 0x473   : > { %5824 = vst.msk [vmem:[#allocation3 + $0x48] sm:$0xff] %vm303_vm3, %v14398_v1  ;;  %14508 = vmatmul.mubr.msk.f32.gmra.mxu1 %vm303_vm3, %v17935_v16  ;;  %v7162_v16 = vld [vmem:[#allocation4 + $0x21] sm:$0xff] }
 0x474   : > { %14510 = vmatprep.mubr.msk.f32.mxu1 %vm303_vm3, %v17940_v50  ;;  %v5746_v60 = vpop.f32.mrf.mxu1  ;;  %v7845_v50 = vld [vmem:[%s19194_s2 + $0x70] sm:$0xff] }
 0x475   : > { %5823 = vst.msk [vmem:[#allocation3 + $0x40] sm:$0xff] %vm303_vm3, %v5746_v60  ;;  %v6105_v1 = vld [vmem:[#allocation3 + $0x18] sm:$0xff] }
 0x476   : > { %v7835_v60 = vld [vmem:[#allocation4 + $0x8a] sm:$0xff] }
 0x477   : > { %14511 = vmatmul.mubr.msk.f32.gmra.mxu1 %vm303_vm3, %v17945_v59 }
 0x478   : > { %14513 = vmatprep.mubr.msk.f32.mxu1 %vm303_vm3, %v17950_v13  ;;  %v7831_v13 = vld [vmem:[#allocation4 + $0x6a] sm:$0xff] }
 0x47b   : > { %14514 = vmatmul.mubr.msk.f32.gmra.mxu1 %vm303_vm3, %v6183_v61 }
 0x47c   : > { %14516 = vmatprep.mubr.msk.f32.mxu1 %vm303_vm3, %v6184_v31  ;;  %v7832_v31 = vld [vmem:[#allocation4 + $0x72] sm:$0xff] }
 0x47f   : > { %14517 = vmatmul.mubr.msk.f32.gmra.mxu1 %vm303_vm3, %v6185_v2 }
 0x480   : > { %14519 = vmatprep.mubr.msk.f32.mxu1 %vm303_vm3, %v6186_v12 }
 0x482   : > { %v14401_v14 = vpop.f32.mrf.mxu1 }
 0x483   : > { %5826 = vst.msk [vmem:[#allocation3 + $0x58] sm:$0xff] %vm303_vm3, %v14401_v14  ;;  %14520 = vmatmul.mubr.msk.f32.gmra.mxu1 %vm303_vm3, %v6187_v23  ;;  %v6103_v23 = vld [vmem:[#allocation3 + $0x8] sm:$0xff] }
 0x484   : > { %14522 = vmatprep.mubr.msk.f32.mxu1 %vm303_vm3, %v6188_v5  ;;  %v5756_v52 = vpop.f32.mrf.mxu1  ;;  %v7833_v5 = vld [vmem:[#allocation4 + $0x7a] sm:$0xff] }
 0x485   : > { %5825 = vst.msk [vmem:[#allocation3 + $0x50] sm:$0xff] %vm303_vm3, %v5756_v52 }
 0x487   : > { %14523 = vmatmul.mubr.msk.f32.gmra.mxu1 %vm303_vm3, %v6189_v11 }
 0x488   : > { %14525 = vmatprep.mubr.msk.f32.mxu1 %vm303_vm3, %v6519_v8 }
 0x48b   : > { %14526 = vmatmul.mubr.msk.f32.gmra.mxu1 %vm303_vm3, %v6520_v28  ;;  %v6104_v28 = vld [vmem:[#allocation3 + $0x10] sm:$0xff] }
 0x48c   : > { %14569 = vmatprep.mubr.msk.f32.mxu1 %vm303_vm3, %v7161_v36 }
 0x48f   : > { %14570 = vmatmul.mubr.msk.f32.vlgmr.msra.gmra.mxu1 %vm303_vm3, %v7162_v16  ;;  %v7836_v16 = vld [vmem:[#allocation4 + $0x92] sm:$0xff] }
 0x490   : > { %14640 = vmatpush3.msra.mxu1 %v7846_v6  ;;  %14572 = vmatprep.mubr.msk.f32.mxu1 %vm303_vm3, %v17765_v46 }
 0x491   : > { %14641 = vmatprep.subr.mxu1 %v7845_v50 }
 0x492   : > { %v14404_v11 = vpop.f32.mrf.mxu1  ;;  %14642 = vmatpush3.msra.mxu1 %v7845_v50 }
 0x493   : > { %5828 = vst.msk [vmem:[#allocation3 + $0x68] sm:$0xff] %vm303_vm3, %v14404_v11  ;;  %14573 = vmatmul.mubr.msk.f32.gmra.mxu1 %vm303_vm3, %v17769_v44 }
 0x494   : > { %14575 = vmatprep.mubr.msk.f32.mxu1 %vm303_vm3, %v17779_v25  ;;  %v5766_v59 = vpop.f32.mrf.mxu1 }
 0x495   : > { %5827 = vst.msk [vmem:[#allocation3 + $0x60] sm:$0xff] %vm303_vm3, %v5766_v59  ;;  %v6107_v59 = vld [vmem:[#allocation3 + $0x28] sm:$0xff] }
 0x497   : > { %14576 = vmatmul.mubr.msk.f32.gmra.mxu1 %vm303_vm3, %v17789_v54 }
 0x498   : > { %14578 = vmatprep.mubr.msk.f32.mxu1 %vm303_vm3, %v17794_v45  ;;  %v7823_v45 = vld [vmem:[#allocation4 + $0x2a] sm:$0xff] }
 0x49b   : > { %14579 = vmatmul.mubr.msk.f32.gmra.mxu1 %vm303_vm3, %v17799_v30  ;;  %v7824_v30 = vld [vmem:[#allocation4 + $0x32] sm:$0xff] }
 0x49c   : > { %14581 = vmatprep.mubr.msk.f32.mxu1 %vm303_vm3, %v17804_v62  ;;  %v18073_v62 = vpop.f32.mrf.mxu0 }
 0x49f   : > { %14582 = vmatmul.mubr.msk.f32.gmra.mxu1 %vm303_vm3, %v17809_v47  ;;  %v7825_v47 = vld [vmem:[#allocation4 + $0x3a] sm:$0xff] }
 0x4a0   : > { %14584 = vmatprep.mubr.msk.f32.mxu1 %vm303_vm3, %v17814_v53  ;;  %v7826_v53 = vld [vmem:[#allocation4 + $0x42] sm:$0xff] }
 0x4a1   : > { %v14407_v46 = vpop.f32.mrf.mxu1 }
 0x4a2   : > { %5830 = vst.msk [vmem:[#allocation3 + $0x78] sm:$0xff] %vm303_vm3, %v14407_v46  ;;  %v7837_v46 = vld [vmem:[#allocation4 + $0x9a] sm:$0xff] }
 0x4a3   : > { %14585 = vmatmul.mubr.msk.f32.gmra.mxu1 %vm303_vm3, %v17819_v56  ;;  %v5776_v44 = vpop.f32.mrf.mxu1  ;;  %v18077_v56 = vpop.f32.mrf.mxu0 }
 0x4a4   : > { %14587 = vmatprep.mubr.msk.f32.mxu1 %vm303_vm3, %v17824_v41  ;;  %5829 = vst.msk [vmem:[#allocation3 + $0x70] sm:$0xff] %vm303_vm3, %v5776_v44  ;;  %v7827_v41 = vld [vmem:[#allocation4 + $0x4a] sm:$0xff] }
 0x4a7   : > { %14588 = vmatmul.mubr.msk.f32.gmra.mxu1 %vm303_vm3, %v17829_v37  ;;  %v18081_v37 = vpop.f32.mrf.mxu0 }
 0x4a8   : > { %14590 = vmatprep.mubr.msk.f32.mxu1 %vm303_vm3, %v17834_v63  ;;  %v7828_v63 = vld [vmem:[#allocation4 + $0x52] sm:$0xff] }
 0x4ab   : > { %14591 = vmatmul.mubr.msk.f32.gmra.mxu1 %vm303_vm3, %v17839_v4 }
 0x4ac   : > { %14593 = vmatprep.mubr.msk.f32.mxu1 %vm303_vm3, %v17844_v17  ;;  %v7829_v17 = vld [vmem:[#allocation4 + $0x5a] sm:$0xff] }
 0x4af   : > { %14594 = vmatmul.mubr.msk.f32.gmra.mxu1 %vm303_vm3, %v17849_v26  ;;  %v18086_v26 = vpop.f32.mrf.mxu0 }
 0x4b0   : > { %14596 = vmatprep.mubr.msk.f32.mxu1 %vm303_vm3, %v17854_v10 }
 0x4b1   : > { %v14410_v25 = vpop.f32.mrf.mxu1 }
 0x4b2   : > { %5832 = vst.msk [vmem:[#allocation3 + $0x88] sm:$0xff] %vm303_vm3, %v14410_v25 }
 0x4b3   : > { %14597 = vmatmul.mubr.msk.f32.gmra.mxu1 %vm303_vm3, %v17859_v20  ;;  %v5786_v54 = vpop.f32.mrf.mxu1  ;;  %v7830_v20 = vld [vmem:[#allocation4 + $0x62] sm:$0xff] }
 0x4b4   : > { %14599 = vmatprep.mubr.msk.f32.mxu1 %vm303_vm3, %v17864_v40  ;;  %5831 = vst.msk [vmem:[#allocation3 + $0x80] sm:$0xff] %vm303_vm3, %v5786_v54  ;;  %v18089_v40 = vpop.f32.mrf.mxu0  ;;  %v6106_v54 = vld [vmem:[#allocation3 + $0x20] sm:$0xff] }
 0x4b6   : > { %v18095_v2 = vpop.f32.mrf.mxu0 }
 0x4b7   : > { %14600 = vmatmul.mubr.msk.f32.gmra.mxu1 %vm303_vm3, %v17869_v39 }
 0x4b8   : > { %14643 = vmatprep.mubr.msk.f32.mxu1 %vm303_vm3, %v7823_v45  ;;  %v18099_v49 = vpop.f32.mrf.mxu0 }
 0x4ba   : > { %v18105_v52 = vpop.f32.mrf.mxu0 }
 0x4bb   : > { %14644 = vmatmul.mubr.msk.f32.vlgmr.msra.gmra.mxu1 %vm303_vm3, %v7824_v30  ;;  %v7838_v30 = vld [vmem:[#allocation4 + $0xa2] sm:$0xff] }
 0x4bc   : > { %14646 = vmatprep.mubr.msk.f32.mxu1 %vm303_vm3, %v7825_v47  ;;  %v18108_v50 = vpop.f32.mrf.mxu0 }
 0x4be   : > { %v18114_v47 = vpop.f32.mrf.mxu0 }
 0x4bf   : > { %14647 = vmatmul.mubr.msk.f32.gmra.mxu1 %vm303_vm3, %v7826_v53 }
 0x4c0   : > { %14649 = vmatprep.mubr.msk.f32.mxu1 %vm303_vm3, %v7827_v41  ;;  %v6109_v41 = vld [vmem:[#allocation3 + $0x38] sm:$0xff] }
 0x4c2   : > { %v14413_v4 = vpop.f32.mrf.mxu1 }
 0x4c3   : > { %14650 = vmatmul.mubr.msk.f32.gmra.mxu1 %vm303_vm3, %v7828_v63  ;;  %5834 = vst.msk [vmem:[#allocation3 + $0x98] sm:$0xff] %vm303_vm3, %v14413_v4  ;;  %v7839_v63 = vld [vmem:[#allocation4 + $0xaa] sm:$0xff] }
 0x4c4   : > { %14652 = vmatprep.mubr.msk.f32.mxu1 %vm303_vm3, %v7829_v17  ;;  %v5796_v10 = vpop.f32.mrf.mxu1  ;;  %v18119_v17 = vpop.f32.mrf.mxu0 }
 0x4c5   : > { %5833 = vst.msk [vmem:[#allocation3 + $0x90] sm:$0xff] %vm303_vm3, %v5796_v10 }
 0x4c6   : > { %v14416_v39 = vpop.f32.mrf.mxu1 }
 0x4c7   : > { %14653 = vmatmul.mubr.msk.f32.gmra.mxu1 %vm303_vm3, %v7830_v20  ;;  %5836 = vst.msk [vmem:[#allocation3 + $0xa8] sm:$0xff] %vm303_vm3, %v14416_v39  ;;  %v6108_v20 = vld [vmem:[#allocation3 + $0x30] sm:$0xff] }
 0x4c8   : > { %14655 = vmatprep.mubr.msk.f32.mxu1 %vm303_vm3, %v7831_v13  ;;  %v5806_v61 = vpop.f32.mrf.mxu1  ;;  %v7840_v13 = vld [vmem:[#allocation4 + $0xb2] sm:$0xff] }
 0x4c9   : > { %5835 = vst.msk [vmem:[#allocation3 + $0xa0] sm:$0xff] %vm303_vm3, %v5806_v61 }
 0x4ca   : > { %v14423_v12 = vpop.f32.mrf.mxu1 }
 0x4cb   : > { %14656 = vmatmul.mubr.msk.f32.gmra.mxu1 %vm303_vm3, %v7832_v31  ;;  %v6125_v9 = vadd.f32 %v14423_v12, %v6103_v23  ;;  %v6111_v31 = vld [vmem:[#allocation3 + $0x48] sm:$0xff] }
 0x4cc   : > { %14658 = vmatprep.mubr.msk.f32.mxu1 %vm303_vm3, %v7833_v5  ;;  %v5993_v15 = vpop.f32.mrf.mxu1  ;;  %v7841_v12 = vld [vmem:[#allocation4 + $0xba] sm:$0xff]  ;;  %v18125_v5 = vpop.f32.mrf.mxu0 }
 0x4cd   : > { %6147 = vst.msk [vmem:[#allocation3 + $0x8] sm:$0xff] %vm303_vm3, %v6125_v9  ;;  %v6124_v6 = vadd.f32 %v6102_v51, %v5993_v15  ;;  %v6110_v15 = vld [vmem:[#allocation3 + $0x40] sm:$0xff] }
 0x4ce   : > { %v7843_v51 = vld [vmem:[#allocation4 + $0xca] sm:$0xff] }
 0x4cf   : > { %v14426_v58 = vpop.f32.mrf.mxu1  ;;  %14659 = vmatmul.mubr.msk.f32.gmra.mxu1 %vm303_vm3, %v7834_v29  ;;  %6146 = vst.msk [vmem:[#allocation3] sm:$0xff] %vm303_vm3, %v6124_v6  ;;  %v7842_v29 = vld [vmem:[#allocation4 + $0xc2] sm:$0xff] }
 0x4d0   : > { %v6127_v14 = vadd.f32 %v14426_v58, %v6105_v1  ;;  %14661 = vmatprep.mubr.msk.f32.mxu1 %vm303_vm3, %v7835_v60  ;;  %v18128_v58 = vpop.f32.mrf.mxu0  ;;  %v6113_v60 = vld [vmem:[#allocation3 + $0x58] sm:$0xff] }
 0x4d1   : > { %v6003_v8 = vpop.f32.mrf.mxu1 }
 0x4d2   : > { %6149 = vst.msk [vmem:[#allocation3 + $0x18] sm:$0xff] %vm303_vm3, %v6127_v14  ;;  %v6126_v36 = vadd.f32 %v6104_v28, %v6003_v8  ;;  %v7844_v8 = vld [vmem:[#allocation4 + $0xd2] sm:$0xff] }
 0x4d3   : > { %v14429_v11 = vpop.f32.mrf.mxu1  ;;  %14662 = vmatmul.mubr.msk.f32.gmra.mxu1 %vm303_vm3, %v7836_v16 }
 0x4d4   : > { %6148 = vst.msk [vmem:[#allocation3 + $0x10] sm:$0xff] %vm303_vm3, %v6126_v36  ;;  %v6129_v44 = vadd.f32 %v14429_v11, %v6107_v59  ;;  %14664 = vmatprep.mubr.msk.f32.mxu1 %vm303_vm3, %v7837_v46  ;;  %v6112_v36 = vld [vmem:[#allocation3 + $0x50] sm:$0xff]  ;;  %v18134_v11 = vpop.f32.mrf.mxu0  ;;  %v6115_v46 = vld [vmem:[#allocation3 + $0x68] sm:$0xff] }
 0x4d5   : > { %v6013_v25 = vpop.f32.mrf.mxu1 }
 0x4d6   : > { %6151 = vst.msk [vmem:[#allocation3 + $0x28] sm:$0xff] %vm303_vm3, %v6129_v44  ;;  %v6128_v45 = vadd.f32 %v6106_v54, %v6013_v25  ;;  %v18138_v25 = vpop.f32.mrf.mxu0 }
 0x4d7   : > { %v14432_v53 = vpop.f32.mrf.mxu1  ;;  %14665 = vmatmul.mubr.msk.f32.gmra.mxu1 %vm303_vm3, %v7838_v30 }
 0x4d8   : > { %6150 = vst.msk [vmem:[#allocation3 + $0x20] sm:$0xff] %vm303_vm3, %v6128_v45  ;;  %v6131_v4 = vadd.f32 %v14432_v53, %v6109_v41  ;;  %14667 = vmatprep.mubr.msk.f32.mxu1 %vm303_vm3, %v7839_v63  ;;  %v6114_v45 = vld [vmem:[#allocation3 + $0x60] sm:$0xff]  ;;  %v6117_v41 = vld [vmem:[#allocation3 + $0x78] sm:$0xff] }
 0x4d9   : > { %v6023_v10 = vpop.f32.mrf.mxu1 }
 0x4da   : > { %6153 = vst.msk [vmem:[#allocation3 + $0x38] sm:$0xff] %vm303_vm3, %v6131_v4  ;;  %v6130_v39 = vadd.f32 %v6108_v20, %v6023_v10  ;;  %v18142_v4 = vpop.f32.mrf.mxu0  ;;  %v6116_v20 = vld [vmem:[#allocation3 + $0x70] sm:$0xff] }
 0x4db   : > { %v14435_v61 = vpop.f32.mrf.mxu1  ;;  %14668 = vmatmul.mubr.msk.f32.gmra.mxu1 %vm303_vm3, %v7840_v13 }
 0x4dc   : > { %6152 = vst.msk [vmem:[#allocation3 + $0x30] sm:$0xff] %vm303_vm3, %v6130_v39  ;;  %v6133_v23 = vadd.f32 %v14435_v61, %v6111_v31  ;;  %14670 = vmatprep.mubr.msk.f32.mxu1 %vm303_vm3, %v7841_v12  ;;  %v18145_v13 = vpop.f32.mrf.mxu0  ;;  %v6119_v31 = vld [vmem:[#allocation3 + $0x88] sm:$0xff] }
 0x4dd   : > { %v6033_v9 = vpop.f32.mrf.mxu1 }
 0x4de   : > { %6155 = vst.msk [vmem:[#allocation3 + $0x48] sm:$0xff] %vm303_vm3, %v6133_v23  ;;  %v6132_v6 = vadd.f32 %v6110_v15, %v6033_v9  ;;  %v6118_v9 = vld [vmem:[#allocation3 + $0x80] sm:$0xff] }
 0x4df   : > { %v14438_v1 = vpop.f32.mrf.mxu1  ;;  %14671 = vmatmul.mubr.msk.f32.gmra.mxu1 %vm303_vm3, %v7842_v29  ;;  %v6121_v29 = vld [vmem:[#allocation3 + $0x98] sm:$0xff] }
 0x4e0   : > { %6154 = vst.msk [vmem:[#allocation3 + $0x40] sm:$0xff] %vm303_vm3, %v6132_v6  ;;  %v6135_v14 = vadd.f32 %v14438_v1, %v6113_v60  ;;  %14673 = vmatprep.mubr.msk.f32.mxu1 %vm303_vm3, %v7843_v51  ;;  %v18149_v51 = vpop.f32.mrf.mxu0 }
 0x4e1   : > { %v6043_v28 = vpop.f32.mrf.mxu1 }
 0x4e2   : > { %6157 = vst.msk [vmem:[#allocation3 + $0x58] sm:$0xff] %vm303_vm3, %v6135_v14  ;;  %v6134_v16 = vadd.f32 %v6112_v36, %v6043_v28  ;;  %v6120_v14 = vld [vmem:[#allocation3 + $0x90] sm:$0xff]  ;;  %v18156_v36 = vpop.f32.mrf.mxu0 }
 0x4e3   : > { %v14441_v59 = vpop.f32.mrf.mxu1  ;;  %14674 = vmatmul.mubr.msk.f32.gmra.mxu1 %vm303_vm3, %v7844_v8  ;;  %v8622_v28 = vld [vmem:[%s19195_s3 + $0x8] sm:$0xff] }
 0x4e4   : > { %6156 = vst.msk [vmem:[#allocation3 + $0x50] sm:$0xff] %vm303_vm3, %v6134_v16  ;;  %v6137_v44 = vadd.f32 %v14441_v59, %v6115_v46  ;;  %v6123_v59 = vld [vmem:[#allocation3 + $0xa8] sm:$0xff]  ;;  %14713 = vmatprep.subr.mxu1 %v8622_v28 }
 0x4e5   : > { %v6053_v54 = vpop.f32.mrf.mxu1  ;;  %14714 = vmatpush3.msra.mxu1 %v8622_v28  ;;  %v6437_v28 = vld [vmem:[#allocation3 + $0x20] sm:$0xff] }
 0x4e6   : > { %6159 = vst.msk [vmem:[#allocation3 + $0x68] sm:$0xff] %vm303_vm3, %v6137_v44  ;;  %v6136_v30 = vadd.f32 %v6114_v45, %v6053_v54  ;;  %v6122_v54 = vld [vmem:[#allocation3 + $0xa0] sm:$0xff] }
 0x4e7   : > { %v14444_v53 = vpop.f32.mrf.mxu1 }
 0x4e8   : > { %6158 = vst.msk [vmem:[#allocation3 + $0x60] sm:$0xff] %vm303_vm3, %v6136_v30  ;;  %v6139_v63 = vadd.f32 %v14444_v53, %v6117_v41  ;;  %v18160_v30 = vpop.f32.mrf.mxu0  ;;  %v6434_v41 = vld [vmem:[#allocation3 + $0x8] sm:$0xff] }
 0x4e9   : > { %v6063_v10 = vpop.f32.mrf.mxu1 }
 0x4ea   : > { %6161 = vst.msk [vmem:[#allocation3 + $0x78] sm:$0xff] %vm303_vm3, %v6139_v63  ;;  %v6138_v39 = vadd.f32 %v6116_v20, %v6063_v10  ;;  %v6433_v20 = vld [vmem:[#allocation3] sm:$0xff] }
 0x4eb   : > { %v14447_v61 = vpop.f32.mrf.mxu1 }
 0x4ec   : > { %6160 = vst.msk [vmem:[#allocation3 + $0x70] sm:$0xff] %vm303_vm3, %v6138_v39  ;;  %v6141_v12 = vadd.f32 %v14447_v61, %v6119_v31  ;;  %v18164_v61 = vpop.f32.mrf.mxu0 }
 0x4ed   : > { %v6073_v23 = vpop.f32.mrf.mxu1 }
 0x4ee   : > { %6163 = vst.msk [vmem:[#allocation3 + $0x88] sm:$0xff] %vm303_vm3, %v6141_v12  ;;  %v6140_v15 = vadd.f32 %v6118_v9, %v6073_v23  ;;  %v6436_v12 = vld [vmem:[#allocation3 + $0x18] sm:$0xff] }
 0x4ef   : > { %v14450_v6 = vpop.f32.mrf.mxu1 }
 0x4f0   : > { %6162 = vst.msk [vmem:[#allocation3 + $0x80] sm:$0xff] %vm303_vm3, %v6140_v15  ;;  %v6143_v1 = vadd.f32 %v14450_v6, %v6121_v29  ;;  %v6435_v15 = vld [vmem:[#allocation3 + $0x10] sm:$0xff]  ;;  %v18168_v29 = vpop.f32.mrf.mxu0 }
 0x4f1   : > { %v6083_v60 = vpop.f32.mrf.mxu1 }
 0x4f2   : > { %6165 = vst.msk [vmem:[#allocation3 + $0x98] sm:$0xff] %vm303_vm3, %v6143_v1  ;;  %v6142_v8 = vadd.f32 %v6120_v14, %v6083_v60  ;;  %v6438_v60 = vld [vmem:[#allocation3 + $0x28] sm:$0xff] }
 0x4f3   : > { %v14453_v16 = vpop.f32.mrf.mxu1 }
 0x4f4   : > { %6164 = vst.msk [vmem:[#allocation3 + $0x90] sm:$0xff] %vm303_vm3, %v6142_v8  ;;  %v6145_v46 = vadd.f32 %v14453_v16, %v6123_v59  ;;  %v18172_v59 = vpop.f32.mrf.mxu0 }
 0x4f5   : > { %v6093_v44 = vpop.f32.mrf.mxu1 }
 0x4f6   : > { %6167 = vst.msk [vmem:[#allocation3 + $0xa8] sm:$0xff] %vm303_vm3, %v6145_v46  ;;  %v6144_v45 = vadd.f32 %v6122_v54, %v6093_v44  ;;  %v6440_v44 = vld [vmem:[#allocation3 + $0x38] sm:$0xff] }
 0x4f7   : > { %v14460_v53 = vpop.f32.mrf.mxu1 }
 0x4f8   : > { %6166 = vst.msk [vmem:[#allocation3 + $0xa0] sm:$0xff] %vm303_vm3, %v6144_v45  ;;  %v6456_v63 = vadd.f32 %v14460_v53, %v6434_v41  ;;  %v6439_v53 = vld [vmem:[#allocation3 + $0x30] sm:$0xff] }
 0x4f9   : > { %v6324_v10 = vpop.f32.mrf.mxu1 }
 0x4fa   : > { %6478 = vst.msk [vmem:[#allocation3 + $0x8] sm:$0xff] %vm303_vm3, %v6456_v63  ;;  %v6455_v39 = vadd.f32 %v6433_v20, %v6324_v10  ;;  %v18176_v63 = vpop.f32.mrf.mxu0  ;;  %v6442_v20 = vld [vmem:[#allocation3 + $0x48] sm:$0xff] }
 0x4fb   : > { %v14463_v31 = vpop.f32.mrf.mxu1 }
 0x4fc   : > { %6477 = vst.msk [vmem:[#allocation3] sm:$0xff] %vm303_vm3, %v6455_v39  ;;  %v6458_v23 = vadd.f32 %v14463_v31, %v6436_v12  ;;  %v6441_v12 = vld [vmem:[#allocation3 + $0x40] sm:$0xff] }
 0x4fd   : > { %v6334_v9 = vpop.f32.mrf.mxu1 }
 0x4fe   : > { %6480 = vst.msk [vmem:[#allocation3 + $0x18] sm:$0xff] %vm303_vm3, %v6458_v23  ;;  %v6457_v6 = vadd.f32 %v6435_v15, %v6334_v9  ;;  %v18180_v9 = vpop.f32.mrf.mxu0 }
 0x4ff   : > { %v14466_v1 = vpop.f32.mrf.mxu1 }
 0x500   : > { %6479 = vst.msk [vmem:[#allocation3 + $0x10] sm:$0xff] %vm303_vm3, %v6457_v6  ;;  %v6460_v14 = vadd.f32 %v14466_v1, %v6438_v60  ;;  %v6444_v6 = vld [vmem:[#allocation3 + $0x58] sm:$0xff] }
 0x501   : > { %v6344_v8 = vpop.f32.mrf.mxu1 }
 0x502   : > { %6482 = vst.msk [vmem:[#allocation3 + $0x28] sm:$0xff] %vm303_vm3, %v6460_v14  ;;  %v6459_v16 = vadd.f32 %v6437_v28, %v6344_v8  ;;  %v6443_v14 = vld [vmem:[#allocation3 + $0x50] sm:$0xff]  ;;  %v18184_v28 = vpop.f32.mrf.mxu0 }
 0x503   : > { %v14469_v46 = vpop.f32.mrf.mxu1 }
 0x504   : > { %6481 = vst.msk [vmem:[#allocation3 + $0x20] sm:$0xff] %vm303_vm3, %v6459_v16  ;;  %v6462_v54 = vadd.f32 %v14469_v46, %v6440_v44  ;;  %v6446_v46 = vld [vmem:[#allocation3 + $0x68] sm:$0xff] }
 0x505   : > { %v6354_v45 = vpop.f32.mrf.mxu1 }
 0x506   : > { %6484 = vst.msk [vmem:[#allocation3 + $0x38] sm:$0xff] %vm303_vm3, %v6462_v54  ;;  %v6461_v41 = vadd.f32 %v6439_v53, %v6354_v45  ;;  %v6445_v45 = vld [vmem:[#allocation3 + $0x60] sm:$0xff] }
 0x507   : > { %v14472_v10 = vpop.f32.mrf.mxu1 }
 0x508   : > { %6483 = vst.msk [vmem:[#allocation3 + $0x30] sm:$0xff] %vm303_vm3, %v6461_v41  ;;  %v6464_v39 = vadd.f32 %v14472_v10, %v6442_v20  ;;  %v18188_v41 = vpop.f32.mrf.mxu0  ;;  %v6448_v20 = vld [vmem:[#allocation3 + $0x78] sm:$0xff] }
 0x509   : > { %v6364_v31 = vpop.f32.mrf.mxu1 }
 0x50a   : > { %6486 = vst.msk [vmem:[#allocation3 + $0x48] sm:$0xff] %vm303_vm3, %v6464_v39  ;;  %v6463_v23 = vadd.f32 %v6441_v12, %v6364_v31  ;;  %v6447_v12 = vld [vmem:[#allocation3 + $0x70] sm:$0xff] }
 0x50b   : > { %v14475_v15 = vpop.f32.mrf.mxu1 }
 0x50c   : > { %6485 = vst.msk [vmem:[#allocation3 + $0x40] sm:$0xff] %vm303_vm3, %v6463_v23  ;;  %v6466_v1 = vadd.f32 %v14475_v15, %v6444_v6  ;;  %v18192_v15 = vpop.f32.mrf.mxu0 }
 0x50d   : > { %v6374_v60 = vpop.f32.mrf.mxu1 }
 0x50e   : > { %6488 = vst.msk [vmem:[#allocation3 + $0x58] sm:$0xff] %vm303_vm3, %v6466_v1  ;;  %v6465_v8 = vadd.f32 %v6443_v14, %v6374_v60  ;;  %v6450_v1 = vld [vmem:[#allocation3 + $0x88] sm:$0xff] }
 0x50f   : > { %v14478_v16 = vpop.f32.mrf.mxu1  ;;  %v8621_v60 = vld [vmem:[%s19195_s3] sm:$0xff] }
 0x510   : > { %6487 = vst.msk [vmem:[#allocation3 + $0x50] sm:$0xff] %vm303_vm3, %v6465_v8  ;;  %v6468_v44 = vadd.f32 %v14478_v16, %v6446_v46  ;;  %14715 = vmatprep.subr.mxu1 %v8621_v60  ;;  %v6449_v16 = vld [vmem:[#allocation3 + $0x80] sm:$0xff] }
 0x511   : > { %v6384_v54 = vpop.f32.mrf.mxu1  ;;  %14716 = vmatpush3.msra.mxu1 %v8621_v60 }
 0x512   : > { %6490 = vst.msk [vmem:[#allocation3 + $0x68] sm:$0xff] %vm303_vm3, %v6468_v44  ;;  %v6467_v53 = vadd.f32 %v6445_v45, %v6384_v54  ;;  %v18199_v44 = vpop.f32.mrf.mxu0  ;;  %v6452_v45 = vld [vmem:[#allocation3 + $0x98] sm:$0xff] }
 0x513   : > { %v14481_v10 = vpop.f32.mrf.mxu1 }
 0x514   : > { %6489 = vst.msk [vmem:[#allocation3 + $0x60] sm:$0xff] %vm303_vm3, %v6467_v53  ;;  %v6470_v39 = vadd.f32 %v14481_v10, %v6448_v20  ;;  %v6451_v20 = vld [vmem:[#allocation3 + $0x90] sm:$0xff] }
 0x515   : > { %v6394_v31 = vpop.f32.mrf.mxu1 }
 0x516   : > { %6492 = vst.msk [vmem:[#allocation3 + $0x78] sm:$0xff] %vm303_vm3, %v6470_v39  ;;  %v6469_v23 = vadd.f32 %v6447_v12, %v6394_v31  ;;  %v8909_v31 = vld [vmem:[%s19195_s3 + $0x18] sm:$0xff]  ;;  %v18206_v12 = vpop.f32.mrf.mxu0 }
 0x517   : > { %v14484_v6 = vpop.f32.mrf.mxu1  ;;  %14750 = vmatprep.subr.mxu0 %v8909_v31 }
 0x518   : > { %6491 = vst.msk [vmem:[#allocation3 + $0x70] sm:$0xff] %vm303_vm3, %v6469_v23  ;;  %v6472_v14 = vadd.f32 %v14484_v6, %v6450_v1  ;;  %v6454_v6 = vld [vmem:[#allocation3 + $0xa8] sm:$0xff]  ;;  %v8599_v1 = vld [vmem:[#allocation5 + $0x5] sm:$0xff]  ;;  %14751 = vmatpush3.msra.mxu0 %v8909_v31 }
 0x519   : > { %v6404_v8 = vpop.f32.mrf.mxu1  ;;  %14717 = vmatprep.mubr.msk.f32.mxu1 %vm303_vm3, %v8599_v1 }
 0x51a   : > { %6494 = vst.msk [vmem:[#allocation3 + $0x88] sm:$0xff] %vm303_vm3, %v6472_v14  ;;  %v6471_v46 = vadd.f32 %v6449_v16, %v6404_v8  ;;  %v8600_v14 = vld [vmem:[#allocation5 + $0xd] sm:$0xff] }
 0x51b   : > { %v14487_v54 = vpop.f32.mrf.mxu1  ;;  %v8908_v8 = vld [vmem:[%s19195_s3 + $0x10] sm:$0xff]  ;;  %14718 = vmatmul.mubr.msk.f32.vlgmr.msra.gmra.mxu1 %vm303_vm3, %v8600_v14 }
 0x51c   : > { %6493 = vst.msk [vmem:[#allocation3 + $0x80] sm:$0xff] %vm303_vm3, %v6471_v46  ;;  %v6474_v53 = vadd.f32 %v14487_v54, %v6452_v45  ;;  %v6453_v46 = vld [vmem:[#allocation3 + $0xa0] sm:$0xff]  ;;  %14752 = vmatprep.subr.mxu0 %v8908_v8  ;;  %v8886_v54 = vld [vmem:[#allocation5 + $0x6] sm:$0xff] }
 0x51d   : > { %v6414_v10 = vpop.f32.mrf.mxu1  ;;  %14753 = vmatpush3.msra.mxu0 %v8908_v8  ;;  %14754 = vmatprep.mubr.msk.f32.mxu0 %vm303_vm3, %v8886_v54  ;;  %v6767_v8 = vld [vmem:[#allocation3 + $0x18] sm:$0xff]  ;;  %v6766_v54 = vld [vmem:[#allocation3 + $0x10] sm:$0xff] }
 0x51e   : > { %6496 = vst.msk [vmem:[#allocation3 + $0x98] sm:$0xff] %vm303_vm3, %v6474_v53  ;;  %v6473_v39 = vadd.f32 %v6451_v20, %v6414_v10  ;;  %v8887_v53 = vld [vmem:[#allocation5 + $0xe] sm:$0xff]  ;;  %v18216_v10 = vpop.f32.mrf.mxu0 }
 0x51f   : > { %v14490_v23 = vpop.f32.mrf.mxu1  ;;  %14755 = vmatmul.mubr.msk.f32.vlgmr.msra.gmra.mxu0 %vm303_vm3, %v8887_v53 }
 0x520   : > { %6495 = vst.msk [vmem:[#allocation3 + $0x90] sm:$0xff] %vm303_vm3, %v6473_v39  ;;  %v6476_v60 = vadd.f32 %v14490_v23, %v6454_v6  ;;  %v6765_v39 = vld [vmem:[#allocation3 + $0x8] sm:$0xff]  ;;  %v6764_v6 = vld [vmem:[#allocation3] sm:$0xff] }
 0x521   : > { %v6424_v16 = vpop.f32.mrf.mxu1 }
 0x522   : > { %6498 = vst.msk [vmem:[#allocation3 + $0xa8] sm:$0xff] %vm303_vm3, %v6476_v60  ;;  %v6475_v45 = vadd.f32 %v6453_v46, %v6424_v16  ;;  %v18221_v60 = vpop.f32.mrf.mxu0 }
 0x523   : > { %v14497_v20 = vpop.f32.mrf.mxu1 }
 0x524   : > { %6497 = vst.msk [vmem:[#allocation3 + $0xa0] sm:$0xff] %vm303_vm3, %v6475_v45  ;;  %v6787_v31 = vadd.f32 %v14497_v20, %v6765_v39  ;;  %v18225_v32 = vpop.f32.mrf.mxu0  ;;  %v6769_v20 = vld [vmem:[#allocation3 + $0x28] sm:$0xff] }
 0x525   : > { %v6655_v23 = vpop.f32.mrf.mxu1 }
 0x526   : > { %6809 = vst.msk [vmem:[#allocation3 + $0x8] sm:$0xff] %vm303_vm3, %v6787_v31  ;;  %v6786_v1 = vadd.f32 %v6764_v6, %v6655_v23  ;;  %v6768_v23 = vld [vmem:[#allocation3 + $0x20] sm:$0xff] }
 0x527   : > { %v14500_v14 = vpop.f32.mrf.mxu1 }
 0x528   : > { %6808 = vst.msk [vmem:[#allocation3] sm:$0xff] %vm303_vm3, %v6786_v1  ;;  %v6789_v16 = vadd.f32 %v14500_v14, %v6767_v8  ;;  %v18230_v14 = vpop.f32.mrf.mxu0 }
 0x529   : > { %v6665_v46 = vpop.f32.mrf.mxu1 }
 0x52a   : > { %6811 = vst.msk [vmem:[#allocation3 + $0x18] sm:$0xff] %vm303_vm3, %v6789_v16  ;;  %v6788_v53 = vadd.f32 %v6766_v54, %v6665_v46  ;;  %v6771_v16 = vld [vmem:[#allocation3 + $0x38] sm:$0xff]  ;;  %v9240_v54 = vld [vmem:[%s19195_s3 + $0x28] sm:$0xff] }
 0x52b   : > { %v14503_v45 = vpop.f32.mrf.mxu1  ;;  %14787 = vmatprep.subr.mxu1 %v9240_v54 }
 0x52c   : > { %6810 = vst.msk [vmem:[#allocation3 + $0x10] sm:$0xff] %vm303_vm3, %v6788_v53  ;;  %v6791_v39 = vadd.f32 %v14503_v45, %v6769_v20  ;;  %14788 = vmatpush3.msra.mxu1 %v9240_v54  ;;  %v6772_v54 = vld [vmem:[#allocation3 + $0x40] sm:$0xff] }
 0x52d   : > { %v6675_v31 = vpop.f32.mrf.mxu1  ;;  %v7096_v6 = vld [vmem:[#allocation3 + $0x8] sm:$0xff] }
 0x52e   : > { %6813 = vst.msk [vmem:[#allocation3 + $0x28] sm:$0xff] %vm303_vm3, %v6791_v39  ;;  %v6790_v7 = vadd.f32 %v6768_v23, %v6675_v31  ;;  %v7118_v1 = vadd.f32 %v18073_v62, %v7096_v6  ;;  %v6770_v39 = vld [vmem:[#allocation3 + $0x30] sm:$0xff]  ;;  %v18241_v6 = vpop.f32.mrf.mxu0 }
 0x52f   : > { %v14506_v8 = vpop.f32.mrf.mxu1  ;;  %v7095_v46 = vld [vmem:[#allocation3] sm:$0xff] }
 0x530   : > { %6812 = vst.msk [vmem:[#allocation3 + $0x20] sm:$0xff] %vm303_vm3, %v6790_v7  ;;  %v6793_v53 = vadd.f32 %v14506_v8, %v6771_v16  ;;  %7140 = vst.msk [vmem:[#allocation3 + $0x8] sm:$0xff] %vm303_vm3, %v7118_v1  ;;  %v7117_v45 = vadd.f32 %v7095_v46, %v18077_v56  ;;  %v6773_v8 = vld [vmem:[#allocation3 + $0x48] sm:$0xff] }
 0x531   : > { %v6685_v20 = vpop.f32.mrf.mxu1  ;;  %v7098_v62 = vld [vmem:[#allocation3 + $0x18] sm:$0xff] }
 0x532   : > { %6815 = vst.msk [vmem:[#allocation3 + $0x38] sm:$0xff] %vm303_vm3, %v6793_v53  ;;  %v6792_v31 = vadd.f32 %v6770_v39, %v6685_v20  ;;  %7139 = vst.msk [vmem:[#allocation3] sm:$0xff] %vm303_vm3, %v7117_v45  ;;  %v7120_v23 = vadd.f32 %v18081_v37, %v7098_v62  ;;  %v18249_v20 = vpop.f32.mrf.mxu0  ;;  %v6775_v62 = vld [vmem:[#allocation3 + $0x58] sm:$0xff] }
 0x533   : > { %v14509_v7 = vpop.f32.mrf.mxu1  ;;  %v7097_v16 = vld [vmem:[#allocation3 + $0x10] sm:$0xff] }
 0x534   : > { %6814 = vst.msk [vmem:[#allocation3 + $0x30] sm:$0xff] %vm303_vm3, %v6792_v31  ;;  %v6795_v56 = vadd.f32 %v14509_v7, %v6773_v8  ;;  %7142 = vst.msk [vmem:[#allocation3 + $0x18] sm:$0xff] %vm303_vm3, %v7120_v23  ;;  %v7119_v1 = vadd.f32 %v7097_v16, %v18086_v26  ;;  %v6774_v8 = vld [vmem:[#allocation3 + $0x50] sm:$0xff] }
 0x535   : > { %v6695_v46 = vpop.f32.mrf.mxu1  ;;  %v7100_v53 = vld [vmem:[#allocation3 + $0x28] sm:$0xff] }
 0x536   : > { %6817 = vst.msk [vmem:[#allocation3 + $0x48] sm:$0xff] %vm303_vm3, %v6795_v56  ;;  %v6794_v45 = vadd.f32 %v6772_v54, %v6695_v46  ;;  %7141 = vst.msk [vmem:[#allocation3 + $0x10] sm:$0xff] %vm303_vm3, %v7119_v1  ;;  %v7122_v37 = vadd.f32 %v18089_v40, %v7100_v53  ;;  %v9239_v1 = vld [vmem:[%s19195_s3 + $0x20] sm:$0xff]  ;;  %v18260_v46 = vpop.f32.mrf.mxu0 }
 0x537   : > { %v14512_v39 = vpop.f32.mrf.mxu1  ;;  %v7099_v31 = vld [vmem:[#allocation3 + $0x20] sm:$0xff]  ;;  %v6777_v53 = vld [vmem:[#allocation3 + $0x68] sm:$0xff]  ;;  %14789 = vmatprep.subr.mxu1 %v9239_v1 }
 0x538   : > { %6816 = vst.msk [vmem:[#allocation3 + $0x40] sm:$0xff] %vm303_vm3, %v6794_v45  ;;  %v6797_v23 = vadd.f32 %v14512_v39, %v6775_v62  ;;  %7144 = vst.msk [vmem:[#allocation3 + $0x28] sm:$0xff] %vm303_vm3, %v7122_v37  ;;  %v7121_v26 = vadd.f32 %v7099_v31, %v18095_v2  ;;  %14790 = vmatpush3.msra.mxu1 %v9239_v1  ;;  %v6776_v62 = vld [vmem:[#allocation3 + $0x60] sm:$0xff] }
 0x539   : > { %v6705_v7 = vpop.f32.mrf.mxu1  ;;  %v7102_v16 = vld [vmem:[#allocation3 + $0x38] sm:$0xff] }
 0x53a   : > { %6819 = vst.msk [vmem:[#allocation3 + $0x58] sm:$0xff] %vm303_vm3, %v6797_v23  ;;  %v6796_v56 = vadd.f32 %v6774_v8, %v6705_v7  ;;  %7143 = vst.msk [vmem:[#allocation3 + $0x20] sm:$0xff] %vm303_vm3, %v7121_v26  ;;  %v7124_v40 = vadd.f32 %v18099_v49, %v7102_v16  ;;  %v9571_v49 = vld [vmem:[%s19195_s3 + $0x38] sm:$0xff]  ;;  %v18271_v7 = vpop.f32.mrf.mxu0  ;;  %v6779_v8 = vld [vmem:[#allocation3 + $0x78] sm:$0xff] }
 0x53b   : > { %v14515_v54 = vpop.f32.mrf.mxu1  ;;  %v7101_v45 = vld [vmem:[#allocation3 + $0x30] sm:$0xff]  ;;  %14824 = vmatprep.subr.mxu0 %v9571_v49 }
 0x53c   : > { %6818 = vst.msk [vmem:[#allocation3 + $0x50] sm:$0xff] %vm303_vm3, %v6796_v56  ;;  %v6799_v2 = vadd.f32 %v14515_v54, %v6777_v53  ;;  %7146 = vst.msk [vmem:[#allocation3 + $0x38] sm:$0xff] %vm303_vm3, %v7124_v40  ;;  %v7123_v37 = vadd.f32 %v7101_v45, %v18105_v52  ;;  %14825 = vmatpush3.msra.mxu0 %v9571_v49  ;;  %v6778_v54 = vld [vmem:[#allocation3 + $0x70] sm:$0xff]  ;;  %v6781_v49 = vld [vmem:[#allocation3 + $0x88] sm:$0xff] }
 0x53d   : > { %v6715_v39 = vpop.f32.mrf.mxu1  ;;  %v7104_v31 = vld [vmem:[#allocation3 + $0x48] sm:$0xff] }
 0x53e   : > { %6821 = vst.msk [vmem:[#allocation3 + $0x68] sm:$0xff] %vm303_vm3, %v6799_v2  ;;  %v6798_v23 = vadd.f32 %v6776_v62, %v6715_v39  ;;  %7145 = vst.msk [vmem:[#allocation3 + $0x30] sm:$0xff] %vm303_vm3, %v7123_v37  ;;  %v7126_v26 = vadd.f32 %v18108_v50, %v7104_v31  ;;  %v18279_v2 = vpop.f32.mrf.mxu0 }
 0x53f   : > { %v14518_v52 = vpop.f32.mrf.mxu1  ;;  %v7103_v16 = vld [vmem:[#allocation3 + $0x40] sm:$0xff] }
 0x540   : > { %6820 = vst.msk [vmem:[#allocation3 + $0x60] sm:$0xff] %vm303_vm3, %v6798_v23  ;;  %v6801_v56 = vadd.f32 %v14518_v52, %v6779_v8  ;;  %7148 = vst.msk [vmem:[#allocation3 + $0x48] sm:$0xff] %vm303_vm3, %v7126_v26  ;;  %v7125_v40 = vadd.f32 %v7103_v16, %v18114_v47  ;;  %v6780_v23 = vld [vmem:[#allocation3 + $0x80] sm:$0xff]  ;;  %v9570_v52 = vld [vmem:[%s19195_s3 + $0x30] sm:$0xff] }
 0x541   : > { %v6725_v1 = vpop.f32.mrf.mxu1  ;;  %v7106_v53 = vld [vmem:[#allocation3 + $0x58] sm:$0xff]  ;;  %14826 = vmatprep.subr.mxu0 %v9570_v52  ;;  %v9902_v16 = vld [vmem:[%s19195_s3 + $0x48] sm:$0xff] }
 0x542   : > { %6823 = vst.msk [vmem:[#allocation3 + $0x78] sm:$0xff] %vm303_vm3, %v6801_v56  ;;  %v6800_v45 = vadd.f32 %v6778_v54, %v6725_v1  ;;  %7147 = vst.msk [vmem:[#allocation3 + $0x40] sm:$0xff] %vm303_vm3, %v7125_v40  ;;  %v7128_v50 = vadd.f32 %v18119_v17, %v7106_v53  ;;  %v6783_v40 = vld [vmem:[#allocation3 + $0x98] sm:$0xff]  ;;  %14827 = vmatpush3.msra.mxu0 %v9570_v52  ;;  %14861 = vmatprep.subr.mxu1 %v9902_v16  ;;  %v6784_v52 = vld [vmem:[#allocation3 + $0xa0] sm:$0xff] }
 0x543   : > { %v14521_v37 = vpop.f32.mrf.mxu1  ;;  %v7105_v39 = vld [vmem:[#allocation3 + $0x50] sm:$0xff] }
 0x544   : > { %6822 = vst.msk [vmem:[#allocation3 + $0x70] sm:$0xff] %vm303_vm3, %v6800_v45  ;;  %v6803_v62 = vadd.f32 %v14521_v37, %v6781_v49  ;;  %7150 = vst.msk [vmem:[#allocation3 + $0x58] sm:$0xff] %vm303_vm3, %v7128_v50  ;;  %v7127_v47 = vadd.f32 %v7105_v39, %v18125_v5  ;;  %v18293_v5 = vpop.f32.mrf.mxu0  ;;  %v6782_v45 = vld [vmem:[#allocation3 + $0x90] sm:$0xff] }
 0x545   : > { %v6735_v31 = vpop.f32.mrf.mxu1  ;;  %v7108_v26 = vld [vmem:[#allocation3 + $0x68] sm:$0xff] }
 0x546   : > { %6825 = vst.msk [vmem:[#allocation3 + $0x88] sm:$0xff] %vm303_vm3, %v6803_v62  ;;  %v6802_v17 = vadd.f32 %v6780_v23, %v6735_v31  ;;  %7149 = vst.msk [vmem:[#allocation3 + $0x50] sm:$0xff] %vm303_vm3, %v7127_v47  ;;  %v7130_v8 = vadd.f32 %v18128_v58, %v7108_v26  ;;  %v18301_v39 = vpop.f32.mrf.mxu0  ;;  %v6785_v47 = vld [vmem:[#allocation3 + $0xa8] sm:$0xff] }
 0x547   : > { %v14524_v56 = vpop.f32.mrf.mxu1  ;;  %v7107_v1 = vld [vmem:[#allocation3 + $0x60] sm:$0xff] }
 0x548   : > { %6824 = vst.msk [vmem:[#allocation3 + $0x80] sm:$0xff] %vm303_vm3, %v6802_v17  ;;  %v6805_v54 = vadd.f32 %v14524_v56, %v6783_v40  ;;  %7152 = vst.msk [vmem:[#allocation3 + $0x68] sm:$0xff] %vm303_vm3, %v7130_v8  ;;  %v7129_v53 = vadd.f32 %v7107_v1, %v18134_v11  ;;  %v18309_v16 = vpop.f32.mrf.mxu0  ;;  %v7427_v40 = vld [vmem:[#allocation3 + $0x8] sm:$0xff] }
 0x549   : > { %v6745_v58 = vpop.f32.mrf.mxu1  ;;  %v7110_v50 = vld [vmem:[#allocation3 + $0x78] sm:$0xff] }
 0x54a   : > { %6827 = vst.msk [vmem:[#allocation3 + $0x98] sm:$0xff] %vm303_vm3, %v6805_v54  ;;  %v6804_v37 = vadd.f32 %v6782_v45, %v6745_v58  ;;  %7151 = vst.msk [vmem:[#allocation3 + $0x60] sm:$0xff] %vm303_vm3, %v7129_v53  ;;  %v7132_v49 = vadd.f32 %v18138_v25, %v7110_v50  ;;  %v7426_v58 = vld [vmem:[#allocation3] sm:$0xff] }
 0x54b   : > { %v14527_v62 = vpop.f32.mrf.mxu1  ;;  %v7109_v31 = vld [vmem:[#allocation3 + $0x70] sm:$0xff] }
 0x54c   : > { %6826 = vst.msk [vmem:[#allocation3 + $0x90] sm:$0xff] %vm303_vm3, %v6804_v37  ;;  %v6807_v23 = vadd.f32 %v14527_v62, %v6785_v47  ;;  %7154 = vst.msk [vmem:[#allocation3 + $0x78] sm:$0xff] %vm303_vm3, %v7132_v49  ;;  %v7131_v11 = vadd.f32 %v7109_v31, %v18142_v4  ;;  %v18317_v37 = vpop.f32.mrf.mxu0  ;;  %v7429_v62 = vld [vmem:[#allocation3 + $0x18] sm:$0xff] }
 0x54d   : > { %v6755_v26 = vpop.f32.mrf.mxu1  ;;  %v7112_v17 = vld [vmem:[#allocation3 + $0x88] sm:$0xff] }
 0x54e   : > { %6829 = vst.msk [vmem:[#allocation3 + $0xa8] sm:$0xff] %vm303_vm3, %v6807_v23  ;;  %v6806_v8 = vadd.f32 %v6784_v52, %v6755_v26  ;;  %7153 = vst.msk [vmem:[#allocation3 + $0x70] sm:$0xff] %vm303_vm3, %v7131_v11  ;;  %v7134_v25 = vadd.f32 %v18145_v13, %v7112_v17  ;;  %v7428_v11 = vld [vmem:[#allocation3 + $0x10] sm:$0xff]  ;;  %v18325_v17 = vpop.f32.mrf.mxu0 }
 0x54f   : > { %v14571_v56 = vpop.f32.mrf.mxu1  ;;  %v7111_v1 = vld [vmem:[#allocation3 + $0x80] sm:$0xff] }
 0x550   : > { %6828 = vst.msk [vmem:[#allocation3 + $0xa0] sm:$0xff] %vm303_vm3, %v6806_v8  ;;  %v7449_v54 = vadd.f32 %v14571_v56, %v7427_v40  ;;  %7156 = vst.msk [vmem:[#allocation3 + $0x88] sm:$0xff] %vm303_vm3, %v7134_v25  ;;  %v7133_v4 = vadd.f32 %v7111_v1, %v18149_v51  ;;  %v7431_v25 = vld [vmem:[#allocation3 + $0x28] sm:$0xff] }
 0x551   : > { %v7317_v53 = vpop.f32.mrf.mxu1  ;;  %v7114_v45 = vld [vmem:[#allocation3 + $0x98] sm:$0xff] }
 0x552   : > { %7471 = vst.msk [vmem:[#allocation3 + $0x8] sm:$0xff] %vm303_vm3, %v7449_v54  ;;  %v7448_v50 = vadd.f32 %v7426_v58, %v7317_v53  ;;  %7155 = vst.msk [vmem:[#allocation3 + $0x80] sm:$0xff] %vm303_vm3, %v7133_v4  ;;  %v7136_v13 = vadd.f32 %v18156_v36, %v7114_v45  ;;  %v7430_v54 = vld [vmem:[#allocation3 + $0x20] sm:$0xff]  ;;  %v18333_v58 = vpop.f32.mrf.mxu0 }
 0x553   : > { %v14574_v49 = vpop.f32.mrf.mxu1  ;;  %v7113_v47 = vld [vmem:[#allocation3 + $0x90] sm:$0xff] }
 0x554   : > { %7470 = vst.msk [vmem:[#allocation3] sm:$0xff] %vm303_vm3, %v7448_v50  ;;  %v7451_v31 = vadd.f32 %v14574_v49, %v7429_v62  ;;  %7158 = vst.msk [vmem:[#allocation3 + $0x98] sm:$0xff] %vm303_vm3, %v7136_v13  ;;  %v7135_v51 = vadd.f32 %v7113_v47, %v18160_v30  ;;  %v7433_v50 = vld [vmem:[#allocation3 + $0x38] sm:$0xff]  ;;  %v7432_v47 = vld [vmem:[#allocation3 + $0x30] sm:$0xff] }
 0x555   : > { %v7327_v23 = vpop.f32.mrf.mxu1  ;;  %v7116_v26 = vld [vmem:[#allocation3 + $0xa8] sm:$0xff] }
 0x556   : > { %7473 = vst.msk [vmem:[#allocation3 + $0x18] sm:$0xff] %vm303_vm3, %v7451_v31  ;;  %v7450_v52 = vadd.f32 %v7428_v11, %v7327_v23  ;;  %7157 = vst.msk [vmem:[#allocation3 + $0x90] sm:$0xff] %vm303_vm3, %v7135_v51  ;;  %v7138_v36 = vadd.f32 %v18164_v61, %v7116_v26  ;;  %v18341_v23 = vpop.f32.mrf.mxu0  ;;  %v7435_v26 = vld [vmem:[#allocation3 + $0x48] sm:$0xff] }
 0x557   : > { %v14577_v8 = vpop.f32.mrf.mxu1  ;;  %v7115_v56 = vld [vmem:[#allocation3 + $0xa0] sm:$0xff] }
 0x558   : > { %7472 = vst.msk [vmem:[#allocation3 + $0x10] sm:$0xff] %vm303_vm3, %v7450_v52  ;;  %v7453_v40 = vadd.f32 %v14577_v8, %v7431_v25  ;;  %7160 = vst.msk [vmem:[#allocation3 + $0xa8] sm:$0xff] %vm303_vm3, %v7138_v36  ;;  %v7137_v30 = vadd.f32 %v7115_v56, %v18168_v29  ;;  %v7434_v25 = vld [vmem:[#allocation3 + $0x40] sm:$0xff] }
 0x559   : > { %v7337_v1 = vpop.f32.mrf.mxu1  ;;  %v7758_v4 = vld [vmem:[#allocation3 + $0x8] sm:$0xff] }
 0x55a   : > { %7475 = vst.msk [vmem:[#allocation3 + $0x28] sm:$0xff] %vm303_vm3, %v7453_v40  ;;  %v7452_v53 = vadd.f32 %v7430_v54, %v7337_v1  ;;  %7159 = vst.msk [vmem:[#allocation3 + $0xa0] sm:$0xff] %vm303_vm3, %v7137_v30  ;;  %v7780_v61 = vadd.f32 %v18172_v59, %v7758_v4  ;;  %v18349_v30 = vpop.f32.mrf.mxu0  ;;  %v7437_v54 = vld [vmem:[#allocation3 + $0x58] sm:$0xff] }
 0x55b   : > { %v14580_v45 = vpop.f32.mrf.mxu1  ;;  %v7757_v13 = vld [vmem:[#allocation3] sm:$0xff] }
 0x55c   : > { %7474 = vst.msk [vmem:[#allocation3 + $0x20] sm:$0xff] %vm303_vm3, %v7452_v53  ;;  %v7455_v49 = vadd.f32 %v14580_v45, %v7433_v50  ;;  %7802 = vst.msk [vmem:[#allocation3 + $0x8] sm:$0xff] %vm303_vm3, %v7780_v61  ;;  %v7779_v29 = vadd.f32 %v7757_v13, %v18176_v63  ;;  %v7436_v45 = vld [vmem:[#allocation3 + $0x50] sm:$0xff] }
 0x55d   : > { %v7347_v62 = vpop.f32.mrf.mxu1  ;;  %v7760_v31 = vld [vmem:[#allocation3 + $0x18] sm:$0xff] }
 0x55e   : > { %7477 = vst.msk [vmem:[#allocation3 + $0x38] sm:$0xff] %vm303_vm3, %v7455_v49  ;;  %v7454_v51 = vadd.f32 %v7432_v47, %v7347_v62  ;;  %7801 = vst.msk [vmem:[#allocation3] sm:$0xff] %vm303_vm3, %v7779_v29  ;;  %v7782_v59 = vadd.f32 %v18180_v9, %v7760_v31  ;;  %v18357_v49 = vpop.f32.mrf.mxu0  ;;  %v7439_v62 = vld [vmem:[#allocation3 + $0x68] sm:$0xff] }
 0x55f   : > { %v14583_v11 = vpop.f32.mrf.mxu1  ;;  %v7759_v52 = vld [vmem:[#allocation3 + $0x10] sm:$0xff] }
 0x560   : > { %7476 = vst.msk [vmem:[#allocation3 + $0x30] sm:$0xff] %vm303_vm3, %v7454_v51  ;;  %v7457_v36 = vadd.f32 %v14583_v11, %v7435_v26  ;;  %7804 = vst.msk [vmem:[#allocation3 + $0x18] sm:$0xff] %vm303_vm3, %v7782_v59  ;;  %v7781_v63 = vadd.f32 %v7759_v52, %v18184_v28  ;;  %v7438_v59 = vld [vmem:[#allocation3 + $0x60] sm:$0xff] }
 0x561   : > { %v7357_v8 = vpop.f32.mrf.mxu1  ;;  %v7762_v56 = vld [vmem:[#allocation3 + $0x28] sm:$0xff]  ;;  %v18365_v26 = vld [vmem:[%s19195_s3 + $0x58] sm:$0xff] }
 0x562   : > { %7479 = vst.msk [vmem:[#allocation3 + $0x48] sm:$0xff] %vm303_vm3, %v7457_v36  ;;  %v7456_v40 = vadd.f32 %v7434_v25, %v7357_v8  ;;  %7803 = vst.msk [vmem:[#allocation3 + $0x10] sm:$0xff] %vm303_vm3, %v7781_v63  ;;  %v7784_v9 = vadd.f32 %v18188_v41, %v7762_v56  ;;  %14898 = vmatprep.subr.mxu0 %v18365_v26  ;;  %v18371_v36 = vpop.f32.mrf.mxu0  ;;  %v7441_v63 = vld [vmem:[#allocation3 + $0x78] sm:$0xff] }
 0x563   : > { %v14586_v1 = vpop.f32.mrf.mxu1  ;;  %v7761_v4 = vld [vmem:[#allocation3 + $0x20] sm:$0xff] }
 0x564   : > { %7478 = vst.msk [vmem:[#allocation3 + $0x40] sm:$0xff] %vm303_vm3, %v7456_v40  ;;  %v7459_v53 = vadd.f32 %v14586_v1, %v7437_v54  ;;  %7806 = vst.msk [vmem:[#allocation3 + $0x28] sm:$0xff] %vm303_vm3, %v7784_v9  ;;  %v7783_v28 = vadd.f32 %v7761_v4, %v18192_v15  ;;  %v7440_v9 = vld [vmem:[#allocation3 + $0x70] sm:$0xff]  ;;  %v18379_v4 = vpop.f32.mrf.mxu0 }
 0x565   : > { %v7367_v61 = vpop.f32.mrf.mxu1  ;;  %v7764_v50 = vld [vmem:[#allocation3 + $0x38] sm:$0xff] }
 0x566   : > { %7481 = vst.msk [vmem:[#allocation3 + $0x58] sm:$0xff] %vm303_vm3, %v7459_v53  ;;  %v7458_v13 = vadd.f32 %v7436_v45, %v7367_v61  ;;  %7805 = vst.msk [vmem:[#allocation3 + $0x20] sm:$0xff] %vm303_vm3, %v7783_v28  ;;  %v7786_v41 = vadd.f32 %v18199_v44, %v7764_v50  ;;  %v7443_v28 = vld [vmem:[#allocation3 + $0x88] sm:$0xff] }
 0x567   : > { %v14589_v29 = vpop.f32.mrf.mxu1  ;;  %v7763_v47 = vld [vmem:[#allocation3 + $0x30] sm:$0xff] }
 0x568   : > { %7480 = vst.msk [vmem:[#allocation3 + $0x50] sm:$0xff] %vm303_vm3, %v7458_v13  ;;  %v7461_v31 = vadd.f32 %v14589_v29, %v7439_v62  ;;  %7808 = vst.msk [vmem:[#allocation3 + $0x38] sm:$0xff] %vm303_vm3, %v7786_v41  ;;  %v7785_v15 = vadd.f32 %v7763_v47, %v18206_v12  ;;  %v7442_v13 = vld [vmem:[#allocation3 + $0x80] sm:$0xff]  ;;  %v18387_v62 = vpop.f32.mrf.mxu0 }
 0x569   : > { %v7377_v51 = vpop.f32.mrf.mxu1  ;;  %v7766_v11 = vld [vmem:[#allocation3 + $0x48] sm:$0xff] }
 0x56a   : > { %7483 = vst.msk [vmem:[#allocation3 + $0x68] sm:$0xff] %vm303_vm3, %v7461_v31  ;;  %v7460_v44 = vadd.f32 %v7438_v59, %v7377_v51  ;;  %7807 = vst.msk [vmem:[#allocation3 + $0x30] sm:$0xff] %vm303_vm3, %v7785_v15  ;;  %v7788_v52 = vadd.f32 %v18216_v10, %v7766_v11  ;;  %v7445_v31 = vld [vmem:[#allocation3 + $0x98] sm:$0xff]  ;;  %v7444_v11 = vld [vmem:[#allocation3 + $0x90] sm:$0xff] }
 0x56b   : > { %v14592_v12 = vpop.f32.mrf.mxu1  ;;  %v7765_v8 = vld [vmem:[#allocation3 + $0x40] sm:$0xff] }
 0x56c   : > { %7482 = vst.msk [vmem:[#allocation3 + $0x60] sm:$0xff] %vm303_vm3, %v7460_v44  ;;  %v7463_v25 = vadd.f32 %v14592_v12, %v7441_v63  ;;  %7810 = vst.msk [vmem:[#allocation3 + $0x48] sm:$0xff] %vm303_vm3, %v7788_v52  ;;  %v7787_v56 = vadd.f32 %v7765_v8, %v18221_v60  ;;  %v18395_v12 = vpop.f32.mrf.mxu0  ;;  %v7447_v8 = vld [vmem:[#allocation3 + $0xa8] sm:$0xff] }
 0x56d   : > { %v7387_v40 = vpop.f32.mrf.mxu1  ;;  %v7768_v1 = vld [vmem:[#allocation3 + $0x58] sm:$0xff] }
 0x56e   : > { %7485 = vst.msk [vmem:[#allocation3 + $0x78] sm:$0xff] %vm303_vm3, %v7463_v25  ;;  %v7462_v10 = vadd.f32 %v7440_v9, %v7387_v40  ;;  %7809 = vst.msk [vmem:[#allocation3 + $0x40] sm:$0xff] %vm303_vm3, %v7787_v56  ;;  %v7790_v54 = vadd.f32 %v18225_v32, %v7768_v1  ;;  %v7446_v9 = vld [vmem:[#allocation3 + $0xa0] sm:$0xff] }
 0x56f   : > { %v14595_v53 = vpop.f32.mrf.mxu1  ;;  %v7767_v61 = vld [vmem:[#allocation3 + $0x50] sm:$0xff] }
 0x570   : > { %7484 = vst.msk [vmem:[#allocation3 + $0x70] sm:$0xff] %vm303_vm3, %v7462_v10  ;;  %v7465_v45 = vadd.f32 %v14595_v53, %v7443_v28  ;;  %7812 = vst.msk [vmem:[#allocation3 + $0x58] sm:$0xff] %vm303_vm3, %v7790_v54  ;;  %v7789_v60 = vadd.f32 %v7767_v61, %v18230_v14  ;;  %v18403_v54 = vpop.f32.mrf.mxu0  ;;  %v8089_v28 = vld [vmem:[#allocation3 + $0x8] sm:$0xff] }
 0x571   : > { %v7397_v50 = vpop.f32.mrf.mxu1  ;;  %v7770_v41 = vld [vmem:[#allocation3 + $0x68] sm:$0xff] }
 0x572   : > { %7487 = vst.msk [vmem:[#allocation3 + $0x88] sm:$0xff] %vm303_vm3, %v7465_v45  ;;  %v7464_v29 = vadd.f32 %v7442_v13, %v7397_v50  ;;  %7811 = vst.msk [vmem:[#allocation3 + $0x50] sm:$0xff] %vm303_vm3, %v7789_v60  ;;  %v7792_v32 = vadd.f32 %v18241_v6, %v7770_v41  ;;  %v8088_v50 = vld [vmem:[#allocation3] sm:$0xff] }
 0x573   : > { %v14598_v47 = vpop.f32.mrf.mxu1  ;;  %v7769_v15 = vld [vmem:[#allocation3 + $0x60] sm:$0xff] }
 0x574   : > { %7486 = vst.msk [vmem:[#allocation3 + $0x80] sm:$0xff] %vm303_vm3, %v7464_v29  ;;  %v7467_v51 = vadd.f32 %v14598_v47, %v7445_v31  ;;  %7814 = vst.msk [vmem:[#allocation3 + $0x68] sm:$0xff] %vm303_vm3, %v7792_v32  ;;  %v7791_v14 = vadd.f32 %v7769_v15, %v18249_v20  ;;  %v18411_v29 = vpop.f32.mrf.mxu0  ;;  %v8091_v47 = vld [vmem:[#allocation3 + $0x18] sm:$0xff] }
 0x575   : > { %v7407_v59 = vpop.f32.mrf.mxu1  ;;  %v7772_v44 = vld [vmem:[#allocation3 + $0x78] sm:$0xff] }
 0x576   : > { %7489 = vst.msk [vmem:[#allocation3 + $0x98] sm:$0xff] %vm303_vm3, %v7467_v51  ;;  %v7466_v52 = vadd.f32 %v7444_v11, %v7407_v59  ;;  %7813 = vst.msk [vmem:[#allocation3 + $0x60] sm:$0xff] %vm303_vm3, %v7791_v14  ;;  %v7794_v6 = vadd.f32 %v18260_v46, %v7772_v44  ;;  %v8090_v14 = vld [vmem:[#allocation3 + $0x10] sm:$0xff]  ;;  %v18419_v44 = vpop.f32.mrf.mxu0 }
 0x577   : > { %v14601_v63 = vpop.f32.mrf.mxu1  ;;  %v7771_v25 = vld [vmem:[#allocation3 + $0x70] sm:$0xff] }
 0x578   : > { %7488 = vst.msk [vmem:[#allocation3 + $0x90] sm:$0xff] %vm303_vm3, %v7466_v52  ;;  %v7469_v56 = vadd.f32 %v14601_v63, %v7447_v8  ;;  %7816 = vst.msk [vmem:[#allocation3 + $0x78] sm:$0xff] %vm303_vm3, %v7794_v6  ;;  %v7793_v20 = vadd.f32 %v7771_v25, %v18271_v7  ;;  %v8093_v6 = vld [vmem:[#allocation3 + $0x28] sm:$0xff] }
 0x579   : > { %v7417_v40 = vpop.f32.mrf.mxu1  ;;  %v7774_v1 = vld [vmem:[#allocation3 + $0x88] sm:$0xff] }
 0x57a   : > { %7491 = vst.msk [vmem:[#allocation3 + $0xa8] sm:$0xff] %vm303_vm3, %v7469_v56  ;;  %v7468_v10 = vadd.f32 %v7446_v9, %v7417_v40  ;;  %7815 = vst.msk [vmem:[#allocation3 + $0x70] sm:$0xff] %vm303_vm3, %v7793_v20  ;;  %v7796_v46 = vadd.f32 %v18279_v2, %v7774_v1  ;;  %v8092_v20 = vld [vmem:[#allocation3 + $0x20] sm:$0xff]  ;;  %v18427_v9 = vpop.f32.mrf.mxu0 }
 0x57b   : > { %v14645_v53 = vpop.f32.mrf.mxu1  ;;  %v7773_v61 = vld [vmem:[#allocation3 + $0x80] sm:$0xff] }
 0x57c   : > { %7490 = vst.msk [vmem:[#allocation3 + $0xa0] sm:$0xff] %vm303_vm3, %v7468_v10  ;;  %v8111_v45 = vadd.f32 %v14645_v53, %v8089_v28  ;;  %7818 = vst.msk [vmem:[#allocation3 + $0x88] sm:$0xff] %vm303_vm3, %v7796_v46  ;;  %v7795_v7 = vadd.f32 %v7773_v61, %v18293_v5  ;;  %v8095_v46 = vld [vmem:[#allocation3 + $0x38] sm:$0xff] }
 0x57d   : > { %v7979_v60 = vpop.f32.mrf.mxu1  ;;  %v7776_v13 = vld [vmem:[#allocation3 + $0x98] sm:$0xff] }
 0x57e   : > { %8133 = vst.msk [vmem:[#allocation3 + $0x8] sm:$0xff] %vm303_vm3, %v8111_v45  ;;  %v8110_v41 = vadd.f32 %v8088_v50, %v7979_v60  ;;  %7817 = vst.msk [vmem:[#allocation3 + $0x80] sm:$0xff] %vm303_vm3, %v7795_v7  ;;  %v7798_v2 = vadd.f32 %v18301_v39, %v7776_v13  ;;  %v18435_v60 = vpop.f32.mrf.mxu0 }
 0x57f   : > { %v14648_v32 = vpop.f32.mrf.mxu1  ;;  %v7775_v31 = vld [vmem:[#allocation3 + $0x90] sm:$0xff] }
 0x580   : > { %8132 = vst.msk [vmem:[#allocation3] sm:$0xff] %vm303_vm3, %v8110_v41  ;;  %v8113_v15 = vadd.f32 %v14648_v32, %v8091_v47  ;;  %7820 = vst.msk [vmem:[#allocation3 + $0x98] sm:$0xff] %vm303_vm3, %v7798_v2  ;;  %v7797_v5 = vadd.f32 %v7775_v31, %v18309_v16  ;;  %v8097_v41 = vld [vmem:[#allocation3 + $0x48] sm:$0xff]  ;;  %v8096_v31 = vld [vmem:[#allocation3 + $0x40] sm:$0xff] }
 0x581   : > { %v7989_v51 = vpop.f32.mrf.mxu1  ;;  %v7778_v59 = vld [vmem:[#allocation3 + $0xa8] sm:$0xff] }
 0x582   : > { %8135 = vst.msk [vmem:[#allocation3 + $0x18] sm:$0xff] %vm303_vm3, %v8113_v15  ;;  %v8112_v11 = vadd.f32 %v8090_v14, %v7989_v51  ;;  %7819 = vst.msk [vmem:[#allocation3 + $0x90] sm:$0xff] %vm303_vm3, %v7797_v5  ;;  %v7800_v39 = vadd.f32 %v18317_v37, %v7778_v59  ;;  %v18448_v51 = vpop.f32.mrf.mxu0 }
 0x583   : > { %v14651_v52 = vpop.f32.mrf.mxu1  ;;  %v7777_v63 = vld [vmem:[#allocation3 + $0xa0] sm:$0xff] }
 0x584   : > { %8134 = vst.msk [vmem:[#allocation3 + $0x10] sm:$0xff] %vm303_vm3, %v8112_v11  ;;  %v8115_v8 = vadd.f32 %v14651_v52, %v8093_v6  ;;  %7822 = vst.msk [vmem:[#allocation3 + $0xa8] sm:$0xff] %vm303_vm3, %v7800_v39  ;;  %v7799_v16 = vadd.f32 %v7777_v63, %v18325_v17  ;;  %v8099_v11 = vld [vmem:[#allocation3 + $0x58] sm:$0xff] }
 0x585   : > { %v8420_v25 = vld [vmem:[#allocation3 + $0x8] sm:$0xff]  ;;  %v7999_v56 = vpop.f32.mrf.mxu1 }
 0x586   : > { %v8442_v40 = vadd.f32 %v18333_v58, %v8420_v25  ;;  %8137 = vst.msk [vmem:[#allocation3 + $0x28] sm:$0xff] %vm303_vm3, %v8115_v8  ;;  %v8114_v37 = vadd.f32 %v8092_v20, %v7999_v56  ;;  %7821 = vst.msk [vmem:[#allocation3 + $0xa0] sm:$0xff] %vm303_vm3, %v7799_v16  ;;  %v8094_v58 = vld [vmem:[#allocation3 + $0x30] sm:$0xff] }
 0x587   : > { %v8419_v1 = vld [vmem:[#allocation3] sm:$0xff]  ;;  %v14654_v10 = vpop.f32.mrf.mxu1  ;;  %v8098_v8 = vld [vmem:[#allocation3 + $0x50] sm:$0xff] }
 0x588   : > { %8464 = vst.msk [vmem:[#allocation3 + $0x8] sm:$0xff] %vm303_vm3, %v8442_v40  ;;  %v8441_v53 = vadd.f32 %v8419_v1, %v18341_v23  ;;  %8136 = vst.msk [vmem:[#allocation3 + $0x20] sm:$0xff] %vm303_vm3, %v8114_v37  ;;  %v8117_v17 = vadd.f32 %v14654_v10, %v8095_v46  ;;  %v8101_v46 = vld [vmem:[#allocation3 + $0x68] sm:$0xff] }
 0x589   : > { %v8422_v28 = vld [vmem:[#allocation3 + $0x18] sm:$0xff]  ;;  %v8009_v61 = vpop.f32.mrf.mxu1 }
 0x58a   : > { %8463 = vst.msk [vmem:[#allocation3] sm:$0xff] %vm303_vm3, %v8441_v53  ;;  %v8444_v45 = vadd.f32 %v18349_v30, %v8422_v28  ;;  %8139 = vst.msk [vmem:[#allocation3 + $0x38] sm:$0xff] %vm303_vm3, %v8117_v17  ;;  %v8116_v7 = vadd.f32 %v8094_v58, %v8009_v61  ;;  %v18443_v30 = vld [vmem:[%s19196_s4 + $0x2] ss:$0 sm:$0xff] }
 0x58b   : > { %v8421_v50 = vld [vmem:[#allocation3 + $0x10] sm:$0xff]  ;;  %v14657_v13 = vpop.f32.mrf.mxu1 }
 0x58c   : > { %8466 = vst.msk [vmem:[#allocation3 + $0x18] sm:$0xff] %vm303_vm3, %v8444_v45  ;;  %v8443_v23 = vadd.f32 %v8421_v50, %v18357_v49  ;;  %8138 = vst.msk [vmem:[#allocation3 + $0x30] sm:$0xff] %vm303_vm3, %v8116_v7  ;;  %v8119_v2 = vadd.f32 %v14657_v13, %v8097_v41  ;;  %v8100_v45 = vld [vmem:[#allocation3 + $0x60] sm:$0xff] }
 0x58d   : > { %v8424_v32 = vld [vmem:[#allocation3 + $0x28] sm:$0xff]  ;;  %v8019_v47 = vpop.f32.mrf.mxu1 }
 0x58e   : > { %8465 = vst.msk [vmem:[#allocation3 + $0x10] sm:$0xff] %vm303_vm3, %v8443_v23  ;;  %v8446_v15 = vadd.f32 %v18371_v36, %v8424_v32  ;;  %8141 = vst.msk [vmem:[#allocation3 + $0x48] sm:$0xff] %vm303_vm3, %v8119_v2  ;;  %v8118_v5 = vadd.f32 %v8096_v31, %v8019_v47  ;;  %v8103_v31 = vld [vmem:[#allocation3 + $0x78] sm:$0xff] }
 0x58f   : > { %v8486_v49 = vld [vmem:[#allocation3 + $0x8] sm:$0xff]  ;;  %v8423_v14 = vld [vmem:[#allocation3 + $0x20] sm:$0xff]  ;;  %v14660_v59 = vpop.f32.mrf.mxu1 }
 0x590   : > { %8468 = vst.msk [vmem:[#allocation3 + $0x28] sm:$0xff] %vm303_vm3, %v8446_v15  ;;  %v8445_v39 = vadd.f32 %v8423_v14, %v18379_v4  ;;  %8140 = vst.msk [vmem:[#allocation3 + $0x40] sm:$0xff] %vm303_vm3, %v8118_v5  ;;  %v8121_v52 = vadd.f32 %v14660_v59, %v8099_v11  ;;  %v8512_v6 = vadd.f32 %v18443_v30, %v8486_v49  ;;  %v18458_v4 = vpop.f32.mrf.mxu0  ;;  %v8102_v11 = vld [vmem:[#allocation3 + $0x70] sm:$0xff] }
 0x591   : > { %v8426_v63 = vld [vmem:[#allocation3 + $0x38] sm:$0xff]  ;;  %v8029_v36 = vpop.f32.mrf.mxu1  ;;  %v8485_v16 = vld [vmem:[#allocation3] sm:$0xff] }
 0x592   : > { %8467 = vst.msk [vmem:[#allocation3 + $0x20] sm:$0xff] %vm303_vm3, %v8445_v39  ;;  %v8448_v25 = vadd.f32 %v18387_v62, %v8426_v63  ;;  %8143 = vst.msk [vmem:[#allocation3 + $0x58] sm:$0xff] %vm303_vm3, %v8121_v52  ;;  %v8120_v56 = vadd.f32 %v8098_v8, %v8029_v36  ;;  %v8511_v20 = vadd.f32 %v18443_v30, %v8485_v16  ;;  %v8534_v40 = vmax.f32 %v8512_v6, 0.0  ;;  %v18473_v23 = vpop.f32.mrf.mxu0 }
 0x593   : > { %v8488_v37 = vld [vmem:[#allocation3 + $0x18] sm:$0xff]  ;;  %v8425_v1 = vld [vmem:[#allocation3 + $0x30] sm:$0xff]  ;;  %v14663_v10 = vpop.f32.mrf.mxu1 }
 0x594   : > { %8470 = vst.msk [vmem:[#allocation3 + $0x38] sm:$0xff] %vm303_vm3, %v8448_v25  ;;  %v8447_v53 = vadd.f32 %v8425_v1, %v18395_v12  ;;  %8142 = vst.msk [vmem:[#allocation3 + $0x50] sm:$0xff] %vm303_vm3, %v8120_v56  ;;  %v8123_v17 = vadd.f32 %v14663_v10, %v8101_v46  ;;  %v8533_v62 = vmax.f32 %v8511_v20, 0.0  ;;  %v8556_v28 = vsel %vm5485_vm14, %v8534_v40, 0.0  ;;  %v18489_v8 = vpop.f32.mrf.mxu0  ;;  %v8105_v56 = vld [vmem:[#allocation3 + $0x88] sm:$0xff]  ;;  %v8104_v40 = vld [vmem:[#allocation3 + $0x80] sm:$0xff] }
 0x595   : > { %v8428_v61 = vld [vmem:[#allocation3 + $0x48] sm:$0xff]  ;;  %v8039_v58 = vpop.f32.mrf.mxu1  ;;  %8578 = vst.msk [vmem:[#allocation5 + $0x20] sm:$0xff] %vm303_vm3, %v8556_v28  ;;  %v8487_v7 = vld [vmem:[#allocation3 + $0x10] sm:$0xff]  ;;  %v8514_v50 = vadd.f32 %v18443_v30, %v8488_v37  ;;  %vm19217_vm14 = vcmp.eq.s32.totalorder %v17481_v33, 1 }
 0x596   : > { %8469 = vst.msk [vmem:[#allocation3 + $0x30] sm:$0xff] %vm303_vm3, %v8447_v53  ;;  %v8450_v13 = vadd.f32 %v18403_v54, %v8428_v61  ;;  %8145 = vst.msk [vmem:[#allocation3 + $0x68] sm:$0xff] %vm303_vm3, %v8123_v17  ;;  %v8122_v12 = vadd.f32 %v8100_v45, %v8039_v58  ;;  %v8555_v41 = vsel %vm5484_vm13, %v8533_v62, 0.0  ;;  %v8513_v21 = vadd.f32 %v18443_v30, %v8487_v7  ;;  %v8107_v53 = vld [vmem:[#allocation3 + $0x98] sm:$0xff]  ;;  %v18505_v35 = vpop.f32.mrf.mxu0 }
 0x597   : > { %v8490_v2 = vld [vmem:[#allocation3 + $0x28] sm:$0xff]  ;;  %v8427_v32 = vld [vmem:[#allocation3 + $0x40] sm:$0xff]  ;;  %v14666_v47 = vpop.f32.mrf.mxu1  ;;  %8577 = vst.msk [vmem:[#allocation5 + $0x18] sm:$0xff] %vm303_vm3, %v8555_v41  ;;  %v8536_v15 = vmax.f32 %v8514_v50, 0.0  ;;  %vm19216_vm13 = vcmp.eq.s32.totalorder %v17479_v38, 1 }
 0x598   : > { %8472 = vst.msk [vmem:[#allocation3 + $0x48] sm:$0xff] %vm303_vm3, %v8450_v13  ;;  %v8449_v54 = vadd.f32 %v8427_v32, %v18411_v29  ;;  %8144 = vst.msk [vmem:[#allocation3 + $0x60] sm:$0xff] %vm303_vm3, %v8122_v12  ;;  %v8125_v5 = vadd.f32 %v14666_v47, %v8103_v31  ;;  %v8535_v57 = vmax.f32 %v8513_v21, 0.0  ;;  %v8516_v49 = vadd.f32 %v18443_v30, %v8490_v2  ;;  %v8106_v32 = vld [vmem:[#allocation3 + $0x90] sm:$0xff]  ;;  %v14709_v22 = vpop.f32.mrf.mxu0 }
 0x599   : > { %v8430_v14 = vld [vmem:[#allocation3 + $0x58] sm:$0xff]  ;;  %v8049_v59 = vpop.f32.mrf.mxu1  ;;  %v8558_v39 = vsel %vm5487_vm0, %v8536_v15, 0.0  ;;  %v8489_v52 = vld [vmem:[#allocation3 + $0x20] sm:$0xff]  ;;  %vm19219_vm0 = vcmp.eq.s32.totalorder %v17488_v43, 1 }
 0x59a   : > { %8471 = vst.msk [vmem:[#allocation3 + $0x40] sm:$0xff] %vm303_vm3, %v8449_v54  ;;  %v8452_v6 = vadd.f32 %v18419_v44, %v8430_v14  ;;  %8147 = vst.msk [vmem:[#allocation3 + $0x78] sm:$0xff] %vm303_vm3, %v8125_v5  ;;  %v8124_v29 = vadd.f32 %v8102_v11, %v8049_v59  ;;  %v8557_v63 = vsel %vm5486_vm15, %v8535_v57, 0.0  ;;  %v8515_v36 = vadd.f32 %v18443_v30, %v8489_v52  ;;  %v8109_v5 = vld [vmem:[#allocation3 + $0xa8] sm:$0xff]  ;;  %v8400_v27 = vpop.f32.mrf.mxu0 }
 0x59b   : > { %8580 = vst.msk [vmem:[#allocation5 + $0x30] sm:$0xff] %vm303_vm3, %v8558_v39  ;;  %v8492_v16 = vld [vmem:[#allocation3 + $0x38] sm:$0xff]  ;;  %v8429_v0 = vld [vmem:[#allocation3 + $0x50] sm:$0xff]  ;;  %v14669_v25 = vpop.f32.mrf.mxu1  ;;  %8579 = vst.msk [vmem:[#allocation5 + $0x28] sm:$0xff] %vm303_vm3, %v8557_v63  ;;  %v8538_v20 = vmax.f32 %v8516_v49, 0.0  ;;  %vm19218_vm15 = vcmp.eq.s32.totalorder %v17486_v48, 1 }
 0x59c   : > { %8474 = vst.msk [vmem:[#allocation3 + $0x58] sm:$0xff] %vm303_vm3, %v8452_v6  ;;  %v8451_v44 = vadd.f32 %v8429_v0, %v18427_v9  ;;  %8146 = vst.msk [vmem:[#allocation3 + $0x70] sm:$0xff] %vm303_vm3, %v8124_v29  ;;  %v8127_v18 = vadd.f32 %v14669_v25, %v8105_v56  ;;  %v8537_v37 = vmax.f32 %v8515_v36, 0.0  ;;  %v8518_v1 = vadd.f32 %v18443_v30, %v8492_v16 }
 0x59d   : > { %v8432_v10 = vld [vmem:[#allocation3 + $0x68] sm:$0xff]  ;;  %v8059_v46 = vpop.f32.mrf.mxu1  ;;  %v8560_v17 = vsel %vm5489_vm5, %v8538_v20, 0.0  ;;  %v8491_v62 = vld [vmem:[#allocation3 + $0x30] sm:$0xff] }
 0x59e   : > { %8473 = vst.msk [vmem:[#allocation3 + $0x50] sm:$0xff] %vm303_vm3, %v8451_v44  ;;  %v8454_v28 = vadd.f32 %v18435_v60, %v8432_v10  ;;  %8149 = vst.msk [vmem:[#allocation3 + $0x88] sm:$0xff] %vm303_vm3, %v8127_v18  ;;  %v8126_v9 = vadd.f32 %v8104_v40, %v8059_v46  ;;  %v8601_v61 = vld [vmem:[#allocation5 + $0x15] sm:$0xff]  ;;  %v8602_v45 = vld [vmem:[#allocation5 + $0x1d] sm:$0xff]  ;;  %v8559_v7 = vsel %vm5488_vm4, %v8537_v37, 0.0  ;;  %v8517_v50 = vadd.f32 %v18443_v30, %v8491_v62 }
 0x59f   : > { %v8888_v58 = vld [vmem:[#allocation5 + $0x16] sm:$0xff]  ;;  %8582 = vst.msk [vmem:[#allocation5 + $0x40] sm:$0xff] %vm303_vm3, %v8560_v17  ;;  %v14672_v41 = vpop.f32.mrf.mxu1  ;;  %14720 = vmatprep.mubr.msk.f32.mxu1 %vm303_vm3, %v8601_v61  ;;  %v8889_v60 = vld [vmem:[#allocation5 + $0x1e] sm:$0xff]  ;;  %8581 = vst.msk [vmem:[#allocation5 + $0x38] sm:$0xff] %vm303_vm3, %v8559_v7  ;;  %v8540_v21 = vmax.f32 %v8518_v1, 0.0 }
 0x5a0   : > { %v8494_v13 = vld [vmem:[#allocation3 + $0x48] sm:$0xff]  ;;  %v8431_v12 = vld [vmem:[#allocation3 + $0x60] sm:$0xff]  ;;  %14757 = vmatprep.mubr.msk.f32.mxu0 %vm303_vm3, %v8888_v58  ;;  %8476 = vst.msk [vmem:[#allocation3 + $0x68] sm:$0xff] %vm303_vm3, %v8454_v28  ;;  %8148 = vst.msk [vmem:[#allocation3 + $0x80] sm:$0xff] %vm303_vm3, %v8126_v9  ;;  %v8129_v2 = vadd.f32 %v14672_v41, %v8107_v53  ;;  %14721 = vmatmul.mubr.msk.f32.gmra.mxu1 %vm303_vm3, %v8602_v45  ;;  %v8539_v47 = vmax.f32 %v8517_v50, 0.0  ;;  %v14712_v50 = vpop.f32.mrf.mxu0 }
 0x5a1   : > { %v8453_v3 = vadd.f32 %v8431_v12, %v18448_v51  ;;  %14758 = vmatmul.mubr.msk.f32.gmra.mxu0 %vm303_vm3, %v8889_v60  ;;  %v8520_v31 = vadd.f32 %v18443_v30, %v8494_v13  ;;  %v8434_v15 = vld [vmem:[#allocation3 + $0x78] sm:$0xff]  ;;  %v8069_v54 = vpop.f32.mrf.mxu1  ;;  %v8562_v57 = vsel %vm5491_vm7, %v8540_v21, 0.0  ;;  %v8493_v49 = vld [vmem:[#allocation3 + $0x40] sm:$0xff] }
 0x5a2   : > { %v8456_v51 = vadd.f32 %v18458_v4, %v8434_v15  ;;  %8151 = vst.msk [vmem:[#allocation3 + $0x98] sm:$0xff] %vm303_vm3, %v8129_v2  ;;  %v8128_v14 = vadd.f32 %v8106_v32, %v8069_v54  ;;  %v8603_v59 = vld [vmem:[#allocation5 + $0x25] sm:$0xff]  ;;  %v8604_v39 = vld [vmem:[#allocation5 + $0x2d] sm:$0xff]  ;;  %v8561_v52 = vsel %vm5490_vm6, %v8539_v47, 0.0  ;;  %8584 = vst.msk [vmem:[#allocation5 + $0x50] sm:$0xff] %vm303_vm3, %v8562_v57  ;;  %v8519_v6 = vadd.f32 %v18443_v30, %v8493_v49  ;;  %v8410_v49 = vpop.f32.mrf.mxu0 }
 0x5a3   : > { %8475 = vst.msk [vmem:[#allocation3 + $0x60] sm:$0xff] %vm303_vm3, %v8453_v3  ;;  %v8890_v11 = vld [vmem:[#allocation5 + $0x26] sm:$0xff]  ;;  %v14675_v36 = vpop.f32.mrf.mxu1  ;;  %14723 = vmatprep.mubr.msk.f32.mxu1 %vm303_vm3, %v8603_v59  ;;  %v8891_v4 = vld [vmem:[#allocation5 + $0x2e] sm:$0xff]  ;;  %8583 = vst.msk [vmem:[#allocation5 + $0x48] sm:$0xff] %vm303_vm3, %v8561_v52  ;;  %v8542_v16 = vmax.f32 %v8520_v31, 0.0 }
 0x5a4   : > { %v8496_v29 = vld [vmem:[#allocation3 + $0x58] sm:$0xff]  ;;  %v8433_v63 = vld [vmem:[#allocation3 + $0x70] sm:$0xff]  ;;  %14760 = vmatprep.mubr.msk.f32.mxu0 %vm303_vm3, %v8890_v11  ;;  %8478 = vst.msk [vmem:[#allocation3 + $0x78] sm:$0xff] %vm303_vm3, %v8456_v51  ;;  %8150 = vst.msk [vmem:[#allocation3 + $0x90] sm:$0xff] %vm303_vm3, %v8128_v14  ;;  %v8131_v0 = vadd.f32 %v14675_v36, %v8109_v5  ;;  %14724 = vmatmul.mubr.msk.f32.gmra.mxu1 %vm303_vm3, %v8604_v39  ;;  %v8541_v25 = vmax.f32 %v8519_v6, 0.0 }
 0x5a5   : > { %v8455_v24 = vadd.f32 %v8433_v63, %v18473_v23  ;;  %14761 = vmatmul.mubr.msk.f32.gmra.mxu0 %vm303_vm3, %v8891_v4  ;;  %v8522_v56 = vadd.f32 %v18443_v30, %v8496_v29  ;;  %v8436_v20 = vld [vmem:[#allocation3 + $0x88] sm:$0xff]  ;;  %v8079_v44 = vpop.f32.mrf.mxu1  ;;  %v8108_v18 = vld [vmem:[#allocation3 + $0xa0] sm:$0xff]  ;;  %v8564_v40 = vsel %vm5493_vm9, %v8542_v16, 0.0  ;;  %v8495_v37 = vld [vmem:[#allocation3 + $0x50] sm:$0xff] }
 0x5a6   : > { %v8458_v23 = vadd.f32 %v18489_v8, %v8436_v20  ;;  %8153 = vst.msk [vmem:[#allocation3 + $0xa8] sm:$0xff] %vm303_vm3, %v8131_v0  ;;  %v8130_v1 = vadd.f32 %v8108_v18, %v8079_v44  ;;  %v8605_v10 = vld [vmem:[#allocation5 + $0x35] sm:$0xff]  ;;  %v8606_v53 = vld [vmem:[#allocation5 + $0x3d] sm:$0xff]  ;;  %v8563_v17 = vsel %vm5492_vm8, %v8541_v25, 0.0  ;;  %8586 = vst.msk [vmem:[#allocation5 + $0x60] sm:$0xff] %vm303_vm3, %v8564_v40  ;;  %v8521_v62 = vadd.f32 %v18443_v30, %v8495_v37 }
 0x5a7   : > { %8477 = vst.msk [vmem:[#allocation3 + $0x70] sm:$0xff] %vm303_vm3, %v8455_v24  ;;  %v8892_v46 = vld [vmem:[#allocation5 + $0x36] sm:$0xff]  ;;  %14726 = vmatprep.mubr.msk.f32.mxu1 %vm303_vm3, %v8605_v10  ;;  %v8893_v8 = vld [vmem:[#allocation5 + $0x3e] sm:$0xff]  ;;  %8585 = vst.msk [vmem:[#allocation5 + $0x58] sm:$0xff] %vm303_vm3, %v8563_v17  ;;  %v8544_v61 = vmax.f32 %v8522_v56, 0.0 }
 0x5a8   : > { %v8498_v28 = vld [vmem:[#allocation3 + $0x68] sm:$0xff]  ;;  %v8435_v9 = vld [vmem:[#allocation3 + $0x80] sm:$0xff]  ;;  %14763 = vmatprep.mubr.msk.f32.mxu0 %vm303_vm3, %v8892_v46  ;;  %8480 = vst.msk [vmem:[#allocation3 + $0x88] sm:$0xff] %vm303_vm3, %v8458_v23  ;;  %8152 = vst.msk [vmem:[#allocation3 + $0xa0] sm:$0xff] %vm303_vm3, %v8130_v1  ;;  %14727 = vmatmul.mubr.msk.f32.gmra.mxu1 %vm303_vm3, %v8606_v53  ;;  %v8543_v58 = vmax.f32 %v8521_v62, 0.0 }
 0x5a9   : > { %v8457_v34 = vadd.f32 %v8435_v9, %v18505_v35  ;;  %14764 = vmatmul.mubr.msk.f32.gmra.mxu0 %vm303_vm3, %v8893_v8  ;;  %v8524_v45 = vadd.f32 %v18443_v30, %v8498_v28  ;;  %v8438_v7 = vld [vmem:[#allocation3 + $0x98] sm:$0xff]  ;;  %v8566_v13 = vsel %vm5495_vm11, %v8544_v61, 0.0  ;;  %v19220_v17 = vld [vmem:[#allocation6_spill] sm:$0xff] }
 0x5aa   : > { %v8497_v12 = vld [vmem:[#allocation3 + $0x60] sm:$0xff]  ;;  %v8460_v41 = vadd.f32 %v14709_v22, %v8438_v7  ;;  %v8607_v60 = vld [vmem:[#allocation5 + $0x45] sm:$0xff]  ;;  %v8565_v3 = vsel %vm5494_vm10, %v8543_v58, 0.0  ;;  %8588 = vst.msk [vmem:[#allocation5 + $0x70] sm:$0xff] %vm303_vm3, %v8566_v13  ;;  %vm19221_vm4 = vcmp.eq.s32.totalorder %v19220_v17, 1 }
 0x5ab   : > { %8479 = vst.msk [vmem:[#allocation3 + $0x80] sm:$0xff] %vm303_vm3, %v8457_v34  ;;  %v8894_v35 = vld [vmem:[#allocation5 + $0x46] sm:$0xff]  ;;  %v8523_v2 = vadd.f32 %v18443_v30, %v8497_v12  ;;  %v8546_v32 = vmax.f32 %v8524_v45, 0.0  ;;  %14729 = vmatprep.mubr.msk.f32.mxu1 %vm303_vm3, %v8607_v60  ;;  %v8895_v55 = vld [vmem:[#allocation5 + $0x4e] sm:$0xff]  ;;  %8587 = vst.msk [vmem:[#allocation5 + $0x68] sm:$0xff] %vm303_vm3, %v8565_v3 }
 0x5ac   : > { %v8608_v21 = vld [vmem:[#allocation5 + $0x4d] sm:$0xff]  ;;  %v8437_v31 = vld [vmem:[#allocation3 + $0x90] sm:$0xff]  ;;  %14766 = vmatprep.mubr.msk.f32.mxu0 %vm303_vm3, %v8894_v35  ;;  %8482 = vst.msk [vmem:[#allocation3 + $0x98] sm:$0xff] %vm303_vm3, %v8460_v41  ;;  %v9883_v60 = vld [vmem:[#allocation5 + $0x38] sm:$0xff] }
 0x5ad   : > { %v8500_v47 = vld [vmem:[#allocation3 + $0x78] sm:$0xff]  ;;  %v8459_v15 = vadd.f32 %v8437_v31, %v8400_v27  ;;  %14730 = vmatmul.mubr.msk.f32.gmra.mxu1 %vm303_vm3, %v8608_v21  ;;  %14767 = vmatmul.mubr.msk.f32.gmra.mxu0 %vm303_vm3, %v8895_v55  ;;  %v8545_v42 = vmax.f32 %v8523_v2, 0.0  ;;  %v8568_v54 = vsel %vm19216_vm13, %v8546_v32, 0.0  ;;  %v8440_v57 = vld [vmem:[#allocation3 + $0xa8] sm:$0xff]  ;;  %v19226_v55 = vld [vmem:[#allocation10_spill] sm:$0xff] }
 0x5ae   : > { %v8526_v5 = vadd.f32 %v18443_v30, %v8500_v47  ;;  %8590 = vst.msk [vmem:[#allocation5 + $0x80] sm:$0xff] %vm303_vm3, %v8568_v54  ;;  %v8499_v51 = vld [vmem:[#allocation3 + $0x70] sm:$0xff]  ;;  %v8462_v14 = vadd.f32 %v14712_v50, %v8440_v57  ;;  %v8609_v59 = vld [vmem:[#allocation5 + $0x55] sm:$0xff] }
 0x5af   : > { %8481 = vst.msk [vmem:[#allocation3 + $0x90] sm:$0xff] %vm303_vm3, %v8459_v15  ;;  %v8896_v11 = vld [vmem:[#allocation5 + $0x56] sm:$0xff]  ;;  %v8567_v52 = vsel %vm19217_vm14, %v8545_v42, 0.0  ;;  %v8525_v6 = vadd.f32 %v18443_v30, %v8499_v51  ;;  %14732 = vmatprep.mubr.msk.f32.mxu1 %vm303_vm3, %v8609_v59  ;;  %v8897_v63 = vld [vmem:[#allocation5 + $0x5e] sm:$0xff]  ;;  %v9217_v54 = vld [vmem:[#allocation5 + $0x7] sm:$0xff] }
 0x5b0   : > { %v8610_v39 = vld [vmem:[#allocation5 + $0x5d] sm:$0xff]  ;;  %v8548_v38 = vmax.f32 %v8526_v5, 0.0  ;;  %v8439_v29 = vld [vmem:[#allocation3 + $0xa0] sm:$0xff]  ;;  %14769 = vmatprep.mubr.msk.f32.mxu0 %vm303_vm3, %v8896_v11  ;;  %8589 = vst.msk [vmem:[#allocation5 + $0x78] sm:$0xff] %vm303_vm3, %v8567_v52  ;;  %8484 = vst.msk [vmem:[#allocation3 + $0xa8] sm:$0xff] %vm303_vm3, %v8462_v14 }
 0x5b1   : > { %v8502_v22 = vld [vmem:[#allocation3 + $0x88] sm:$0xff]  ;;  %v8461_v36 = vadd.f32 %v8439_v29, %v8410_v49  ;;  %14733 = vmatmul.mubr.msk.f32.gmra.mxu1 %vm303_vm3, %v8610_v39  ;;  %14770 = vmatmul.mubr.msk.f32.gmra.mxu0 %vm303_vm3, %v8897_v63  ;;  %v8547_v33 = vmax.f32 %v8525_v6, 0.0  ;;  %v9218_v59 = vld [vmem:[#allocation5 + $0xf] sm:$0xff]  ;;  %v15063_v52 = vld [vmem:[%s19195_s3 + $0x48] sm:$0xff] }
 0x5b2   : > { %v8570_v4 = vsel %vm19218_vm15, %v8548_v38, 0.0  ;;  %v8528_v16 = vadd.f32 %v18443_v30, %v8502_v22  ;;  %v8501_v24 = vld [vmem:[#allocation3 + $0x80] sm:$0xff]  ;;  %v8611_v0 = vld [vmem:[#allocation5 + $0x65] sm:$0xff]  ;;  %v19224_v2 = vld [vmem:[#allocation9_spill] sm:$0xff] }
 0x5b3   : > { %8592 = vst.msk [vmem:[#allocation5 + $0x90] sm:$0xff] %vm303_vm3, %v8570_v4  ;;  %8483 = vst.msk [vmem:[#allocation3 + $0xa0] sm:$0xff] %vm303_vm3, %v8461_v36  ;;  %v8898_v25 = vld [vmem:[#allocation5 + $0x66] sm:$0xff]  ;;  %v8569_v20 = vsel %vm19219_vm0, %v8547_v33, 0.0  ;;  %v8527_v44 = vadd.f32 %v18443_v30, %v8501_v24  ;;  %14735 = vmatprep.mubr.msk.f32.mxu1 %vm303_vm3, %v8611_v0  ;;  %v8899_v48 = vld [vmem:[#allocation5 + $0x6e] sm:$0xff] }
 0x5b4   : > { %v8612_v56 = vld [vmem:[#allocation5 + $0x6d] sm:$0xff]  ;;  %v8550_v18 = vmax.f32 %v8528_v16, 0.0  ;;  %14772 = vmatprep.mubr.msk.f32.mxu0 %vm303_vm3, %v8898_v25  ;;  %8591 = vst.msk [vmem:[#allocation5 + $0x88] sm:$0xff] %vm303_vm3, %v8569_v20  ;;  %v9548_v14 = vld [vmem:[#allocation5 + $0x17] sm:$0xff]  ;;  %v9549_v11 = vld [vmem:[#allocation5 + $0x1f] sm:$0xff] }
 0x5b5   : > { %v8504_v40 = vld [vmem:[#allocation3 + $0x98] sm:$0xff]  ;;  %14736 = vmatmul.mubr.msk.f32.gmra.mxu1 %vm303_vm3, %v8612_v56  ;;  %14773 = vmatmul.mubr.msk.f32.gmra.mxu0 %vm303_vm3, %v8899_v48  ;;  %v8549_v37 = vmax.f32 %v8527_v44, 0.0  ;;  %v9901_v39 = vld [vmem:[%s19195_s3 + $0x40] sm:$0xff]  ;;  %v18649_v29 = vld [vmem:[%s19195_s3 + $0x68] sm:$0xff] }
 0x5b6   : > { %v8572_v43 = vsel %vm5501_vm1, %v8550_v18, 0.0  ;;  %v8530_v23 = vadd.f32 %v18443_v30, %v8504_v40  ;;  %v8503_v1 = vld [vmem:[#allocation3 + $0x90] sm:$0xff]  ;;  %vm19225_vm1 = vcmp.eq.s32.totalorder %v19224_v2, 1  ;;  %v9551_v38 = vld [vmem:[#allocation5 + $0x2f] sm:$0xff]  ;;  %v9552_v63 = vld [vmem:[#allocation5 + $0x37] sm:$0xff] }
 0x5b7   : > { %8594 = vst.msk [vmem:[#allocation5 + $0xa0] sm:$0xff] %vm303_vm3, %v8572_v43  ;;  %v8613_v10 = vld [vmem:[#allocation5 + $0x75] sm:$0xff]  ;;  %v8614_v53 = vld [vmem:[#allocation5 + $0x7d] sm:$0xff]  ;;  %v8571_v62 = vsel %vm19221_vm4, %v8549_v37, 0.0  ;;  %v8529_v27 = vadd.f32 %v18443_v30, %v8503_v1  ;;  %v9550_v6 = vld [vmem:[#allocation5 + $0x27] sm:$0xff] }
 0x5b8   : > { %v8900_v46 = vld [vmem:[#allocation5 + $0x76] sm:$0xff]  ;;  %v8552_v28 = vmax.f32 %v8530_v23, 0.0  ;;  %14738 = vmatprep.mubr.msk.f32.mxu1 %vm303_vm3, %v8613_v10  ;;  %v8901_v19 = vld [vmem:[#allocation5 + $0x7e] sm:$0xff]  ;;  %8593 = vst.msk [vmem:[#allocation5 + $0x98] sm:$0xff] %vm303_vm3, %v8571_v62  ;;  %v10232_v22 = vld [vmem:[%s19195_s3 + $0x50] sm:$0xff] }
 0x5b9   : > { %v8506_v9 = vld [vmem:[#allocation3 + $0xa8] sm:$0xff]  ;;  %14775 = vmatprep.mubr.msk.f32.mxu0 %vm303_vm3, %v8900_v46  ;;  %14739 = vmatmul.mubr.msk.f32.gmra.mxu1 %vm303_vm3, %v8614_v53  ;;  %v8551_v61 = vmax.f32 %v8529_v27, 0.0  ;;  %v18659_v36 = vld [vmem:[%s19195_s3 + $0x78] sm:$0xff]  ;;  %v9554_v33 = vld [vmem:[#allocation5 + $0x47] sm:$0xff] }
 0x5ba   : > { %v8532_v8 = vadd.f32 %v18443_v30, %v8506_v9  ;;  %14776 = vmatmul.mubr.msk.f32.gmra.mxu0 %vm303_vm3, %v8901_v19  ;;  %v8574_v58 = vsel %vm5503_vm12, %v8552_v28, 0.0  ;;  %v8505_v45 = vld [vmem:[#allocation3 + $0xa0] sm:$0xff]  ;;  %v9557_v24 = vld [vmem:[#allocation5 + $0x5f] sm:$0xff]  ;;  %v9558_v0 = vld [vmem:[#allocation5 + $0x67] sm:$0xff] }
 0x5bb   : > { %8596 = vst.msk [vmem:[#allocation5 + $0xb0] sm:$0xff] %vm303_vm3, %v8574_v58  ;;  %v8531_v50 = vadd.f32 %v18443_v30, %v8505_v45  ;;  %v8615_v13 = vld [vmem:[#allocation5 + $0x85] sm:$0xff]  ;;  %v8616_v41 = vld [vmem:[#allocation5 + $0x8d] sm:$0xff]  ;;  %v8573_v35 = vsel %vm5502_vm2, %v8551_v61, 0.0  ;;  %vm19227_vm2 = vcmp.eq.s32.totalorder %v19226_v55, 1  ;;  %v9556_v16 = vld [vmem:[#allocation5 + $0x57] sm:$0xff] }
 0x5bc   : > { %v8554_v7 = vmax.f32 %v8532_v8, 0.0  ;;  %v8902_v12 = vld [vmem:[#allocation5 + $0x86] sm:$0xff]  ;;  %14741 = vmatprep.mubr.msk.f32.mxu1 %vm303_vm3, %v8615_v13  ;;  %v8903_v21 = vld [vmem:[#allocation5 + $0x8e] sm:$0xff]  ;;  %8595 = vst.msk [vmem:[#allocation5 + $0xa8] sm:$0xff] %vm303_vm3, %v8573_v35  ;;  %v9560_v56 = vld [vmem:[#allocation5 + $0x77] sm:$0xff] }
 0x5bd   : > { %14778 = vmatprep.mubr.msk.f32.mxu0 %vm303_vm3, %v8902_v12  ;;  %14742 = vmatmul.mubr.msk.f32.gmra.mxu1 %vm303_vm3, %v8616_v41  ;;  %v8553_v3 = vmax.f32 %v8531_v50, 0.0  ;;  %v9555_v4 = vld [vmem:[#allocation5 + $0x4f] sm:$0xff]  ;;  %v9561_v20 = vld [vmem:[#allocation5 + $0x7f] sm:$0xff]  ;;  %v9562_v44 = vld [vmem:[#allocation5 + $0x87] sm:$0xff] }
 0x5be   : > { %14779 = vmatmul.mubr.msk.f32.gmra.mxu0 %vm303_vm3, %v8903_v21  ;;  %v8576_v30 = vsel %vm19225_vm1, %v8554_v7, 0.0  ;;  %v9559_v25 = vld [vmem:[#allocation5 + $0x6f] sm:$0xff]  ;;  %v9879_v19 = vld [vmem:[#allocation5 + $0x18] sm:$0xff]  ;;  %v9880_v61 = vld [vmem:[#allocation5 + $0x20] sm:$0xff] }
 0x5bf   : > { %8598 = vst.msk [vmem:[#allocation5 + $0xc0] sm:$0xff] %vm303_vm3, %v8576_v30  ;;  %v8617_v32 = vld [vmem:[#allocation5 + $0x95] sm:$0xff]  ;;  %v8618_v31 = vld [vmem:[#allocation5 + $0x9d] sm:$0xff]  ;;  %v8575_v15 = vsel %vm19227_vm2, %v8553_v3, 0.0  ;;  %v9881_v45 = vld [vmem:[#allocation5 + $0x28] sm:$0xff] }
 0x5c0   : > { %v8904_v47 = vld [vmem:[#allocation5 + $0x96] sm:$0xff]  ;;  %14744 = vmatprep.mubr.msk.f32.mxu1 %vm303_vm3, %v8617_v32  ;;  %v8905_v42 = vld [vmem:[#allocation5 + $0x9e] sm:$0xff]  ;;  %8597 = vst.msk [vmem:[#allocation5 + $0xb8] sm:$0xff] %vm303_vm3, %v8575_v15  ;;  %v18709_v7 = vld [vmem:[#allocation5 + $0x29] sm:$0xff] }
 0x5c1   : > { %14781 = vmatprep.mubr.msk.f32.mxu0 %vm303_vm3, %v8904_v47  ;;  %14745 = vmatmul.mubr.msk.f32.gmra.mxu1 %vm303_vm3, %v8618_v31  ;;  %v9563_v40 = vld [vmem:[#allocation5 + $0x8f] sm:$0xff]  ;;  %v9564_v37 = vld [vmem:[#allocation5 + $0x97] sm:$0xff]  ;;  %v9565_v43 = vld [vmem:[#allocation5 + $0x9f] sm:$0xff] }
 0x5c2   : > { %14782 = vmatmul.mubr.msk.f32.gmra.mxu0 %vm303_vm3, %v8905_v42  ;;  %v10210_v8 = vld [vmem:[#allocation5 + $0x19] sm:$0xff]  ;;  %v10211_v34 = vld [vmem:[#allocation5 + $0x21] sm:$0xff]  ;;  %v9882_v13 = vld [vmem:[#allocation5 + $0x30] sm:$0xff] }
 0x5c3   : > { %v8619_v5 = vld [vmem:[#allocation5 + $0xa5] sm:$0xff]  ;;  %v8620_v49 = vld [vmem:[#allocation5 + $0xad] sm:$0xff]  ;;  %v10563_v58 = vld [vmem:[%s19195_s3 + $0x60] sm:$0xff] }
 0x5c4   : > { %v8906_v57 = vld [vmem:[#allocation5 + $0xa6] sm:$0xff]  ;;  %14747 = vmatprep.mubr.msk.f32.mxu1 %vm303_vm3, %v8619_v5  ;;  %v8907_v51 = vld [vmem:[#allocation5 + $0xae] sm:$0xff]  ;;  %v18727_v35 = vld [vmem:[#allocation5 + $0x39] sm:$0xff] }
 0x5c5   : > { %14784 = vmatprep.mubr.msk.f32.mxu0 %vm303_vm3, %v8906_v57  ;;  %14748 = vmatmul.mubr.msk.f32.gmra.mxu1 %vm303_vm3, %v8620_v49  ;;  %v9566_v1 = vld [vmem:[#allocation5 + $0xa7] sm:$0xff]  ;;  %v9567_v53 = vld [vmem:[#allocation5 + $0xaf] sm:$0xff]  ;;  %v9887_v31 = vld [vmem:[#allocation5 + $0x58] sm:$0xff] }
 0x5c6   : > { %14785 = vmatmul.mubr.msk.f32.gmra.mxu0 %vm303_vm3, %v8907_v51  ;;  %14791 = vmatprep.mubr.msk.f32.mxu1 %vm303_vm3, %v9217_v54  ;;  %v10894_v50 = vld [vmem:[%s19195_s3 + $0x70] sm:$0xff]  ;;  %v18716_v12 = vld [vmem:[#allocation5 + $0x31] sm:$0xff]  ;;  %v18722_v41 = vld [vmem:[%s19195_s3 + $0x88] sm:$0xff] }
 0x5c7   : > { %14828 = vmatprep.mubr.msk.f32.mxu0 %vm303_vm3, %v9548_v14  ;;  %v9568_v27 = vld [vmem:[#allocation5 + $0xb7] sm:$0xff]  ;;  %v9569_v9 = vld [vmem:[#allocation5 + $0xbf] sm:$0xff]  ;;  %v9885_v2 = vld [vmem:[#allocation5 + $0x48] sm:$0xff] }
 0x5c8   : > { %v9884_v21 = vld [vmem:[#allocation5 + $0x40] sm:$0xff]  ;;  %v18738_v30 = vld [vmem:[#allocation5 + $0x49] sm:$0xff]  ;;  %v18743_v47 = vld [vmem:[#allocation5 + $0x51] sm:$0xff] }
 0x5c9   : > { %14792 = vmatmul.mubr.msk.f32.vlgmr.msra.gmra.mxu1 %vm303_vm3, %v9218_v59  ;;  %v18733_v3 = vld [vmem:[#allocation5 + $0x41] sm:$0xff]  ;;  %v9886_v32 = vld [vmem:[#allocation5 + $0x50] sm:$0xff]  ;;  %v18748_v55 = vld [vmem:[#allocation5 + $0x59] sm:$0xff] }
 0x5ca   : > { %14829 = vmatmul.mubr.msk.f32.vlgmr.msra.gmra.mxu0 %vm303_vm3, %v9549_v11  ;;  %14862 = vmatpush3.msra.mxu1 %v15063_v52  ;;  %v9888_v15 = vld [vmem:[#allocation5 + $0x60] sm:$0xff]  ;;  %v9889_v54 = vld [vmem:[#allocation5 + $0x68] sm:$0xff]  ;;  %v9890_v57 = vld [vmem:[#allocation5 + $0x70] sm:$0xff] }
 0x5cb   : > { %14794 = vmatprep.mubr.msk.f32.mxu1 %vm303_vm3, %v9548_v14  ;;  %14831 = vmatprep.mubr.msk.f32.mxu0 %vm303_vm3, %v9550_v6  ;;  %v18753_v42 = vld [vmem:[#allocation5 + $0x61] sm:$0xff]  ;;  %v18758_v5 = vld [vmem:[#allocation5 + $0x69] sm:$0xff]  ;;  %v18763_v49 = vld [vmem:[#allocation5 + $0x71] sm:$0xff] }
 0x5cc   : > { %14863 = vmatprep.subr.mxu1 %v9901_v39  ;;  %14899 = vmatpush3.msra.mxu0 %v18365_v26  ;;  %v9553_v26 = vld [vmem:[#allocation5 + $0x3f] sm:$0xff]  ;;  %v18778_v52 = vld [vmem:[#allocation5 + $0x89] sm:$0xff] }
 0x5cd   : > { %14864 = vmatpush3.msra.mxu1 %v9901_v39  ;;  %14900 = vmatprep.subr.mxu0 %v10232_v22  ;;  %v9891_v51 = vld [vmem:[#allocation5 + $0x78] sm:$0xff]  ;;  %v9892_v59 = vld [vmem:[#allocation5 + $0x80] sm:$0xff]  ;;  %v9893_v39 = vld [vmem:[#allocation5 + $0x88] sm:$0xff] }
 0x5ce   : > { %14795 = vmatmul.mubr.msk.f32.gmra.mxu1 %vm303_vm3, %v9549_v11  ;;  %14832 = vmatmul.mubr.msk.f32.gmra.mxu0 %vm303_vm3, %v9551_v38  ;;  %v18768_v14 = vld [vmem:[#allocation5 + $0x79] sm:$0xff]  ;;  %v18773_v11 = vld [vmem:[#allocation5 + $0x81] sm:$0xff] }
 0x5cf   : > { %14797 = vmatprep.mubr.msk.f32.mxu1 %vm303_vm3, %v9550_v6  ;;  %14834 = vmatprep.mubr.msk.f32.mxu0 %vm303_vm3, %v9552_v63  ;;  %v9894_v6 = vld [vmem:[#allocation5 + $0x90] sm:$0xff] }
 0x5d0   : > { %14935 = vmatprep.subr.mxu1 %v18649_v29  ;;  %14901 = vmatpush3.msra.mxu0 %v10232_v22  ;;  %v9895_v22 = vld [vmem:[#allocation5 + $0x98] sm:$0xff] }
 0x5d1   : > { %14972 = vmatprep.subr.mxu0 %v18659_v36 }
 0x5d2   : > { %14798 = vmatmul.mubr.msk.f32.gmra.mxu1 %vm303_vm3, %v9551_v38  ;;  %14835 = vmatmul.mubr.msk.f32.gmra.mxu0 %vm303_vm3, %v9553_v26  ;;  %v18783_v38 = vld [vmem:[#allocation5 + $0x91] sm:$0xff] }
 0x5d3   : > { %14800 = vmatprep.mubr.msk.f32.mxu1 %vm303_vm3, %v9552_v63  ;;  %14837 = vmatprep.mubr.msk.f32.mxu0 %vm303_vm3, %v9554_v33  ;;  %v9896_v63 = vld [vmem:[#allocation5 + $0xa0] sm:$0xff] }
 0x5d6   : > { %14801 = vmatmul.mubr.msk.f32.gmra.mxu1 %vm303_vm3, %v9553_v26  ;;  %14838 = vmatmul.mubr.msk.f32.gmra.mxu0 %vm303_vm3, %v9555_v4  ;;  %v18793_v26 = vld [vmem:[#allocation5 + $0xa1] sm:$0xff] }
 0x5d7   : > { %14803 = vmatprep.mubr.msk.f32.mxu1 %vm303_vm3, %v9554_v33  ;;  %14840 = vmatprep.mubr.msk.f32.mxu0 %vm303_vm3, %v9556_v16  ;;  %v18798_v33 = vld [vmem:[#allocation5 + $0xa9] sm:$0xff] }
 0x5da   : > { %14804 = vmatmul.mubr.msk.f32.gmra.mxu1 %vm303_vm3, %v9555_v4  ;;  %14841 = vmatmul.mubr.msk.f32.gmra.mxu0 %vm303_vm3, %v9557_v24  ;;  %v9898_v4 = vld [vmem:[#allocation5 + $0xb0] sm:$0xff] }
 0x5db   : > { %14806 = vmatprep.mubr.msk.f32.mxu1 %vm303_vm3, %v9556_v16  ;;  %14843 = vmatprep.mubr.msk.f32.mxu0 %vm303_vm3, %v9558_v0  ;;  %v14719_v18 = vpop.f32.mrf.mxu1  ;;  %v18803_v16 = vld [vmem:[#allocation5 + $0xb1] sm:$0xff] }
 0x5dc   : > { %8865 = vst.msk [vmem:[#allocation3 + $0x8] sm:$0xff] %vm303_vm3, %v14719_v18  ;;  %v11225_v18 = vld [vmem:[%s19195_s3 + $0x80] sm:$0xff] }
 0x5dd   : > { %v8755_v48 = vpop.f32.mrf.mxu1 }
 0x5de   : > { %14807 = vmatmul.mubr.msk.f32.gmra.mxu1 %vm303_vm3, %v9557_v24  ;;  %14844 = vmatmul.mubr.msk.f32.gmra.mxu0 %vm303_vm3, %v9559_v25  ;;  %8864 = vst.msk [vmem:[#allocation3] sm:$0xff] %vm303_vm3, %v8755_v48  ;;  %v9899_v24 = vld [vmem:[#allocation5 + $0xb8] sm:$0xff]  ;;  %v10875_v48 = vld [vmem:[#allocation5 + $0x42] sm:$0xff] }
 0x5df   : > { %14809 = vmatprep.mubr.msk.f32.mxu1 %vm303_vm3, %v9558_v0  ;;  %14846 = vmatprep.mubr.msk.f32.mxu0 %vm303_vm3, %v9560_v56  ;;  %v14756_v23 = vpop.f32.mrf.mxu0  ;;  %v18808_v0 = vld [vmem:[#allocation5 + $0xb9] sm:$0xff] }
 0x5e1   : > { %v9042_v17 = vpop.f32.mrf.mxu0 }
 0x5e2   : > { %14810 = vmatmul.mubr.msk.f32.gmra.mxu1 %vm303_vm3, %v9559_v25  ;;  %14847 = vmatmul.mubr.msk.f32.gmra.mxu0 %vm303_vm3, %v9561_v20  ;;  %v9900_v25 = vld [vmem:[#allocation5 + $0xc0] sm:$0xff] }
 0x5e3   : > { %14812 = vmatprep.mubr.msk.f32.mxu1 %vm303_vm3, %v9560_v56  ;;  %14849 = vmatprep.mubr.msk.f32.mxu0 %vm303_vm3, %v9562_v44  ;;  %v9152_v10 = vld [vmem:[#allocation3 + $0x8] sm:$0xff]  ;;  %v18813_v56 = vld [vmem:[#allocation5 + $0xc1] sm:$0xff] }
 0x5e4   : > { %v9174_v46 = vadd.f32 %v14756_v23, %v9152_v10  ;;  %v10878_v23 = vld [vmem:[#allocation5 + $0x5a] sm:$0xff]  ;;  %v10880_v10 = vld [vmem:[#allocation5 + $0x6a] sm:$0xff] }
 0x5e5   : > { %v9151_v62 = vld [vmem:[#allocation3] sm:$0xff] }
 0x5e6   : > { %14813 = vmatmul.mubr.msk.f32.gmra.mxu1 %vm303_vm3, %v9561_v20  ;;  %14850 = vmatmul.mubr.msk.f32.gmra.mxu0 %vm303_vm3, %v9563_v40  ;;  %9196 = vst.msk [vmem:[#allocation3 + $0x8] sm:$0xff] %vm303_vm3, %v9174_v46  ;;  %v9173_v28 = vadd.f32 %v9151_v62, %v9042_v17  ;;  %v10872_v20 = vld [vmem:[#allocation5 + $0x2a] sm:$0xff]  ;;  %v10881_v46 = vld [vmem:[#allocation5 + $0x72] sm:$0xff]  ;;  %v10883_v17 = vld [vmem:[#allocation5 + $0x82] sm:$0xff] }
 0x5e7   : > { %14815 = vmatprep.mubr.msk.f32.mxu1 %vm303_vm3, %v9562_v44  ;;  %14852 = vmatprep.mubr.msk.f32.mxu0 %vm303_vm3, %v9564_v37  ;;  %v10873_v44 = vld [vmem:[#allocation5 + $0x32] sm:$0xff]  ;;  %v10884_v62 = vld [vmem:[#allocation5 + $0x8a] sm:$0xff] }
 0x5e8   : > { %9195 = vst.msk [vmem:[#allocation3] sm:$0xff] %vm303_vm3, %v9173_v28  ;;  %v10886_v28 = vld [vmem:[#allocation5 + $0x9a] sm:$0xff] }
 0x5ea   : > { %14816 = vmatmul.mubr.msk.f32.gmra.mxu1 %vm303_vm3, %v9563_v40  ;;  %14853 = vmatmul.mubr.msk.f32.gmra.mxu0 %vm303_vm3, %v9565_v43  ;;  %v10874_v40 = vld [vmem:[#allocation5 + $0x3a] sm:$0xff] }
 0x5eb   : > { %14818 = vmatprep.mubr.msk.f32.mxu1 %vm303_vm3, %v9564_v37  ;;  %14855 = vmatprep.mubr.msk.f32.mxu0 %vm303_vm3, %v9566_v1  ;;  %v10876_v37 = vld [vmem:[#allocation5 + $0x4a] sm:$0xff] }
 0x5ee   : > { %14819 = vmatmul.mubr.msk.f32.gmra.mxu1 %vm303_vm3, %v9565_v43  ;;  %14856 = vmatmul.mubr.msk.f32.gmra.mxu0 %vm303_vm3, %v9567_v53  ;;  %v10877_v43 = vld [vmem:[#allocation5 + $0x52] sm:$0xff] }
 0x5ef   : > { %14821 = vmatprep.mubr.msk.f32.mxu1 %vm303_vm3, %v9566_v1  ;;  %14858 = vmatprep.mubr.msk.f32.mxu0 %vm303_vm3, %v9568_v27  ;;  %v10879_v1 = vld [vmem:[#allocation5 + $0x62] sm:$0xff]  ;;  %v10885_v27 = vld [vmem:[#allocation5 + $0x92] sm:$0xff] }
 0x5f2   : > { %14822 = vmatmul.mubr.msk.f32.gmra.mxu1 %vm303_vm3, %v9567_v53  ;;  %14859 = vmatmul.mubr.msk.f32.gmra.mxu0 %vm303_vm3, %v9569_v9  ;;  %v10882_v53 = vld [vmem:[#allocation5 + $0x7a] sm:$0xff]  ;;  %v10887_v9 = vld [vmem:[#allocation5 + $0xa2] sm:$0xff] }
 0x5f3   : > { %14865 = vmatprep.mubr.msk.f32.mxu1 %vm303_vm3, %v9879_v19  ;;  %14902 = vmatprep.mubr.msk.f32.mxu0 %vm303_vm3, %v10210_v8  ;;  %v10888_v19 = vld [vmem:[#allocation5 + $0xaa] sm:$0xff]  ;;  %v10889_v8 = vld [vmem:[#allocation5 + $0xb2] sm:$0xff] }
 0x5f6   : > { %14866 = vmatmul.mubr.msk.f32.vlgmr.msra.gmra.mxu1 %vm303_vm3, %v9880_v61  ;;  %14903 = vmatmul.mubr.msk.f32.vlgmr.msra.gmra.mxu0 %vm303_vm3, %v10211_v34  ;;  %v10890_v61 = vld [vmem:[#allocation5 + $0xba] sm:$0xff]  ;;  %v10561_v34 = vld [vmem:[#allocation5 + $0xc9] sm:$0xff] }
 0x5f7   : > { %14936 = vmatpush3.msra.mxu1 %v18649_v29  ;;  %14868 = vmatprep.mubr.msk.f32.mxu1 %vm303_vm3, %v9881_v45  ;;  %v18788_v29 = vld [vmem:[#allocation5 + $0x99] sm:$0xff]  ;;  %v10891_v45 = vld [vmem:[#allocation5 + $0xc2] sm:$0xff] }
 0x5f8   : > { %14905 = vmatprep.mubr.msk.f32.mxu0 %vm303_vm3, %v18709_v7  ;;  %14937 = vmatprep.subr.mxu1 %v10563_v58 }
 0x5f9   : > { %14938 = vmatpush3.msra.mxu1 %v10563_v58  ;;  %14973 = vmatpush3.msra.mxu0 %v18659_v36  ;;  %v9897_v36 = vld [vmem:[#allocation5 + $0xa8] sm:$0xff] }
 0x5fa   : > { %14869 = vmatmul.mubr.msk.f32.gmra.mxu1 %vm303_vm3, %v9882_v13  ;;  %14906 = vmatmul.mubr.msk.f32.gmra.mxu0 %vm303_vm3, %v18716_v12  ;;  %v10892_v58 = vld [vmem:[#allocation5 + $0xca] sm:$0xff] }
 0x5fb   : > { %14871 = vmatprep.mubr.msk.f32.mxu1 %vm303_vm3, %v9883_v60  ;;  %14908 = vmatprep.mubr.msk.f32.mxu0 %vm303_vm3, %v18727_v35  ;;  %v11203_v13 = vld [vmem:[#allocation5 + $0x2b] sm:$0xff]  ;;  %v11206_v60 = vld [vmem:[#allocation5 + $0x43] sm:$0xff] }
 0x5fc   : > { %14974 = vmatprep.subr.mxu0 %v10894_v50  ;;  %15009 = vmatprep.subr.mxu1 %v18722_v41 }
 0x5fd   : > { %14975 = vmatpush3.msra.mxu0 %v10894_v50  ;;  %v10893_v50 = vld [vmem:[#allocation5 + $0xd2] sm:$0xff] }
 0x5fe   : > { %14872 = vmatmul.mubr.msk.f32.gmra.mxu1 %vm303_vm3, %v9884_v21  ;;  %14909 = vmatmul.mubr.msk.f32.gmra.mxu0 %vm303_vm3, %v18733_v3  ;;  %v11208_v21 = vld [vmem:[#allocation5 + $0x53] sm:$0xff] }
 0x5ff   : > { %14874 = vmatprep.mubr.msk.f32.mxu1 %vm303_vm3, %v9885_v2  ;;  %14911 = vmatprep.mubr.msk.f32.mxu0 %vm303_vm3, %v18738_v30  ;;  %v11210_v2 = vld [vmem:[#allocation5 + $0x63] sm:$0xff] }
 0x602   : > { %14875 = vmatmul.mubr.msk.f32.gmra.mxu1 %vm303_vm3, %v9886_v32  ;;  %14912 = vmatmul.mubr.msk.f32.gmra.mxu0 %vm303_vm3, %v18743_v47  ;;  %v11212_v32 = vld [vmem:[#allocation5 + $0x73] sm:$0xff] }
 0x603   : > { %14877 = vmatprep.mubr.msk.f32.mxu1 %vm303_vm3, %v9887_v31  ;;  %14914 = vmatprep.mubr.msk.f32.mxu0 %vm303_vm3, %v18748_v55  ;;  %v11214_v31 = vld [vmem:[#allocation5 + $0x83] sm:$0xff] }
 0x606   : > { %14878 = vmatmul.mubr.msk.f32.gmra.mxu1 %vm303_vm3, %v9888_v15  ;;  %14915 = vmatmul.mubr.msk.f32.gmra.mxu0 %vm303_vm3, %v18753_v42 }
 0x607   : > { %14880 = vmatprep.mubr.msk.f32.mxu1 %vm303_vm3, %v9889_v54  ;;  %14917 = vmatprep.mubr.msk.f32.mxu0 %vm303_vm3, %v18758_v5 }
 0x60a   : > { %14881 = vmatmul.mubr.msk.f32.gmra.mxu1 %vm303_vm3, %v9890_v57  ;;  %14918 = vmatmul.mubr.msk.f32.gmra.mxu0 %vm303_vm3, %v18763_v49  ;;  %v11216_v57 = vld [vmem:[#allocation5 + $0x93] sm:$0xff] }
 0x60b   : > { %14883 = vmatprep.mubr.msk.f32.mxu1 %vm303_vm3, %v9891_v51  ;;  %14920 = vmatprep.mubr.msk.f32.mxu0 %vm303_vm3, %v18768_v14 }
 0x60e   : > { %14884 = vmatmul.mubr.msk.f32.gmra.mxu1 %vm303_vm3, %v9892_v59  ;;  %14921 = vmatmul.mubr.msk.f32.gmra.mxu0 %vm303_vm3, %v18773_v11 }
 0x60f   : > { %14886 = vmatprep.mubr.msk.f32.mxu1 %vm303_vm3, %v9893_v39  ;;  %14923 = vmatprep.mubr.msk.f32.mxu0 %vm303_vm3, %v18778_v52  ;;  %v11218_v39 = vld [vmem:[#allocation5 + $0xa3] sm:$0xff] }
 0x612   : > { %14887 = vmatmul.mubr.msk.f32.gmra.mxu1 %vm303_vm3, %v9894_v6  ;;  %14924 = vmatmul.mubr.msk.f32.gmra.mxu0 %vm303_vm3, %v18783_v38 }
 0x613   : > { %14889 = vmatprep.mubr.msk.f32.mxu1 %vm303_vm3, %v9895_v22  ;;  %14926 = vmatprep.mubr.msk.f32.mxu0 %vm303_vm3, %v18788_v29  ;;  %v11219_v22 = vld [vmem:[#allocation5 + $0xab] sm:$0xff] }
 0x616   : > { %14890 = vmatmul.mubr.msk.f32.gmra.mxu1 %vm303_vm3, %v9896_v63  ;;  %14927 = vmatmul.mubr.msk.f32.gmra.mxu0 %vm303_vm3, %v18793_v26 }
 0x617   : > { %14892 = vmatprep.mubr.msk.f32.mxu1 %vm303_vm3, %v9897_v36  ;;  %14929 = vmatprep.mubr.msk.f32.mxu0 %vm303_vm3, %v18798_v33 }
 0x61a   : > { %14893 = vmatmul.mubr.msk.f32.gmra.mxu1 %vm303_vm3, %v9898_v4  ;;  %14930 = vmatmul.mubr.msk.f32.gmra.mxu0 %vm303_vm3, %v18803_v16  ;;  %v11220_v4 = vld [vmem:[#allocation5 + $0xb3] sm:$0xff] }
 0x61b   : > { %14895 = vmatprep.mubr.msk.f32.mxu1 %vm303_vm3, %v9899_v24  ;;  %14932 = vmatprep.mubr.msk.f32.mxu0 %vm303_vm3, %v18808_v0 }
 0x61e   : > { %14896 = vmatmul.mubr.msk.f32.gmra.mxu1 %vm303_vm3, %v9900_v25  ;;  %14933 = vmatmul.mubr.msk.f32.gmra.mxu0 %vm303_vm3, %v18813_v56  ;;  %v11221_v25 = vld [vmem:[#allocation5 + $0xbb] sm:$0xff] }
 0x61f   : > { %14939 = vmatprep.mubr.msk.f32.mxu1 %vm303_vm3, %v18709_v7  ;;  %14976 = vmatprep.mubr.msk.f32.mxu0 %vm303_vm3, %v10872_v20  ;;  %v10562_v7 = vld [vmem:[#allocation5 + $0xd1] sm:$0xff] }
 0x622   : > { %14940 = vmatmul.mubr.msk.f32.vlgmr.msra.gmra.mxu1 %vm303_vm3, %v18716_v12  ;;  %14977 = vmatmul.mubr.msk.f32.vlgmr.msra.gmra.mxu0 %vm303_vm3, %v10873_v44  ;;  %v11204_v12 = vld [vmem:[#allocation5 + $0x33] sm:$0xff] }
 0x623   : > { %15010 = vmatpush3.msra.mxu1 %v18722_v41  ;;  %14942 = vmatprep.mubr.msk.f32.mxu1 %vm303_vm3, %v18727_v35  ;;  %v11205_v41 = vld [vmem:[#allocation5 + $0x3b] sm:$0xff]  ;;  %v11207_v35 = vld [vmem:[#allocation5 + $0x4b] sm:$0xff] }
 0x624   : > { %14979 = vmatprep.mubr.msk.f32.mxu0 %vm303_vm3, %v10874_v40  ;;  %15011 = vmatprep.subr.mxu1 %v11225_v18  ;;  %v11223_v40 = vld [vmem:[#allocation5 + $0xcb] sm:$0xff] }
 0x625   : > { %15012 = vmatpush3.msra.mxu1 %v11225_v18 }
 0x626   : > { %14943 = vmatmul.mubr.msk.f32.gmra.mxu1 %vm303_vm3, %v18733_v3  ;;  %14980 = vmatmul.mubr.msk.f32.gmra.mxu0 %vm303_vm3, %v10875_v48  ;;  %v11209_v3 = vld [vmem:[#allocation5 + $0x5b] sm:$0xff] }
 0x627   : > { %14945 = vmatprep.mubr.msk.f32.mxu1 %vm303_vm3, %v18738_v30  ;;  %14982 = vmatprep.mubr.msk.f32.mxu0 %vm303_vm3, %v10876_v37  ;;  %v11211_v30 = vld [vmem:[#allocation5 + $0x6b] sm:$0xff]  ;;  %v11222_v37 = vld [vmem:[#allocation5 + $0xc3] sm:$0xff] }
 0x62a   : > { %14946 = vmatmul.mubr.msk.f32.gmra.mxu1 %vm303_vm3, %v18743_v47  ;;  %14983 = vmatmul.mubr.msk.f32.gmra.mxu0 %vm303_vm3, %v10877_v43  ;;  %v11213_v47 = vld [vmem:[#allocation5 + $0x7b] sm:$0xff] }
 0x62b   : > { %14948 = vmatprep.mubr.msk.f32.mxu1 %vm303_vm3, %v18748_v55  ;;  %14985 = vmatprep.mubr.msk.f32.mxu0 %vm303_vm3, %v10878_v23 }
 0x62e   : > { %14949 = vmatmul.mubr.msk.f32.gmra.mxu1 %vm303_vm3, %v18753_v42  ;;  %14986 = vmatmul.mubr.msk.f32.gmra.mxu0 %vm303_vm3, %v10879_v1  ;;  %v11215_v42 = vld [vmem:[#allocation5 + $0x8b] sm:$0xff] }
 0x62f   : > { %14951 = vmatprep.mubr.msk.f32.mxu1 %vm303_vm3, %v18758_v5  ;;  %14988 = vmatprep.mubr.msk.f32.mxu0 %vm303_vm3, %v10880_v10 }
 0x632   : > { %14952 = vmatmul.mubr.msk.f32.gmra.mxu1 %vm303_vm3, %v18763_v49  ;;  %14989 = vmatmul.mubr.msk.f32.gmra.mxu0 %vm303_vm3, %v10881_v46  ;;  %v11224_v46 = vld [vmem:[#allocation5 + $0xd3] sm:$0xff] }
 0x633   : > { %14954 = vmatprep.mubr.msk.f32.mxu1 %vm303_vm3, %v18768_v14  ;;  %14991 = vmatprep.mubr.msk.f32.mxu0 %vm303_vm3, %v10882_v53  ;;  %v11217_v14 = vld [vmem:[#allocation5 + $0x9b] sm:$0xff] }
 0x636   : > { %14955 = vmatmul.mubr.msk.f32.gmra.mxu1 %vm303_vm3, %v18773_v11  ;;  %14992 = vmatmul.mubr.msk.f32.gmra.mxu0 %vm303_vm3, %v10883_v17 }
 0x637   : > { %14957 = vmatprep.mubr.msk.f32.mxu1 %vm303_vm3, %v18778_v52  ;;  %14994 = vmatprep.mubr.msk.f32.mxu0 %vm303_vm3, %v10884_v62 }
 0x63a   : > { %14958 = vmatmul.mubr.msk.f32.gmra.mxu1 %vm303_vm3, %v18783_v38  ;;  %14995 = vmatmul.mubr.msk.f32.gmra.mxu0 %vm303_vm3, %v10885_v27 }
 0x63b   : > { %14960 = vmatprep.mubr.msk.f32.mxu1 %vm303_vm3, %v18788_v29  ;;  %14997 = vmatprep.mubr.msk.f32.mxu0 %vm303_vm3, %v10886_v28 }
 0x63e   : > { %14961 = vmatmul.mubr.msk.f32.gmra.mxu1 %vm303_vm3, %v18793_v26  ;;  %14998 = vmatmul.mubr.msk.f32.gmra.mxu0 %vm303_vm3, %v10887_v9 }
 0x63f   : > { %14963 = vmatprep.mubr.msk.f32.mxu1 %vm303_vm3, %v18798_v33  ;;  %15000 = vmatprep.mubr.msk.f32.mxu0 %vm303_vm3, %v10888_v19 }
 0x642   : > { %14964 = vmatmul.mubr.msk.f32.gmra.mxu1 %vm303_vm3, %v18803_v16  ;;  %15001 = vmatmul.mubr.msk.f32.gmra.mxu0 %vm303_vm3, %v10889_v8 }
 0x643   : > { %14966 = vmatprep.mubr.msk.f32.mxu1 %vm303_vm3, %v18808_v0  ;;  %15003 = vmatprep.mubr.msk.f32.mxu0 %vm303_vm3, %v10890_v61 }
 0x646   : > { %14967 = vmatmul.mubr.msk.f32.gmra.mxu1 %vm303_vm3, %v18813_v56  ;;  %15004 = vmatmul.mubr.msk.f32.gmra.mxu0 %vm303_vm3, %v10891_v45 }
 0x647   : > { %14969 = vmatprep.mubr.msk.f32.mxu1 %vm303_vm3, %v10561_v34  ;;  %15006 = vmatprep.mubr.msk.f32.mxu0 %vm303_vm3, %v10892_v58 }
 0x64a   : > { %14970 = vmatmul.mubr.msk.f32.gmra.mxu1 %vm303_vm3, %v10562_v7  ;;  %15007 = vmatmul.mubr.msk.f32.gmra.mxu0 %vm303_vm3, %v10893_v50 }
 0x64b   : > { %15013 = vmatprep.mubr.msk.f32.mxu1 %vm303_vm3, %v11203_v13 }
 0x64e   : > { %15014 = vmatmul.mubr.msk.f32.vlgmr.msra.gmra.mxu1 %vm303_vm3, %v11204_v12 }
 0x64f   : > { %15016 = vmatprep.mubr.msk.f32.mxu1 %vm303_vm3, %v11205_v41 }
 0x652   : > { %15017 = vmatmul.mubr.msk.f32.gmra.mxu1 %vm303_vm3, %v11206_v60 }
 0x653   : > { %15019 = vmatprep.mubr.msk.f32.mxu1 %vm303_vm3, %v11207_v35 }
 0x656   : > { %15020 = vmatmul.mubr.msk.f32.gmra.mxu1 %vm303_vm3, %v11208_v21 }
 0x657   : > { %15022 = vmatprep.mubr.msk.f32.mxu1 %vm303_vm3, %v11209_v3 }
 0x65a   : > { %15023 = vmatmul.mubr.msk.f32.gmra.mxu1 %vm303_vm3, %v11210_v2 }
 0x65b   : > { %15025 = vmatprep.mubr.msk.f32.mxu1 %vm303_vm3, %v11211_v30 }
 0x65e   : > { %15026 = vmatmul.mubr.msk.f32.gmra.mxu1 %vm303_vm3, %v11212_v32 }
 0x65f   : > { %15028 = vmatprep.mubr.msk.f32.mxu1 %vm303_vm3, %v11213_v47 }
 0x660   : > { %v14722_v55 = vpop.f32.mrf.mxu1 }
 0x661   : > { %v14759_v15 = vpop.f32.mrf.mxu0  ;;  %8867 = vst.msk [vmem:[#allocation3 + $0x18] sm:$0xff] %vm303_vm3, %v14722_v55 }
 0x662   : > { %15029 = vmatmul.mubr.msk.f32.gmra.mxu1 %vm303_vm3, %v11214_v31  ;;  %v8765_v54 = vpop.f32.mrf.mxu1 }
 0x663   : > { %15031 = vmatprep.mubr.msk.f32.mxu1 %vm303_vm3, %v11215_v42  ;;  %v9052_v5 = vpop.f32.mrf.mxu0  ;;  %8866 = vst.msk [vmem:[#allocation3 + $0x10] sm:$0xff] %vm303_vm3, %v8765_v54 }
 0x664   : > { %v14725_v49 = vpop.f32.mrf.mxu1 }
 0x665   : > { %v14762_v51 = vpop.f32.mrf.mxu0  ;;  %8869 = vst.msk [vmem:[#allocation3 + $0x28] sm:$0xff] %vm303_vm3, %v14725_v49 }
 0x666   : > { %15032 = vmatmul.mubr.msk.f32.gmra.mxu1 %vm303_vm3, %v11216_v57  ;;  %v8775_v59 = vpop.f32.mrf.mxu1 }
 0x667   : > { %15034 = vmatprep.mubr.msk.f32.mxu1 %vm303_vm3, %v11217_v14  ;;  %v9062_v11 = vpop.f32.mrf.mxu0  ;;  %8868 = vst.msk [vmem:[#allocation3 + $0x20] sm:$0xff] %vm303_vm3, %v8775_v59 }
 0x668   : > { %v9154_v52 = vld [vmem:[#allocation3 + $0x18] sm:$0xff]  ;;  %v14728_v6 = vpop.f32.mrf.mxu1 }
 0x669   : > { %v14765_v38 = vpop.f32.mrf.mxu0  ;;  %v9176_v29 = vadd.f32 %v14759_v15, %v9154_v52  ;;  %8871 = vst.msk [vmem:[#allocation3 + $0x38] sm:$0xff] %vm303_vm3, %v14728_v6 }
 0x66a   : > { %15035 = vmatmul.mubr.msk.f32.gmra.mxu1 %vm303_vm3, %v11218_v39  ;;  %v9153_v63 = vld [vmem:[#allocation3 + $0x10] sm:$0xff]  ;;  %v8785_v26 = vpop.f32.mrf.mxu1 }
 0x66b   : > { %15037 = vmatprep.mubr.msk.f32.mxu1 %vm303_vm3, %v11219_v22  ;;  %v9072_v36 = vpop.f32.mrf.mxu0  ;;  %9198 = vst.msk [vmem:[#allocation3 + $0x18] sm:$0xff] %vm303_vm3, %v9176_v29  ;;  %v9175_v33 = vadd.f32 %v9153_v63, %v9052_v5  ;;  %8870 = vst.msk [vmem:[#allocation3 + $0x30] sm:$0xff] %vm303_vm3, %v8785_v26 }
 0x66c   : > { %v9156_v16 = vld [vmem:[#allocation3 + $0x28] sm:$0xff] }
 0x66d   : > { %v14731_v24 = vpop.f32.mrf.mxu1  ;;  %v14768_v0 = vpop.f32.mrf.mxu0  ;;  %9197 = vst.msk [vmem:[#allocation3 + $0x10] sm:$0xff] %vm303_vm3, %v9175_v33  ;;  %v9178_v56 = vadd.f32 %v14762_v51, %v9156_v16  ;;  %v9483_v33 = vld [vmem:[#allocation3 + $0x8] sm:$0xff] }
 0x66e   : > { %15038 = vmatmul.mubr.msk.f32.gmra.mxu1 %vm303_vm3, %v11220_v4  ;;  %8873 = vst.msk [vmem:[#allocation3 + $0x48] sm:$0xff] %vm303_vm3, %v14731_v24  ;;  %v9155_v20 = vld [vmem:[#allocation3 + $0x20] sm:$0xff] }
 0x66f   : > { %15040 = vmatprep.mubr.msk.f32.mxu1 %vm303_vm3, %v11221_v25  ;;  %v8795_v44 = vpop.f32.mrf.mxu1  ;;  %v9082_v18 = vpop.f32.mrf.mxu0  ;;  %9200 = vst.msk [vmem:[#allocation3 + $0x28] sm:$0xff] %vm303_vm3, %v9178_v56  ;;  %v9177_v48 = vadd.f32 %v9155_v20, %v9062_v11  ;;  %v9482_v56 = vld [vmem:[#allocation3] sm:$0xff] }
 0x670   : > { %8872 = vst.msk [vmem:[#allocation3 + $0x40] sm:$0xff] %vm303_vm3, %v8795_v44  ;;  %v9158_v43 = vld [vmem:[#allocation3 + $0x38] sm:$0xff] }
 0x671   : > { %v14734_v23 = vpop.f32.mrf.mxu1  ;;  %v14771_v1 = vpop.f32.mrf.mxu0  ;;  %9199 = vst.msk [vmem:[#allocation3 + $0x20] sm:$0xff] %vm303_vm3, %v9177_v48  ;;  %v9180_v10 = vadd.f32 %v14765_v38, %v9158_v43 }
 0x672   : > { %15041 = vmatmul.mubr.msk.f32.gmra.mxu1 %vm303_vm3, %v11222_v37  ;;  %8875 = vst.msk [vmem:[#allocation3 + $0x58] sm:$0xff] %vm303_vm3, %v14734_v23  ;;  %v9157_v53 = vld [vmem:[#allocation3 + $0x30] sm:$0xff]  ;;  %v9485_v37 = vld [vmem:[#allocation3 + $0x18] sm:$0xff] }
 0x673   : > { %15043 = vmatprep.mubr.msk.f32.mxu1 %vm303_vm3, %v11223_v40  ;;  %v8805_v17 = vpop.f32.mrf.mxu1  ;;  %v9092_v62 = vpop.f32.mrf.mxu0  ;;  %9202 = vst.msk [vmem:[#allocation3 + $0x38] sm:$0xff] %vm303_vm3, %v9180_v10  ;;  %v9179_v27 = vadd.f32 %v9157_v53, %v9072_v36 }
 0x674   : > { %8874 = vst.msk [vmem:[#allocation3 + $0x50] sm:$0xff] %vm303_vm3, %v8805_v17  ;;  %v9484_v53 = vld [vmem:[#allocation3 + $0x10] sm:$0xff] }
 0x675   : > { %v9160_v28 = vld [vmem:[#allocation3 + $0x48] sm:$0xff]  ;;  %v14737_v9 = vpop.f32.mrf.mxu1  ;;  %v14774_v19 = vpop.f32.mrf.mxu0  ;;  %9201 = vst.msk [vmem:[#allocation3 + $0x30] sm:$0xff] %vm303_vm3, %v9179_v27 }
 0x676   : > { %15044 = vmatmul.mubr.msk.f32.gmra.mxu1 %vm303_vm3, %v11224_v46  ;;  %v9182_v8 = vadd.f32 %v14768_v0, %v9160_v28  ;;  %8877 = vst.msk [vmem:[#allocation3 + $0x68] sm:$0xff] %vm303_vm3, %v14737_v9  ;;  %v9487_v9 = vld [vmem:[#allocation3 + $0x28] sm:$0xff] }
 0x677   : > { %v9159_v61 = vld [vmem:[#allocation3 + $0x40] sm:$0xff]  ;;  %v8815_v34 = vpop.f32.mrf.mxu1  ;;  %v9102_v58 = vpop.f32.mrf.mxu0 }
 0x678   : > { %9204 = vst.msk [vmem:[#allocation3 + $0x48] sm:$0xff] %vm303_vm3, %v9182_v8  ;;  %v9181_v45 = vadd.f32 %v9159_v61, %v9082_v18  ;;  %8876 = vst.msk [vmem:[#allocation3 + $0x60] sm:$0xff] %vm303_vm3, %v8815_v34 }
 0x679   : > { %v9162_v7 = vld [vmem:[#allocation3 + $0x58] sm:$0xff]  ;;  %v14740_v50 = vpop.f32.mrf.mxu1 }
 0x67a   : > { %v14777_v13 = vpop.f32.mrf.mxu0  ;;  %9203 = vst.msk [vmem:[#allocation3 + $0x40] sm:$0xff] %vm303_vm3, %v9181_v45  ;;  %v9184_v12 = vadd.f32 %v14771_v1, %v9162_v7  ;;  %8879 = vst.msk [vmem:[#allocation3 + $0x78] sm:$0xff] %vm303_vm3, %v14740_v50 }
 0x67b   : > { %v9161_v41 = vld [vmem:[#allocation3 + $0x50] sm:$0xff]  ;;  %v8825_v60 = vpop.f32.mrf.mxu1 }
 0x67c   : > { %v9112_v35 = vpop.f32.mrf.mxu0  ;;  %9206 = vst.msk [vmem:[#allocation3 + $0x58] sm:$0xff] %vm303_vm3, %v9184_v12  ;;  %v9183_v21 = vadd.f32 %v9161_v41, %v9092_v62  ;;  %8878 = vst.msk [vmem:[#allocation3 + $0x70] sm:$0xff] %vm303_vm3, %v8825_v60  ;;  %v9489_v41 = vld [vmem:[#allocation3 + $0x38] sm:$0xff] }
 0x67d   : > { %v9164_v3 = vld [vmem:[#allocation3 + $0x68] sm:$0xff]  ;;  %v14743_v2 = vpop.f32.mrf.mxu1 }
 0x67e   : > { %v14780_v30 = vpop.f32.mrf.mxu0  ;;  %9205 = vst.msk [vmem:[#allocation3 + $0x50] sm:$0xff] %vm303_vm3, %v9183_v21  ;;  %v9186_v32 = vadd.f32 %v14774_v19, %v9164_v3  ;;  %8881 = vst.msk [vmem:[#allocation3 + $0x88] sm:$0xff] %vm303_vm3, %v14743_v2 }
 0x67f   : > { %v9163_v47 = vld [vmem:[#allocation3 + $0x60] sm:$0xff]  ;;  %v8835_v31 = vpop.f32.mrf.mxu1 }
 0x680   : > { %v9122_v55 = vpop.f32.mrf.mxu0  ;;  %9208 = vst.msk [vmem:[#allocation3 + $0x68] sm:$0xff] %vm303_vm3, %v9186_v32  ;;  %v9185_v15 = vadd.f32 %v9163_v47, %v9102_v58  ;;  %8880 = vst.msk [vmem:[#allocation3 + $0x80] sm:$0xff] %vm303_vm3, %v8835_v31  ;;  %v9486_v58 = vld [vmem:[#allocation3 + $0x20] sm:$0xff] }
 0x681   : > { %v9166_v42 = vld [vmem:[#allocation3 + $0x78] sm:$0xff]  ;;  %v14746_v54 = vpop.f32.mrf.mxu1 }
 0x682   : > { %v14783_v5 = vpop.f32.mrf.mxu0  ;;  %9207 = vst.msk [vmem:[#allocation3 + $0x60] sm:$0xff] %vm303_vm3, %v9185_v15  ;;  %v9188_v57 = vadd.f32 %v14777_v13, %v9166_v42  ;;  %8883 = vst.msk [vmem:[#allocation3 + $0x98] sm:$0xff] %vm303_vm3, %v14746_v54  ;;  %v9491_v42 = vld [vmem:[#allocation3 + $0x48] sm:$0xff] }
 0x683   : > { %v9165_v49 = vld [vmem:[#allocation3 + $0x70] sm:$0xff]  ;;  %v8845_v51 = vpop.f32.mrf.mxu1 }
 0x684   : > { %v9132_v14 = vpop.f32.mrf.mxu0  ;;  %9210 = vst.msk [vmem:[#allocation3 + $0x78] sm:$0xff] %vm303_vm3, %v9188_v57  ;;  %v9187_v59 = vadd.f32 %v9165_v49, %v9112_v35  ;;  %8882 = vst.msk [vmem:[#allocation3 + $0x90] sm:$0xff] %vm303_vm3, %v8845_v51 }
 0x685   : > { %v9168_v11 = vld [vmem:[#allocation3 + $0x88] sm:$0xff]  ;;  %v14749_v39 = vpop.f32.mrf.mxu1 }
 0x686   : > { %v14786_v52 = vpop.f32.mrf.mxu0  ;;  %9209 = vst.msk [vmem:[#allocation3 + $0x70] sm:$0xff] %vm303_vm3, %v9187_v59  ;;  %v9190_v6 = vadd.f32 %v14780_v30, %v9168_v11  ;;  %8885 = vst.msk [vmem:[#allocation3 + $0xa8] sm:$0xff] %vm303_vm3, %v14749_v39  ;;  %v9488_v30 = vld [vmem:[#allocation3 + $0x30] sm:$0xff] }
 0x687   : > { %v9167_v38 = vld [vmem:[#allocation3 + $0x80] sm:$0xff]  ;;  %v8855_v22 = vpop.f32.mrf.mxu1 }
 0x688   : > { %v9142_v29 = vpop.f32.mrf.mxu0  ;;  %9212 = vst.msk [vmem:[#allocation3 + $0x88] sm:$0xff] %vm303_vm3, %v9190_v6  ;;  %v9189_v63 = vadd.f32 %v9167_v38, %v9122_v55  ;;  %8884 = vst.msk [vmem:[#allocation3 + $0xa0] sm:$0xff] %vm303_vm3, %v8855_v22  ;;  %v9493_v38 = vld [vmem:[#allocation3 + $0x58] sm:$0xff] }
 0x689   : > { %v9170_v26 = vld [vmem:[#allocation3 + $0x98] sm:$0xff]  ;;  %v14793_v36 = vpop.f32.mrf.mxu1 }
 0x68a   : > { %v14830_v4 = vpop.f32.mrf.mxu0  ;;  %9211 = vst.msk [vmem:[#allocation3 + $0x80] sm:$0xff] %vm303_vm3, %v9189_v63  ;;  %v9192_v16 = vadd.f32 %v14783_v5, %v9170_v26  ;;  %v9505_v24 = vadd.f32 %v14793_v36, %v9483_v33  ;;  %v9492_v33 = vld [vmem:[#allocation3 + $0x50] sm:$0xff] }
 0x68b   : > { %v9169_v0 = vld [vmem:[#allocation3 + $0x90] sm:$0xff]  ;;  %v9373_v25 = vpop.f32.mrf.mxu1 }
 0x68c   : > { %v9704_v20 = vpop.f32.mrf.mxu0  ;;  %9214 = vst.msk [vmem:[#allocation3 + $0x98] sm:$0xff] %vm303_vm3, %v9192_v16  ;;  %v9191_v44 = vadd.f32 %v9169_v0, %v9132_v14  ;;  %9527 = vst.msk [vmem:[#allocation3 + $0x8] sm:$0xff] %vm303_vm3, %v9505_v24  ;;  %v9504_v18 = vadd.f32 %v9482_v56, %v9373_v25  ;;  %v9490_v14 = vld [vmem:[#allocation3 + $0x40] sm:$0xff]  ;;  %v9495_v56 = vld [vmem:[#allocation3 + $0x68] sm:$0xff] }
 0x68d   : > { %v9172_v40 = vld [vmem:[#allocation3 + $0xa8] sm:$0xff] }
 0x68e   : > { %v14796_v48 = vpop.f32.mrf.mxu1  ;;  %v14833_v43 = vpop.f32.mrf.mxu0  ;;  %9213 = vst.msk [vmem:[#allocation3 + $0x90] sm:$0xff] %vm303_vm3, %v9191_v44  ;;  %v9194_v23 = vadd.f32 %v14786_v52, %v9172_v40  ;;  %9526 = vst.msk [vmem:[#allocation3] sm:$0xff] %vm303_vm3, %v9504_v18 }
 0x68f   : > { %v9507_v1 = vadd.f32 %v14796_v48, %v9485_v37  ;;  %v9171_v10 = vld [vmem:[#allocation3 + $0xa0] sm:$0xff] }
 0x690   : > { %v9383_v46 = vpop.f32.mrf.mxu1  ;;  %v9714_v17 = vpop.f32.mrf.mxu0  ;;  %9216 = vst.msk [vmem:[#allocation3 + $0xa8] sm:$0xff] %vm303_vm3, %v9194_v23  ;;  %v9193_v62 = vadd.f32 %v9171_v10, %v9142_v29  ;;  %v9494_v37 = vld [vmem:[#allocation3 + $0x60] sm:$0xff] }
 0x691   : > { %9529 = vst.msk [vmem:[#allocation3 + $0x18] sm:$0xff] %vm303_vm3, %v9507_v1  ;;  %v9506_v27 = vadd.f32 %v9484_v53, %v9383_v46  ;;  %v9497_v53 = vld [vmem:[#allocation3 + $0x78] sm:$0xff] }
 0x692   : > { %v14799_v28 = vpop.f32.mrf.mxu1  ;;  %v14836_v19 = vpop.f32.mrf.mxu0  ;;  %9215 = vst.msk [vmem:[#allocation3 + $0xa0] sm:$0xff] %vm303_vm3, %v9193_v62 }
 0x693   : > { %9528 = vst.msk [vmem:[#allocation3 + $0x10] sm:$0xff] %vm303_vm3, %v9506_v27  ;;  %v9509_v8 = vadd.f32 %v14799_v28, %v9487_v9  ;;  %v9814_v61 = vld [vmem:[#allocation3 + $0x8] sm:$0xff] }
 0x694   : > { %v9393_v34 = vpop.f32.mrf.mxu1  ;;  %v9724_v45 = vpop.f32.mrf.mxu0  ;;  %v9836_v7 = vadd.f32 %v14830_v4, %v9814_v61 }
 0x695   : > { %9531 = vst.msk [vmem:[#allocation3 + $0x28] sm:$0xff] %vm303_vm3, %v9509_v8  ;;  %v9508_v50 = vadd.f32 %v9486_v58, %v9393_v34  ;;  %v9813_v13 = vld [vmem:[#allocation3] sm:$0xff] }
 0x696   : > { %v14802_v12 = vpop.f32.mrf.mxu1  ;;  %v14839_v60 = vpop.f32.mrf.mxu0  ;;  %9858 = vst.msk [vmem:[#allocation3 + $0x8] sm:$0xff] %vm303_vm3, %v9836_v7  ;;  %v9835_v35 = vadd.f32 %v9813_v13, %v9704_v20  ;;  %v9499_v7 = vld [vmem:[#allocation3 + $0x88] sm:$0xff] }
 0x697   : > { %9530 = vst.msk [vmem:[#allocation3 + $0x20] sm:$0xff] %vm303_vm3, %v9508_v50  ;;  %v9511_v21 = vadd.f32 %v14802_v12, %v9489_v41 }
 0x698   : > { %v9816_v3 = vld [vmem:[#allocation3 + $0x18] sm:$0xff]  ;;  %v9403_v2 = vpop.f32.mrf.mxu1  ;;  %v9734_v32 = vpop.f32.mrf.mxu0  ;;  %9857 = vst.msk [vmem:[#allocation3] sm:$0xff] %vm303_vm3, %v9835_v35  ;;  %v9498_v35 = vld [vmem:[#allocation3 + $0x80] sm:$0xff] }
 0x699   : > { %v9838_v47 = vadd.f32 %v14833_v43, %v9816_v3  ;;  %9533 = vst.msk [vmem:[#allocation3 + $0x38] sm:$0xff] %vm303_vm3, %v9511_v21  ;;  %v9510_v31 = vadd.f32 %v9488_v30, %v9403_v2 }
 0x69a   : > { %v9815_v55 = vld [vmem:[#allocation3 + $0x10] sm:$0xff]  ;;  %v14805_v15 = vpop.f32.mrf.mxu1  ;;  %v14842_v54 = vpop.f32.mrf.mxu0 }
 0x69b   : > { %9860 = vst.msk [vmem:[#allocation3 + $0x18] sm:$0xff] %vm303_vm3, %v9838_v47  ;;  %v9837_v5 = vadd.f32 %v9815_v55, %v9714_v17  ;;  %9532 = vst.msk [vmem:[#allocation3 + $0x30] sm:$0xff] %vm303_vm3, %v9510_v31  ;;  %v9513_v57 = vadd.f32 %v14805_v15, %v9491_v42  ;;  %v9501_v47 = vld [vmem:[#allocation3 + $0x98] sm:$0xff] }
 0x69c   : > { %v9818_v49 = vld [vmem:[#allocation3 + $0x28] sm:$0xff]  ;;  %v9413_v51 = vpop.f32.mrf.mxu1  ;;  %v9744_v59 = vpop.f32.mrf.mxu0 }
 0x69d   : > { %9859 = vst.msk [vmem:[#allocation3 + $0x10] sm:$0xff] %vm303_vm3, %v9837_v5  ;;  %v9840_v11 = vadd.f32 %v14836_v19, %v9818_v49  ;;  %9535 = vst.msk [vmem:[#allocation3 + $0x48] sm:$0xff] %vm303_vm3, %v9513_v57  ;;  %v9512_v39 = vadd.f32 %v9490_v14, %v9413_v51  ;;  %v9496_v19 = vld [vmem:[#allocation3 + $0x70] sm:$0xff] }
 0x69e   : > { %v9817_v52 = vld [vmem:[#allocation3 + $0x20] sm:$0xff]  ;;  %v14808_v6 = vpop.f32.mrf.mxu1  ;;  %v14845_v22 = vpop.f32.mrf.mxu0  ;;  %v9500_v5 = vld [vmem:[#allocation3 + $0x90] sm:$0xff] }
 0x69f   : > { %9862 = vst.msk [vmem:[#allocation3 + $0x28] sm:$0xff] %vm303_vm3, %v9840_v11  ;;  %v9839_v29 = vadd.f32 %v9817_v52, %v9724_v45  ;;  %9534 = vst.msk [vmem:[#allocation3 + $0x40] sm:$0xff] %vm303_vm3, %v9512_v39  ;;  %v9515_v63 = vadd.f32 %v14808_v6, %v9493_v38  ;;  %v9503_v11 = vld [vmem:[#allocation3 + $0xa8] sm:$0xff] }
 0x6a0   : > { %v9820_v26 = vld [vmem:[#allocation3 + $0x38] sm:$0xff]  ;;  %v9423_v36 = vpop.f32.mrf.mxu1  ;;  %v9754_v4 = vpop.f32.mrf.mxu0 }
 0x6a1   : > { %9861 = vst.msk [vmem:[#allocation3 + $0x20] sm:$0xff] %vm303_vm3, %v9839_v29  ;;  %v9842_v16 = vadd.f32 %v14839_v60, %v9820_v26  ;;  %9537 = vst.msk [vmem:[#allocation3 + $0x58] sm:$0xff] %vm303_vm3, %v9515_v63  ;;  %v9514_v24 = vadd.f32 %v9492_v33, %v9423_v36  ;;  %v9502_v29 = vld [vmem:[#allocation3 + $0xa0] sm:$0xff] }
 0x6a2   : > { %v9819_v0 = vld [vmem:[#allocation3 + $0x30] sm:$0xff]  ;;  %v14811_v25 = vpop.f32.mrf.mxu1  ;;  %v14848_v20 = vpop.f32.mrf.mxu0 }
 0x6a3   : > { %9864 = vst.msk [vmem:[#allocation3 + $0x38] sm:$0xff] %vm303_vm3, %v9842_v16  ;;  %v9841_v44 = vadd.f32 %v9819_v0, %v9734_v32  ;;  %9536 = vst.msk [vmem:[#allocation3 + $0x50] sm:$0xff] %vm303_vm3, %v9514_v24  ;;  %v9517_v18 = vadd.f32 %v14811_v25, %v9495_v56  ;;  %v10145_v16 = vld [vmem:[#allocation3 + $0x8] sm:$0xff] }
 0x6a4   : > { %v9822_v40 = vld [vmem:[#allocation3 + $0x48] sm:$0xff]  ;;  %v9433_v48 = vpop.f32.mrf.mxu1  ;;  %v9764_v43 = vpop.f32.mrf.mxu0 }
 0x6a5   : > { %9863 = vst.msk [vmem:[#allocation3 + $0x30] sm:$0xff] %vm303_vm3, %v9841_v44  ;;  %v9844_v23 = vadd.f32 %v14842_v54, %v9822_v40  ;;  %9539 = vst.msk [vmem:[#allocation3 + $0x68] sm:$0xff] %vm303_vm3, %v9517_v18  ;;  %v9516_v1 = vadd.f32 %v9494_v37, %v9433_v48  ;;  %v10144_v44 = vld [vmem:[#allocation3] sm:$0xff] }
 0x6a6   : > { %v9821_v10 = vld [vmem:[#allocation3 + $0x40] sm:$0xff]  ;;  %v14814_v46 = vpop.f32.mrf.mxu1  ;;  %v14851_v17 = vpop.f32.mrf.mxu0 }
 0x6a7   : > { %9866 = vst.msk [vmem:[#allocation3 + $0x48] sm:$0xff] %vm303_vm3, %v9844_v23  ;;  %v9843_v62 = vadd.f32 %v9821_v10, %v9744_v59  ;;  %9538 = vst.msk [vmem:[#allocation3 + $0x60] sm:$0xff] %vm303_vm3, %v9516_v1  ;;  %v9519_v27 = vadd.f32 %v14814_v46, %v9497_v53  ;;  %v10147_v23 = vld [vmem:[#allocation3 + $0x18] sm:$0xff] }
 0x6a8   : > { %v9824_v28 = vld [vmem:[#allocation3 + $0x58] sm:$0xff]  ;;  %v9443_v9 = vpop.f32.mrf.mxu1  ;;  %v9774_v8 = vpop.f32.mrf.mxu0 }
 0x6a9   : > { %9865 = vst.msk [vmem:[#allocation3 + $0x40] sm:$0xff] %vm303_vm3, %v9843_v62  ;;  %v9846_v61 = vadd.f32 %v14845_v22, %v9824_v28  ;;  %9541 = vst.msk [vmem:[#allocation3 + $0x78] sm:$0xff] %vm303_vm3, %v9519_v27  ;;  %v9518_v34 = vadd.f32 %v9496_v19, %v9443_v9  ;;  %v10146_v62 = vld [vmem:[#allocation3 + $0x10] sm:$0xff] }
 0x6aa   : > { %v9823_v58 = vld [vmem:[#allocation3 + $0x50] sm:$0xff]  ;;  %v14817_v45 = vpop.f32.mrf.mxu1  ;;  %v14854_v50 = vpop.f32.mrf.mxu0 }
 0x6ab   : > { %9868 = vst.msk [vmem:[#allocation3 + $0x58] sm:$0xff] %vm303_vm3, %v9846_v61  ;;  %v9845_v13 = vadd.f32 %v9823_v58, %v9754_v4  ;;  %9540 = vst.msk [vmem:[#allocation3 + $0x70] sm:$0xff] %vm303_vm3, %v9518_v34  ;;  %v9521_v12 = vadd.f32 %v14817_v45, %v9499_v7  ;;  %v10149_v61 = vld [vmem:[#allocation3 + $0x28] sm:$0xff] }
 0x6ac   : > { %v9826_v41 = vld [vmem:[#allocation3 + $0x68] sm:$0xff]  ;;  %v9453_v60 = vpop.f32.mrf.mxu1  ;;  %v9784_v21 = vpop.f32.mrf.mxu0 }
 0x6ad   : > { %9867 = vst.msk [vmem:[#allocation3 + $0x50] sm:$0xff] %vm303_vm3, %v9845_v13  ;;  %v9848_v3 = vadd.f32 %v14848_v20, %v9826_v41  ;;  %9543 = vst.msk [vmem:[#allocation3 + $0x88] sm:$0xff] %vm303_vm3, %v9521_v12  ;;  %v9520_v2 = vadd.f32 %v9498_v35, %v9453_v60  ;;  %v10148_v13 = vld [vmem:[#allocation3 + $0x20] sm:$0xff] }
 0x6ae   : > { %v9825_v30 = vld [vmem:[#allocation3 + $0x60] sm:$0xff]  ;;  %v14820_v32 = vpop.f32.mrf.mxu1  ;;  %v14857_v31 = vpop.f32.mrf.mxu0 }
 0x6af   : > { %9870 = vst.msk [vmem:[#allocation3 + $0x68] sm:$0xff] %vm303_vm3, %v9848_v3  ;;  %v9847_v55 = vadd.f32 %v9825_v30, %v9764_v43  ;;  %9542 = vst.msk [vmem:[#allocation3 + $0x80] sm:$0xff] %vm303_vm3, %v9520_v2  ;;  %v9523_v15 = vadd.f32 %v14820_v32, %v9501_v47  ;;  %v10151_v3 = vld [vmem:[#allocation3 + $0x38] sm:$0xff] }
 0x6b0   : > { %v9828_v42 = vld [vmem:[#allocation3 + $0x78] sm:$0xff]  ;;  %v9463_v54 = vpop.f32.mrf.mxu1  ;;  %v9794_v57 = vpop.f32.mrf.mxu0 }
 0x6b1   : > { %9869 = vst.msk [vmem:[#allocation3 + $0x60] sm:$0xff] %vm303_vm3, %v9847_v55  ;;  %v9850_v49 = vadd.f32 %v14851_v17, %v9828_v42  ;;  %9545 = vst.msk [vmem:[#allocation3 + $0x98] sm:$0xff] %vm303_vm3, %v9523_v15  ;;  %v9522_v51 = vadd.f32 %v9500_v5, %v9463_v54  ;;  %v10150_v55 = vld [vmem:[#allocation3 + $0x30] sm:$0xff] }
 0x6b2   : > { %v9827_v14 = vld [vmem:[#allocation3 + $0x70] sm:$0xff]  ;;  %v14823_v59 = vpop.f32.mrf.mxu1  ;;  %v14860_v39 = vpop.f32.mrf.mxu0 }
 0x6b3   : > { %9872 = vst.msk [vmem:[#allocation3 + $0x78] sm:$0xff] %vm303_vm3, %v9850_v49  ;;  %v9849_v52 = vadd.f32 %v9827_v14, %v9774_v8  ;;  %9544 = vst.msk [vmem:[#allocation3 + $0x90] sm:$0xff] %vm303_vm3, %v9522_v51  ;;  %v9525_v6 = vadd.f32 %v14823_v59, %v9503_v11  ;;  %v10153_v49 = vld [vmem:[#allocation3 + $0x48] sm:$0xff] }
 0x6b4   : > { %v9830_v38 = vld [vmem:[#allocation3 + $0x88] sm:$0xff]  ;;  %v9473_v22 = vpop.f32.mrf.mxu1  ;;  %v9804_v63 = vpop.f32.mrf.mxu0 }
 0x6b5   : > { %9871 = vst.msk [vmem:[#allocation3 + $0x70] sm:$0xff] %vm303_vm3, %v9849_v52  ;;  %v9852_v26 = vadd.f32 %v14854_v50, %v9830_v38  ;;  %9547 = vst.msk [vmem:[#allocation3 + $0xa8] sm:$0xff] %vm303_vm3, %v9525_v6  ;;  %v9524_v36 = vadd.f32 %v9502_v29, %v9473_v22  ;;  %v10152_v52 = vld [vmem:[#allocation3 + $0x40] sm:$0xff] }
 0x6b6   : > { %v9829_v33 = vld [vmem:[#allocation3 + $0x80] sm:$0xff]  ;;  %v14867_v4 = vpop.f32.mrf.mxu1  ;;  %v14904_v24 = vpop.f32.mrf.mxu0 }
 0x6b7   : > { %9874 = vst.msk [vmem:[#allocation3 + $0x88] sm:$0xff] %vm303_vm3, %v9852_v26  ;;  %v9851_v0 = vadd.f32 %v9829_v33, %v9784_v21  ;;  %9546 = vst.msk [vmem:[#allocation3 + $0xa0] sm:$0xff] %vm303_vm3, %v9524_v36  ;;  %v10167_v25 = vadd.f32 %v14867_v4, %v10145_v16  ;;  %v10155_v26 = vld [vmem:[#allocation3 + $0x58] sm:$0xff] }
 0x6b8   : > { %v9832_v56 = vld [vmem:[#allocation3 + $0x98] sm:$0xff]  ;;  %v10035_v20 = vpop.f32.mrf.mxu1  ;;  %v10366_v18 = vpop.f32.mrf.mxu0 }
 0x6b9   : > { %9873 = vst.msk [vmem:[#allocation3 + $0x80] sm:$0xff] %vm303_vm3, %v9851_v0  ;;  %v9854_v40 = vadd.f32 %v14857_v31, %v9832_v56  ;;  %10189 = vst.msk [vmem:[#allocation3 + $0x8] sm:$0xff] %vm303_vm3, %v10167_v25  ;;  %v10166_v48 = vadd.f32 %v10144_v44, %v10035_v20  ;;  %v10154_v0 = vld [vmem:[#allocation3 + $0x50] sm:$0xff] }
 0x6ba   : > { %v9831_v37 = vld [vmem:[#allocation3 + $0x90] sm:$0xff]  ;;  %v14870_v43 = vpop.f32.mrf.mxu1  ;;  %v14907_v1 = vpop.f32.mrf.mxu0 }
 0x6bb   : > { %9876 = vst.msk [vmem:[#allocation3 + $0x98] sm:$0xff] %vm303_vm3, %v9854_v40  ;;  %v9853_v10 = vadd.f32 %v9831_v37, %v9794_v57  ;;  %10188 = vst.msk [vmem:[#allocation3] sm:$0xff] %vm303_vm3, %v10166_v48  ;;  %v10169_v46 = vadd.f32 %v14870_v43, %v10147_v23  ;;  %v10157_v40 = vld [vmem:[#allocation3 + $0x68] sm:$0xff] }
 0x6bc   : > { %v9834_v53 = vld [vmem:[#allocation3 + $0xa8] sm:$0xff]  ;;  %v10045_v17 = vpop.f32.mrf.mxu1  ;;  %v10376_v27 = vpop.f32.mrf.mxu0 }
 0x6bd   : > { %9875 = vst.msk [vmem:[#allocation3 + $0x90] sm:$0xff] %vm303_vm3, %v9853_v10  ;;  %v9856_v28 = vadd.f32 %v14860_v39, %v9834_v53  ;;  %10191 = vst.msk [vmem:[#allocation3 + $0x18] sm:$0xff] %vm303_vm3, %v10169_v46  ;;  %v10168_v9 = vadd.f32 %v10146_v62, %v10045_v17  ;;  %v10156_v10 = vld [vmem:[#allocation3 + $0x60] sm:$0xff] }
 0x6be   : > { %v9833_v19 = vld [vmem:[#allocation3 + $0xa0] sm:$0xff]  ;;  %v14873_v8 = vpop.f32.mrf.mxu1  ;;  %v14910_v34 = vpop.f32.mrf.mxu0 }
 0x6bf   : > { %9878 = vst.msk [vmem:[#allocation3 + $0xa8] sm:$0xff] %vm303_vm3, %v9856_v28  ;;  %v9855_v58 = vadd.f32 %v9833_v19, %v9804_v63  ;;  %10190 = vst.msk [vmem:[#allocation3 + $0x10] sm:$0xff] %vm303_vm3, %v10168_v9  ;;  %v10171_v45 = vadd.f32 %v14873_v8, %v10149_v61  ;;  %v10159_v28 = vld [vmem:[#allocation3 + $0x78] sm:$0xff] }
 0x6c0   : > { %v10476_v7 = vld [vmem:[#allocation3 + $0x8] sm:$0xff]  ;;  %v10055_v50 = vpop.f32.mrf.mxu1  ;;  %v10386_v12 = vpop.f32.mrf.mxu0 }
 0x6c1   : > { %9877 = vst.msk [vmem:[#allocation3 + $0xa0] sm:$0xff] %vm303_vm3, %v9855_v58  ;;  %v10498_v41 = vadd.f32 %v14904_v24, %v10476_v7  ;;  %10193 = vst.msk [vmem:[#allocation3 + $0x28] sm:$0xff] %vm303_vm3, %v10171_v45  ;;  %v10170_v60 = vadd.f32 %v10148_v13, %v10055_v50  ;;  %v10158_v58 = vld [vmem:[#allocation3 + $0x70] sm:$0xff] }
 0x6c2   : > { %v10475_v35 = vld [vmem:[#allocation3] sm:$0xff]  ;;  %v14876_v21 = vpop.f32.mrf.mxu1  ;;  %v14913_v2 = vpop.f32.mrf.mxu0 }
 0x6c3   : > { %10520 = vst.msk [vmem:[#allocation3 + $0x8] sm:$0xff] %vm303_vm3, %v10498_v41  ;;  %v10497_v30 = vadd.f32 %v10475_v35, %v10366_v18  ;;  %10192 = vst.msk [vmem:[#allocation3 + $0x20] sm:$0xff] %vm303_vm3, %v10170_v60  ;;  %v10173_v32 = vadd.f32 %v14876_v21, %v10151_v3  ;;  %v10161_v41 = vld [vmem:[#allocation3 + $0x88] sm:$0xff] }
 0x6c4   : > { %v10478_v47 = vld [vmem:[#allocation3 + $0x18] sm:$0xff]  ;;  %v10065_v31 = vpop.f32.mrf.mxu1  ;;  %v10396_v15 = vpop.f32.mrf.mxu0 }
 0x6c5   : > { %10519 = vst.msk [vmem:[#allocation3] sm:$0xff] %vm303_vm3, %v10497_v30  ;;  %v10500_v42 = vadd.f32 %v14907_v1, %v10478_v47  ;;  %10195 = vst.msk [vmem:[#allocation3 + $0x38] sm:$0xff] %vm303_vm3, %v10173_v32  ;;  %v10172_v54 = vadd.f32 %v10150_v55, %v10065_v31  ;;  %v10160_v30 = vld [vmem:[#allocation3 + $0x80] sm:$0xff] }
 0x6c6   : > { %v10477_v5 = vld [vmem:[#allocation3 + $0x10] sm:$0xff]  ;;  %v14879_v57 = vpop.f32.mrf.mxu1  ;;  %v14916_v51 = vpop.f32.mrf.mxu0 }
 0x6c7   : > { %10522 = vst.msk [vmem:[#allocation3 + $0x18] sm:$0xff] %vm303_vm3, %v10500_v42  ;;  %v10499_v14 = vadd.f32 %v10477_v5, %v10376_v27  ;;  %10194 = vst.msk [vmem:[#allocation3 + $0x30] sm:$0xff] %vm303_vm3, %v10172_v54  ;;  %v10175_v59 = vadd.f32 %v14879_v57, %v10153_v49  ;;  %v10163_v42 = vld [vmem:[#allocation3 + $0x98] sm:$0xff] }
 0x6c8   : > { %v10480_v11 = vld [vmem:[#allocation3 + $0x28] sm:$0xff]  ;;  %v10075_v39 = vpop.f32.mrf.mxu1  ;;  %v10406_v6 = vpop.f32.mrf.mxu0 }
 0x6c9   : > { %10521 = vst.msk [vmem:[#allocation3 + $0x10] sm:$0xff] %vm303_vm3, %v10499_v14  ;;  %v10502_v38 = vadd.f32 %v14910_v34, %v10480_v11  ;;  %10197 = vst.msk [vmem:[#allocation3 + $0x48] sm:$0xff] %vm303_vm3, %v10175_v59  ;;  %v10174_v22 = vadd.f32 %v10152_v52, %v10075_v39  ;;  %v10162_v14 = vld [vmem:[#allocation3 + $0x90] sm:$0xff] }
 0x6ca   : > { %v10479_v29 = vld [vmem:[#allocation3 + $0x20] sm:$0xff]  ;;  %v14882_v63 = vpop.f32.mrf.mxu1  ;;  %v14919_v36 = vpop.f32.mrf.mxu0 }
 0x6cb   : > { %10524 = vst.msk [vmem:[#allocation3 + $0x28] sm:$0xff] %vm303_vm3, %v10502_v38  ;;  %v10501_v33 = vadd.f32 %v10479_v29, %v10386_v12  ;;  %10196 = vst.msk [vmem:[#allocation3 + $0x40] sm:$0xff] %vm303_vm3, %v10174_v22  ;;  %v10177_v4 = vadd.f32 %v14882_v63, %v10155_v26  ;;  %v10165_v38 = vld [vmem:[#allocation3 + $0xa8] sm:$0xff] }
 0x6cc   : > { %v10482_v16 = vld [vmem:[#allocation3 + $0x38] sm:$0xff]  ;;  %v10085_v24 = vpop.f32.mrf.mxu1  ;;  %v10416_v25 = vpop.f32.mrf.mxu0 }
 0x6cd   : > { %10523 = vst.msk [vmem:[#allocation3 + $0x20] sm:$0xff] %vm303_vm3, %v10501_v33  ;;  %v10504_v56 = vadd.f32 %v14913_v2, %v10482_v16  ;;  %10199 = vst.msk [vmem:[#allocation3 + $0x58] sm:$0xff] %vm303_vm3, %v10177_v4  ;;  %v10176_v20 = vadd.f32 %v10154_v0, %v10085_v24  ;;  %v10164_v33 = vld [vmem:[#allocation3 + $0xa0] sm:$0xff] }
 0x6ce   : > { %v10481_v44 = vld [vmem:[#allocation3 + $0x30] sm:$0xff]  ;;  %v14885_v18 = vpop.f32.mrf.mxu1  ;;  %v14922_v48 = vpop.f32.mrf.mxu0 }
 0x6cf   : > { %10526 = vst.msk [vmem:[#allocation3 + $0x38] sm:$0xff] %vm303_vm3, %v10504_v56  ;;  %v10503_v37 = vadd.f32 %v10481_v44, %v10396_v15  ;;  %10198 = vst.msk [vmem:[#allocation3 + $0x50] sm:$0xff] %vm303_vm3, %v10176_v20  ;;  %v10179_v43 = vadd.f32 %v14885_v18, %v10157_v40  ;;  %v10807_v56 = vld [vmem:[#allocation3 + $0x8] sm:$0xff] }
 0x6d0   : > { %v10484_v23 = vld [vmem:[#allocation3 + $0x48] sm:$0xff]  ;;  %v10095_v1 = vpop.f32.mrf.mxu1  ;;  %v10426_v46 = vpop.f32.mrf.mxu0 }
 0x6d1   : > { %10525 = vst.msk [vmem:[#allocation3 + $0x30] sm:$0xff] %vm303_vm3, %v10503_v37  ;;  %v10506_v53 = vadd.f32 %v14916_v51, %v10484_v23  ;;  %10201 = vst.msk [vmem:[#allocation3 + $0x68] sm:$0xff] %vm303_vm3, %v10179_v43  ;;  %v10178_v17 = vadd.f32 %v10156_v10, %v10095_v1  ;;  %v10806_v37 = vld [vmem:[#allocation3] sm:$0xff] }
 0x6d2   : > { %v10483_v62 = vld [vmem:[#allocation3 + $0x40] sm:$0xff]  ;;  %v14888_v27 = vpop.f32.mrf.mxu1  ;;  %v14925_v9 = vpop.f32.mrf.mxu0 }
 0x6d3   : > { %10528 = vst.msk [vmem:[#allocation3 + $0x48] sm:$0xff] %vm303_vm3, %v10506_v53  ;;  %v10505_v19 = vadd.f32 %v10483_v62, %v10406_v6  ;;  %10200 = vst.msk [vmem:[#allocation3 + $0x60] sm:$0xff] %vm303_vm3, %v10178_v17  ;;  %v10181_v8 = vadd.f32 %v14888_v27, %v10159_v28  ;;  %v10809_v53 = vld [vmem:[#allocation3 + $0x18] sm:$0xff] }
 0x6d4   : > { %v10486_v61 = vld [vmem:[#allocation3 + $0x58] sm:$0xff]  ;;  %v10105_v34 = vpop.f32.mrf.mxu1  ;;  %v10436_v45 = vpop.f32.mrf.mxu0 }
 0x6d5   : > { %10527 = vst.msk [vmem:[#allocation3 + $0x40] sm:$0xff] %vm303_vm3, %v10505_v19  ;;  %v10508_v7 = vadd.f32 %v14919_v36, %v10486_v61  ;;  %10203 = vst.msk [vmem:[#allocation3 + $0x78] sm:$0xff] %vm303_vm3, %v10181_v8  ;;  %v10180_v50 = vadd.f32 %v10158_v58, %v10105_v34  ;;  %v10808_v19 = vld [vmem:[#allocation3 + $0x10] sm:$0xff] }
 0x6d6   : > { %v10485_v13 = vld [vmem:[#allocation3 + $0x50] sm:$0xff]  ;;  %v14891_v12 = vpop.f32.mrf.mxu1  ;;  %v14928_v60 = vpop.f32.mrf.mxu0 }
 0x6d7   : > { %10530 = vst.msk [vmem:[#allocation3 + $0x58] sm:$0xff] %vm303_vm3, %v10508_v7  ;;  %v10507_v35 = vadd.f32 %v10485_v13, %v10416_v25  ;;  %10202 = vst.msk [vmem:[#allocation3 + $0x70] sm:$0xff] %vm303_vm3, %v10180_v50  ;;  %v10183_v21 = vadd.f32 %v14891_v12, %v10161_v41  ;;  %v10811_v7 = vld [vmem:[#allocation3 + $0x28] sm:$0xff] }
 0x6d8   : > { %v10488_v3 = vld [vmem:[#allocation3 + $0x68] sm:$0xff]  ;;  %v10115_v2 = vpop.f32.mrf.mxu1  ;;  %v10446_v32 = vpop.f32.mrf.mxu0 }
 0x6d9   : > { %10529 = vst.msk [vmem:[#allocation3 + $0x50] sm:$0xff] %vm303_vm3, %v10507_v35  ;;  %v10510_v47 = vadd.f32 %v14922_v48, %v10488_v3  ;;  %10205 = vst.msk [vmem:[#allocation3 + $0x88] sm:$0xff] %vm303_vm3, %v10183_v21  ;;  %v10182_v31 = vadd.f32 %v10160_v30, %v10115_v2  ;;  %v10810_v35 = vld [vmem:[#allocation3 + $0x20] sm:$0xff] }
 0x6da   : > { %v10487_v55 = vld [vmem:[#allocation3 + $0x60] sm:$0xff]  ;;  %v14894_v15 = vpop.f32.mrf.mxu1  ;;  %v14931_v54 = vpop.f32.mrf.mxu0 }
 0x6db   : > { %10532 = vst.msk [vmem:[#allocation3 + $0x68] sm:$0xff] %vm303_vm3, %v10510_v47  ;;  %v10509_v5 = vadd.f32 %v10487_v55, %v10426_v46  ;;  %10204 = vst.msk [vmem:[#allocation3 + $0x80] sm:$0xff] %vm303_vm3, %v10182_v31  ;;  %v10185_v57 = vadd.f32 %v14894_v15, %v10163_v42  ;;  %v10813_v47 = vld [vmem:[#allocation3 + $0x38] sm:$0xff] }
 0x6dc   : > { %v10490_v49 = vld [vmem:[#allocation3 + $0x78] sm:$0xff]  ;;  %v10125_v51 = vpop.f32.mrf.mxu1  ;;  %v10456_v59 = vpop.f32.mrf.mxu0 }
 0x6dd   : > { %10531 = vst.msk [vmem:[#allocation3 + $0x60] sm:$0xff] %vm303_vm3, %v10509_v5  ;;  %v10512_v11 = vadd.f32 %v14925_v9, %v10490_v49  ;;  %10207 = vst.msk [vmem:[#allocation3 + $0x98] sm:$0xff] %vm303_vm3, %v10185_v57  ;;  %v10184_v39 = vadd.f32 %v10162_v14, %v10125_v51  ;;  %v10812_v5 = vld [vmem:[#allocation3 + $0x30] sm:$0xff] }
 0x6de   : > { %v10489_v52 = vld [vmem:[#allocation3 + $0x70] sm:$0xff]  ;;  %v14897_v6 = vpop.f32.mrf.mxu1  ;;  %v14934_v22 = vpop.f32.mrf.mxu0 }
 0x6df   : > { %10534 = vst.msk [vmem:[#allocation3 + $0x78] sm:$0xff] %vm303_vm3, %v10512_v11  ;;  %v10511_v29 = vadd.f32 %v10489_v52, %v10436_v45  ;;  %10206 = vst.msk [vmem:[#allocation3 + $0x90] sm:$0xff] %vm303_vm3, %v10184_v39  ;;  %v10187_v63 = vadd.f32 %v14897_v6, %v10165_v38  ;;  %v10815_v11 = vld [vmem:[#allocation3 + $0x48] sm:$0xff] }
 0x6e0   : > { %v10492_v26 = vld [vmem:[#allocation3 + $0x88] sm:$0xff]  ;;  %v10135_v36 = vpop.f32.mrf.mxu1  ;;  %v10466_v4 = vpop.f32.mrf.mxu0 }
 0x6e1   : > { %10533 = vst.msk [vmem:[#allocation3 + $0x70] sm:$0xff] %vm303_vm3, %v10511_v29  ;;  %v10514_v16 = vadd.f32 %v14928_v60, %v10492_v26  ;;  %10209 = vst.msk [vmem:[#allocation3 + $0xa8] sm:$0xff] %vm303_vm3, %v10187_v63  ;;  %v10186_v24 = vadd.f32 %v10164_v33, %v10135_v36  ;;  %v10814_v29 = vld [vmem:[#allocation3 + $0x40] sm:$0xff] }
 0x6e2   : > { %v10491_v0 = vld [vmem:[#allocation3 + $0x80] sm:$0xff]  ;;  %v14941_v25 = vpop.f32.mrf.mxu1  ;;  %v14978_v20 = vpop.f32.mrf.mxu0 }
 0x6e3   : > { %10536 = vst.msk [vmem:[#allocation3 + $0x88] sm:$0xff] %vm303_vm3, %v10514_v16  ;;  %v10513_v44 = vadd.f32 %v10491_v0, %v10446_v32  ;;  %10208 = vst.msk [vmem:[#allocation3 + $0xa0] sm:$0xff] %vm303_vm3, %v10186_v24  ;;  %v10829_v18 = vadd.f32 %v14941_v25, %v10807_v56  ;;  %v10817_v16 = vld [vmem:[#allocation3 + $0x58] sm:$0xff] }
 0x6e4   : > { %v10494_v40 = vld [vmem:[#allocation3 + $0x98] sm:$0xff]  ;;  %v10697_v48 = vpop.f32.mrf.mxu1  ;;  %v11028_v43 = vpop.f32.mrf.mxu0 }
 0x6e5   : > { %10535 = vst.msk [vmem:[#allocation3 + $0x80] sm:$0xff] %vm303_vm3, %v10513_v44  ;;  %v10516_v23 = vadd.f32 %v14931_v54, %v10494_v40  ;;  %10851 = vst.msk [vmem:[#allocation3 + $0x8] sm:$0xff] %vm303_vm3, %v10829_v18  ;;  %v10828_v1 = vadd.f32 %v10806_v37, %v10697_v48  ;;  %v10816_v44 = vld [vmem:[#allocation3 + $0x50] sm:$0xff] }
 0x6e6   : > { %v10493_v10 = vld [vmem:[#allocation3 + $0x90] sm:$0xff]  ;;  %v14944_v46 = vpop.f32.mrf.mxu1  ;;  %v14981_v17 = vpop.f32.mrf.mxu0 }
 0x6e7   : > { %10538 = vst.msk [vmem:[#allocation3 + $0x98] sm:$0xff] %vm303_vm3, %v10516_v23  ;;  %v10515_v62 = vadd.f32 %v10493_v10, %v10456_v59  ;;  %10850 = vst.msk [vmem:[#allocation3] sm:$0xff] %vm303_vm3, %v10828_v1  ;;  %v10831_v27 = vadd.f32 %v14944_v46, %v10809_v53  ;;  %v10819_v23 = vld [vmem:[#allocation3 + $0x68] sm:$0xff] }
 0x6e8   : > { %v10496_v28 = vld [vmem:[#allocation3 + $0xa8] sm:$0xff]  ;;  %v10707_v9 = vpop.f32.mrf.mxu1  ;;  %v11038_v8 = vpop.f32.mrf.mxu0 }
 0x6e9   : > { %10537 = vst.msk [vmem:[#allocation3 + $0x90] sm:$0xff] %vm303_vm3, %v10515_v62  ;;  %v10518_v61 = vadd.f32 %v14934_v22, %v10496_v28  ;;  %10853 = vst.msk [vmem:[#allocation3 + $0x18] sm:$0xff] %vm303_vm3, %v10831_v27  ;;  %v10830_v34 = vadd.f32 %v10808_v19, %v10707_v9  ;;  %v10818_v62 = vld [vmem:[#allocation3 + $0x60] sm:$0xff] }
 0x6ea   : > { %v10495_v58 = vld [vmem:[#allocation3 + $0xa0] sm:$0xff]  ;;  %v14947_v45 = vpop.f32.mrf.mxu1  ;;  %v14984_v50 = vpop.f32.mrf.mxu0 }
 0x6eb   : > { %10540 = vst.msk [vmem:[#allocation3 + $0xa8] sm:$0xff] %vm303_vm3, %v10518_v61  ;;  %v10517_v13 = vadd.f32 %v10495_v58, %v10466_v4  ;;  %10852 = vst.msk [vmem:[#allocation3 + $0x10] sm:$0xff] %vm303_vm3, %v10830_v34  ;;  %v10833_v12 = vadd.f32 %v14947_v45, %v10811_v7  ;;  %v10821_v61 = vld [vmem:[#allocation3 + $0x78] sm:$0xff] }
 0x6ec   : > { %v11138_v41 = vld [vmem:[#allocation3 + $0x8] sm:$0xff]  ;;  %v10717_v60 = vpop.f32.mrf.mxu1  ;;  %v11048_v21 = vpop.f32.mrf.mxu0 }
 0x6ed   : > { %10539 = vst.msk [vmem:[#allocation3 + $0xa0] sm:$0xff] %vm303_vm3, %v10517_v13  ;;  %v11160_v3 = vadd.f32 %v14978_v20, %v11138_v41  ;;  %10855 = vst.msk [vmem:[#allocation3 + $0x28] sm:$0xff] %vm303_vm3, %v10833_v12  ;;  %v10832_v2 = vadd.f32 %v10810_v35, %v10717_v60  ;;  %v10820_v13 = vld [vmem:[#allocation3 + $0x70] sm:$0xff] }
 0x6ee   : > { %v11137_v30 = vld [vmem:[#allocation3] sm:$0xff]  ;;  %v14950_v32 = vpop.f32.mrf.mxu1  ;;  %v14987_v31 = vpop.f32.mrf.mxu0 }
 0x6ef   : > { %11182 = vst.msk [vmem:[#allocation3 + $0x8] sm:$0xff] %vm303_vm3, %v11160_v3  ;;  %v11159_v55 = vadd.f32 %v11137_v30, %v11028_v43  ;;  %10854 = vst.msk [vmem:[#allocation3 + $0x20] sm:$0xff] %vm303_vm3, %v10832_v2  ;;  %v10835_v15 = vadd.f32 %v14950_v32, %v10813_v47  ;;  %v10823_v3 = vld [vmem:[#allocation3 + $0x88] sm:$0xff] }
 0x6f0   : > { %v11140_v42 = vld [vmem:[#allocation3 + $0x18] sm:$0xff]  ;;  %v10727_v54 = vpop.f32.mrf.mxu1  ;;  %v11058_v57 = vpop.f32.mrf.mxu0 }
 0x6f1   : > { %11181 = vst.msk [vmem:[#allocation3] sm:$0xff] %vm303_vm3, %v11159_v55  ;;  %v11162_v49 = vadd.f32 %v14981_v17, %v11140_v42  ;;  %10857 = vst.msk [vmem:[#allocation3 + $0x38] sm:$0xff] %vm303_vm3, %v10835_v15  ;;  %v10834_v51 = vadd.f32 %v10812_v5, %v10727_v54  ;;  %v10822_v55 = vld [vmem:[#allocation3 + $0x80] sm:$0xff] }
 0x6f2   : > { %v11139_v14 = vld [vmem:[#allocation3 + $0x10] sm:$0xff]  ;;  %v14953_v59 = vpop.f32.mrf.mxu1  ;;  %v14990_v39 = vpop.f32.mrf.mxu0 }
 0x6f3   : > { %11184 = vst.msk [vmem:[#allocation3 + $0x18] sm:$0xff] %vm303_vm3, %v11162_v49  ;;  %v11161_v52 = vadd.f32 %v11139_v14, %v11038_v8  ;;  %10856 = vst.msk [vmem:[#allocation3 + $0x30] sm:$0xff] %vm303_vm3, %v10834_v51  ;;  %v10837_v6 = vadd.f32 %v14953_v59, %v10815_v11  ;;  %v10825_v49 = vld [vmem:[#allocation3 + $0x98] sm:$0xff] }
 0x6f4   : > { %v11142_v38 = vld [vmem:[#allocation3 + $0x28] sm:$0xff]  ;;  %v10737_v22 = vpop.f32.mrf.mxu1  ;;  %v11068_v63 = vpop.f32.mrf.mxu0 }
 0x6f5   : > { %11183 = vst.msk [vmem:[#allocation3 + $0x10] sm:$0xff] %vm303_vm3, %v11161_v52  ;;  %v11164_v26 = vadd.f32 %v14984_v50, %v11142_v38  ;;  %10859 = vst.msk [vmem:[#allocation3 + $0x48] sm:$0xff] %vm303_vm3, %v10837_v6  ;;  %v10836_v36 = vadd.f32 %v10814_v29, %v10737_v22 }
 0x6f6   : > { %v11141_v33 = vld [vmem:[#allocation3 + $0x20] sm:$0xff]  ;;  %v14956_v4 = vpop.f32.mrf.mxu1  ;;  %v14993_v24 = vpop.f32.mrf.mxu0 }
 0x6f7   : > { %11186 = vst.msk [vmem:[#allocation3 + $0x28] sm:$0xff] %vm303_vm3, %v11164_v26  ;;  %v11163_v0 = vadd.f32 %v11141_v33, %v11048_v21  ;;  %10858 = vst.msk [vmem:[#allocation3 + $0x40] sm:$0xff] %vm303_vm3, %v10836_v36  ;;  %v10839_v25 = vadd.f32 %v14956_v4, %v10817_v16  ;;  %v10826_v16 = vld [vmem:[#allocation3 + $0xa0] sm:$0xff] }
 0x6f8   : > { %v11144_v56 = vld [vmem:[#allocation3 + $0x38] sm:$0xff]  ;;  %v10747_v20 = vpop.f32.mrf.mxu1  ;;  %v11078_v18 = vpop.f32.mrf.mxu0 }
 0x6f9   : > { %11185 = vst.msk [vmem:[#allocation3 + $0x20] sm:$0xff] %vm303_vm3, %v11163_v0  ;;  %v11166_v40 = vadd.f32 %v14987_v31, %v11144_v56  ;;  %10861 = vst.msk [vmem:[#allocation3 + $0x58] sm:$0xff] %vm303_vm3, %v10839_v25  ;;  %v10838_v48 = vadd.f32 %v10816_v44, %v10747_v20  ;;  %v11469_v44 = vld [vmem:[#allocation3 + $0x8] sm:$0xff] }
 0x6fa   : > { %v11143_v37 = vld [vmem:[#allocation3 + $0x30] sm:$0xff]  ;;  %v14959_v43 = vpop.f32.mrf.mxu1  ;;  %v14996_v1 = vpop.f32.mrf.mxu0 }
 0x6fb   : > { %11188 = vst.msk [vmem:[#allocation3 + $0x38] sm:$0xff] %vm303_vm3, %v11166_v40  ;;  %v11165_v10 = vadd.f32 %v11143_v37, %v11058_v57  ;;  %10860 = vst.msk [vmem:[#allocation3 + $0x50] sm:$0xff] %vm303_vm3, %v10838_v48  ;;  %v10841_v46 = vadd.f32 %v14959_v43, %v10819_v23  ;;  %v11468_v43 = vld [vmem:[#allocation3] sm:$0xff] }
 0x6fc   : > { %v11146_v53 = vld [vmem:[#allocation3 + $0x48] sm:$0xff]  ;;  %v10757_v17 = vpop.f32.mrf.mxu1  ;;  %v11088_v27 = vpop.f32.mrf.mxu0 }
 0x6fd   : > { %11187 = vst.msk [vmem:[#allocation3 + $0x30] sm:$0xff] %vm303_vm3, %v11165_v10  ;;  %v11168_v28 = vadd.f32 %v14990_v39, %v11146_v53  ;;  %10863 = vst.msk [vmem:[#allocation3 + $0x68] sm:$0xff] %vm303_vm3, %v10841_v46  ;;  %v10840_v9 = vadd.f32 %v10818_v62, %v10757_v17  ;;  %v10824_v39 = vld [vmem:[#allocation3 + $0x90] sm:$0xff]  ;;  %v11471_v17 = vld [vmem:[#allocation3 + $0x18] sm:$0xff] }
 0x6fe   : > { %v11145_v19 = vld [vmem:[#allocation3 + $0x40] sm:$0xff]  ;;  %v14962_v8 = vpop.f32.mrf.mxu1  ;;  %v14999_v34 = vpop.f32.mrf.mxu0 }
 0x6ff   : > { %11190 = vst.msk [vmem:[#allocation3 + $0x48] sm:$0xff] %vm303_vm3, %v11168_v28  ;;  %v11167_v58 = vadd.f32 %v11145_v19, %v11068_v63  ;;  %10862 = vst.msk [vmem:[#allocation3 + $0x60] sm:$0xff] %vm303_vm3, %v10840_v9  ;;  %v10843_v45 = vadd.f32 %v14962_v8, %v10821_v61  ;;  %v10827_v63 = vld [vmem:[#allocation3 + $0xa8] sm:$0xff]  ;;  %v11470_v19 = vld [vmem:[#allocation3 + $0x10] sm:$0xff] }
 0x700   : > { %v11148_v7 = vld [vmem:[#allocation3 + $0x58] sm:$0xff]  ;;  %v10767_v50 = vpop.f32.mrf.mxu1  ;;  %v11098_v12 = vpop.f32.mrf.mxu0 }
 0x701   : > { %11189 = vst.msk [vmem:[#allocation3 + $0x40] sm:$0xff] %vm303_vm3, %v11167_v58  ;;  %v11170_v41 = vadd.f32 %v14993_v24, %v11148_v7  ;;  %10865 = vst.msk [vmem:[#allocation3 + $0x78] sm:$0xff] %vm303_vm3, %v10843_v45  ;;  %v10842_v60 = vadd.f32 %v10820_v13, %v10767_v50  ;;  %v19089_v58 = vld [vmem:[%s19196_s4 + $0x3] ss:$0 sm:$0xff] }
 0x702   : > { %v11147_v35 = vld [vmem:[#allocation3 + $0x50] sm:$0xff]  ;;  %v14965_v21 = vpop.f32.mrf.mxu1  ;;  %v15002_v2 = vpop.f32.mrf.mxu0  ;;  %v11473_v50 = vld [vmem:[#allocation3 + $0x28] sm:$0xff] }
 0x703   : > { %11192 = vst.msk [vmem:[#allocation3 + $0x58] sm:$0xff] %vm303_vm3, %v11170_v41  ;;  %v11169_v30 = vadd.f32 %v11147_v35, %v11078_v18  ;;  %10864 = vst.msk [vmem:[#allocation3 + $0x70] sm:$0xff] %vm303_vm3, %v10842_v60  ;;  %v10845_v32 = vadd.f32 %v14965_v21, %v10823_v3  ;;  %v11472_v35 = vld [vmem:[#allocation3 + $0x20] sm:$0xff] }
 0x704   : > { %v11150_v47 = vld [vmem:[#allocation3 + $0x68] sm:$0xff]  ;;  %v10777_v31 = vpop.f32.mrf.mxu1  ;;  %v11108_v5 = vpop.f32.mrf.mxu0 }
 0x705   : > { %11191 = vst.msk [vmem:[#allocation3 + $0x50] sm:$0xff] %vm303_vm3, %v11169_v30  ;;  %v11172_v15 = vadd.f32 %v14996_v1, %v11150_v47  ;;  %10867 = vst.msk [vmem:[#allocation3 + $0x88] sm:$0xff] %vm303_vm3, %v10845_v32  ;;  %v10844_v42 = vadd.f32 %v10822_v55, %v10777_v31  ;;  %v11475_v32 = vld [vmem:[#allocation3 + $0x38] sm:$0xff]  ;;  %v15064_v47 = vld [vmem:[#allocation4 + $0x20] sm:$0xff] }
 0x706   : > { %v11149_v54 = vld [vmem:[#allocation3 + $0x60] sm:$0xff]  ;;  %v14968_v57 = vpop.f32.mrf.mxu1  ;;  %v15005_v22 = vpop.f32.mrf.mxu0 }
 0x707   : > { %11194 = vst.msk [vmem:[#allocation3 + $0x68] sm:$0xff] %vm303_vm3, %v11172_v15  ;;  %v11171_v51 = vadd.f32 %v11149_v54, %v11088_v27  ;;  %10866 = vst.msk [vmem:[#allocation3 + $0x80] sm:$0xff] %vm303_vm3, %v10844_v42  ;;  %v10847_v14 = vadd.f32 %v14968_v57, %v10825_v49  ;;  %v15065_v49 = vld [vmem:[#allocation4 + $0x18] sm:$0xff] }
 0x708   : > { %v11152_v59 = vld [vmem:[#allocation3 + $0x78] sm:$0xff]  ;;  %v10787_v11 = vpop.f32.mrf.mxu1  ;;  %v11118_v56 = vpop.f32.mrf.mxu0 }
 0x709   : > { %11193 = vst.msk [vmem:[#allocation3 + $0x60] sm:$0xff] %vm303_vm3, %v11171_v51  ;;  %v11174_v52 = vadd.f32 %v14999_v34, %v11152_v59  ;;  %10869 = vst.msk [vmem:[#allocation3 + $0x98] sm:$0xff] %vm303_vm3, %v10847_v14  ;;  %v10846_v6 = vadd.f32 %v10824_v39, %v10787_v11 }
 0x70a   : > { %v11151_v38 = vld [vmem:[#allocation3 + $0x70] sm:$0xff]  ;;  %v14971_v29 = vpop.f32.mrf.mxu1  ;;  %v15008_v23 = vpop.f32.mrf.mxu0 }
 0x70b   : > { %11196 = vst.msk [vmem:[#allocation3 + $0x78] sm:$0xff] %vm303_vm3, %v11174_v52  ;;  %v11173_v26 = vadd.f32 %v11151_v38, %v11098_v12  ;;  %10868 = vst.msk [vmem:[#allocation3 + $0x90] sm:$0xff] %vm303_vm3, %v10846_v6  ;;  %v10849_v36 = vadd.f32 %v14971_v29, %v10827_v63  ;;  %v15066_v38 = vld [vmem:[#allocation4 + $0x30] sm:$0xff]  ;;  %v11477_v63 = vld [vmem:[#allocation3 + $0x48] sm:$0xff] }
 0x70c   : > { %v11154_v33 = vld [vmem:[#allocation3 + $0x88] sm:$0xff]  ;;  %v10797_v4 = vpop.f32.mrf.mxu1  ;;  %v11128_v8 = vpop.f32.mrf.mxu0 }
 0x70d   : > { %11195 = vst.msk [vmem:[#allocation3 + $0x70] sm:$0xff] %vm303_vm3, %v11173_v26  ;;  %v11176_v24 = vadd.f32 %v15002_v2, %v11154_v33  ;;  %10871 = vst.msk [vmem:[#allocation3 + $0xa8] sm:$0xff] %vm303_vm3, %v10849_v36  ;;  %v10848_v0 = vadd.f32 %v10826_v16, %v10797_v4 }
 0x70e   : > { %v11153_v25 = vld [vmem:[#allocation3 + $0x80] sm:$0xff]  ;;  %v15015_v20 = vpop.f32.mrf.mxu1 }
 0x70f   : > { %11198 = vst.msk [vmem:[#allocation3 + $0x88] sm:$0xff] %vm303_vm3, %v11176_v24  ;;  %v11175_v18 = vadd.f32 %v11153_v25, %v11108_v5  ;;  %10870 = vst.msk [vmem:[#allocation3 + $0xa0] sm:$0xff] %vm303_vm3, %v10848_v0  ;;  %v11491_v40 = vadd.f32 %v15015_v20, %v11469_v44  ;;  %v11474_v5 = vld [vmem:[#allocation3 + $0x30] sm:$0xff]  ;;  %v15067_v24 = vld [vmem:[#allocation4 + $0x28] sm:$0xff] }
 0x710   : > { %v11156_v48 = vld [vmem:[#allocation3 + $0x98] sm:$0xff]  ;;  %v11359_v37 = vpop.f32.mrf.mxu1 }
 0x711   : > { %11197 = vst.msk [vmem:[#allocation3 + $0x80] sm:$0xff] %vm303_vm3, %v11175_v18  ;;  %v11178_v1 = vadd.f32 %v15005_v22, %v11156_v48  ;;  %11513 = vst.msk [vmem:[#allocation3 + $0x8] sm:$0xff] %vm303_vm3, %v11491_v40  ;;  %v11490_v10 = vadd.f32 %v11468_v43, %v11359_v37  ;;  %v15068_v37 = vld [vmem:[#allocation4 + $0x40] sm:$0xff] }
 0x712   : > { %v11155_v46 = vld [vmem:[#allocation3 + $0x90] sm:$0xff]  ;;  %v15018_v53 = vpop.f32.mrf.mxu1 }
 0x713   : > { %11200 = vst.msk [vmem:[#allocation3 + $0x98] sm:$0xff] %vm303_vm3, %v11178_v1  ;;  %v11177_v62 = vadd.f32 %v11155_v46, %v11118_v56  ;;  %11512 = vst.msk [vmem:[#allocation3] sm:$0xff] %vm303_vm3, %v11490_v10  ;;  %v11493_v27 = vadd.f32 %v15018_v53, %v11471_v17  ;;  %v11476_v56 = vld [vmem:[#allocation3 + $0x40] sm:$0xff]  ;;  %v11479_v1 = vld [vmem:[#allocation3 + $0x58] sm:$0xff] }
 0x714   : > { %v11158_v28 = vld [vmem:[#allocation3 + $0xa8] sm:$0xff]  ;;  %v11369_v9 = vpop.f32.mrf.mxu1 }
 0x715   : > { %11199 = vst.msk [vmem:[#allocation3 + $0x90] sm:$0xff] %vm303_vm3, %v11177_v62  ;;  %11515 = vst.msk [vmem:[#allocation3 + $0x18] sm:$0xff] %vm303_vm3, %v11493_v27  ;;  %v11180_v61 = vadd.f32 %v15008_v23, %v11158_v28  ;;  %v11492_v34 = vadd.f32 %v11470_v19, %v11369_v9  ;;  %v15069_v27 = vld [vmem:[#allocation4 + $0x38] sm:$0xff]  ;;  %v11478_v19 = vld [vmem:[#allocation3 + $0x50] sm:$0xff] }
 0x716   : > { %v11157_v45 = vld [vmem:[#allocation3 + $0xa0] sm:$0xff]  ;;  %v15021_v7 = vpop.f32.mrf.mxu1 }
 0x717   : > { %11202 = vst.msk [vmem:[#allocation3 + $0xa8] sm:$0xff] %vm303_vm3, %v11180_v61  ;;  %11514 = vst.msk [vmem:[#allocation3 + $0x10] sm:$0xff] %vm303_vm3, %v11492_v34  ;;  %v11179_v13 = vadd.f32 %v11157_v45, %v11128_v8  ;;  %v11495_v12 = vadd.f32 %v15021_v7, %v11473_v50  ;;  %v15070_v50 = vld [vmem:[#allocation4 + $0x50] sm:$0xff] }
 0x718   : > { %v11557_v41 = vld [vmem:[#allocation3 + $0x8] sm:$0xff]  ;;  %v11379_v60 = vpop.f32.mrf.mxu1 }
 0x719   : > { %v11583_v21 = vadd.f32 %v19089_v58, %v11557_v41  ;;  %11201 = vst.msk [vmem:[#allocation3 + $0xa0] sm:$0xff] %vm303_vm3, %v11179_v13  ;;  %11517 = vst.msk [vmem:[#allocation3 + $0x28] sm:$0xff] %vm303_vm3, %v11495_v12  ;;  %v11494_v3 = vadd.f32 %v11472_v35, %v11379_v60  ;;  %v11481_v41 = vld [vmem:[#allocation3 + $0x68] sm:$0xff] }
 0x71a   : > { %v11556_v2 = vld [vmem:[#allocation3] sm:$0xff]  ;;  %v15024_v30 = vpop.f32.mrf.mxu1 }
 0x71b   : > { %v11605_v31 = vadd.f32 %v15064_v47, %v11583_v21  ;;  %v11582_v55 = vadd.f32 %v19089_v58, %v11556_v2  ;;  %11516 = vst.msk [vmem:[#allocation3 + $0x20] sm:$0xff] %vm303_vm3, %v11494_v3  ;;  %v11497_v15 = vadd.f32 %v15024_v30, %v11475_v32  ;;  %v11480_v21 = vld [vmem:[#allocation3 + $0x60] sm:$0xff]  ;;  %v15071_v30 = vld [vmem:[#allocation4 + $0x48] sm:$0xff] }
 0x71c   : > { %v11559_v42 = vld [vmem:[#allocation3 + $0x18] sm:$0xff]  ;;  %v11389_v54 = vpop.f32.mrf.mxu1 }
 0x71d   : > { %v11627_v57 = vmax.f32 %v11605_v31, 0.0  ;;  %v11604_v51 = vadd.f32 %v15065_v49, %v11582_v55  ;;  %v11585_v14 = vadd.f32 %v19089_v58, %v11559_v42  ;;  %11519 = vst.msk [vmem:[#allocation3 + $0x38] sm:$0xff] %vm303_vm3, %v11497_v15  ;;  %v11496_v59 = vadd.f32 %v11474_v5, %v11389_v54  ;;  %v11483_v42 = vld [vmem:[#allocation3 + $0x78] sm:$0xff] }
 0x71e   : > { %v11558_v11 = vld [vmem:[#allocation3 + $0x10] sm:$0xff]  ;;  %v15027_v39 = vpop.f32.mrf.mxu1 }
 0x71f   : > { %v11649_v52 = vadd.f32 %v15064_v47, %v11627_v57  ;;  %v11626_v6 = vmax.f32 %v11604_v51, 0.0  ;;  %v11607_v22 = vadd.f32 %v15066_v38, %v11585_v14  ;;  %v11584_v29 = vadd.f32 %v19089_v58, %v11558_v11  ;;  %11518 = vst.msk [vmem:[#allocation3 + $0x30] sm:$0xff] %vm303_vm3, %v11496_v59  ;;  %v15072_v51 = vld [vmem:[#allocation4 + $0x60] sm:$0xff] }
 0x720   : > { %v11561_v26 = vld [vmem:[#allocation3 + $0x28] sm:$0xff]  ;;  %v11499_v36 = vadd.f32 %v15027_v39, %v11477_v63  ;;  %v11399_v33 = vpop.f32.mrf.mxu1  ;;  %v11482_v39 = vld [vmem:[#allocation3 + $0x70] sm:$0xff] }
 0x721   : > { %11671 = vst.msk [vmem:[%s19109_s27 + $0x8] sm:$0xff] %vm303_vm3, %v11649_v52  ;;  %v11648_v4 = vadd.f32 %v15065_v49, %v11626_v6  ;;  %v11629_v16 = vmax.f32 %v11607_v22, 0.0  ;;  %v11606_v0 = vadd.f32 %v15067_v24, %v11584_v29  ;;  %v11587_v25 = vadd.f32 %v19089_v58, %v11561_v26  ;;  %v15073_v29 = vld [vmem:[#allocation4 + $0x58] sm:$0xff] }
 0x722   : > { %v11560_v20 = vld [vmem:[#allocation3 + $0x20] sm:$0xff]  ;;  %11521 = vst.msk [vmem:[#allocation3 + $0x48] sm:$0xff] %vm303_vm3, %v11499_v36  ;;  %v11498_v44 = vadd.f32 %v11476_v56, %v11399_v33  ;;  %v15030_v18 = vpop.f32.mrf.mxu1  ;;  %v11485_v33 = vld [vmem:[#allocation3 + $0x88] sm:$0xff] }
 0x723   : > { %11670 = vst.msk [vmem:[%s19109_s27] sm:$0xff] %vm303_vm3, %v11648_v4  ;;  %v11651_v40 = vadd.f32 %v15066_v38, %v11629_v16  ;;  %v11628_v48 = vmax.f32 %v11606_v0, 0.0  ;;  %v11609_v43 = vadd.f32 %v15068_v37, %v11587_v25  ;;  %v11586_v23 = vadd.f32 %v19089_v58, %v11560_v20  ;;  %v15074_v25 = vld [vmem:[#allocation4 + $0x70] sm:$0xff] }
 0x724   : > { %v11563_v10 = vld [vmem:[#allocation3 + $0x38] sm:$0xff]  ;;  %11520 = vst.msk [vmem:[#allocation3 + $0x40] sm:$0xff] %vm303_vm3, %v11498_v44  ;;  %v11501_v46 = vadd.f32 %v15030_v18, %v11479_v1  ;;  %v11409_v53 = vpop.f32.mrf.mxu1  ;;  %v11484_v18 = vld [vmem:[#allocation3 + $0x80] sm:$0xff] }
 0x725   : > { %11673 = vst.msk [vmem:[%s19109_s27 + $0x18] sm:$0xff] %vm303_vm3, %v11651_v40  ;;  %v11650_v17 = vadd.f32 %v15067_v24, %v11628_v48  ;;  %v11631_v62 = vmax.f32 %v11609_v43, 0.0  ;;  %v11608_v28 = vadd.f32 %v15069_v27, %v11586_v23  ;;  %v11589_v9 = vadd.f32 %v19089_v58, %v11563_v10  ;;  %v15075_v23 = vld [vmem:[#allocation4 + $0x68] sm:$0xff] }
 0x726   : > { %v11562_v8 = vld [vmem:[#allocation3 + $0x30] sm:$0xff]  ;;  %11523 = vst.msk [vmem:[#allocation3 + $0x58] sm:$0xff] %vm303_vm3, %v11501_v46  ;;  %v11500_v61 = vadd.f32 %v11478_v19, %v11409_v53  ;;  %v15033_v34 = vpop.f32.mrf.mxu1 }
 0x727   : > { %11672 = vst.msk [vmem:[%s19109_s27 + $0x10] sm:$0xff] %vm303_vm3, %v11650_v17  ;;  %v11653_v45 = vadd.f32 %v15068_v37, %v11631_v62  ;;  %v11630_v7 = vmax.f32 %v11608_v28, 0.0  ;;  %v11611_v13 = vadd.f32 %v15070_v50, %v11589_v9  ;;  %v11588_v12 = vadd.f32 %v19089_v58, %v11562_v8  ;;  %v11487_v17 = vld [vmem:[#allocation3 + $0x98] sm:$0xff]  ;;  %v11547_v62 = vld [vmem:[#allocation4 + $0x80] sm:$0xff] }
 0x728   : > { %11522 = vst.msk [vmem:[#allocation3 + $0x50] sm:$0xff] %vm303_vm3, %v11500_v61  ;;  %v11503_v60 = vadd.f32 %v15033_v34, %v11481_v41  ;;  %v11419_v35 = vpop.f32.mrf.mxu1 }
 0x729   : > { %11675 = vst.msk [vmem:[%s19109_s27 + $0x28] sm:$0xff] %vm303_vm3, %v11653_v45  ;;  %v11652_v3 = vadd.f32 %v15069_v27, %v11630_v7  ;;  %v11633_v2 = vmax.f32 %v11611_v13, 0.0  ;;  %v11610_v32 = vadd.f32 %v15071_v30, %v11588_v12  ;;  %v11565_v47 = vld [vmem:[#allocation3 + $0x48] sm:$0xff]  ;;  %v11502_v31 = vadd.f32 %v11480_v21, %v11419_v35  ;;  %v11486_v45 = vld [vmem:[#allocation3 + $0x90] sm:$0xff]  ;;  %v11549_v35 = vld [vmem:[#allocation4 + $0x90] sm:$0xff] }
 0x72a   : > { %v11591_v55 = vadd.f32 %v19089_v58, %v11565_v47  ;;  %11525 = vst.msk [vmem:[#allocation3 + $0x68] sm:$0xff] %vm303_vm3, %v11503_v60  ;;  %v15036_v15 = vpop.f32.mrf.mxu1  ;;  %v15076_v7 = vld [vmem:[#allocation4 + $0x78] sm:$0xff] }
 0x72b   : > { %11674 = vst.msk [vmem:[%s19109_s27 + $0x20] sm:$0xff] %vm303_vm3, %v11652_v3  ;;  %v11655_v54 = vadd.f32 %v15070_v50, %v11633_v2  ;;  %v11632_v5 = vmax.f32 %v11610_v32, 0.0  ;;  %v11564_v57 = vld [vmem:[#allocation3 + $0x40] sm:$0xff]  ;;  %11524 = vst.msk [vmem:[#allocation3 + $0x60] sm:$0xff] %vm303_vm3, %v11502_v31  ;;  %v11505_v49 = vadd.f32 %v15036_v15, %v11483_v42  ;;  %v11489_v2 = vld [vmem:[#allocation3 + $0xa8] sm:$0xff] }
 0x72c   : > { %v11613_v14 = vadd.f32 %v15072_v51, %v11591_v55  ;;  %v11590_v59 = vadd.f32 %v19089_v58, %v11564_v57  ;;  %v11429_v11 = vpop.f32.mrf.mxu1  ;;  %v11548_v15 = vld [vmem:[#allocation4 + $0x88] sm:$0xff] }
 0x72d   : > { %11677 = vst.msk [vmem:[%s19109_s27 + $0x38] sm:$0xff] %vm303_vm3, %v11655_v54  ;;  %v11654_v52 = vadd.f32 %v15071_v30, %v11632_v5  ;;  %v11567_v6 = vld [vmem:[#allocation3 + $0x58] sm:$0xff]  ;;  %11527 = vst.msk [vmem:[#allocation3 + $0x78] sm:$0xff] %vm303_vm3, %v11505_v49  ;;  %v11504_v38 = vadd.f32 %v11482_v39, %v11429_v11 }
 0x72e   : > { %v11635_v22 = vmax.f32 %v11613_v14, 0.0  ;;  %v11612_v63 = vadd.f32 %v15073_v29, %v11590_v59  ;;  %v11593_v26 = vadd.f32 %v19089_v58, %v11567_v6  ;;  %v15039_v36 = vpop.f32.mrf.mxu1  ;;  %v11488_v14 = vld [vmem:[#allocation3 + $0xa0] sm:$0xff]  ;;  %v11551_v59 = vld [vmem:[#allocation4 + $0xa0] sm:$0xff] }
 0x72f   : > { %11676 = vst.msk [vmem:[%s19109_s27 + $0x30] sm:$0xff] %vm303_vm3, %v11654_v52  ;;  %v11566_v4 = vld [vmem:[#allocation3 + $0x50] sm:$0xff]  ;;  %11526 = vst.msk [vmem:[#allocation3 + $0x70] sm:$0xff] %vm303_vm3, %v11504_v38  ;;  %v11507_v16 = vadd.f32 %v15039_v36, %v11485_v33 }
 0x730   : > { %v11657_v24 = vadd.f32 %v15072_v51, %v11635_v22  ;;  %v11634_v0 = vmax.f32 %v11612_v63, 0.0  ;;  %v11615_v56 = vadd.f32 %v15074_v25, %v11593_v26  ;;  %v11592_v20 = vadd.f32 %v19089_v58, %v11566_v4  ;;  %v11439_v44 = vpop.f32.mrf.mxu1 }
 0x731   : > { %v11569_v40 = vld [vmem:[#allocation3 + $0x68] sm:$0xff]  ;;  %11529 = vst.msk [vmem:[#allocation3 + $0x88] sm:$0xff] %vm303_vm3, %v11507_v16  ;;  %v11506_v48 = vadd.f32 %v11484_v18, %v11439_v44  ;;  %v11553_v16 = vld [vmem:[#allocation4 + $0xb0] sm:$0xff]  ;;  %v11552_v44 = vld [vmem:[#allocation4 + $0xa8] sm:$0xff] }
 0x732   : > { %11679 = vst.msk [vmem:[%s19109_s27 + $0x48] sm:$0xff] %vm303_vm3, %v11657_v24  ;;  %v11656_v37 = vadd.f32 %v15073_v29, %v11634_v0  ;;  %v11637_v43 = vmax.f32 %v11615_v56, 0.0  ;;  %v11614_v1 = vadd.f32 %v15075_v23, %v11592_v20  ;;  %v11595_v10 = vadd.f32 %v19089_v58, %v11569_v40  ;;  %v11568_v46 = vld [vmem:[#allocation3 + $0x60] sm:$0xff]  ;;  %v15042_v53 = vpop.f32.mrf.mxu1  ;;  %v11550_v29 = vld [vmem:[#allocation4 + $0x98] sm:$0xff] }
 0x733   : > { %v11594_v27 = vadd.f32 %v19089_v58, %v11568_v46  ;;  %11528 = vst.msk [vmem:[#allocation3 + $0x80] sm:$0xff] %vm303_vm3, %v11506_v48  ;;  %v11509_v28 = vadd.f32 %v15042_v53, %v11487_v17 }
 0x734   : > { %11678 = vst.msk [vmem:[%s19109_s27 + $0x40] sm:$0xff] %vm303_vm3, %v11656_v37  ;;  %v11659_v9 = vadd.f32 %v15074_v25, %v11637_v43  ;;  %v11636_v19 = vmax.f32 %v11614_v1, 0.0  ;;  %v11617_v8 = vadd.f32 %v11595_v10, %v11547_v62  ;;  %v11571_v61 = vld [vmem:[#allocation3 + $0x78] sm:$0xff]  ;;  %v11449_v34 = vpop.f32.mrf.mxu1  ;;  %v15077_v10 = vld [vmem:[#allocation4 + $0xc0] sm:$0xff] }
 0x735   : > { %v11616_v50 = vadd.f32 %v15076_v7, %v11594_v27  ;;  %v11597_v13 = vadd.f32 %v19089_v58, %v11571_v61  ;;  %11531 = vst.msk [vmem:[#allocation3 + $0x98] sm:$0xff] %vm303_vm3, %v11509_v28  ;;  %v11508_v12 = vadd.f32 %v11486_v45, %v11449_v34  ;;  %v15078_v28 = vld [vmem:[#allocation4 + $0xb8] sm:$0xff] }
 0x736   : > { %11681 = vst.msk [vmem:[%s19109_s27 + $0x58] sm:$0xff] %vm303_vm3, %v11659_v9  ;;  %v11658_v41 = vadd.f32 %v15075_v23, %v11636_v19  ;;  %v11639_v60 = vmax.f32 %v11617_v8, 0.0  ;;  %v11570_v21 = vld [vmem:[#allocation3 + $0x70] sm:$0xff]  ;;  %v15045_v3 = vpop.f32.mrf.mxu1 }
 0x737   : > { %v11638_v30 = vmax.f32 %v11616_v50, 0.0  ;;  %v11619_v32 = vadd.f32 %v11597_v13, %v11549_v35  ;;  %v11596_v47 = vadd.f32 %v19089_v58, %v11570_v21  ;;  %11530 = vst.msk [vmem:[#allocation3 + $0x90] sm:$0xff] %vm303_vm3, %v11508_v12  ;;  %v11511_v31 = vadd.f32 %v15045_v3, %v11489_v2 }
 0x738   : > { %11680 = vst.msk [vmem:[%s19109_s27 + $0x50] sm:$0xff] %vm303_vm3, %v11658_v41  ;;  %v11661_v55 = vadd.f32 %v11639_v60, %v11547_v62  ;;  %v11573_v42 = vld [vmem:[#allocation3 + $0x88] sm:$0xff]  ;;  %v11459_v54 = vpop.f32.mrf.mxu1 }
 0x739   : > { %v11660_v5 = vadd.f32 %v15076_v7, %v11638_v30  ;;  %v11641_v57 = vmax.f32 %v11619_v32, 0.0  ;;  %v11618_v49 = vadd.f32 %v11596_v47, %v11548_v15  ;;  %v11599_v51 = vadd.f32 %v19089_v58, %v11573_v42  ;;  %11533 = vst.msk [vmem:[#allocation3 + $0xa8] sm:$0xff] %vm303_vm3, %v11511_v31 }
 0x73a   : > { %11683 = vst.msk [vmem:[%s19109_s27 + $0x68] sm:$0xff] %vm303_vm3, %v11661_v55  ;;  %v11572_v11 = vld [vmem:[#allocation3 + $0x80] sm:$0xff]  ;;  %v11510_v39 = vadd.f32 %v11488_v14, %v11459_v54 }
 0x73b   : > { %11682 = vst.msk [vmem:[%s19109_s27 + $0x60] sm:$0xff] %vm303_vm3, %v11660_v5  ;;  %v11663_v52 = vadd.f32 %v11641_v57, %v11549_v35  ;;  %v11640_v6 = vmax.f32 %v11618_v49, 0.0  ;;  %v11621_v38 = vadd.f32 %v11599_v51, %v11551_v59  ;;  %v11598_v22 = vadd.f32 %v19089_v58, %v11572_v11 }
 0x73c   : > { %v11575_v63 = vld [vmem:[#allocation3 + $0x98] sm:$0xff]  ;;  %11532 = vst.msk [vmem:[#allocation3 + $0xa0] sm:$0xff] %vm303_vm3, %v11510_v39 }
 0x73d   : > { %11685 = vst.msk [vmem:[%s19109_s27 + $0x78] sm:$0xff] %vm303_vm3, %v11663_v52  ;;  %v11662_v26 = vadd.f32 %v11640_v6, %v11548_v15  ;;  %v11643_v36 = vmax.f32 %v11621_v38, 0.0  ;;  %v11620_v33 = vadd.f32 %v11598_v22, %v11550_v29  ;;  %v11601_v4 = vadd.f32 %v19089_v58, %v11575_v63 }
 0x73e   : > { %v11574_v24 = vld [vmem:[#allocation3 + $0x90] sm:$0xff] }
 0x73f   : > { %11684 = vst.msk [vmem:[%s19109_s27 + $0x70] sm:$0xff] %vm303_vm3, %v11662_v26  ;;  %v11665_v0 = vadd.f32 %v11643_v36, %v11551_v59  ;;  %v11642_v25 = vmax.f32 %v11620_v33, 0.0  ;;  %v11623_v56 = vadd.f32 %v11601_v4, %v11553_v16  ;;  %v11600_v20 = vadd.f32 %v19089_v58, %v11574_v24 }
 0x740   : > { %v11577_v18 = vld [vmem:[#allocation3 + $0xa8] sm:$0xff] }
 0x741   : > { %11687 = vst.msk [vmem:[%s19109_s27 + $0x88] sm:$0xff] %vm303_vm3, %v11665_v0  ;;  %v11664_v40 = vadd.f32 %v11642_v25, %v11550_v29  ;;  %v11645_v48 = vmax.f32 %v11623_v56, 0.0  ;;  %v11622_v37 = vadd.f32 %v11600_v20, %v11552_v44  ;;  %v11603_v43 = vadd.f32 %v19089_v58, %v11577_v18 }
 0x743   : > { %11686 = vst.msk [vmem:[%s19109_s27 + $0x80] sm:$0xff] %vm303_vm3, %v11664_v40  ;;  %v11667_v23 = vadd.f32 %v11645_v48, %v11553_v16  ;;  %v11644_v1 = vmax.f32 %v11622_v37, 0.0  ;;  %v11625_v46 = vadd.f32 %v15077_v10, %v11603_v43  ;;  %v11576_v53 = vld [vmem:[#allocation3 + $0xa0] sm:$0xff] }
 0x744   : > { %v11602_v17 = vadd.f32 %v19089_v58, %v11576_v53 }
 0x745   : > { %11689 = vst.msk [vmem:[%s19109_s27 + $0x98] sm:$0xff] %vm303_vm3, %v11667_v23  ;;  %v11666_v62 = vadd.f32 %v11644_v1, %v11552_v44  ;;  %v11647_v27 = vmax.f32 %v11625_v46, 0.0 }
 0x746   : > { %v11624_v9 = vadd.f32 %v15078_v28, %v11602_v17 }
 0x747   : > { %11688 = vst.msk [vmem:[%s19109_s27 + $0x90] sm:$0xff] %vm303_vm3, %v11666_v62  ;;  %v11669_v19 = vadd.f32 %v15077_v10, %v11647_v27 }
 0x748   : > { %v11646_v8 = vmax.f32 %v11624_v9, 0.0 }
 0x749   : > { %11691 = vst.msk [vmem:[%s19109_s27 + $0xa8] sm:$0xff] %vm303_vm3, %v11669_v19 }
 0x74a   : > { %v11668_v61 = vadd.f32 %v15078_v28, %v11646_v8 }
 0x74c   : > { %11690 = vst.msk [vmem:[%s19109_s27 + $0xa0] sm:$0xff] %vm303_vm3, %v11668_v61 }
 0x74d PF: > { %s16_s21 = sadd.s32 1, %s15085_s21  }
 0x74e   : > { %p13_p5 = scmp.ge.s32.totalorder %s16_s21, 4  }
 0x750   :  { %15 = sbr.rel (!%p13_p5) target bundleno = 1 (0x1), region = 161 }

</bundles_post_ra>
